<compile_context>
chip_gen: v7x
topology: tpu7x:2x2x1
jax: 0.10.0
libtpu: 0.0.40
codegen_flags: <defaults>
</compile_context>

<pallas_src>
import functools

import numpy as np
import jax
import jax.numpy as jnp
from jax.experimental import pallas as pl
from jax.experimental.pallas import tpu as pltpu

IMG_RES = 32                 # original: 256
FLOW_RES = IMG_RES // 4      # original: 64 (FlowNetS flow2 is at 1/4 resolution)
FLOW_MUL = 7.0


def _round_up(x, m):
    return (x + m - 1) // m * m


# --------------------------------------------------------------------------
# Pallas kernel 1: single-K-block matmul with fused bias + optional ReLU.
# Used for every conv (via im2col) and for the separable bilinear upsample.
# --------------------------------------------------------------------------
def _matmul_kernel(a_ref, b_ref, bias_ref, o_ref, *, relu):
    r = jnp.dot(a_ref[...], b_ref[...],
                preferred_element_type=jnp.float32) + bias_ref[...]
    if relu:
        r = jnp.maximum(r, 0.0)
    o_ref[...] = r.astype(o_ref.dtype)


def _pick_tile_m(M):
    """Row tile: multiple of 8, divides M when possible, >=2 grid steps once M
    is big enough (v7x megacore), capped at 1024 rows."""
    if M <= 1024:
        if M >= 128 and M % 16 == 0:
            return M // 2
        return max(8, _round_up(M, 8))
    for t in range(1024, 7, -8):
        if M % t == 0:
            return t
    return 1024


def matmul_bias_act(a, b, bias=None, relu=False,
                    out_dtype=jnp.float32, compute_dtype=jnp.bfloat16):
    M, K = a.shape
    K2, N = b.shape
    assert K == K2
    a = a.astype(compute_dtype)
    b = b.astype(compute_dtype)
    if bias is None:
        bias = jnp.zeros((1, N), jnp.float32)
    else:
        bias = jnp.asarray(bias, jnp.float32).reshape(1, N)

    # All GEMMs here have small K (<=512) and N (<=128 conv channels), so the
    # whole K reduction fits one block: no reduction grid axis, no accumulator
    # scratch.  K/N stay unpadded (full-dim blocks) so no extra XLA copies.
    tm = _pick_tile_m(M)
    Mp = _round_up(M, tm)           # == M for every shape in this model
    if Mp != M:
        a = jnp.pad(a, ((0, Mp - M), (0, 0)))

    out = pl.pallas_call(
        functools.partial(_matmul_kernel, relu=relu),
        out_shape=jax.ShapeDtypeStruct((Mp, N), out_dtype),
        grid_spec=pltpu.PrefetchScalarGridSpec(
            num_scalar_prefetch=0,
            grid=(Mp // tm,),
            in_specs=[pl.BlockSpec((tm, K), lambda i: (i, 0)),
                      pl.BlockSpec((K, N), lambda i: (0, 0)),   # resident
                      pl.BlockSpec((1, N), lambda i: (0, 0))],  # resident
            out_specs=pl.BlockSpec((tm, N), lambda i: (i, 0))),
        compiler_params=pltpu.CompilerParams(
            dimension_semantics=("parallel",)),
    )(a, b, bias)
    if Mp != M:
        out = out[:M]
    return out


# --------------------------------------------------------------------------
# Conv2d = NHWC im2col (bf16, no transpose, K order matches pre-reshaped
# weights) + Pallas matmul hot path.
# TODO(synk): fuse im2col into the A BlockSpec/index_map (read the padded NHWC
# input directly) to remove the XLA-side column-matrix materialization at full
# 256x256 resolution.
# --------------------------------------------------------------------------
def _im2col_nhwc(x, kh, kw, stride, pad):
    B, H, W, C = x.shape
    if pad:
        x = jnp.pad(x, ((0, 0), (pad, pad), (pad, pad), (0, 0)))
    Ho = (H + 2 * pad - kh) // stride + 1
    Wo = (W + 2 * pad - kw) // stride + 1
    if kh == 1 and kw == 1 and stride == 1:
        return x.reshape(B * Ho * Wo, C), Ho, Wo
    patches = [x[:, i:i + stride * (Ho - 1) + 1:stride,
                 j:j + stride * (Wo - 1) + 1:stride, :]
               for i in range(kh) for j in range(kw)]
    col = jnp.stack(patches, axis=3).reshape(B * Ho * Wo, kh * kw * C)
    return col, Ho, Wo


def conv2d(x_nhwc, wmat, bias, kh, kw, stride=1, pad=0, relu=False,
           out_dtype=jnp.bfloat16):
    B = x_nhwc.shape[0]
    col, Ho, Wo = _im2col_nhwc(x_nhwc.astype(jnp.bfloat16), kh, kw, stride, pad)
    out = matmul_bias_act(col, wmat, bias, relu=relu, out_dtype=out_dtype)
    Cout = wmat.shape[1]
    return out.reshape(B, Ho, Wo, Cout)


# --------------------------------------------------------------------------
# flow -> normalized sampling grid.  Tiny elementwise op: plain jnp (XLA fuses
# it; a dedicated kernel launch costs more than the math).
#   add_dim = (-flow * flow_mul + 2*[w,h]) / (FLOW_RES-1) - 1
# --------------------------------------------------------------------------
def flow_to_grid(flow_nhwc, flow_mul):
    B, Hf, Wf, _ = flow_nhwc.shape
    ww = jnp.broadcast_to(jnp.arange(Wf, dtype=jnp.float32)[None, :, None],
                          (Hf, Wf, 1))
    hh = jnp.broadcast_to(jnp.arange(Hf, dtype=jnp.float32)[:, None, None],
                          (Hf, Wf, 1))
    wh = jnp.concatenate([ww, hh], axis=-1)        # channel 0 = x(w), 1 = y(h)
    # TODO(synk): "/ (Hf-1)" mirrors the module's "/63" and assumes a square flow map.
    return (-flow_nhwc * flow_mul + 2.0 * wh[None]) / float(Hf - 1) - 1.0


# --------------------------------------------------------------------------
# Bilinear upsampling (align_corners=False) as two separable interpolation
# matrices -> driven through the Pallas matmul kernel, f32 end-to-end because
# these are sampling *coordinates* (bf16 would add ~0.5px warp error at 256^2).
# TODO(synk): `antialias='true'` is a no-op for bilinear *up*sampling in
# PyTorch, so plain bilinear is exact here.
# --------------------------------------------------------------------------
@functools.lru_cache(maxsize=None)
def _bilinear_matrix(out_size, in_size):
    i = np.arange(out_size, dtype=np.float64)
    scale = in_size / out_size
    src = np.maximum((i + 0.5) * scale - 0.5, 0.0)
    i0 = np.minimum(np.floor(src).astype(np.int64), in_size - 1)
    i1 = np.minimum(i0 + 1, in_size - 1)
    frac = src - i0
    R = np.zeros((out_size, in_size), np.float32)
    R[np.arange(out_size), i0] += (1.0 - frac)
    R[np.arange(out_size), i1] += frac
    return R


def bilinear_resize_cm(x_cm, out_h, out_w):
    # x_cm: (Nmaps, Hin, Win) f32 -> (Nmaps, out_h, out_w) f32
    Nmaps, Hin, Win = x_cm.shape
    Rh = jnp.asarray(_bilinear_matrix(out_h, Hin))
    Rw = jnp.asarray(_bilinear_matrix(out_w, Win))
    y = matmul_bias_act(x_cm.reshape(Nmaps * Hin, Win), Rw.T,
                        compute_dtype=jnp.float32, out_dtype=jnp.float32)
    y = y.reshape(Nmaps, Hin, out_w).transpose(1, 0, 2).reshape(Hin, Nmaps * out_w)
    z = matmul_bias_act(Rh, y, compute_dtype=jnp.float32, out_dtype=jnp.float32)
    return z.reshape(out_h, Nmaps, out_w).transpose(1, 0, 2)


# --------------------------------------------------------------------------
# Pallas kernel 2: grid_sample (bilinear, padding_mode='zeros',
# align_corners=False), separable + transposed formulation:
#   out[c, n] = sum_x kx[n,x] * sum_y ky[n,y] * img[y,x,c]
# The image is stored channel-major-transposed (Cp*W, H) and stays resident
# per batch; ky is built transposed (H, Tq) so every per-query quantity and
# the output block keep queries on the lane axis (lane-dense loads/stores).
# Out-of-range corners never match the iota compare -> zero weight, which
# reproduces padding_mode='zeros'.
# --------------------------------------------------------------------------
def _grid_sample_kernel(img_ref, grid_ref, o_ref, *, H, W, Cp):
    imgT = img_ref[0]                     # (Cp*W, H) bf16, rows ordered c*W + x
    g = grid_ref[0]                       # (2, Tq) f32
    gx = g[0:1, :]
    gy = g[1:2, :]
    Tq = gx.shape[1]

    # Unnormalize (align_corners=False).
    ix = ((gx + 1.0) * W - 1.0) * 0.5
    iy = ((gy + 1.0) * H - 1.0) * 0.5
    ix0 = jnp.floor(ix)
    iy0 = jnp.floor(iy)
    wx1 = ix - ix0
    wx0 = 1.0 - wx1
    wy1 = iy - iy0
    wy0 = 1.0 - wy1
    # Clip only so the int cast is safe; out-of-range corners never match the
    # iota compare below, i.e. they contribute zero (== 'zeros' padding).
    ix0i = jnp.clip(ix0, -1.0, float(W)).astype(jnp.int32)
    ix1i = jnp.clip(ix0 + 1.0, -1.0, float(W)).astype(jnp.int32)
    iy0i = jnp.clip(iy0, -1.0, float(H)).astype(jnp.int32)
    iy1i = jnp.clip(iy0 + 1.0, -1.0, float(H)).astype(jnp.int32)

    # Row-interp matrix, built transposed (H, Tq): queries on lanes.
    yio = jax.lax.broadcasted_iota(jnp.int32, (H, Tq), 0)
    kyT = jnp.where(yio == iy0i, wy0, 0.0) + jnp.where(yio == iy1i, wy1, 0.0)
    tT = jnp.dot(imgT, kyT.astype(jnp.bfloat16),
                 preferred_element_type=jnp.float32)          # (Cp*W, Tq) f32

    # Column weights built on a (W, Tq) iota (Cp x fewer VPU ops than full
    # width), broadcast over the channel axis below.
    xio = jax.lax.broadcasted_iota(jnp.int32, (W, Tq), 0)
    kxT = jnp.where(xio == ix0i, wx0, 0.0) + jnp.where(xio == ix1i, wx1, 0.0)

    # Fold the x axis: rows of tT are (c, x) with x minor.
    pT = tT.reshape(Cp, W, Tq) * kxT[None, :, :]
    o_ref[0] = jnp.sum(pT, axis=1)                            # (Cp, Tq) lane-dense


def _pick_tile_q(npix, w_cp):
    # Keep ~3 live f32 (Cp*W, Tq) arrays under ~8 MiB so the default scoped
    # VMEM (16 MiB v5e, 32 MiB v6e/v7x) is never exceeded at any resolution.
    budget = (8 * 1024 * 1024) // (12 * w_cp)
    cap = min(512, npix, max(128, budget))
    cap = max(128, (cap // 128) * 128)
    t = cap
    while t >= 128:
        if npix % t == 0:
            return t
        t -= 128
    return npix


def grid_sample_bilinear(img_nhwc, grid_b2n):
    # img_nhwc: (B, H, W, C); grid_b2n: (B, 2, H*W) with channel 0 = x, 1 = y.
    B, H, W, C = img_nhwc.shape
    Npix = H * W
    Cp = 8                                            # channels padded to 8 only
    imgT = jnp.pad(img_nhwc, ((0, 0), (0, 0), (0, 0), (0, Cp - C)))
    imgT = imgT.transpose(0, 3, 2, 1).reshape(B, Cp * W, H).astype(jnp.bfloat16)
    grid = grid_b2n.astype(jnp.float32)
    Tq = _pick_tile_q(Npix, Cp * W)

    out = pl.pallas_call(
        functools.partial(_grid_sample_kernel, H=H, W=W, Cp=Cp),
        out_shape=jax.ShapeDtypeStruct((B, Cp, Npix), jnp.float32),
        grid_spec=pltpu.PrefetchScalarGridSpec(
            num_scalar_prefetch=0,
            grid=(B, Npix // Tq),
            in_specs=[pl.BlockSpec((1, Cp * W, H), lambda b, q: (b, 0, 0)),  # resident per b
                      pl.BlockSpec((1, 2, Tq), lambda b, q: (b, 0, q))],
            out_specs=pl.BlockSpec((1, Cp, Tq), lambda b, q: (b, 0, q))),
        compiler_params=pltpu.CompilerParams(
            dimension_semantics=("parallel", "parallel")),
    )(imgT, grid)
    return out[:, :C, :].transpose(0, 2, 1).reshape(B, H, W, C)


# --------------------------------------------------------------------------
# Sub-networks (NHWC).
# --------------------------------------------------------------------------
def flownet_s(p, x6):
    h = conv2d(x6, p["fn_conv1_wm"], p["fn_conv1_b"], 7, 7, stride=2, pad=3, relu=True)
    h = conv2d(h, p["fn_conv2_wm"], p["fn_conv2_b"], 5, 5, stride=2, pad=2, relu=True)
    flow2 = conv2d(h, p["fn_pred_wm"], p["fn_pred_b"], 3, 3, stride=1, pad=1,
                   relu=False, out_dtype=jnp.float32)
    return (flow2,)          # tuple so `flow[0]` matches the PyTorch indexing


def unet(p, x7):
    h = conv2d(x7, p["un_conv1_wm"], p["un_conv1_b"], 3, 3, stride=1, pad=1, relu=True)
    h = conv2d(h, p["un_conv2_wm"], p["un_conv2_b"], 3, 3, stride=1, pad=1, relu=True)
    return conv2d(h, p["un_conv3_wm"], p["un_conv3_b"], 1, 1, stride=1, pad=0,
                  relu=False, out_dtype=jnp.float32)


def _gemm_weight(w):
    # (Cout, Cin, kh, kw) -> (kh*kw*Cin, Cout) bf16, matching _im2col_nhwc's K order.
    Cout, Cin, kh, kw = w.shape
    return jnp.transpose(w, (2, 3, 1, 0)).reshape(kh * kw * Cin, Cout).astype(jnp.bfloat16)


def init_params(key):
    # TODO(synk): the real FlowNetS / Unet definitions live in external files and
    # a pretrained checkpoint (torch.load); replaced here by reduced,
    # deterministically-initialized conv stacks that preserve the I/O shapes used
    # by FlowGen.forward (flow[0]: (B,2,H/4,W/4); unet: 7ch in -> 3ch out).
    def conv_w(k, cout, cin, ksz):
        fan_in = cin * ksz * ksz
        return (jax.random.normal(k, (cout, cin, ksz, ksz), jnp.float32)
                / np.sqrt(fan_in))
    ks = jax.random.split(key, 6)
    raw = {
        "fn_conv1": conv_w(ks[0], 16, 6, 7),
        "fn_conv2": conv_w(ks[1], 32, 16, 5),
        "fn_pred": conv_w(ks[2], 2, 32, 3),
        "un_conv1": conv_w(ks[3], 16, 7, 3),
        "un_conv2": conv_w(ks[4], 16, 16, 3),
        "un_conv3": conv_w(ks[5], 3, 16, 1),
    }
    p = {"flow_mul": jnp.float32(FLOW_MUL)}
    for name, w in raw.items():
        p[name + "_wm"] = _gemm_weight(w)        # pre-cast / pre-reshaped once
        p[name + "_b"] = jnp.zeros((w.shape[0],), jnp.float32)
    return p


# --------------------------------------------------------------------------
# FlowGen.forward
# --------------------------------------------------------------------------
def flowgen_forward(p, x):
    B, C, H, W = x.shape
    x_nhwc = jnp.transpose(x, (0, 2, 3, 1))        # one NCHW -> NHWC transpose

    depth_1 = x_nhwc[..., 0:3]
    img_1 = x_nhwc[..., 3:6]
    depth_2_3 = x_nhwc[..., 6:9]
    seg_2 = x_nhwc[..., 9:12]

    cat = jnp.concatenate([depth_1, depth_2_3], axis=-1)          # (B, H, W, 6)
    flow = flownet_s(p, cat)
    flow2 = flow[0]                                               # (B, Hf, Wf, 2) f32

    grid_lr = flow_to_grid(flow2, p["flow_mul"])                  # (B, Hf, Wf, 2) f32
    Hf, Wf = grid_lr.shape[1], grid_lr.shape[2]
    grid_cm = grid_lr.transpose(0, 3, 1, 2).reshape(B * 2, Hf, Wf)
    up = bilinear_resize_cm(grid_cm, H, W)                        # (B*2, H, W) f32
    grid_flat = up.reshape(B, 2, H * W)                           # lane-dense sampler input

    warped_img = grid_sample_bilinear(img_1, grid_flat)           # (B, H, W, 3)

    depth_2 = x_nhwc[..., 6:7]                                    # (B, H, W, 1)
    cat_imgs = jnp.concatenate([warped_img, depth_2, seg_2], axis=-1)  # (B, H, W, 7)
    out = unet(p, cat_imgs)                                       # (B, H, W, 3)
    return jnp.transpose(out, (0, 3, 1, 2))                       # back to NCHW


if __name__ == "__main__":
    key = jax.random.PRNGKey(0)
    x = jax.random.uniform(key, (2, 12, IMG_RES, IMG_RES), jnp.float32)
    params = init_params(jax.random.PRNGKey(1))
    fwd = jax.jit(flowgen_forward)
    o = jax.block_until_ready(fwd(params, x))
    assert o.shape == (2, 3, IMG_RES, IMG_RES), o.shape
    assert bool(jnp.all(jnp.isfinite(o)))
    print("KERNEL_OK")
</pallas_src>

<mosaic_0001>
module attributes {stable_mosaic.version = 11 : i64} {
  func.func @_matmul_kernel(%arg0: i32, %arg1: memref<256x294xbf16, #tpu.memory_space<vmem>>, %arg2: memref<294x16xbf16, #tpu.memory_space<vmem>>, %arg3: memref<1x16xf32, #tpu.memory_space<vmem>>, %arg4: memref<256x16xbf16, #tpu.memory_space<vmem>>) attributes {dimension_semantics = [#tpu.dimension_semantics<parallel>], iteration_bounds = array<i64: 2>, scalar_prefetch = 0 : i64, scratch_operands = 0 : i64, tpu.core_type = #tpu.core_type<tc>, window_params = [{transform_indices = @transform_0, window_bounds = array<i64: 256, 294>}, {pipeline_mode = #tpu.pipeline_mode<synchronous>, transform_indices = @transform_1, window_bounds = array<i64: 294, 16>}, {pipeline_mode = #tpu.pipeline_mode<synchronous>, transform_indices = @transform_2, window_bounds = array<i64: 1, 16>}, {transform_indices = @transform_3, window_bounds = array<i64: 256, 16>}]} {
    %c0 = arith.constant 0 : index
    %c0_0 = arith.constant 0 : index
    %0 = vector.load %arg1[%c0, %c0_0] : memref<256x294xbf16, #tpu.memory_space<vmem>>, vector<256x294xbf16>
    %c0_1 = arith.constant 0 : index
    %c0_2 = arith.constant 0 : index
    %1 = vector.load %arg2[%c0_1, %c0_2] : memref<294x16xbf16, #tpu.memory_space<vmem>>, vector<294x16xbf16>
    %cst = arith.constant dense<0.000000e+00> : vector<256x16xf32>
    %2 = tpu.matmul %0, %1, %cst {dimension_numbers = #tpu.dot_dimension_numbers<[1], [0], [0], [1], [0, 0, 1, 1], [], []>} : vector<256x294xbf16>, vector<294x16xbf16>, vector<256x16xf32> -> vector<256x16xf32>
    %c0_3 = arith.constant 0 : index
    %c0_4 = arith.constant 0 : index
    %3 = vector.load %arg3[%c0_3, %c0_4] : memref<1x16xf32, #tpu.memory_space<vmem>>, vector<1x16xf32>
    %4 = vector.broadcast %3 : vector<1x16xf32> to vector<256x16xf32>
    %5 = arith.addf %2, %4 : vector<256x16xf32>
    %cst_5 = arith.constant 0.000000e+00 : f32
    %6 = vector.broadcast %cst_5 : f32 to vector<256x16xf32>
    %7 = arith.maximumf %5, %6 : vector<256x16xf32>
    %8 = arith.truncf %7 : vector<256x16xf32> to vector<256x16xbf16>
    %c0_6 = arith.constant 0 : index
    %c0_7 = arith.constant 0 : index
    %9 = vector.load %arg4[%c0_6, %c0_7] : memref<256x16xbf16, #tpu.memory_space<vmem>>, vector<256x16xbf16>
    tpu.vector_store %arg4[%c0_6, %c0_7], %8 {strides = array<i32>} : memref<256x16xbf16, #tpu.memory_space<vmem>>, vector<256x16xbf16>,
    return
  }
  func.func @transform_0(%arg0: i32) -> (i32, i32) {
    %c0_i32 = arith.constant 0 : i32
    %c0_i32_0 = arith.constant 0 : i32
    return %arg0, %c0_i32 : i32, i32
  }
  func.func @transform_1(%arg0: i32) -> (i32, i32) {
    %c0_i32 = arith.constant 0 : i32
    %c0_i32_0 = arith.constant 0 : i32
    %c0_i32_1 = arith.constant 0 : i32
    return %c0_i32, %c0_i32_0 : i32, i32
  }
  func.func @transform_2(%arg0: i32) -> (i32, i32) {
    %c0_i32 = arith.constant 0 : i32
    %c0_i32_0 = arith.constant 0 : i32
    %c0_i32_1 = arith.constant 0 : i32
    return %c0_i32, %c0_i32_0 : i32, i32
  }
  func.func @transform_3(%arg0: i32) -> (i32, i32) {
    %c0_i32 = arith.constant 0 : i32
    %c0_i32_0 = arith.constant 0 : i32
    return %arg0, %c0_i32 : i32, i32
  }
}

module attributes {stable_mosaic.version = 11 : i64} {
  func.func @_matmul_kernel(%arg0: i32, %arg1: memref<64x400xbf16, #tpu.memory_space<vmem>>, %arg2: memref<400x32xbf16, #tpu.memory_space<vmem>>, %arg3: memref<1x32xf32, #tpu.memory_space<vmem>>, %arg4: memref<64x32xbf16, #tpu.memory_space<vmem>>) attributes {dimension_semantics = [#tpu.dimension_semantics<parallel>], iteration_bounds = array<i64: 2>, scalar_prefetch = 0 : i64, scratch_operands = 0 : i64, tpu.core_type = #tpu.core_type<tc>, window_params = [{transform_indices = @transform_0, window_bounds = array<i64: 64, 400>}, {pipeline_mode = #tpu.pipeline_mode<synchronous>, transform_indices = @transform_1, window_bounds = array<i64: 400, 32>}, {pipeline_mode = #tpu.pipeline_mode<synchronous>, transform_indices = @transform_2, window_bounds = array<i64: 1, 32>}, {transform_indices = @transform_3, window_bounds = array<i64: 64, 32>}]} {
    %c0 = arith.constant 0 : index
    %c0_0 = arith.constant 0 : index
    %0 = vector.load %arg1[%c0, %c0_0] : memref<64x400xbf16, #tpu.memory_space<vmem>>, vector<64x400xbf16>
    %c0_1 = arith.constant 0 : index
    %c0_2 = arith.constant 0 : index
    %1 = vector.load %arg2[%c0_1, %c0_2] : memref<400x32xbf16, #tpu.memory_space<vmem>>, vector<400x32xbf16>
    %cst = arith.constant dense<0.000000e+00> : vector<64x32xf32>
    %2 = tpu.matmul %0, %1, %cst {dimension_numbers = #tpu.dot_dimension_numbers<[1], [0], [0], [1], [0, 0, 1, 1], [], []>} : vector<64x400xbf16>, vector<400x32xbf16>, vector<64x32xf32> -> vector<64x32xf32>
    %c0_3 = arith.constant 0 : index
    %c0_4 = arith.constant 0 : index
    %3 = vector.load %arg3[%c0_3, %c0_4] : memref<1x32xf32, #tpu.memory_space<vmem>>, vector<1x32xf32>
    %4 = vector.broadcast %3 : vector<1x32xf32> to vector<64x32xf32>
    %5 = arith.addf %2, %4 : vector<64x32xf32>
    %cst_5 = arith.constant 0.000000e+00 : f32
    %6 = vector.broadcast %cst_5 : f32 to vector<64x32xf32>
    %7 = arith.maximumf %5, %6 : vector<64x32xf32>
    %8 = arith.truncf %7 : vector<64x32xf32> to vector<64x32xbf16>
    %c0_6 = arith.constant 0 : index
    %c0_7 = arith.constant 0 : index
    %9 = vector.load %arg4[%c0_6, %c0_7] : memref<64x32xbf16, #tpu.memory_space<vmem>>, vector<64x32xbf16>
    tpu.vector_store %arg4[%c0_6, %c0_7], %8 {strides = array<i32>} : memref<64x32xbf16, #tpu.memory_space<vmem>>, vector<64x32xbf16>,
    return
  }
  func.func @transform_0(%arg0: i32) -> (i32, i32) {
    %c0_i32 = arith.constant 0 : i32
    %c0_i32_0 = arith.constant 0 : i32
    return %arg0, %c0_i32 : i32, i32
  }
  func.func @transform_1(%arg0: i32) -> (i32, i32) {
    %c0_i32 = arith.constant 0 : i32
    %c0_i32_0 = arith.constant 0 : i32
    %c0_i32_1 = arith.constant 0 : i32
    return %c0_i32, %c0_i32_0 : i32, i32
  }
  func.func @transform_2(%arg0: i32) -> (i32, i32) {
    %c0_i32 = arith.constant 0 : i32
    %c0_i32_0 = arith.constant 0 : i32
    %c0_i32_1 = arith.constant 0 : i32
    return %c0_i32, %c0_i32_0 : i32, i32
  }
  func.func @transform_3(%arg0: i32) -> (i32, i32) {
    %c0_i32 = arith.constant 0 : i32
    %c0_i32_0 = arith.constant 0 : i32
    return %arg0, %c0_i32 : i32, i32
  }
}

module attributes {stable_mosaic.version = 11 : i64} {
  func.func @_matmul_kernel(%arg0: i32, %arg1: memref<64x288xbf16, #tpu.memory_space<vmem>>, %arg2: memref<288x2xbf16, #tpu.memory_space<vmem>>, %arg3: memref<1x2xf32, #tpu.memory_space<vmem>>, %arg4: memref<64x2xf32, #tpu.memory_space<vmem>>) attributes {dimension_semantics = [#tpu.dimension_semantics<parallel>], iteration_bounds = array<i64: 2>, scalar_prefetch = 0 : i64, scratch_operands = 0 : i64, tpu.core_type = #tpu.core_type<tc>, window_params = [{transform_indices = @transform_0, window_bounds = array<i64: 64, 288>}, {pipeline_mode = #tpu.pipeline_mode<synchronous>, transform_indices = @transform_1, window_bounds = array<i64: 288, 2>}, {pipeline_mode = #tpu.pipeline_mode<synchronous>, transform_indices = @transform_2, window_bounds = array<i64: 1, 2>}, {transform_indices = @transform_3, window_bounds = array<i64: 64, 2>}]} {
    %c0 = arith.constant 0 : index
    %c0_0 = arith.constant 0 : index
    %0 = vector.load %arg1[%c0, %c0_0] : memref<64x288xbf16, #tpu.memory_space<vmem>>, vector<64x288xbf16>
    %c0_1 = arith.constant 0 : index
    %c0_2 = arith.constant 0 : index
    %1 = vector.load %arg2[%c0_1, %c0_2] : memref<288x2xbf16, #tpu.memory_space<vmem>>, vector<288x2xbf16>
    %cst = arith.constant dense<0.000000e+00> : vector<64x2xf32>
    %2 = tpu.matmul %0, %1, %cst {dimension_numbers = #tpu.dot_dimension_numbers<[1], [0], [0], [1], [0, 0, 1, 1], [], []>} : vector<64x288xbf16>, vector<288x2xbf16>, vector<64x2xf32> -> vector<64x2xf32>
    %c0_3 = arith.constant 0 : index
    %c0_4 = arith.constant 0 : index
    %3 = vector.load %arg3[%c0_3, %c0_4] : memref<1x2xf32, #tpu.memory_space<vmem>>, vector<1x2xf32>
    %4 = vector.broadcast %3 : vector<1x2xf32> to vector<64x2xf32>
    %5 = arith.addf %2, %4 : vector<64x2xf32>
    %c0_5 = arith.constant 0 : index
    %c0_6 = arith.constant 0 : index
    %6 = vector.load %arg4[%c0_5, %c0_6] : memref<64x2xf32, #tpu.memory_space<vmem>>, vector<64x2xf32>
    tpu.vector_store %arg4[%c0_5, %c0_6], %5 {strides = array<i32>} : memref<64x2xf32, #tpu.memory_space<vmem>>, vector<64x2xf32>,
    return
  }
  func.func @transform_0(%arg0: i32) -> (i32, i32) {
    %c0_i32 = arith.constant 0 : i32
    %c0_i32_0 = arith.constant 0 : i32
    return %arg0, %c0_i32 : i32, i32
  }
  func.func @transform_1(%arg0: i32) -> (i32, i32) {
    %c0_i32 = arith.constant 0 : i32
    %c0_i32_0 = arith.constant 0 : i32
    %c0_i32_1 = arith.constant 0 : i32
    return %c0_i32, %c0_i32_0 : i32, i32
  }
  func.func @transform_2(%arg0: i32) -> (i32, i32) {
    %c0_i32 = arith.constant 0 : i32
    %c0_i32_0 = arith.constant 0 : i32
    %c0_i32_1 = arith.constant 0 : i32
    return %c0_i32, %c0_i32_0 : i32, i32
  }
  func.func @transform_3(%arg0: i32) -> (i32, i32) {
    %c0_i32 = arith.constant 0 : i32
    %c0_i32_0 = arith.constant 0 : i32
    return %arg0, %c0_i32 : i32, i32
  }
}

module attributes {stable_mosaic.version = 11 : i64} {
  func.func @_matmul_kernel(%arg0: i32, %arg1: memref<32x8xf32, #tpu.memory_space<vmem>>, %arg2: memref<8x32xf32, #tpu.memory_space<vmem>>, %arg3: memref<1x32xf32, #tpu.memory_space<vmem>>, %arg4: memref<32x32xf32, #tpu.memory_space<vmem>>) attributes {dimension_semantics = [#tpu.dimension_semantics<parallel>], iteration_bounds = array<i64: 1>, scalar_prefetch = 0 : i64, scratch_operands = 0 : i64, tpu.core_type = #tpu.core_type<tc>, window_params = [{transform_indices = @transform_0, window_bounds = array<i64: 32, 8>}, {pipeline_mode = #tpu.pipeline_mode<synchronous>, transform_indices = @transform_1, window_bounds = array<i64: 8, 32>}, {pipeline_mode = #tpu.pipeline_mode<synchronous>, transform_indices = @transform_2, window_bounds = array<i64: 1, 32>}, {transform_indices = @transform_3, window_bounds = array<i64: 32, 32>}]} {
    %c0 = arith.constant 0 : index
    %c0_0 = arith.constant 0 : index
    %0 = vector.load %arg1[%c0, %c0_0] : memref<32x8xf32, #tpu.memory_space<vmem>>, vector<32x8xf32>
    %c0_1 = arith.constant 0 : index
    %c0_2 = arith.constant 0 : index
    %1 = vector.load %arg2[%c0_1, %c0_2] : memref<8x32xf32, #tpu.memory_space<vmem>>, vector<8x32xf32>
    %cst = arith.constant dense<0.000000e+00> : vector<32x32xf32>
    %2 = tpu.matmul %0, %1, %cst {dimension_numbers = #tpu.dot_dimension_numbers<[1], [0], [0], [1], [0, 0, 1, 1], [], []>} : vector<32x8xf32>, vector<8x32xf32>, vector<32x32xf32> -> vector<32x32xf32>
    %c0_3 = arith.constant 0 : index
    %c0_4 = arith.constant 0 : index
    %3 = vector.load %arg3[%c0_3, %c0_4] : memref<1x32xf32, #tpu.memory_space<vmem>>, vector<1x32xf32>
    %4 = vector.broadcast %3 : vector<1x32xf32> to vector<32x32xf32>
    %5 = arith.addf %2, %4 : vector<32x32xf32>
    %c0_5 = arith.constant 0 : index
    %c0_6 = arith.constant 0 : index
    %6 = vector.load %arg4[%c0_5, %c0_6] : memref<32x32xf32, #tpu.memory_space<vmem>>, vector<32x32xf32>
    tpu.vector_store %arg4[%c0_5, %c0_6], %5 {strides = array<i32>} : memref<32x32xf32, #tpu.memory_space<vmem>>, vector<32x32xf32>,
    return
  }
  func.func @transform_0(%arg0: i32) -> (i32, i32) {
    %c0_i32 = arith.constant 0 : i32
    %c0_i32_0 = arith.constant 0 : i32
    return %arg0, %c0_i32 : i32, i32
  }
  func.func @transform_1(%arg0: i32) -> (i32, i32) {
    %c0_i32 = arith.constant 0 : i32
    %c0_i32_0 = arith.constant 0 : i32
    %c0_i32_1 = arith.constant 0 : i32
    return %c0_i32, %c0_i32_0 : i32, i32
  }
  func.func @transform_2(%arg0: i32) -> (i32, i32) {
    %c0_i32 = arith.constant 0 : i32
    %c0_i32_0 = arith.constant 0 : i32
    %c0_i32_1 = arith.constant 0 : i32
    return %c0_i32, %c0_i32_0 : i32, i32
  }
  func.func @transform_3(%arg0: i32) -> (i32, i32) {
    %c0_i32 = arith.constant 0 : i32
    %c0_i32_0 = arith.constant 0 : i32
    return %arg0, %c0_i32 : i32, i32
  }
}

module attributes {stable_mosaic.version = 11 : i64} {
  func.func @_matmul_kernel(%arg0: i32, %arg1: memref<32x8xf32, #tpu.memory_space<vmem>>, %arg2: memref<8x128xf32, #tpu.memory_space<vmem>>, %arg3: memref<1x128xf32, #tpu.memory_space<vmem>>, %arg4: memref<32x128xf32, #tpu.memory_space<vmem>>) attributes {dimension_semantics = [#tpu.dimension_semantics<parallel>], iteration_bounds = array<i64: 1>, scalar_prefetch = 0 : i64, scratch_operands = 0 : i64, tpu.core_type = #tpu.core_type<tc>, window_params = [{transform_indices = @transform_0, window_bounds = array<i64: 32, 8>}, {pipeline_mode = #tpu.pipeline_mode<synchronous>, transform_indices = @transform_1, window_bounds = array<i64: 8, 128>}, {pipeline_mode = #tpu.pipeline_mode<synchronous>, transform_indices = @transform_2, window_bounds = array<i64: 1, 128>}, {transform_indices = @transform_3, window_bounds = array<i64: 32, 128>}]} {
    %c0 = arith.constant 0 : index
    %c0_0 = arith.constant 0 : index
    %0 = vector.load %arg1[%c0, %c0_0] : memref<32x8xf32, #tpu.memory_space<vmem>>, vector<32x8xf32>
    %c0_1 = arith.constant 0 : index
    %c0_2 = arith.constant 0 : index
    %1 = vector.load %arg2[%c0_1, %c0_2] : memref<8x128xf32, #tpu.memory_space<vmem>>, vector<8x128xf32>
    %cst = arith.constant dense<0.000000e+00> : vector<32x128xf32>
    %2 = tpu.matmul %0, %1, %cst {dimension_numbers = #tpu.dot_dimension_numbers<[1], [0], [0], [1], [0, 0, 1, 1], [], []>} : vector<32x8xf32>, vector<8x128xf32>, vector<32x128xf32> -> vector<32x128xf32>
    %c0_3 = arith.constant 0 : index
    %c0_4 = arith.constant 0 : index
    %3 = vector.load %arg3[%c0_3, %c0_4] : memref<1x128xf32, #tpu.memory_space<vmem>>, vector<1x128xf32>
    %4 = vector.broadcast %3 : vector<1x128xf32> to vector<32x128xf32>
    %5 = arith.addf %2, %4 : vector<32x128xf32>
    %c0_5 = arith.constant 0 : index
    %c0_6 = arith.constant 0 : index
    %6 = vector.load %arg4[%c0_5, %c0_6] : memref<32x128xf32, #tpu.memory_space<vmem>>, vector<32x128xf32>
    tpu.vector_store %arg4[%c0_5, %c0_6], %5 {strides = array<i32>} : memref<32x128xf32, #tpu.memory_space<vmem>>, vector<32x128xf32>,
    return
  }
  func.func @transform_0(%arg0: i32) -> (i32, i32) {
    %c0_i32 = arith.constant 0 : i32
    %c0_i32_0 = arith.constant 0 : i32
    return %arg0, %c0_i32 : i32, i32
  }
  func.func @transform_1(%arg0: i32) -> (i32, i32) {
    %c0_i32 = arith.constant 0 : i32
    %c0_i32_0 = arith.constant 0 : i32
    %c0_i32_1 = arith.constant 0 : i32
    return %c0_i32, %c0_i32_0 : i32, i32
  }
  func.func @transform_2(%arg0: i32) -> (i32, i32) {
    %c0_i32 = arith.constant 0 : i32
    %c0_i32_0 = arith.constant 0 : i32
    %c0_i32_1 = arith.constant 0 : i32
    return %c0_i32, %c0_i32_0 : i32, i32
  }
  func.func @transform_3(%arg0: i32) -> (i32, i32) {
    %c0_i32 = arith.constant 0 : i32
    %c0_i32_0 = arith.constant 0 : i32
    return %arg0, %c0_i32 : i32, i32
  }
}

module attributes {stable_mosaic.version = 11 : i64} {
  func.func @_grid_sample_kernel(%arg0: i32, %arg1: i32, %arg2: memref<1x256x32xbf16, #tpu.memory_space<vmem>>, %arg3: memref<1x2x512xf32, #tpu.memory_space<vmem>>, %arg4: memref<1x8x512xf32, #tpu.memory_space<vmem>>) attributes {dimension_semantics = [#tpu.dimension_semantics<parallel>, #tpu.dimension_semantics<parallel>], iteration_bounds = array<i64: 2, 2>, scalar_prefetch = 0 : i64, scratch_operands = 0 : i64, tpu.core_type = #tpu.core_type<tc>, window_params = [{transform_indices = @transform_0, window_bounds = array<i64: 1, 256, 32>}, {transform_indices = @transform_1, window_bounds = array<i64: 1, 2, 512>}, {transform_indices = @transform_2, window_bounds = array<i64: 1, 8, 512>}]} {
    %c0 = arith.constant 0 : index
    %c0_0 = arith.constant 0 : index
    %c0_1 = arith.constant 0 : index
    %0 = vector.load %arg2[%c0, %c0_0, %c0_1] : memref<1x256x32xbf16, #tpu.memory_space<vmem>>, vector<1x256x32xbf16>
    %1 = vector.shape_cast %0 : vector<1x256x32xbf16> to vector<256x32xbf16>
    %c0_2 = arith.constant 0 : index
    %c0_3 = arith.constant 0 : index
    %c0_4 = arith.constant 0 : index
    %2 = vector.load %arg3[%c0_2, %c0_3, %c0_4] : memref<1x2x512xf32, #tpu.memory_space<vmem>>, vector<1x2x512xf32>
    %3 = vector.shape_cast %2 : vector<1x2x512xf32> to vector<2x512xf32>
    %4 = vector.extract_strided_slice %3 {offsets = [0, 0], sizes = [1, 512], strides = [1, 1]} : vector<2x512xf32> to vector<1x512xf32>
    %5 = vector.extract_strided_slice %3 {offsets = [1, 0], sizes = [1, 512], strides = [1, 1]} : vector<2x512xf32> to vector<1x512xf32>
    %cst = arith.constant 1.000000e+00 : f32
    %6 = vector.broadcast %cst : f32 to vector<1x512xf32>
    %7 = arith.addf %4, %6 : vector<1x512xf32>
    %cst_5 = arith.constant 3.200000e+01 : f32
    %8 = vector.broadcast %cst_5 : f32 to vector<1x512xf32>
    %9 = arith.mulf %7, %8 : vector<1x512xf32>
    %cst_6 = arith.constant 1.000000e+00 : f32
    %10 = vector.broadcast %cst_6 : f32 to vector<1x512xf32>
    %11 = arith.subf %9, %10 : vector<1x512xf32>
    %cst_7 = arith.constant 5.000000e-01 : f32
    %12 = vector.broadcast %cst_7 : f32 to vector<1x512xf32>
    %13 = arith.mulf %11, %12 : vector<1x512xf32>
    %cst_8 = arith.constant 1.000000e+00 : f32
    %14 = vector.broadcast %cst_8 : f32 to vector<1x512xf32>
    %15 = arith.addf %5, %14 : vector<1x512xf32>
    %cst_9 = arith.constant 3.200000e+01 : f32
    %16 = vector.broadcast %cst_9 : f32 to vector<1x512xf32>
    %17 = arith.mulf %15, %16 : vector<1x512xf32>
    %cst_10 = arith.constant 1.000000e+00 : f32
    %18 = vector.broadcast %cst_10 : f32 to vector<1x512xf32>
    %19 = arith.subf %17, %18 : vector<1x512xf32>
    %cst_11 = arith.constant 5.000000e-01 : f32
    %20 = vector.broadcast %cst_11 : f32 to vector<1x512xf32>
    %21 = arith.mulf %19, %20 : vector<1x512xf32>
    %22 = math.floor %13 : vector<1x512xf32>
    %23 = math.floor %21 : vector<1x512xf32>
    %24 = arith.subf %13, %22 : vector<1x512xf32>
    %cst_12 = arith.constant 1.000000e+00 : f32
    %25 = vector.broadcast %cst_12 : f32 to vector<1x512xf32>
    %26 = arith.subf %25, %24 : vector<1x512xf32>
    %27 = arith.subf %21, %23 : vector<1x512xf32>
    %cst_13 = arith.constant 1.000000e+00 : f32
    %28 = vector.broadcast %cst_13 : f32 to vector<1x512xf32>
    %29 = arith.subf %28, %27 : vector<1x512xf32>
    %cst_14 = arith.constant -1.000000e+00 : f32
    %cst_15 = arith.constant 3.200000e+01 : f32
    %30 = vector.broadcast %cst_14 : f32 to vector<1x512xf32>
    %31 = arith.maximumf %30, %22 : vector<1x512xf32>
    %32 = vector.broadcast %cst_15 : f32 to vector<1x512xf32>
    %33 = arith.minimumf %32, %31 : vector<1x512xf32>
    %34 = arith.fptosi %33 : vector<1x512xf32> to vector<1x512xi32>
    %cst_16 = arith.constant 1.000000e+00 : f32
    %35 = vector.broadcast %cst_16 : f32 to vector<1x512xf32>
    %36 = arith.addf %22, %35 : vector<1x512xf32>
    %cst_17 = arith.constant -1.000000e+00 : f32
    %cst_18 = arith.constant 3.200000e+01 : f32
    %37 = vector.broadcast %cst_17 : f32 to vector<1x512xf32>
    %38 = arith.maximumf %37, %36 : vector<1x512xf32>
    %39 = vector.broadcast %cst_18 : f32 to vector<1x512xf32>
    %40 = arith.minimumf %39, %38 : vector<1x512xf32>
    %41 = arith.fptosi %40 : vector<1x512xf32> to vector<1x512xi32>
    %cst_19 = arith.constant -1.000000e+00 : f32
    %cst_20 = arith.constant 3.200000e+01 : f32
    %42 = vector.broadcast %cst_19 : f32 to vector<1x512xf32>
    %43 = arith.maximumf %42, %23 : vector<1x512xf32>
    %44 = vector.broadcast %cst_20 : f32 to vector<1x512xf32>
    %45 = arith.minimumf %44, %43 : vector<1x512xf32>
    %46 = arith.fptosi %45 : vector<1x512xf32> to vector<1x512xi32>
    %cst_21 = arith.constant 1.000000e+00 : f32
    %47 = vector.broadcast %cst_21 : f32 to vector<1x512xf32>
    %48 = arith.addf %23, %47 : vector<1x512xf32>
    %cst_22 = arith.constant -1.000000e+00 : f32
    %cst_23 = arith.constant 3.200000e+01 : f32
    %49 = vector.broadcast %cst_22 : f32 to vector<1x512xf32>
    %50 = arith.maximumf %49, %48 : vector<1x512xf32>
    %51 = vector.broadcast %cst_23 : f32 to vector<1x512xf32>
    %52 = arith.minimumf %51, %50 : vector<1x512xf32>
    %53 = arith.fptosi %52 : vector<1x512xf32> to vector<1x512xi32>
    %54 = tpu.iota {dimensions = array<i32: 0>} : vector<32x512xi32>
    %55 = vector.broadcast %46 : vector<1x512xi32> to vector<32x512xi32>
    %56 = arith.cmpi eq, %54, %55 : vector<32x512xi32>
    %cst_24 = arith.constant 0.000000e+00 : f32
    %57 = vector.shape_cast %29 : vector<1x512xf32> to vector<1x512xf32>
    %58 = vector.broadcast %57 : vector<1x512xf32> to vector<32x512xf32>
    %59 = vector.broadcast %cst_24 : f32 to vector<32x512xf32>
    %60 = arith.select %56, %58, %59 : vector<32x512xi1>, vector<32x512xf32>
    %61 = vector.broadcast %53 : vector<1x512xi32> to vector<32x512xi32>
    %62 = arith.cmpi eq, %54, %61 : vector<32x512xi32>
    %cst_25 = arith.constant 0.000000e+00 : f32
    %63 = vector.shape_cast %27 : vector<1x512xf32> to vector<1x512xf32>
    %64 = vector.broadcast %63 : vector<1x512xf32> to vector<32x512xf32>
    %65 = vector.broadcast %cst_25 : f32 to vector<32x512xf32>
    %66 = arith.select %62, %64, %65 : vector<32x512xi1>, vector<32x512xf32>
    %67 = arith.addf %60, %66 : vector<32x512xf32>
    %68 = arith.truncf %67 : vector<32x512xf32> to vector<32x512xbf16>
    %cst_26 = arith.constant dense<0.000000e+00> : vector<256x512xf32>
    %69 = tpu.matmul %1, %68, %cst_26 {dimension_numbers = #tpu.dot_dimension_numbers<[1], [0], [0], [1], [0, 0, 1, 1], [], []>} : vector<256x32xbf16>, vector<32x512xbf16>, vector<256x512xf32> -> vector<256x512xf32>
    %70 = tpu.iota {dimensions = array<i32: 0>} : vector<32x512xi32>
    %71 = vector.broadcast %34 : vector<1x512xi32> to vector<32x512xi32>
    %72 = arith.cmpi eq, %70, %71 : vector<32x512xi32>
    %cst_27 = arith.constant 0.000000e+00 : f32
    %73 = vector.shape_cast %26 : vector<1x512xf32> to vector<1x512xf32>
    %74 = vector.broadcast %73 : vector<1x512xf32> to vector<32x512xf32>
    %75 = vector.broadcast %cst_27 : f32 to vector<32x512xf32>
    %76 = arith.select %72, %74, %75 : vector<32x512xi1>, vector<32x512xf32>
    %77 = vector.broadcast %41 : vector<1x512xi32> to vector<32x512xi32>
    %78 = arith.cmpi eq, %70, %77 : vector<32x512xi32>
    %cst_28 = arith.constant 0.000000e+00 : f32
    %79 = vector.shape_cast %24 : vector<1x512xf32> to vector<1x512xf32>
    %80 = vector.broadcast %79 : vector<1x512xf32> to vector<32x512xf32>
    %81 = vector.broadcast %cst_28 : f32 to vector<32x512xf32>
    %82 = arith.select %78, %80, %81 : vector<32x512xi1>, vector<32x512xf32>
    %83 = arith.addf %76, %82 : vector<32x512xf32>
    %84 = vector.shape_cast %69 : vector<256x512xf32> to vector<8x32x512xf32>
    %85 = vector.shape_cast %83 : vector<32x512xf32> to vector<1x32x512xf32>
    %86 = vector.broadcast %85 : vector<1x32x512xf32> to vector<8x32x512xf32>
    %87 = arith.mulf %84, %86 : vector<8x32x512xf32>
    %cst_29 = arith.constant dense<0.000000e+00> : vector<8x512xf32>
    %88 = vector.multi_reduction <add>, %87, %cst_29 [1] : vector<8x32x512xf32> to vector<8x512xf32>
    %c0_30 = arith.constant 0 : index
    %c0_31 = arith.constant 0 : index
    %c0_32 = arith.constant 0 : index
    %89 = vector.load %arg4[%c0_30, %c0_31, %c0_32] : memref<1x8x512xf32, #tpu.memory_space<vmem>>, vector<1x8x512xf32>
    %90 = vector.shape_cast %89 : vector<1x8x512xf32> to vector<8x512xf32>
    %91 = vector.shape_cast %88 : vector<8x512xf32> to vector<1x8x512xf32>
    tpu.vector_store %arg4[%c0_30, %c0_31, %c0_32], %91 {strides = array<i32>} : memref<1x8x512xf32, #tpu.memory_space<vmem>>, vector<1x8x512xf32>,
    return
  }
  func.func @transform_0(%arg0: i32, %arg1: i32) -> (i32, i32, i32) {
    %c0_i32 = arith.constant 0 : i32
    %c0_i32_0 = arith.constant 0 : i32
    %c0_i32_1 = arith.constant 0 : i32
    return %arg0, %c0_i32, %c0_i32_0 : i32, i32, i32
  }
  func.func @transform_1(%arg0: i32, %arg1: i32) -> (i32, i32, i32) {
    %c0_i32 = arith.constant 0 : i32
    %c0_i32_0 = arith.constant 0 : i32
    return %arg0, %c0_i32, %arg1 : i32, i32, i32
  }
  func.func @transform_2(%arg0: i32, %arg1: i32) -> (i32, i32, i32) {
    %c0_i32 = arith.constant 0 : i32
    %c0_i32_0 = arith.constant 0 : i32
    return %arg0, %c0_i32, %arg1 : i32, i32, i32
  }
}

module attributes {stable_mosaic.version = 11 : i64} {
  func.func @_matmul_kernel(%arg0: i32, %arg1: memref<1024x63xbf16, #tpu.memory_space<vmem>>, %arg2: memref<63x16xbf16, #tpu.memory_space<vmem>>, %arg3: memref<1x16xf32, #tpu.memory_space<vmem>>, %arg4: memref<1024x16xbf16, #tpu.memory_space<vmem>>) attributes {dimension_semantics = [#tpu.dimension_semantics<parallel>], iteration_bounds = array<i64: 2>, scalar_prefetch = 0 : i64, scratch_operands = 0 : i64, tpu.core_type = #tpu.core_type<tc>, window_params = [{transform_indices = @transform_0, window_bounds = array<i64: 1024, 63>}, {pipeline_mode = #tpu.pipeline_mode<synchronous>, transform_indices = @transform_1, window_bounds = array<i64: 63, 16>}, {pipeline_mode = #tpu.pipeline_mode<synchronous>, transform_indices = @transform_2, window_bounds = array<i64: 1, 16>}, {transform_indices = @transform_3, window_bounds = array<i64: 1024, 16>}]} {
    %c0 = arith.constant 0 : index
    %c0_0 = arith.constant 0 : index
    %0 = vector.load %arg1[%c0, %c0_0] : memref<1024x63xbf16, #tpu.memory_space<vmem>>, vector<1024x63xbf16>
    %c0_1 = arith.constant 0 : index
    %c0_2 = arith.constant 0 : index
    %1 = vector.load %arg2[%c0_1, %c0_2] : memref<63x16xbf16, #tpu.memory_space<vmem>>, vector<63x16xbf16>
    %cst = arith.constant dense<0.000000e+00> : vector<1024x16xf32>
    %2 = tpu.matmul %0, %1, %cst {dimension_numbers = #tpu.dot_dimension_numbers<[1], [0], [0], [1], [0, 0, 1, 1], [], []>} : vector<1024x63xbf16>, vector<63x16xbf16>, vector<1024x16xf32> -> vector<1024x16xf32>
    %c0_3 = arith.constant 0 : index
    %c0_4 = arith.constant 0 : index
    %3 = vector.load %arg3[%c0_3, %c0_4] : memref<1x16xf32, #tpu.memory_space<vmem>>, vector<1x16xf32>
    %4 = vector.broadcast %3 : vector<1x16xf32> to vector<1024x16xf32>
    %5 = arith.addf %2, %4 : vector<1024x16xf32>
    %cst_5 = arith.constant 0.000000e+00 : f32
    %6 = vector.broadcast %cst_5 : f32 to vector<1024x16xf32>
    %7 = arith.maximumf %5, %6 : vector<1024x16xf32>
    %8 = arith.truncf %7 : vector<1024x16xf32> to vector<1024x16xbf16>
    %c0_6 = arith.constant 0 : index
    %c0_7 = arith.constant 0 : index
    %9 = vector.load %arg4[%c0_6, %c0_7] : memref<1024x16xbf16, #tpu.memory_space<vmem>>, vector<1024x16xbf16>
    tpu.vector_store %arg4[%c0_6, %c0_7], %8 {strides = array<i32>} : memref<1024x16xbf16, #tpu.memory_space<vmem>>, vector<1024x16xbf16>,
    return
  }
  func.func @transform_0(%arg0: i32) -> (i32, i32) {
    %c0_i32 = arith.constant 0 : i32
    %c0_i32_0 = arith.constant 0 : i32
    return %arg0, %c0_i32 : i32, i32
  }
  func.func @transform_1(%arg0: i32) -> (i32, i32) {
    %c0_i32 = arith.constant 0 : i32
    %c0_i32_0 = arith.constant 0 : i32
    %c0_i32_1 = arith.constant 0 : i32
    return %c0_i32, %c0_i32_0 : i32, i32
  }
  func.func @transform_2(%arg0: i32) -> (i32, i32) {
    %c0_i32 = arith.constant 0 : i32
    %c0_i32_0 = arith.constant 0 : i32
    %c0_i32_1 = arith.constant 0 : i32
    return %c0_i32, %c0_i32_0 : i32, i32
  }
  func.func @transform_3(%arg0: i32) -> (i32, i32) {
    %c0_i32 = arith.constant 0 : i32
    %c0_i32_0 = arith.constant 0 : i32
    return %arg0, %c0_i32 : i32, i32
  }
}

module attributes {stable_mosaic.version = 11 : i64} {
  func.func @_matmul_kernel(%arg0: i32, %arg1: memref<1024x144xbf16, #tpu.memory_space<vmem>>, %arg2: memref<144x16xbf16, #tpu.memory_space<vmem>>, %arg3: memref<1x16xf32, #tpu.memory_space<vmem>>, %arg4: memref<1024x16xbf16, #tpu.memory_space<vmem>>) attributes {dimension_semantics = [#tpu.dimension_semantics<parallel>], iteration_bounds = array<i64: 2>, scalar_prefetch = 0 : i64, scratch_operands = 0 : i64, tpu.core_type = #tpu.core_type<tc>, window_params = [{transform_indices = @transform_0, window_bounds = array<i64: 1024, 144>}, {pipeline_mode = #tpu.pipeline_mode<synchronous>, transform_indices = @transform_1, window_bounds = array<i64: 144, 16>}, {pipeline_mode = #tpu.pipeline_mode<synchronous>, transform_indices = @transform_2, window_bounds = array<i64: 1, 16>}, {transform_indices = @transform_3, window_bounds = array<i64: 1024, 16>}]} {
    %c0 = arith.constant 0 : index
    %c0_0 = arith.constant 0 : index
    %0 = vector.load %arg1[%c0, %c0_0] : memref<1024x144xbf16, #tpu.memory_space<vmem>>, vector<1024x144xbf16>
    %c0_1 = arith.constant 0 : index
    %c0_2 = arith.constant 0 : index
    %1 = vector.load %arg2[%c0_1, %c0_2] : memref<144x16xbf16, #tpu.memory_space<vmem>>, vector<144x16xbf16>
    %cst = arith.constant dense<0.000000e+00> : vector<1024x16xf32>
    %2 = tpu.matmul %0, %1, %cst {dimension_numbers = #tpu.dot_dimension_numbers<[1], [0], [0], [1], [0, 0, 1, 1], [], []>} : vector<1024x144xbf16>, vector<144x16xbf16>, vector<1024x16xf32> -> vector<1024x16xf32>
    %c0_3 = arith.constant 0 : index
    %c0_4 = arith.constant 0 : index
    %3 = vector.load %arg3[%c0_3, %c0_4] : memref<1x16xf32, #tpu.memory_space<vmem>>, vector<1x16xf32>
    %4 = vector.broadcast %3 : vector<1x16xf32> to vector<1024x16xf32>
    %5 = arith.addf %2, %4 : vector<1024x16xf32>
    %cst_5 = arith.constant 0.000000e+00 : f32
    %6 = vector.broadcast %cst_5 : f32 to vector<1024x16xf32>
    %7 = arith.maximumf %5, %6 : vector<1024x16xf32>
    %8 = arith.truncf %7 : vector<1024x16xf32> to vector<1024x16xbf16>
    %c0_6 = arith.constant 0 : index
    %c0_7 = arith.constant 0 : index
    %9 = vector.load %arg4[%c0_6, %c0_7] : memref<1024x16xbf16, #tpu.memory_space<vmem>>, vector<1024x16xbf16>
    tpu.vector_store %arg4[%c0_6, %c0_7], %8 {strides = array<i32>} : memref<1024x16xbf16, #tpu.memory_space<vmem>>, vector<1024x16xbf16>,
    return
  }
  func.func @transform_0(%arg0: i32) -> (i32, i32) {
    %c0_i32 = arith.constant 0 : i32
    %c0_i32_0 = arith.constant 0 : i32
    return %arg0, %c0_i32 : i32, i32
  }
  func.func @transform_1(%arg0: i32) -> (i32, i32) {
    %c0_i32 = arith.constant 0 : i32
    %c0_i32_0 = arith.constant 0 : i32
    %c0_i32_1 = arith.constant 0 : i32
    return %c0_i32, %c0_i32_0 : i32, i32
  }
  func.func @transform_2(%arg0: i32) -> (i32, i32) {
    %c0_i32 = arith.constant 0 : i32
    %c0_i32_0 = arith.constant 0 : i32
    %c0_i32_1 = arith.constant 0 : i32
    return %c0_i32, %c0_i32_0 : i32, i32
  }
  func.func @transform_3(%arg0: i32) -> (i32, i32) {
    %c0_i32 = arith.constant 0 : i32
    %c0_i32_0 = arith.constant 0 : i32
    return %arg0, %c0_i32 : i32, i32
  }
}

module attributes {stable_mosaic.version = 11 : i64} {
  func.func @_matmul_kernel(%arg0: i32, %arg1: memref<1024x16xbf16, #tpu.memory_space<vmem>>, %arg2: memref<16x3xbf16, #tpu.memory_space<vmem>>, %arg3: memref<1x3xf32, #tpu.memory_space<vmem>>, %arg4: memref<1024x3xf32, #tpu.memory_space<vmem>>) attributes {dimension_semantics = [#tpu.dimension_semantics<parallel>], iteration_bounds = array<i64: 2>, scalar_prefetch = 0 : i64, scratch_operands = 0 : i64, tpu.core_type = #tpu.core_type<tc>, window_params = [{transform_indices = @transform_0, window_bounds = array<i64: 1024, 16>}, {pipeline_mode = #tpu.pipeline_mode<synchronous>, transform_indices = @transform_1, window_bounds = array<i64: 16, 3>}, {pipeline_mode = #tpu.pipeline_mode<synchronous>, transform_indices = @transform_2, window_bounds = array<i64: 1, 3>}, {transform_indices = @transform_3, window_bounds = array<i64: 1024, 3>}]} {
    %c0 = arith.constant 0 : index
    %c0_0 = arith.constant 0 : index
    %0 = vector.load %arg1[%c0, %c0_0] : memref<1024x16xbf16, #tpu.memory_space<vmem>>, vector<1024x16xbf16>
    %c0_1 = arith.constant 0 : index
    %c0_2 = arith.constant 0 : index
    %1 = vector.load %arg2[%c0_1, %c0_2] : memref<16x3xbf16, #tpu.memory_space<vmem>>, vector<16x3xbf16>
    %cst = arith.constant dense<0.000000e+00> : vector<1024x3xf32>
    %2 = tpu.matmul %0, %1, %cst {dimension_numbers = #tpu.dot_dimension_numbers<[1], [0], [0], [1], [0, 0, 1, 1], [], []>} : vector<1024x16xbf16>, vector<16x3xbf16>, vector<1024x3xf32> -> vector<1024x3xf32>
    %c0_3 = arith.constant 0 : index
    %c0_4 = arith.constant 0 : index
    %3 = vector.load %arg3[%c0_3, %c0_4] : memref<1x3xf32, #tpu.memory_space<vmem>>, vector<1x3xf32>
    %4 = vector.broadcast %3 : vector<1x3xf32> to vector<1024x3xf32>
    %5 = arith.addf %2, %4 : vector<1024x3xf32>
    %c0_5 = arith.constant 0 : index
    %c0_6 = arith.constant 0 : index
    %6 = vector.load %arg4[%c0_5, %c0_6] : memref<1024x3xf32, #tpu.memory_space<vmem>>, vector<1024x3xf32>
    tpu.vector_store %arg4[%c0_5, %c0_6], %5 {strides = array<i32>} : memref<1024x3xf32, #tpu.memory_space<vmem>>, vector<1024x3xf32>,
    return
  }
  func.func @transform_0(%arg0: i32) -> (i32, i32) {
    %c0_i32 = arith.constant 0 : i32
    %c0_i32_0 = arith.constant 0 : i32
    return %arg0, %c0_i32 : i32, i32
  }
  func.func @transform_1(%arg0: i32) -> (i32, i32) {
    %c0_i32 = arith.constant 0 : i32
    %c0_i32_0 = arith.constant 0 : i32
    %c0_i32_1 = arith.constant 0 : i32
    return %c0_i32, %c0_i32_0 : i32, i32
  }
  func.func @transform_2(%arg0: i32) -> (i32, i32) {
    %c0_i32 = arith.constant 0 : i32
    %c0_i32_0 = arith.constant 0 : i32
    %c0_i32_1 = arith.constant 0 : i32
    return %c0_i32, %c0_i32_0 : i32, i32
  }
  func.func @transform_3(%arg0: i32) -> (i32, i32) {
    %c0_i32 = arith.constant 0 : i32
    %c0_i32_0 = arith.constant 0 : i32
    return %arg0, %c0_i32 : i32, i32
  }
}

</mosaic_0001>

<bundles_post_ra>
// kernel: flowgen_forward.9
= control target key start
LH: loop header
LB: loop body
LE: loop exit
PB: predicated region body
PF: predicated region fallthrough
CT: control target
= control target key end

     0   :  { %s1726_s12 = smov 0   ;;  %s2003_s0 = inlined_call_operand.vmem [shape: bf16[512,294], index: 0, kind: input, shape index: {}]   ;;  %s2004_s1 = inlined_call_operand.vmem [shape: bf16[294,16], index: 1, kind: input, shape index: {}]   ;;  %s2005_s2 = inlined_call_operand.vmem [shape: f32[1,16], index: 2, kind: input, shape index: {}]   ;;  %s2006_s3 = inlined_call_operand.vmem [shape: bf16[512,16], index: 3, kind: output, shape index: {}]  }
   0x1 LB: > { %s1261_s13 = sadd.s32 4294967295, %s1704_s12   ;;  %p1265_p0 = scmp.ge.s32.totalorder %s1704_s12, 1  ;;  %s1704_s12 = sphi %s1726_s12, %s13_s12  }
   0x2   : > { %p139_p1 = scmp.lt.s32.totalorder %s1704_s12, 3 }
   0x4   : > { %p140_p2 = pnand %p1265_p0, %p139_p1 }
   0x5   : > { %v1615_v0 = vld [vmem:[%s2004_s1 + $0x40] sm:$0xff] (!%p140_p2)   ;;  %s1266_s16 = sshll.u32 (!%p140_p2), %s1261_s13, 5  ;;  %v1617_v2 = vld [vmem:[%s2004_s1 + $0x48] sm:$0xff] (!%p140_p2)   ;;  %v1619_v4 = vld [vmem:[%s2004_s1 + $0x50] sm:$0xff] (!%p140_p2)   ;;  %vm686_vm0 = vcmask (!%p140_p2), 1042432   ;;  %vm637_vm1 = vcmask (!%p140_p2), 310272  }
   0x6   : > { %143 = sbr.rel (%p140_p2) target bundleno = 352 (0x160), region = 32  ;;  %v1616_v1 = vld [vmem:[%s2004_s1] sm:$0xff] (!%p140_p2)   ;;  %1420 = vmatprep.subr.bf16.mxu0 (!%p140_p2), %v1615_v0  ;;  %1589 = vmatprep.subr.bf16.mxu1 (!%p140_p2), %v1615_v0  ;;  %p165_p3 = scmp.lt.s32.totalorder (!%p140_p2), %s1266_s16, 63  ;;  %v1618_v3 = vld [vmem:[%s2004_s1 + $0x8] sm:$0xff] (!%p140_p2)   ;;  %v1620_v5 = vld [vmem:[%s2004_s1 + $0x10] sm:$0xff] (!%p140_p2)   ;;  %vm1172_vm2 = vcmask (!%p140_p2), 125952  }
   0x7   : > { %1421 = vmatpush3.bf16.msra.mxu0 (!%p140_p2), %v1616_v1  ;;  %1597 = vmatpush3.bf16.msra.mxu1 (!%p140_p2), %v1616_v1  ;;  %v1621_v6 = vld [vmem:[%s2004_s1 + $0x58] sm:$0xff] (!%p140_p2)   ;;  %v1623_v8 = vld [vmem:[%s2004_s1 + $0x60] sm:$0xff] (!%p140_p2)   ;;  %v1625_v10 = vld [vmem:[%s2004_s1 + $0x68] sm:$0xff] (!%p140_p2)  }
   0x8   : > { %1422 = vmatprep.subr.bf16.mxu0 (!%p140_p2), %v1617_v2  ;;  %1590 = vmatprep.subr.bf16.mxu1 (!%p140_p2), %v1617_v2  ;;  %v1622_v7 = vld [vmem:[%s2004_s1 + $0x18] sm:$0xff] (!%p140_p2)   ;;  %v1624_v9 = vld [vmem:[%s2004_s1 + $0x20] sm:$0xff] (!%p140_p2)   ;;  %v1626_v13 = vld [vmem:[%s2004_s1 + $0x28] sm:$0xff] (!%p140_p2)  }
   0x9   : > { %v1627_v14 = vld [vmem:[%s2004_s1 + $0x70] sm:$0xff] (!%p140_p2)   ;;  %v1629_v16 = vld [vmem:[%s2004_s1 + $0x78] sm:$0xff] (!%p140_p2)   ;;  %v1637_v18 = vld [vmem:[%s2004_s1 + $0x80] sm:$0xff] (!%p140_p2)  }
   0xa   : > { %v1628_v15 = vld [vmem:[%s2004_s1 + $0x30] sm:$0xff] (!%p140_p2)   ;;  %v1630_v17 = vld [vmem:[%s2004_s1 + $0x38] sm:$0xff] (!%p140_p2)   ;;  %v1644_v23 = vld [vmem:[%s2004_s1 + $0x88] sm:$0xff] (!%p140_p2)  }
   0xb   : > { %1423 = vmatpush3.bf16.msra.mxu0 (!%p140_p2), %v1618_v3  ;;  %1598 = vmatpush3.bf16.msra.mxu1 (!%p140_p2), %v1618_v3  ;;  %v1657_v25 = vld [vmem:[%s2004_s1 + $0x90] ss:$0 sps:$4 sm:$0x77] (!%p140_p2)  }
   0xc   : > { %1424 = vmatprep.subr.bf16.mxu0 (!%p140_p2), %v1619_v4  ;;  %1591 = vmatprep.subr.bf16.mxu1 (!%p140_p2), %v1619_v4  ;;  %v688_v29 = vsel (!%p140_p2), %vm686_vm0, %v1657_v25, 0 }
   0xd   : > { %s2008_s16 = smov (!%p165_p3, %s1266_s16), 63 }
   0xe   : > { %s1606_s29 = smul.u32 12, %s2008_s16  ;;  %s1269_s7 = sshll.u32 %s2008_s16, 2 }
   0xf   : > { %1425 = vmatpush3.bf16.msra.mxu0 %v1620_v5  ;;  %1599 = vmatpush3.bf16.msra.mxu1 %v1620_v5  ;;  %s1892_s10 = scalar_lea.vmem %s2006_s3, %s1269_s7 }
  0x10   : > { %1426 = vmatprep.subr.bf16.mxu0 %v1621_v6  ;;  %1592 = vmatprep.subr.bf16.mxu1 %v1621_v6  ;;  %s1767_s9 = scalar_lea.vmem %s2003_s0, %s1606_s29 }
  0x11   : > { %v1633_v11 = vld [vmem:[%s1767_s9 + $0x4] ss:$12 sps:$4 sm:$0xff]   ;;  %v1631_v19 = vld [vmem:[%s1767_s9] ss:$12 sps:$4 sm:$0xff]   ;;  %v1638_v21 = vld [vmem:[%s1767_s9 + $0x1c] ss:$12 sps:$4 sm:$0xff]  }
  0x12   : > { %v1636_v12 = vld [vmem:[%s1767_s9 + $0x124] ss:$12 sps:$4 sm:$0xff]   ;;  %722 = vmatprep.mubr.bf16.mxu0 %v1633_v11  ;;  %v1634_v20 = vld [vmem:[%s1767_s9 + $0x120] ss:$12 sps:$4 sm:$0xff]   ;;  %v1640_v22 = vld [vmem:[%s1767_s9 + $0x13c] ss:$12 sps:$4 sm:$0xff]  }
  0x13   : > { %1427 = vmatpush3.bf16.msra.mxu0 %v1622_v7  ;;  %1600 = vmatpush3.bf16.msra.mxu1 %v1622_v7  ;;  %v1642_v24 = vld [vmem:[%s1767_s9 + $0x18] ss:$12 sps:$4 sm:$0xff]   ;;  %v1645_v27 = vld [vmem:[%s1767_s9 + $0x34] ss:$12 sps:$4 sm:$0xff]   ;;  %v1649_v30 = vld [vmem:[%s1767_s9 + $0x30] ss:$12 sps:$4 sm:$0xff]  }
  0x14   : > { %1428 = vmatprep.subr.bf16.mxu0 %v1623_v8  ;;  %1593 = vmatprep.subr.bf16.mxu1 %v1623_v8  ;;  %v1643_v26 = vld [vmem:[%s1767_s9 + $0x138] ss:$12 sps:$4 sm:$0xff]   ;;  %v1647_v28 = vld [vmem:[%s1767_s9 + $0x154] ss:$12 sps:$4 sm:$0xff]   ;;  %v1650_v31 = vld [vmem:[%s1767_s9 + $0x150] ss:$12 sps:$4 sm:$0xff]  }
  0x15   : > { %818 = vmatprep.mubr.bf16.mxu1 %v1636_v12  ;;  %v1651_v32 = vld [vmem:[%s1767_s9 + $0x4c] ss:$12 sps:$4 sm:$0xff]   ;;  %v1655_v34 = vld [vmem:[%s1767_s9 + $0x48] ss:$12 sps:$4 sm:$0xff]   ;;  %v1658_v36 = vld [vmem:[%s1767_s9 + $0x64] ss:$12 sps:$4 sm:$0xff]  }
  0x16   : > { %v1653_v33 = vld [vmem:[%s1767_s9 + $0x16c] ss:$12 sps:$4 sm:$0xff]   ;;  %v1656_v35 = vld [vmem:[%s1767_s9 + $0x168] ss:$12 sps:$4 sm:$0xff]   ;;  %v1667_v43 = vld [vmem:[%s1767_s9 + $0x50] ss:$12 sps:$4 sm:$0xff]  }
  0x17   : > { %1429 = vmatpush3.bf16.msra.mxu0 %v1624_v9  ;;  %1601 = vmatpush3.bf16.msra.mxu1 %v1624_v9  ;;  %v1660_v37 = vld [vmem:[%s1767_s9 + $0x8] ss:$12 sps:$4 sm:$0xff]   ;;  %v1661_v38 = vld [vmem:[%s1767_s9 + $0x60] ss:$12 sps:$4 sm:$0xff]   ;;  %v1665_v41 = vld [vmem:[%s1767_s9 + $0x38] ss:$12 sps:$4 sm:$0xff]  }
  0x18   : > { %1430 = vmatprep.subr.bf16.mxu0 %v1625_v10  ;;  %1594 = vmatprep.subr.bf16.mxu1 %v1625_v10  ;;  %v1662_v39 = vld [vmem:[%s1767_s9 + $0x20] ss:$12 sps:$4 sm:$0xff]   ;;  %v1663_v40 = vld [vmem:[%s1767_s9 + $0x7c] ss:$12 sps:$4 sm:$0xff]   ;;  %v1666_v42 = vld [vmem:[%s1767_s9 + $0x78] ss:$12 sps:$4 sm:$0xff]  }
  0x19   : > { %v1668_v44 = vld [vmem:[%s1767_s9 + $0x94] ss:$12 sps:$4 sm:$0xff]   ;;  %v1671_v46 = vld [vmem:[%s1767_s9 + $0x90] ss:$12 sps:$4 sm:$0xff]   ;;  %v1673_v48 = vld [vmem:[%s1767_s9 + $0xac] ss:$12 sps:$4 sm:$0xff]  }
  0x1a   : > { %v1670_v45 = vld [vmem:[%s1767_s9 + $0x68] ss:$12 sps:$4 sm:$0xff]   ;;  %v1672_v47 = vld [vmem:[%s1767_s9 + $0x80] ss:$12 sps:$4 sm:$0xff]   ;;  %v1675_v49 = vld [vmem:[%s1767_s9 + $0x98] ss:$12 sps:$4 sm:$0xff]  }
  0x1b   : > { %1431 = vmatpush3.bf16.msra.mxu0 %v1626_v13  ;;  %1602 = vmatpush3.bf16.msra.mxu1 %v1626_v13  ;;  %v1676_v50 = vld [vmem:[%s1767_s9 + $0xa8] ss:$12 sps:$4 sm:$0xff]   ;;  %v1677_v51 = vld [vmem:[%s1767_s9 + $0xb0] ss:$12 sps:$4 sm:$0xff]   ;;  %v1681_v54 = vld [vmem:[%s1767_s9 + $0xc0] ss:$12 sps:$4 sm:$0xff]  }
  0x1c   : > { %1432 = vmatprep.subr.bf16.mxu0 %v1627_v14  ;;  %1595 = vmatprep.subr.bf16.mxu1 %v1627_v14  ;;  %v1678_v52 = vld [vmem:[%s1767_s9 + $0xc4] ss:$12 sps:$4 sm:$0xff]   ;;  %v1680_v53 = vld [vmem:[%s1767_s9 + $0xc8] ss:$12 sps:$4 sm:$0xff]   ;;  %v1682_v55 = vld [vmem:[%s1767_s9 + $0xe0] ss:$12 sps:$4 sm:$0xff]  }
  0x1d   : > { %v1683_v56 = vld [vmem:[%s1767_s9 + $0xdc] ss:$12 sps:$4 sm:$0xff]   ;;  %v1685_v57 = vld [vmem:[%s1767_s9 + $0xf8] ss:$12 sps:$4 sm:$0xff]   ;;  %v1688_v60 = vld [vmem:[%s1767_s9 + $0xf4] ss:$12 sps:$4 sm:$0xff]  }
  0x1e   : > { %v1686_v58 = vld [vmem:[%s1767_s9 + $0xd8] ss:$12 sps:$4 sm:$0xff]   ;;  %v1687_v59 = vld [vmem:[%s1767_s9 + $0x110] ss:$12 sps:$4 sm:$0xff]   ;;  %v1690_v61 = vld [vmem:[%s1767_s9 + $0x128] ss:$12 sps:$4 sm:$0xff]  }
  0x1f   : > { %1433 = vmatpush3.bf16.msra.mxu0 %v1628_v15  ;;  %1603 = vmatpush3.bf16.msra.mxu1 %v1628_v15  ;;  %v1691_v62 = vld [vmem:[%s1767_s9 + $0xf0] ss:$12 sps:$4 sm:$0xff]   ;;  %v1692_v63 = vld [vmem:[%s1767_s9 + $0x140] ss:$12 sps:$4 sm:$0xff]   ;;  %v1695_v1 = vld [vmem:[%s1767_s9 + $0x158] ss:$12 sps:$4 sm:$0xff]  }
  0x20   : > { %1434 = vmatprep.subr.bf16.mxu0 %v1629_v16  ;;  %1596 = vmatprep.subr.bf16.mxu1 %v1629_v16  ;;  %v1693_v0 = vld [vmem:[%s1767_s9 + $0x10c] ss:$12 sps:$4 sm:$0xff]   ;;  %v1696_v2 = vld [vmem:[%s1767_s9 + $0x108] ss:$12 sps:$4 sm:$0xff]   ;;  %v1697_v3 = vld [vmem:[%s1767_s9 + $0x170] ss:$12 sps:$4 sm:$0xff]  }
  0x23   : > { %1435 = vmatpush3.bf16.msra.mxu0 %v1630_v17  ;;  %1604 = vmatpush3.bf16.msra.mxu1 %v1630_v17 }
  0x24   : > { %1551 = vmatprep.subr.bf16.mxu1 %v1637_v18 }
  0x26   : > { %723 = vmatmul.mubr.bf16.vlgmr.msra.gmra.mrb[0].mxu0 %v1631_v19  ;;  %819 = vmatmul.mubr.bf16.vlgmr.msra.gmra.mrb[0].mxu1 %v1634_v20 }
  0x27   : > { %1552 = vmatpush3.bf16.msra.mxu1 %v1637_v18  ;;  %730 = vmatprep.mubr.bf16.mxu0 %v1638_v21 }
  0x28   : > { %826 = vmatprep.mubr.bf16.mxu1 %v1640_v22  ;;  %1553 = vmatprep.subr.bf16.mxu1 %v1644_v23 }
  0x2b   : > { %1554 = vmatpush3.bf16.msra.mxu1 %v1644_v23 }
  0x2c   : > { %1605 = vmatprep.subr.msk.bf16.mxu1 %vm686_vm0, %v1657_v25 }
  0x2e   : > { %731 = vmatmul.mubr.bf16.gmra.mrb[4].mxu0 %v1642_v24  ;;  %827 = vmatmul.mubr.bf16.gmra.mrb[4].mxu1 %v1643_v26 }
  0x2f   : > { %738 = vmatprep.mubr.bf16.mxu0 %v1645_v27  ;;  %834 = vmatprep.mubr.bf16.mxu1 %v1647_v28 }
  0x30   : > { %1556 = vmatpush3.bf16.msra.mxu1 %v688_v29 }
  0x36   : > { %739 = vmatmul.mubr.bf16.gmra.mrb[8].mxu0 %v1649_v30  ;;  %835 = vmatmul.mubr.bf16.gmra.mrb[8].mxu1 %v1650_v31 }
  0x37   : > { %746 = vmatprep.mubr.bf16.mxu0 %v1651_v32  ;;  %842 = vmatprep.mubr.bf16.mxu1 %v1653_v33 }
  0x3e   : > { %747 = vmatmul.mubr.bf16.gmra.mrb[12].mxu0 %v1655_v34  ;;  %843 = vmatmul.mubr.bf16.gmra.mrb[12].mxu1 %v1656_v35 }
  0x3f   : > { %754 = vmatprep.mubr.bf16.mxu0 %v1658_v36  ;;  %1557 = vmatprep.mubr.msk.bf16.mxu1 %vm637_vm1, %v1660_v37 }
  0x46   : > { %755 = vmatmul.mubr.bf16.gmra.mrb[16].mxu0 %v1661_v38  ;;  %1558 = vmatmul.mubr.msk.bf16.vlgmr.msra.gmra.mrb[16].mxu1 %vm637_vm1, %v1662_v39 }
  0x47   : > { %762 = vmatprep.mubr.bf16.mxu0 %v1663_v40  ;;  %1561 = vmatprep.mubr.msk.bf16.mxu1 %vm637_vm1, %v1665_v41 }
  0x4e   : > { %763 = vmatmul.mubr.bf16.gmra.mrb[20].mxu0 %v1666_v42  ;;  %1562 = vmatmul.mubr.msk.bf16.gmra.mrb[20].mxu1 %vm637_vm1, %v1667_v43 }
  0x4f   : > { %770 = vmatprep.mubr.bf16.mxu0 %v1668_v44  ;;  %1565 = vmatprep.mubr.msk.bf16.mxu1 %vm637_vm1, %v1670_v45 }
  0x56   : > { %771 = vmatmul.mubr.bf16.gmra.mrb[24].mxu0 %v1671_v46  ;;  %1566 = vmatmul.mubr.msk.bf16.gmra.mrb[24].mxu1 %vm637_vm1, %v1672_v47 }
  0x57   : > { %778 = vmatprep.mubr.bf16.mxu0 %v1673_v48  ;;  %1569 = vmatprep.mubr.msk.bf16.mxu1 %vm637_vm1, %v1675_v49 }
  0x5e   : > { %779 = vmatmul.mubr.bf16.gmra.mrb[28].mxu0 %v1676_v50  ;;  %1570 = vmatmul.mubr.msk.bf16.gmra.mrb[28].mxu1 %vm637_vm1, %v1677_v51 }
  0x5f   : > { %786 = vmatprep.mubr.bf16.mxu0 %v1678_v52  ;;  %1573 = vmatprep.mubr.msk.bf16.mxu1 %vm637_vm1, %v1680_v53  ;;  %v1882_v52 = vld [vmem:[%s2005_s2] ss:$0 sm:$0xff] }
  0x66   : > { %787 = vmatmul.mubr.bf16.gmra.mrb[32].mxu0 %v1681_v54  ;;  %1574 = vmatmul.mubr.msk.bf16.gmra.mrb[32].mxu1 %vm637_vm1, %v1682_v55 }
  0x67   : > { %794 = vmatprep.mubr.bf16.mxu0 %v1683_v56  ;;  %1577 = vmatprep.mubr.msk.bf16.mxu1 %vm637_vm1, %v1685_v57 }
  0x6e   : > { %795 = vmatmul.mubr.bf16.gmra.mrb[36].mxu0 %v1686_v58  ;;  %1578 = vmatmul.mubr.msk.bf16.gmra.mrb[36].mxu1 %vm637_vm1, %v1687_v59 }
  0x6f   : > { %802 = vmatprep.mubr.bf16.mxu0 %v1688_v60  ;;  %1581 = vmatprep.mubr.msk.bf16.mxu1 %vm637_vm1, %v1690_v61 }
  0x76   : > { %803 = vmatmul.mubr.bf16.gmra.mrb[40].mxu0 %v1691_v62  ;;  %1582 = vmatmul.mubr.msk.bf16.gmra.mrb[40].mxu1 %vm637_vm1, %v1692_v63 }
  0x77   : > { %810 = vmatprep.mubr.bf16.mxu0 %v1693_v0  ;;  %1585 = vmatprep.mubr.msk.bf16.mxu1 %vm637_vm1, %v1695_v1 }
  0x7e   : > { %811 = vmatmul.mubr.bf16.gmra.mrb[44].mxu0 %v1696_v2  ;;  %1586 = vmatmul.mubr.msk.bf16.gmra.mrb[44].mxu1 %vm637_vm1, %v1697_v3 }
  0xf9   : > { %v1436_v4 = vpop.f32.mrb[0].mxu0  ;;  %v1508_v5 = vpop.f32.mrb[0].mxu1 }
  0xfa   : > { %v1437_v6 = vpop.f32.mrb[1].mxu0  ;;  %v1509_v7 = vpop.f32.mrb[1].mxu1 }
  0xfb   : > { %v1438_v8 = vadd.f32 %v1437_v6, %v1436_v4  ;;  %v1439_v9 = vpop.f32.mrb[2].mxu0  ;;  %v1863_v10 = vadd.f32 %v1509_v7, %v1508_v5  ;;  %v1511_v11 = vpop.f32.mrb[2].mxu1 }
  0xfc   : > { %v1440_v12 = vpop.f32.mrb[3].mxu0  ;;  %v1512_v13 = vpop.f32.mrb[3].mxu1 }
  0xfd   : > { %v1441_v14 = vadd.f32 %v1440_v12, %v1439_v9  ;;  %v1865_v15 = vadd.f32 %v1512_v13, %v1511_v11  ;;  %v725_v56 = vadd.f32 %v1438_v8, %v1882_v52 }
  0xff   : > { %v728_v1 = vadd.f32 %v1441_v14, %v1882_v52 }
 0x101   : > { %v1442_v16 = vpop.f32.mrb[4].mxu0  ;;  %v1514_v17 = vpop.f32.mrb[4].mxu1 }
 0x102   : > { %v1443_v18 = vpop.f32.mrb[5].mxu0  ;;  %v1515_v19 = vpop.f32.mrb[5].mxu1 }
 0x103   : > { %v1444_v20 = vadd.f32 %v1443_v18, %v1442_v16  ;;  %v1445_v21 = vpop.f32.mrb[6].mxu0  ;;  %v1867_v22 = vadd.f32 %v1515_v19, %v1514_v17  ;;  %v1517_v23 = vpop.f32.mrb[6].mxu1 }
 0x104   : > { %v1446_v24 = vpop.f32.mrb[7].mxu0  ;;  %v1518_v25 = vpop.f32.mrb[7].mxu1 }
 0x105   : > { %v1447_v26 = vadd.f32 %v1446_v24, %v1445_v21  ;;  %v1869_v27 = vadd.f32 %v1518_v25, %v1517_v23  ;;  %v733_v53 = vadd.f32 %v1444_v20, %v1882_v52 }
 0x107   : > { %v736_v60 = vadd.f32 %v1447_v26, %v1882_v52 }
 0x109   : > { %v1448_v28 = vpop.f32.mrb[8].mxu0  ;;  %v1520_v29 = vpop.f32.mrb[8].mxu1 }
 0x10a   : > { %v1449_v30 = vpop.f32.mrb[9].mxu0  ;;  %v1521_v31 = vpop.f32.mrb[9].mxu1 }
 0x10b   : > { %v1450_v32 = vadd.f32 %v1449_v30, %v1448_v28  ;;  %v1451_v33 = vpop.f32.mrb[10].mxu0  ;;  %v1871_v34 = vadd.f32 %v1521_v31, %v1520_v29  ;;  %v1523_v35 = vpop.f32.mrb[10].mxu1 }
 0x10c   : > { %v1452_v36 = vpop.f32.mrb[11].mxu0  ;;  %v1524_v37 = vpop.f32.mrb[11].mxu1 }
 0x10d   : > { %v1453_v38 = vadd.f32 %v1452_v36, %v1451_v33  ;;  %v1873_v39 = vadd.f32 %v1524_v37, %v1523_v35  ;;  %v741_v20 = vadd.f32 %v1450_v32, %v1882_v52 }
 0x10f   : > { %v744_v31 = vadd.f32 %v1453_v38, %v1882_v52 }
 0x111   : > { %v1454_v40 = vpop.f32.mrb[12].mxu0  ;;  %v1526_v41 = vpop.f32.mrb[12].mxu1 }
 0x112   : > { %v1455_v42 = vpop.f32.mrb[13].mxu0  ;;  %v1527_v43 = vpop.f32.mrb[13].mxu1 }
 0x113   : > { %v1456_v44 = vadd.f32 %v1455_v42, %v1454_v40  ;;  %v1457_v45 = vpop.f32.mrb[14].mxu0  ;;  %v1875_v46 = vadd.f32 %v1527_v43, %v1526_v41  ;;  %v1529_v47 = vpop.f32.mrb[14].mxu1 }
 0x114   : > { %v1458_v48 = vpop.f32.mrb[15].mxu0  ;;  %v1530_v49 = vpop.f32.mrb[15].mxu1 }
 0x115   : > { %v1459_v50 = vadd.f32 %v1458_v48, %v1457_v45  ;;  %v1877_v51 = vadd.f32 %v1530_v49, %v1529_v47  ;;  %v749_v16 = vadd.f32 %v1456_v44, %v1882_v52 }
 0x117   : > { %v752_v25 = vadd.f32 %v1459_v50, %v1882_v52 }
 0x119   : > { %v1460_v54 = vpop.f32.mrb[16].mxu0  ;;  %v1559_v55 = vpop.f32.mrb[16].mxu1 }
 0x11a   : > { %v894_v57 = vadd.f32 %v1559_v55, %v733_v53  ;;  %v1461_v58 = vpop.f32.mrb[17].mxu0  ;;  %v885_v59 = vpop.f32.mrb[17].mxu1 }
 0x11b   : > { %v1462_v61 = vadd.f32 %v1461_v58, %v1460_v54  ;;  %v886_v62 = vadd.f32 %v885_v59, %v725_v56  ;;  %v1463_v63 = vpop.f32.mrb[18].mxu0  ;;  %v1560_v0 = vpop.f32.mrb[18].mxu1 }
 0x11c   : > { %v1014_v2 = vmax.f32 %v894_v57, 0.0  ;;  %v897_v3 = vadd.f32 %v1560_v0, %v736_v60  ;;  %v1464_v4 = vpop.f32.mrb[19].mxu0  ;;  %v888_v5 = vpop.f32.mrb[19].mxu1 }
 0x11d   : > { %v1012_v6 = vmax.f32 %v886_v62, 0.0  ;;  %v1465_v7 = vadd.f32 %v1464_v4, %v1463_v63  ;;  %v889_v8 = vadd.f32 %v888_v5, %v728_v1  ;;  %v757_v53 = vadd.f32 %v1462_v61, %v1882_v52 }
 0x11e   : > { %v1390_v9 = vpack.c.bf16 %v1014_v2, %v1014_v2  ;;  %v1015_v11 = vmax.f32 %v897_v3, 0.0 }
 0x11f   : > { %v1388_v12 = vpack.c.bf16 %v1012_v6, %v1012_v6  ;;  %v1013_v13 = vmax.f32 %v889_v8, 0.0  ;;  %v760_v63 = vadd.f32 %v1465_v7, %v1882_v52 }
 0x120   : > { %1175 = vst.msk [vmem:[%s1892_s10 + $0x8] sm:$0xf] %vm1172_vm2, %v1390_v9  ;;  %v1391_v14 = vpack.c.bf16 %v1015_v11, %v1015_v11 }
 0x121   : > { %1173 = vst.msk [vmem:[%s1892_s10] sm:$0xf] %vm1172_vm2, %v1388_v12  ;;  %v1389_v17 = vpack.c.bf16 %v1013_v13, %v1013_v13  ;;  %v1466_v18 = vpop.f32.mrb[20].mxu0  ;;  %v1563_v19 = vpop.f32.mrb[20].mxu1 }
 0x122   : > { %1176 = vst.msk [vmem:[%s1892_s10 + $0xc] sm:$0xf] %vm1172_vm2, %v1391_v14  ;;  %v910_v21 = vadd.f32 %v1563_v19, %v749_v16  ;;  %v1467_v23 = vpop.f32.mrb[21].mxu0  ;;  %v901_v24 = vpop.f32.mrb[21].mxu1 }
 0x123   : > { %1174 = vst.msk [vmem:[%s1892_s10 + $0x4] sm:$0xf] %vm1172_vm2, %v1389_v17  ;;  %v1468_v26 = vadd.f32 %v1467_v23, %v1466_v18  ;;  %v902_v28 = vadd.f32 %v901_v24, %v741_v20  ;;  %v1469_v29 = vpop.f32.mrb[22].mxu0  ;;  %v1564_v30 = vpop.f32.mrb[22].mxu1 }
 0x124   : > { %v1018_v33 = vmax.f32 %v910_v21, 0.0  ;;  %v913_v35 = vadd.f32 %v1564_v30, %v752_v25  ;;  %v1470_v32 = vpop.f32.mrb[23].mxu0  ;;  %v904_v36 = vpop.f32.mrb[23].mxu1 }
 0x125   : > { %v1016_v37 = vmax.f32 %v902_v28, 0.0  ;;  %v1471_v40 = vadd.f32 %v1470_v32, %v1469_v29  ;;  %v905_v41 = vadd.f32 %v904_v36, %v744_v31  ;;  %v765_v48 = vadd.f32 %v1468_v26, %v1882_v52 }
 0x126   : > { %v1394_v42 = vpack.c.bf16 %v1018_v33, %v1018_v33  ;;  %v1019_v43 = vmax.f32 %v913_v35, 0.0 }
 0x127   : > { %v1392_v44 = vpack.c.bf16 %v1016_v37, %v1016_v37  ;;  %v1017_v45 = vmax.f32 %v905_v41, 0.0  ;;  %v768_v57 = vadd.f32 %v1471_v40, %v1882_v52 }
 0x128   : > { %1179 = vst.msk [vmem:[%s1892_s10 + $0x18] sm:$0xf] %vm1172_vm2, %v1394_v42  ;;  %v1395_v47 = vpack.c.bf16 %v1019_v43, %v1019_v43 }
 0x129   : > { %1177 = vst.msk [vmem:[%s1892_s10 + $0x10] sm:$0xf] %vm1172_vm2, %v1392_v44  ;;  %v1393_v38 = vpack.c.bf16 %v1017_v45, %v1017_v45  ;;  %v1472_v49 = vpop.f32.mrb[24].mxu0  ;;  %v1567_v50 = vpop.f32.mrb[24].mxu1 }
 0x12a   : > { %1180 = vst.msk [vmem:[%s1892_s10 + $0x1c] sm:$0xf] %vm1172_vm2, %v1395_v47  ;;  %v926_v54 = vadd.f32 %v1567_v50, %v765_v48  ;;  %v1473_v55 = vpop.f32.mrb[25].mxu0  ;;  %v917_v56 = vpop.f32.mrb[25].mxu1 }
 0x12b   : > { %1178 = vst.msk [vmem:[%s1892_s10 + $0x14] sm:$0xf] %vm1172_vm2, %v1393_v38  ;;  %v1474_v58 = vadd.f32 %v1473_v55, %v1472_v49  ;;  %v918_v59 = vadd.f32 %v917_v56, %v757_v53  ;;  %v1475_v60 = vpop.f32.mrb[26].mxu0  ;;  %v1568_v62 = vpop.f32.mrb[26].mxu1 }
 0x12c   : > { %v1022_v0 = vmax.f32 %v926_v54, 0.0  ;;  %v929_v1 = vadd.f32 %v1568_v62, %v768_v57  ;;  %v1476_v61 = vpop.f32.mrb[27].mxu0  ;;  %v920_v2 = vpop.f32.mrb[27].mxu1 }
 0x12d   : > { %v1020_v3 = vmax.f32 %v918_v59, 0.0  ;;  %v1477_v4 = vadd.f32 %v1476_v61, %v1475_v60  ;;  %v921_v5 = vadd.f32 %v920_v2, %v760_v63  ;;  %v773_v16 = vadd.f32 %v1474_v58, %v1882_v52 }
 0x12e   : > { %v1398_v6 = vpack.c.bf16 %v1022_v0, %v1022_v0  ;;  %v1023_v8 = vmax.f32 %v929_v1, 0.0 }
 0x12f   : > { %v1396_v9 = vpack.c.bf16 %v1020_v3, %v1020_v3  ;;  %v1021_v11 = vmax.f32 %v921_v5, 0.0  ;;  %v776_v24 = vadd.f32 %v1477_v4, %v1882_v52 }
 0x130   : > { %1183 = vst.msk [vmem:[%s1892_s10 + $0x28] sm:$0xf] %vm1172_vm2, %v1398_v6  ;;  %v1399_v12 = vpack.c.bf16 %v1023_v8, %v1023_v8 }
 0x131   : > { %1181 = vst.msk [vmem:[%s1892_s10 + $0x20] sm:$0xf] %vm1172_vm2, %v1396_v9  ;;  %v1397_v13 = vpack.c.bf16 %v1021_v11, %v1021_v11  ;;  %v1478_v7 = vpop.f32.mrb[28].mxu0  ;;  %v1571_v14 = vpop.f32.mrb[28].mxu1 }
 0x132   : > { %1184 = vst.msk [vmem:[%s1892_s10 + $0x2c] sm:$0xf] %vm1172_vm2, %v1399_v12  ;;  %v1479_v17 = vpop.f32.mrb[29].mxu0  ;;  %v933_v18 = vpop.f32.mrb[29].mxu1 }
 0x133   : > { %1182 = vst.msk [vmem:[%s1892_s10 + $0x24] sm:$0xf] %vm1172_vm2, %v1397_v13  ;;  %v1480_v19 = vadd.f32 %v1479_v17, %v1478_v7  ;;  %v934_v20 = vadd.f32 %v933_v18, %v773_v16  ;;  %v1481_v21 = vpop.f32.mrb[30].mxu0  ;;  %v1572_v23 = vpop.f32.mrb[30].mxu1  ;;  %v829_v16 = vadd.f32 %v1867_v22, %v1882_v52 }
 0x134   : > { %v1482_v25 = vpop.f32.mrb[31].mxu0  ;;  %v936_v26 = vpop.f32.mrb[31].mxu1 }
 0x135   : > { %v781_v28 = vadd.f32 %v1480_v19, %v1882_v52  ;;  %v1024_v29 = vmax.f32 %v934_v20, 0.0  ;;  %v1483_v30 = vadd.f32 %v1482_v25, %v1481_v21  ;;  %v937_v31 = vadd.f32 %v936_v26, %v776_v24 }
 0x136   : > { %v821_v21 = vadd.f32 %v1863_v10, %v1882_v52  ;;  %v832_v26 = vadd.f32 %v1869_v27, %v1882_v52  ;;  %v824_v10 = vadd.f32 %v1865_v15, %v1882_v52 }
 0x137   : > { %v942_v33 = vadd.f32 %v1571_v14, %v781_v28  ;;  %v1400_v35 = vpack.c.bf16 %v1024_v29, %v1024_v29  ;;  %v784_v32 = vadd.f32 %v1483_v30, %v1882_v52  ;;  %v1025_v36 = vmax.f32 %v937_v31, 0.0 }
 0x139   : > { %v1026_v37 = vmax.f32 %v942_v33, 0.0  ;;  %1185 = vst.msk [vmem:[%s1892_s10 + $0x30] sm:$0xf] %vm1172_vm2, %v1400_v35  ;;  %v945_v40 = vadd.f32 %v1572_v23, %v784_v32  ;;  %v1401_v41 = vpack.c.bf16 %v1025_v36, %v1025_v36  ;;  %v1484_v42 = vpop.f32.mrb[32].mxu0  ;;  %v1575_v43 = vpop.f32.mrb[32].mxu1 }
 0x13a   : > { %v1485_v44 = vpop.f32.mrb[33].mxu0  ;;  %v949_v45 = vpop.f32.mrb[33].mxu1 }
 0x13b   : > { %v1402_v47 = vpack.c.bf16 %v1026_v37, %v1026_v37  ;;  %v1027_v48 = vmax.f32 %v945_v40, 0.0  ;;  %1186 = vst.msk [vmem:[%s1892_s10 + $0x34] sm:$0xf] %vm1172_vm2, %v1401_v41  ;;  %v1486_v38 = vadd.f32 %v1485_v44, %v1484_v42  ;;  %v1487_v49 = vpop.f32.mrb[34].mxu0  ;;  %v1576_v50 = vpop.f32.mrb[34].mxu1 }
 0x13c   : > { %v1488_v53 = vpop.f32.mrb[35].mxu0  ;;  %v952_v54 = vpop.f32.mrb[35].mxu1 }
 0x13d   : > { %1187 = vst.msk [vmem:[%s1892_s10 + $0x38] sm:$0xf] %vm1172_vm2, %v1402_v47  ;;  %v1403_v55 = vpack.c.bf16 %v1027_v48, %v1027_v48  ;;  %v789_v56 = vadd.f32 %v1486_v38, %v1882_v52  ;;  %v1489_v57 = vadd.f32 %v1488_v53, %v1487_v49 }
 0x13f   : > { %1188 = vst.msk [vmem:[%s1892_s10 + $0x3c] sm:$0xf] %vm1172_vm2, %v1403_v55  ;;  %v950_v58 = vadd.f32 %v949_v45, %v789_v56  ;;  %v792_v59 = vadd.f32 %v1489_v57, %v1882_v52  ;;  %v837_v57 = vadd.f32 %v1871_v34, %v1882_v52 }
 0x141   : > { %v1028_v60 = vmax.f32 %v950_v58, 0.0  ;;  %v953_v62 = vadd.f32 %v952_v54, %v792_v59  ;;  %v1490_v63 = vpop.f32.mrb[36].mxu0  ;;  %v1940_v0 = vpop.f32.mrb[36].mxu1 }
 0x142   : > { %v1491_v1 = vpop.f32.mrb[37].mxu0  ;;  %v965_v61 = vpop.f32.mrb[37].mxu1 }
 0x143   : > { %v1404_v2 = vpack.c.bf16 %v1028_v60, %v1028_v60  ;;  %v1029_v3 = vmax.f32 %v953_v62, 0.0  ;;  %v1492_v4 = vadd.f32 %v1491_v1, %v1490_v63  ;;  %v1493_v5 = vpop.f32.mrb[38].mxu0  ;;  %v1942_v6 = vpop.f32.mrb[38].mxu1 }
 0x144   : > { %v1494_v8 = vpop.f32.mrb[39].mxu0  ;;  %v968_v9 = vpop.f32.mrb[39].mxu1 }
 0x145   : > { %1189 = vst.msk [vmem:[%s1892_s10 + $0x40] sm:$0xf] %vm1172_vm2, %v1404_v2  ;;  %v1405_v11 = vpack.c.bf16 %v1029_v3, %v1029_v3  ;;  %v797_v12 = vadd.f32 %v1492_v4, %v1882_v52  ;;  %v1495_v13 = vadd.f32 %v1494_v8, %v1493_v5 }
 0x147   : > { %1190 = vst.msk [vmem:[%s1892_s10 + $0x44] sm:$0xf] %vm1172_vm2, %v1405_v11  ;;  %v958_v7 = vadd.f32 %v1575_v43, %v797_v12  ;;  %v800_v14 = vadd.f32 %v1495_v13, %v1882_v52 }
 0x149   : > { %v1030_v17 = vmax.f32 %v958_v7, 0.0  ;;  %v961_v18 = vadd.f32 %v1576_v50, %v800_v14  ;;  %v1496_v19 = vpop.f32.mrb[40].mxu0  ;;  %v1583_v20 = vpop.f32.mrb[40].mxu1  ;;  %v845_v50 = vadd.f32 %v1875_v46, %v1882_v52  ;;  %v848_v46 = vadd.f32 %v1877_v51, %v1882_v52 }
 0x14a   : > { %v990_v23 = vadd.f32 %v1583_v20, %v829_v16  ;;  %v1497_v24 = vpop.f32.mrb[41].mxu0  ;;  %v981_v25 = vpop.f32.mrb[41].mxu1 }
 0x14b   : > { %v1406_v28 = vpack.c.bf16 %v1030_v17, %v1030_v17  ;;  %v1031_v29 = vmax.f32 %v961_v18, 0.0  ;;  %v1498_v30 = vadd.f32 %v1497_v24, %v1496_v19  ;;  %v982_v31 = vadd.f32 %v981_v25, %v821_v21  ;;  %v1499_v22 = vpop.f32.mrb[42].mxu0  ;;  %v1584_v33 = vpop.f32.mrb[42].mxu1 }
 0x14c   : > { %v1038_v35 = vmax.f32 %v990_v23, 0.0  ;;  %v993_v32 = vadd.f32 %v1584_v33, %v832_v26  ;;  %v1500_v36 = vpop.f32.mrb[43].mxu0  ;;  %v984_v37 = vpop.f32.mrb[43].mxu1 }
 0x14d   : > { %1191 = vst.msk [vmem:[%s1892_s10 + $0x48] sm:$0xf] %vm1172_vm2, %v1406_v28  ;;  %v1407_v40 = vpack.c.bf16 %v1031_v29, %v1031_v29  ;;  %v805_v27 = vadd.f32 %v1498_v30, %v1882_v52  ;;  %v1036_v41 = vmax.f32 %v982_v31, 0.0  ;;  %v1501_v42 = vadd.f32 %v1500_v36, %v1499_v22 }
 0x14e   : > { %v1414_v43 = vpack.c.bf16 %v1038_v35, %v1038_v35  ;;  %v1039_v44 = vmax.f32 %v993_v32, 0.0  ;;  %v985_v45 = vadd.f32 %v984_v37, %v824_v10 }
 0x14f   : > { %1192 = vst.msk [vmem:[%s1892_s10 + $0x4c] sm:$0xf] %vm1172_vm2, %v1407_v40  ;;  %v966_v47 = vadd.f32 %v965_v61, %v805_v27  ;;  %v1412_v48 = vpack.c.bf16 %v1036_v41, %v1036_v41  ;;  %v808_v38 = vadd.f32 %v1501_v42, %v1882_v52 }
 0x150   : > { %1199 = vst.msk [vmem:[%s1892_s10 + $0x68] sm:$0xf] %vm1172_vm2, %v1414_v43  ;;  %v1415_v15 = vpack.c.bf16 %v1039_v44, %v1039_v44  ;;  %v1037_v49 = vmax.f32 %v985_v45, 0.0 }
 0x151   : > { %v1032_v53 = vmax.f32 %v966_v47, 0.0  ;;  %1197 = vst.msk [vmem:[%s1892_s10 + $0x60] sm:$0xf] %vm1172_vm2, %v1412_v48  ;;  %v969_v54 = vadd.f32 %v968_v9, %v808_v38  ;;  %v1502_v55 = vpop.f32.mrb[44].mxu0  ;;  %v1587_v56 = vpop.f32.mrb[44].mxu1  ;;  %v840_v9 = vadd.f32 %v1873_v39, %v1882_v52 }
 0x152   : > { %1200 = vst.msk [vmem:[%s1892_s10 + $0x6c] sm:$0xf] %vm1172_vm2, %v1415_v15  ;;  %v1413_v58 = vpack.c.bf16 %v1037_v49, %v1037_v49  ;;  %v1006_v59 = vadd.f32 %v1587_v56, %v845_v50  ;;  %v1503_v60 = vpop.f32.mrb[45].mxu0  ;;  %v997_v62 = vpop.f32.mrb[45].mxu1 }
 0x153   : > { %v1408_v63 = vpack.c.bf16 %v1032_v53, %v1032_v53  ;;  %v1033_v1 = vmax.f32 %v969_v54, 0.0  ;;  %v1504_v61 = vadd.f32 %v1503_v60, %v1502_v55  ;;  %v998_v2 = vadd.f32 %v997_v62, %v837_v57  ;;  %v1505_v3 = vpop.f32.mrb[46].mxu0  ;;  %v1588_v4 = vpop.f32.mrb[46].mxu1 }
 0x154   : > { %1198 = vst.msk [vmem:[%s1892_s10 + $0x64] sm:$0xf] %vm1172_vm2, %v1413_v58  ;;  %v1042_v34 = vmax.f32 %v1006_v59, 0.0  ;;  %v1009_v5 = vadd.f32 %v1588_v4, %v848_v46  ;;  %v1506_v8 = vpop.f32.mrb[47].mxu0  ;;  %v1000_v11 = vpop.f32.mrb[47].mxu1 }
 0x155   : > { %1193 = vst.msk [vmem:[%s1892_s10 + $0x50] sm:$0xf] %vm1172_vm2, %v1408_v63  ;;  %v1409_v51 = vpack.c.bf16 %v1033_v1, %v1033_v1  ;;  %v813_v12 = vadd.f32 %v1504_v61, %v1882_v52  ;;  %v1040_v13 = vmax.f32 %v998_v2, 0.0  ;;  %v1507_v7 = vadd.f32 %v1506_v8, %v1505_v3 }
 0x156   : > { %v1418_v14 = vpack.c.bf16 %v1042_v34, %v1042_v34  ;;  %v1043_v16 = vmax.f32 %v1009_v5, 0.0  ;;  %v1001_v17 = vadd.f32 %v1000_v11, %v840_v9 }
 0x157   : > { %1194 = vst.msk [vmem:[%s1892_s10 + $0x54] sm:$0xf] %vm1172_vm2, %v1409_v51  ;;  %v974_v18 = vadd.f32 %v1940_v0, %v813_v12  ;;  %v1416_v39 = vpack.c.bf16 %v1040_v13, %v1040_v13  ;;  %v816_v19 = vadd.f32 %v1507_v7, %v1882_v52 }
 0x158   : > { %1203 = vst.msk [vmem:[%s1892_s10 + $0x78] sm:$0xf] %vm1172_vm2, %v1418_v14  ;;  %v1419_v20 = vpack.c.bf16 %v1043_v16, %v1043_v16  ;;  %v1041_v21 = vmax.f32 %v1001_v17, 0.0 }
 0x159   : > { %v1034_v23 = vmax.f32 %v974_v18, 0.0  ;;  %1201 = vst.msk [vmem:[%s1892_s10 + $0x70] sm:$0xf] %vm1172_vm2, %v1416_v39  ;;  %v977_v24 = vadd.f32 %v1942_v6, %v816_v19 }
 0x15a   : > { %1204 = vst.msk [vmem:[%s1892_s10 + $0x7c] sm:$0xf] %vm1172_vm2, %v1419_v20  ;;  %v1417_v25 = vpack.c.bf16 %v1041_v21, %v1041_v21 }
 0x15b   : > { %v1410_v26 = vpack.c.bf16 %v1034_v23, %v1034_v23  ;;  %v1035_v28 = vmax.f32 %v977_v24, 0.0 }
 0x15c   : > { %1202 = vst.msk [vmem:[%s1892_s10 + $0x74] sm:$0xf] %vm1172_vm2, %v1417_v25 }
 0x15d   : > { %1195 = vst.msk [vmem:[%s1892_s10 + $0x58] sm:$0xf] %vm1172_vm2, %v1410_v26  ;;  %v1411_v0 = vpack.c.bf16 %v1035_v28, %v1035_v28 }
 0x15f   : > { %1196 = vst.msk [vmem:[%s1892_s10 + $0x5c] sm:$0xf] %vm1172_vm2, %v1411_v0 }
 0x160 PF: > { %s13_s12 = sadd.s32 1, %s1704_s12  }
 0x161   : > { %p10_p4 = scmp.ge.s32.totalorder %s13_s12, 4  }
 0x163   :  { %12 = sbr.rel (!%p10_p4) target bundleno = 1 (0x1), region = 62 }

// kernel: flowgen_forward.10
= control target key start
LH: loop header
LB: loop body
LE: loop exit
PB: predicated region body
PF: predicated region fallthrough
CT: control target
= control target key end

     0   :  { %s927_s12 = smov 0   ;;  %s1085_s0 = inlined_call_operand.vmem [shape: bf16[128,400], index: 0, kind: input, shape index: {}]   ;;  %s1086_s1 = inlined_call_operand.vmem [shape: bf16[400,32], index: 1, kind: input, shape index: {}]   ;;  %s1087_s2 = inlined_call_operand.vmem [shape: f32[1,32], index: 2, kind: input, shape index: {}]   ;;  %s1088_s3 = inlined_call_operand.vmem [shape: bf16[128,32], index: 3, kind: output, shape index: {}]  }
   0x1 LB: > { %s725_s13 = sadd.s32 4294967295, %s904_s12   ;;  %p729_p0 = scmp.ge.s32.totalorder %s904_s12, 1  ;;  %s904_s12 = sphi %s927_s12, %s13_s12  }
   0x2   : > { %p139_p1 = scmp.lt.s32.totalorder %s904_s12, 3 }
   0x4   : > { %p140_p2 = pnand %p729_p0, %p139_p1 }
   0x5   : > { %v849_v0 = vld [vmem:[%s1086_s1 + $0x40] sm:$0xff] (!%p140_p2)   ;;  %v906_v1 = vmov (!%p140_p2), 0   ;;  %v852_v4 = vld [vmem:[%s1086_s1 + $0x48] sm:$0xff] (!%p140_p2)   ;;  %v855_v7 = vld [vmem:[%s1086_s1 + $0x50] sm:$0xff] (!%p140_p2)   ;;  %s730_s5 = sshll.u32 (!%p140_p2), %s725_s13, 3  ;;  %vm477_vm0 = vcmask (!%p140_p2), 130048  }
   0x6   : > { %143 = sbr.rel (%p140_p2) target bundleno = 289 (0x121), region = 32  ;;  %555 = vmatprep.subr.bf16.mxu1 (!%p140_p2), %v906_v1  ;;  %v850_v2 = vld [vmem:[%s1086_s1 + $0x80] sm:$0xff] (!%p140_p2)   ;;  %800 = vmatprep.subr.bf16.mxu0 (!%p140_p2), %v849_v0  ;;  %v853_v5 = vld [vmem:[%s1086_s1 + $0x88] sm:$0xff] (!%p140_p2)   ;;  %v856_v8 = vld [vmem:[%s1086_s1 + $0x90] sm:$0xff] (!%p140_p2)   ;;  %p165_p3 = scmp.lt.s32.totalorder (!%p140_p2), %s730_s5, 15  ;;  %vm660_vm1 = vcmask (!%p140_p2), 257024  }
   0x7   : > { %v851_v3 = vld [vmem:[%s1086_s1] sm:$0xff] (!%p140_p2)   ;;  %556 = vmatpush1.bf16.msra.mxu1 (!%p140_p2), %v850_v2  ;;  %v854_v6 = vld [vmem:[%s1086_s1 + $0x8] sm:$0xff] (!%p140_p2)   ;;  %v857_v9 = vld [vmem:[%s1086_s1 + $0x10] sm:$0xff] (!%p140_p2)  }
   0x8   : > { %801 = vmatpush3.bf16.msra.mxu0 (!%p140_p2), %v851_v3  ;;  %557 = vmatprep.subr.bf16.mxu1 (!%p140_p2), %v906_v1  ;;  %v858_v10 = vld [vmem:[%s1086_s1 + $0x58] sm:$0xff] (!%p140_p2)   ;;  %v861_v13 = vld [vmem:[%s1086_s1 + $0x60] sm:$0xff] (!%p140_p2)   ;;  %v864_v16 = vld [vmem:[%s1086_s1 + $0x68] sm:$0xff] (!%p140_p2)  }
   0x9   : > { %802 = vmatprep.subr.bf16.mxu0 (!%p140_p2), %v852_v4  ;;  %v859_v11 = vld [vmem:[%s1086_s1 + $0x98] sm:$0xff] (!%p140_p2)   ;;  %v862_v14 = vld [vmem:[%s1086_s1 + $0xa0] sm:$0xff] (!%p140_p2)   ;;  %v865_v17 = vld [vmem:[%s1086_s1 + $0xa8] sm:$0xff] (!%p140_p2)  }
   0xa   : > { %v860_v12 = vld [vmem:[%s1086_s1 + $0x18] sm:$0xff] (!%p140_p2)   ;;  %v863_v15 = vld [vmem:[%s1086_s1 + $0x20] sm:$0xff] (!%p140_p2)   ;;  %v866_v18 = vld [vmem:[%s1086_s1 + $0x28] sm:$0xff] (!%p140_p2)  }
   0xb   : > { %558 = vmatpush1.bf16.msra.mxu1 (!%p140_p2), %v853_v5  ;;  %v867_v19 = vld [vmem:[%s1086_s1 + $0x70] sm:$0xff] (!%p140_p2)   ;;  %v870_v22 = vld [vmem:[%s1086_s1 + $0x78] sm:$0xff] (!%p140_p2)   ;;  %v876_v28 = vld [vmem:[%s1086_s1 + $0xc0] sm:$0xff] (!%p140_p2)  }
   0xc   : > { %803 = vmatpush3.bf16.msra.mxu0 (!%p140_p2), %v854_v6  ;;  %559 = vmatprep.subr.bf16.mxu1 (!%p140_p2), %v906_v1  ;;  %v868_v20 = vld [vmem:[%s1086_s1 + $0xb0] sm:$0xff] (!%p140_p2)   ;;  %v871_v24 = vld [vmem:[%s1086_s1 + $0xb8] sm:$0xff] (!%p140_p2)   ;;  %v1050_v44 = vld [vmem:[%s1087_s2] ss:$0 sm:$0xff] (!%p140_p2) }
   0xd   : > { %804 = vmatprep.subr.bf16.mxu0 %v855_v7  ;;  %s1090_s5 = smov (!%p165_p3, %s730_s5), 15  ;;  %v869_v21 = vld [vmem:[%s1086_s1 + $0x30] sm:$0xff]   ;;  %v872_v26 = vld [vmem:[%s1086_s1 + $0x38] sm:$0xff]  }
   0xe   : > { %s791_s23 = sshll.u32 %s1090_s5, 4  ;;  %s734_s20 = sshll.u32 %s1090_s5, 2 }
   0xf   : > { %560 = vmatpush1.bf16.msra.mxu1 %v856_v8  ;;  %s1007_s6 = scalar_lea.vmem %s1085_s0, %s791_s23  ;;  %s1058_s23 = scalar_lea.vmem %s1088_s3, %s734_s20 }
  0x10   : > { %805 = vmatpush3.bf16.msra.mxu0 %v857_v9  ;;  %561 = vmatprep.subr.bf16.mxu1 %v906_v1  ;;  %v875_v23 = vld [vmem:[%s1007_s6 + $0x4] ss:$16 sps:$4 sm:$0xff]   ;;  %v879_v25 = vld [vmem:[%s1007_s6 + $0xc] ss:$16 sps:$4 sm:$0xff]   ;;  %v873_v27 = vld [vmem:[%s1007_s6] ss:$16 sps:$4 sm:$0xff]  }
  0x11   : > { %806 = vmatprep.subr.bf16.mxu0 %v858_v10  ;;  %522 = vmatprep.mubr.bf16.mxu0 %v875_v23  ;;  %v880_v29 = vld [vmem:[%s1007_s6 + $0x24] ss:$16 sps:$4 sm:$0xff]   ;;  %v877_v30 = vld [vmem:[%s1007_s6 + $0x8] ss:$16 sps:$4 sm:$0xff]   ;;  %v883_v31 = vld [vmem:[%s1007_s6 + $0x2c] ss:$16 sps:$4 sm:$0xff]  }
  0x12   : > { %777 = vmatprep.mubr.msk.bf16.mxu1 %vm477_vm0, %v879_v25  ;;  %v882_v32 = vld [vmem:[%s1007_s6 + $0x20] ss:$16 sps:$4 sm:$0xff]   ;;  %v886_v33 = vld [vmem:[%s1007_s6 + $0x44] ss:$16 sps:$4 sm:$0xff]   ;;  %v885_v34 = vld [vmem:[%s1007_s6 + $0x28] ss:$16 sps:$4 sm:$0xff]  }
  0x13   : > { %562 = vmatpush1.bf16.msra.mxu1 %v859_v11  ;;  %v889_v35 = vld [vmem:[%s1007_s6 + $0x4c] ss:$16 sps:$4 sm:$0xff]   ;;  %v888_v36 = vld [vmem:[%s1007_s6 + $0x40] ss:$16 sps:$4 sm:$0xff]   ;;  %v892_v37 = vld [vmem:[%s1007_s6 + $0x64] ss:$16 sps:$4 sm:$0xff]  }
  0x14   : > { %807 = vmatpush3.bf16.msra.mxu0 %v860_v12  ;;  %563 = vmatprep.subr.bf16.mxu1 %v906_v1  ;;  %v891_v38 = vld [vmem:[%s1007_s6 + $0x48] ss:$16 sps:$4 sm:$0xff]   ;;  %v895_v39 = vld [vmem:[%s1007_s6 + $0x6c] ss:$16 sps:$4 sm:$0xff]   ;;  %v894_v40 = vld [vmem:[%s1007_s6 + $0x60] ss:$16 sps:$4 sm:$0xff]  }
  0x15   : > { %808 = vmatprep.subr.bf16.mxu0 %v861_v13  ;;  %v897_v41 = vld [vmem:[%s1007_s6 + $0x68] ss:$16 sps:$4 sm:$0xff]  }
  0x17   : > { %564 = vmatpush1.bf16.msra.mxu1 %v862_v14 }
  0x18   : > { %809 = vmatpush3.bf16.msra.mxu0 %v863_v15  ;;  %565 = vmatprep.subr.bf16.mxu1 %v906_v1 }
  0x19   : > { %810 = vmatprep.subr.bf16.mxu0 %v864_v16 }
  0x1b   : > { %566 = vmatpush1.bf16.msra.mxu1 %v865_v17 }
  0x1c   : > { %811 = vmatpush3.bf16.msra.mxu0 %v866_v18  ;;  %567 = vmatprep.subr.bf16.mxu1 %v906_v1 }
  0x1d   : > { %812 = vmatprep.subr.bf16.mxu0 %v867_v19 }
  0x1f   : > { %568 = vmatpush1.bf16.msra.mxu1 %v868_v20 }
  0x20   : > { %813 = vmatpush3.bf16.msra.mxu0 %v869_v21  ;;  %569 = vmatprep.subr.bf16.mxu1 %v906_v1 }
  0x21   : > { %814 = vmatprep.subr.bf16.mxu0 %v870_v22 }
  0x23   : > { %570 = vmatpush1.bf16.msra.mxu1 %v871_v24 }
  0x24   : > { %815 = vmatpush3.bf16.msra.mxu0 %v872_v26  ;;  %571 = vmatprep.subr.bf16.mxu1 %v906_v1 }
  0x27   : > { %523 = vmatmul.mubr.bf16.vlgmr.msra.gmra.mrb[0].mxu0 %v873_v27  ;;  %572 = vmatpush1.bf16.msra.mxu1 %v876_v28 }
  0x28   : > { %530 = vmatprep.mubr.bf16.mxu0 %v880_v29 }
  0x2a   : > { %588 = vmatmul.mubr.bf16.vlgmr.msra.gmra.mrb[0].mxu1 %v877_v30 }
  0x2b   : > { %778 = vmatprep.mubr.msk.bf16.mxu1 %vm477_vm0, %v883_v31 }
  0x2f   : > { %531 = vmatmul.mubr.bf16.gmra.mrb[4].mxu0 %v882_v32 }
  0x30   : > { %538 = vmatprep.mubr.bf16.mxu0 %v886_v33 }
  0x32   : > { %596 = vmatmul.mubr.bf16.gmra.mrb[4].mxu1 %v885_v34 }
  0x33   : > { %779 = vmatprep.mubr.msk.bf16.mxu1 %vm477_vm0, %v889_v35 }
  0x37   : > { %539 = vmatmul.mubr.bf16.gmra.mrb[8].mxu0 %v888_v36 }
  0x38   : > { %546 = vmatprep.mubr.bf16.mxu0 %v892_v37 }
  0x3a   : > { %604 = vmatmul.mubr.bf16.gmra.mrb[8].mxu1 %v891_v38 }
  0x3b   : > { %780 = vmatprep.mubr.msk.bf16.mxu1 %vm477_vm0, %v895_v39 }
  0x3f   : > { %547 = vmatmul.mubr.bf16.gmra.mrb[12].mxu0 %v894_v40 }
  0x42   : > { %612 = vmatmul.mubr.bf16.gmra.mrb[12].mxu1 %v897_v41 }
  0xfa   : > { %v816_v42 = vpop.f32.mrb[0].mxu0 }
  0xfb   : > { %v817_v43 = vpop.f32.mrb[1].mxu0 }
  0xfc   : > { %v818_v45 = vadd.f32 %v817_v43, %v816_v42  ;;  %v819_v46 = vpop.f32.mrb[2].mxu0 }
  0xfd   : > { %v820_v47 = vpop.f32.mrb[3].mxu0  ;;  %v589_v48 = vpop.f32.mrb[0].mxu1 }
  0xfe   : > { %v821_v49 = vadd.f32 %v820_v47, %v819_v46  ;;  %v525_v50 = vadd.f32 %v818_v45, %v1050_v44  ;;  %v591_v51 = vpop.f32.mrb[1].mxu1 }
  0xff   : > { %v592_v52 = vpop.f32.mrb[2].mxu1 }
 0x100   : > { %v590_v53 = vadd.f32 %v589_v48, %v525_v50  ;;  %v528_v54 = vadd.f32 %v821_v49, %v1050_v44  ;;  %v594_v55 = vpop.f32.mrb[3].mxu1 }
 0x102   : > { %v620_v56 = vmax.f32 %v590_v53, 0.0  ;;  %v593_v57 = vadd.f32 %v592_v52, %v528_v54  ;;  %v822_v58 = vpop.f32.mrb[4].mxu0 }
 0x103   : > { %v823_v59 = vpop.f32.mrb[5].mxu0 }
 0x104   : > { %v792_v60 = vpack.c.bf16 %v620_v56, %v620_v56  ;;  %v621_v61 = vmax.f32 %v593_v57, 0.0  ;;  %v824_v62 = vadd.f32 %v823_v59, %v822_v58  ;;  %v825_v63 = vpop.f32.mrb[6].mxu0 }
 0x105   : > { %v826_v0 = vpop.f32.mrb[7].mxu0  ;;  %v597_v1 = vpop.f32.mrb[4].mxu1 }
 0x106   : > { %661 = vst.msk [vmem:[%s1058_s23] sm:$0xf] %vm660_vm1, %v792_v60  ;;  %v793_v2 = vpack.c.bf16 %v621_v61, %v621_v61  ;;  %v827_v3 = vadd.f32 %v826_v0, %v825_v63  ;;  %v533_v4 = vadd.f32 %v824_v62, %v1050_v44  ;;  %v599_v5 = vpop.f32.mrb[5].mxu1 }
 0x107   : > { %v600_v6 = vpop.f32.mrb[6].mxu1 }
 0x108   : > { %662 = vst.msk [vmem:[%s1058_s23 + $0x4] sm:$0xf] %vm660_vm1, %v793_v2  ;;  %v598_v7 = vadd.f32 %v597_v1, %v533_v4  ;;  %v536_v8 = vadd.f32 %v827_v3, %v1050_v44  ;;  %v602_v9 = vpop.f32.mrb[7].mxu1 }
 0x10a   : > { %v622_v10 = vmax.f32 %v598_v7, 0.0  ;;  %v601_v11 = vadd.f32 %v600_v6, %v536_v8  ;;  %v828_v12 = vpop.f32.mrb[8].mxu0 }
 0x10b   : > { %v829_v13 = vpop.f32.mrb[9].mxu0 }
 0x10c   : > { %v794_v14 = vpack.c.bf16 %v622_v10, %v622_v10  ;;  %v623_v15 = vmax.f32 %v601_v11, 0.0  ;;  %v830_v16 = vadd.f32 %v829_v13, %v828_v12  ;;  %v831_v17 = vpop.f32.mrb[10].mxu0 }
 0x10d   : > { %v832_v18 = vpop.f32.mrb[11].mxu0  ;;  %v605_v19 = vpop.f32.mrb[8].mxu1 }
 0x10e   : > { %663 = vst.msk [vmem:[%s1058_s23 + $0x8] sm:$0xf] %vm660_vm1, %v794_v14  ;;  %v795_v20 = vpack.c.bf16 %v623_v15, %v623_v15  ;;  %v833_v21 = vadd.f32 %v832_v18, %v831_v17  ;;  %v541_v22 = vadd.f32 %v830_v16, %v1050_v44  ;;  %v607_v23 = vpop.f32.mrb[9].mxu1 }
 0x10f   : > { %v608_v24 = vpop.f32.mrb[10].mxu1 }
 0x110   : > { %664 = vst.msk [vmem:[%s1058_s23 + $0xc] sm:$0xf] %vm660_vm1, %v795_v20  ;;  %v606_v25 = vadd.f32 %v605_v19, %v541_v22  ;;  %v544_v26 = vadd.f32 %v833_v21, %v1050_v44  ;;  %v610_v27 = vpop.f32.mrb[11].mxu1 }
 0x112   : > { %v624_v28 = vmax.f32 %v606_v25, 0.0  ;;  %v609_v29 = vadd.f32 %v608_v24, %v544_v26  ;;  %v834_v30 = vpop.f32.mrb[12].mxu0 }
 0x113   : > { %v835_v31 = vpop.f32.mrb[13].mxu0 }
 0x114   : > { %v796_v32 = vpack.c.bf16 %v624_v28, %v624_v28  ;;  %v625_v33 = vmax.f32 %v609_v29, 0.0  ;;  %v836_v34 = vadd.f32 %v835_v31, %v834_v30  ;;  %v837_v35 = vpop.f32.mrb[14].mxu0 }
 0x115   : > { %v838_v36 = vpop.f32.mrb[15].mxu0  ;;  %v613_v37 = vpop.f32.mrb[12].mxu1 }
 0x116   : > { %665 = vst.msk [vmem:[%s1058_s23 + $0x10] sm:$0xf] %vm660_vm1, %v796_v32  ;;  %v797_v38 = vpack.c.bf16 %v625_v33, %v625_v33  ;;  %v839_v39 = vadd.f32 %v838_v36, %v837_v35  ;;  %v549_v40 = vadd.f32 %v836_v34, %v1050_v44  ;;  %v615_v41 = vpop.f32.mrb[13].mxu1 }
 0x117   : > { %v616_v42 = vpop.f32.mrb[14].mxu1 }
 0x118   : > { %666 = vst.msk [vmem:[%s1058_s23 + $0x14] sm:$0xf] %vm660_vm1, %v797_v38  ;;  %v614_v43 = vadd.f32 %v613_v37, %v549_v40  ;;  %v552_v45 = vadd.f32 %v839_v39, %v1050_v44  ;;  %v618_v46 = vpop.f32.mrb[15].mxu1 }
 0x11a   : > { %v626_v47 = vmax.f32 %v614_v43, 0.0  ;;  %v617_v48 = vadd.f32 %v616_v42, %v552_v45 }
 0x11c   : > { %v798_v49 = vpack.c.bf16 %v626_v47, %v626_v47  ;;  %v627_v50 = vmax.f32 %v617_v48, 0.0 }
 0x11e   : > { %667 = vst.msk [vmem:[%s1058_s23 + $0x18] sm:$0xf] %vm660_vm1, %v798_v49  ;;  %v799_v51 = vpack.c.bf16 %v627_v50, %v627_v50 }
 0x120   : > { %668 = vst.msk [vmem:[%s1058_s23 + $0x1c] sm:$0xf] %vm660_vm1, %v799_v51 }
 0x121 PF: > { %s13_s12 = sadd.s32 1, %s904_s12  }
 0x122   : > { %p10_p4 = scmp.ge.s32.totalorder %s13_s12, 4  }
 0x124   :  { %12 = sbr.rel (!%p10_p4) target bundleno = 1 (0x1), region = 62 }

// kernel: flowgen_forward.11
= control target key start
LH: loop header
LB: loop body
LE: loop exit
PB: predicated region body
PF: predicated region fallthrough
CT: control target
= control target key end

     0   :  { %s804_s12 = smov 0   ;;  %s918_s0 = inlined_call_operand.vmem [shape: bf16[128,288], index: 0, kind: input, shape index: {}]   ;;  %s919_s1 = inlined_call_operand.vmem [shape: bf16[288,2], index: 1, kind: input, shape index: {}]   ;;  %s920_s2 = inlined_call_operand.vmem [shape: f32[1,2], index: 2, kind: input, shape index: {}]   ;;  %s921_s3 = inlined_call_operand.vmem [shape: f32[128,2], index: 3, kind: output, shape index: {}]  }
   0x1 LB: > { %s613_s13 = sadd.s32 4294967295, %s782_s12   ;;  %p617_p0 = scmp.ge.s32.totalorder %s782_s12, 1  ;;  %s782_s12 = sphi %s804_s12, %s13_s12  }
   0x2   : > { %p139_p1 = scmp.lt.s32.totalorder %s782_s12, 3 }
   0x4   : > { %p140_p2 = pnand %p617_p0, %p139_p1 }
   0x5   : > { %v742_v0 = vld [vmem:[%s919_s1 + $0x40] sm:$0xff] (!%p140_p2)   ;;  %s618_s16 = sshll.u32 (!%p140_p2), %s613_s13, 3  ;;  %v744_v2 = vld [vmem:[%s919_s1 + $0x48] sm:$0xff] (!%p140_p2)   ;;  %v746_v4 = vld [vmem:[%s919_s1 + $0x50] sm:$0xff] (!%p140_p2)   ;;  %vm405_vm0 = vcmask (!%p140_p2), 261120   ;;  %vm548_vm1 = vcmask (!%p140_p2), 15360  }
   0x6   : > { %143 = sbr.rel (%p140_p2) target bundleno = 276 (0x114), region = 32  ;;  %v743_v1 = vld [vmem:[%s919_s1] sm:$0xff] (!%p140_p2)   ;;  %659 = vmatprep.subr.bf16.mxu0 (!%p140_p2), %v742_v0  ;;  %717 = vmatprep.subr.bf16.mxu1 (!%p140_p2), %v742_v0  ;;  %p165_p3 = scmp.lt.s32.totalorder (!%p140_p2), %s618_s16, 15  ;;  %v745_v3 = vld [vmem:[%s919_s1 + $0x8] sm:$0xff] (!%p140_p2)   ;;  %v747_v5 = vld [vmem:[%s919_s1 + $0x10] sm:$0xff] (!%p140_p2)  }
   0x7   : > { %660 = vmatpush3.bf16.msra.mxu0 (!%p140_p2), %v743_v1  ;;  %725 = vmatpush3.bf16.msra.mxu1 (!%p140_p2), %v743_v1  ;;  %v748_v6 = vld [vmem:[%s919_s1 + $0x58] sm:$0xff] (!%p140_p2)   ;;  %v750_v8 = vld [vmem:[%s919_s1 + $0x60] sm:$0xff] (!%p140_p2)   ;;  %v752_v10 = vld [vmem:[%s919_s1 + $0x68] sm:$0xff] (!%p140_p2)  }
   0x8   : > { %661 = vmatprep.subr.bf16.mxu0 (!%p140_p2), %v744_v2  ;;  %718 = vmatprep.subr.bf16.mxu1 (!%p140_p2), %v744_v2  ;;  %v749_v7 = vld [vmem:[%s919_s1 + $0x18] sm:$0xff] (!%p140_p2)   ;;  %v751_v9 = vld [vmem:[%s919_s1 + $0x20] sm:$0xff] (!%p140_p2)   ;;  %v753_v13 = vld [vmem:[%s919_s1 + $0x28] sm:$0xff] (!%p140_p2)  }
   0x9   : > { %v754_v14 = vld [vmem:[%s919_s1 + $0x70] sm:$0xff] (!%p140_p2)   ;;  %v756_v16 = vld [vmem:[%s919_s1 + $0x78] sm:$0xff] (!%p140_p2)   ;;  %v764_v18 = vld [vmem:[%s919_s1 + $0x80] sm:$0xff] (!%p140_p2)  }
   0xa   : > { %v755_v15 = vld [vmem:[%s919_s1 + $0x30] sm:$0xff] (!%p140_p2)   ;;  %v757_v17 = vld [vmem:[%s919_s1 + $0x38] sm:$0xff] (!%p140_p2)   ;;  %v765_v22 = vld [vmem:[%s919_s1 + $0x88] sm:$0xff] (!%p140_p2)  }
   0xb   : > { %662 = vmatpush3.bf16.msra.mxu0 (!%p140_p2), %v745_v3  ;;  %726 = vmatpush3.bf16.msra.mxu1 (!%p140_p2), %v745_v3  ;;  %v622_v42 = vld [vmem:[%s920_s2] ss:$0 sm:$0xff] (!%p140_p2) }
   0xc   : > { %663 = vmatprep.subr.bf16.mxu0 (!%p140_p2), %v746_v4  ;;  %719 = vmatprep.subr.bf16.mxu1 (!%p140_p2), %v746_v4 }
   0xd   : > { %s923_s16 = smov (!%p165_p3, %s618_s16), 15 }
   0xe   : > { %s733_s29 = smul.u32 12, %s923_s16  ;;  %s621_s5 = sshll.u32 %s923_s16, 3 }
   0xf   : > { %664 = vmatpush3.bf16.msra.mxu0 %v747_v5  ;;  %727 = vmatpush3.bf16.msra.mxu1 %v747_v5  ;;  %s897_s8 = scalar_lea.vmem %s921_s3, %s621_s5 }
  0x10   : > { %665 = vmatprep.subr.bf16.mxu0 %v748_v6  ;;  %720 = vmatprep.subr.bf16.mxu1 %v748_v6  ;;  %s845_s9 = scalar_lea.vmem %s918_s0, %s733_s29 }
  0x11   : > { %v760_v11 = vld [vmem:[%s845_s9 + $0x4] ss:$12 sps:$4 sm:$0xff]   ;;  %v763_v12 = vld [vmem:[%s845_s9 + $0x4c] ss:$12 sps:$4 sm:$0xff]   ;;  %v761_v20 = vld [vmem:[%s845_s9 + $0x48] ss:$12 sps:$4 sm:$0xff]  }
  0x12   : > { %450 = vmatprep.mubr.bf16.mxu0 %v760_v11  ;;  %474 = vmatprep.mubr.bf16.mxu1 %v763_v12  ;;  %v758_v19 = vld [vmem:[%s845_s9] ss:$12 sps:$4 sm:$0xff]   ;;  %v766_v21 = vld [vmem:[%s845_s9 + $0x1c] ss:$12 sps:$4 sm:$0xff]   ;;  %v769_v24 = vld [vmem:[%s845_s9 + $0x18] ss:$12 sps:$4 sm:$0xff]  }
  0x13   : > { %666 = vmatpush3.bf16.msra.mxu0 %v749_v7  ;;  %728 = vmatpush3.bf16.msra.mxu1 %v749_v7  ;;  %v768_v23 = vld [vmem:[%s845_s9 + $0x8] ss:$12 sps:$4 sm:$0xff]   ;;  %v770_v25 = vld [vmem:[%s845_s9 + $0x20] ss:$12 sps:$4 sm:$0xff]   ;;  %v773_v27 = vld [vmem:[%s845_s9 + $0x38] ss:$12 sps:$4 sm:$0xff]  }
  0x14   : > { %667 = vmatprep.subr.bf16.mxu0 %v750_v8  ;;  %721 = vmatprep.subr.bf16.mxu1 %v750_v8  ;;  %v771_v26 = vld [vmem:[%s845_s9 + $0x34] ss:$12 sps:$4 sm:$0xff]   ;;  %v774_v28 = vld [vmem:[%s845_s9 + $0x30] ss:$12 sps:$4 sm:$0xff]  }
  0x15   : > { %v775_v29 = vld [vmem:[%s845_s9 + $0x50] ss:$12 sps:$4 sm:$0xff]  }
  0x17   : > { %668 = vmatpush3.bf16.msra.mxu0 %v751_v9  ;;  %729 = vmatpush3.bf16.msra.mxu1 %v751_v9 }
  0x18   : > { %669 = vmatprep.subr.bf16.mxu0 %v752_v10  ;;  %722 = vmatprep.subr.bf16.mxu1 %v752_v10 }
  0x1b   : > { %670 = vmatpush3.bf16.msra.mxu0 %v753_v13  ;;  %730 = vmatpush3.bf16.msra.mxu1 %v753_v13 }
  0x1c   : > { %671 = vmatprep.subr.bf16.mxu0 %v754_v14  ;;  %723 = vmatprep.subr.bf16.mxu1 %v754_v14 }
  0x1f   : > { %672 = vmatpush3.bf16.msra.mxu0 %v755_v15  ;;  %731 = vmatpush3.bf16.msra.mxu1 %v755_v15 }
  0x20   : > { %673 = vmatprep.subr.bf16.mxu0 %v756_v16  ;;  %724 = vmatprep.subr.bf16.mxu1 %v756_v16 }
  0x23   : > { %674 = vmatpush3.bf16.msra.mxu0 %v757_v17  ;;  %732 = vmatpush3.bf16.msra.mxu1 %v757_v17 }
  0x24   : > { %705 = vmatprep.subr.bf16.mxu1 %v764_v18 }
  0x26   : > { %451 = vmatmul.mubr.bf16.vlgmr.msra.gmra.mrb[0].mxu0 %v758_v19  ;;  %475 = vmatmul.mubr.bf16.vlgmr.msra.gmra.mrb[0].mxu1 %v761_v20 }
  0x27   : > { %706 = vmatpush3.bf16.msra.mxu1 %v764_v18  ;;  %458 = vmatprep.mubr.bf16.mxu0 %v766_v21 }
  0x28   : > { %707 = vmatprep.subr.bf16.mxu1 %v765_v22  ;;  %709 = vmatprep.mubr.msk.bf16.mxu1 %vm405_vm0, %v768_v23 }
  0x2b   : > { %708 = vmatpush3.bf16.msra.mxu1 %v765_v22 }
  0x2e   : > { %459 = vmatmul.mubr.bf16.gmra.mrb[4].mxu0 %v769_v24  ;;  %710 = vmatmul.mubr.msk.bf16.vlgmr.msra.gmra.mrb[4].mxu1 %vm405_vm0, %v770_v25 }
  0x2f   : > { %466 = vmatprep.mubr.bf16.mxu0 %v771_v26  ;;  %713 = vmatprep.mubr.msk.bf16.mxu1 %vm405_vm0, %v773_v27 }
  0x36   : > { %467 = vmatmul.mubr.bf16.gmra.mrb[8].mxu0 %v774_v28  ;;  %714 = vmatmul.mubr.msk.bf16.gmra.mrb[8].mxu1 %vm405_vm0, %v775_v29 }
  0xf9   : > { %v675_v30 = vpop.f32.mrb[0].mxu0  ;;  %v693_v31 = vpop.f32.mrb[0].mxu1 }
  0xfa   : > { %v676_v32 = vpop.f32.mrb[1].mxu0  ;;  %v694_v33 = vpop.f32.mrb[1].mxu1 }
  0xfb   : > { %v677_v34 = vadd.f32 %v676_v32, %v675_v30  ;;  %v678_v35 = vpop.f32.mrb[2].mxu0  ;;  %v695_v36 = vadd.f32 %v694_v33, %v693_v31  ;;  %v696_v37 = vpop.f32.mrb[2].mxu1 }
  0xfc   : > { %v679_v38 = vpop.f32.mrb[3].mxu0  ;;  %v697_v39 = vpop.f32.mrb[3].mxu1 }
  0xfd   : > { %v680_v40 = vadd.f32 %v679_v38, %v678_v35  ;;  %v698_v41 = vadd.f32 %v697_v39, %v696_v37  ;;  %v453_v45 = vadd.f32 %v677_v34, %v622_v42  ;;  %v477_v60 = vadd.f32 %v695_v36, %v622_v42 }
  0xff   : > { %v456_v52 = vadd.f32 %v680_v40, %v622_v42  ;;  %v480_v3 = vadd.f32 %v698_v41, %v622_v42 }
 0x101   : > { %v681_v43 = vpop.f32.mrb[4].mxu0  ;;  %v711_v44 = vpop.f32.mrb[4].mxu1 }
 0x102   : > { %v682_v46 = vpop.f32.mrb[5].mxu0  ;;  %v517_v47 = vpop.f32.mrb[5].mxu1 }
 0x103   : > { %v683_v48 = vadd.f32 %v682_v46, %v681_v43  ;;  %v518_v49 = vadd.f32 %v517_v47, %v453_v45  ;;  %v684_v50 = vpop.f32.mrb[6].mxu0  ;;  %v712_v51 = vpop.f32.mrb[6].mxu1 }
 0x104   : > { %v685_v53 = vpop.f32.mrb[7].mxu0  ;;  %v520_v54 = vpop.f32.mrb[7].mxu1 }
 0x105   : > { %v461_v55 = vadd.f32 %v683_v48, %v622_v42  ;;  %549 = vst.msk [vmem:[%s897_s8] sm:$0xff] %vm548_vm1, %v518_v49  ;;  %v686_v56 = vadd.f32 %v685_v53, %v684_v50  ;;  %v521_v57 = vadd.f32 %v520_v54, %v456_v52 }
 0x107   : > { %v526_v58 = vadd.f32 %v711_v44, %v461_v55  ;;  %v464_v59 = vadd.f32 %v686_v56, %v622_v42  ;;  %550 = vst.msk [vmem:[%s897_s8 + $0x8] sm:$0xff] %vm548_vm1, %v521_v57 }
 0x109   : > { %551 = vst.msk [vmem:[%s897_s8 + $0x10] sm:$0xff] %vm548_vm1, %v526_v58  ;;  %v529_v61 = vadd.f32 %v712_v51, %v464_v59  ;;  %v687_v62 = vpop.f32.mrb[8].mxu0  ;;  %v715_v63 = vpop.f32.mrb[8].mxu1 }
 0x10a   : > { %v542_v0 = vadd.f32 %v715_v63, %v477_v60  ;;  %v688_v1 = vpop.f32.mrb[9].mxu0  ;;  %v533_v2 = vpop.f32.mrb[9].mxu1 }
 0x10b   : > { %552 = vst.msk [vmem:[%s897_s8 + $0x18] sm:$0xff] %vm548_vm1, %v529_v61  ;;  %v689_v4 = vadd.f32 %v688_v1, %v687_v62  ;;  %v690_v5 = vpop.f32.mrb[10].mxu0  ;;  %v716_v6 = vpop.f32.mrb[10].mxu1 }
 0x10c   : > { %555 = vst.msk [vmem:[%s897_s8 + $0x30] sm:$0xff] %vm548_vm1, %v542_v0  ;;  %v545_v7 = vadd.f32 %v716_v6, %v480_v3  ;;  %v691_v8 = vpop.f32.mrb[11].mxu0  ;;  %v536_v9 = vpop.f32.mrb[11].mxu1 }
 0x10d   : > { %v469_v10 = vadd.f32 %v689_v4, %v622_v42  ;;  %v692_v11 = vadd.f32 %v691_v8, %v690_v5 }
 0x10e   : > { %556 = vst.msk [vmem:[%s897_s8 + $0x38] sm:$0xff] %vm548_vm1, %v545_v7 }
 0x10f   : > { %v534_v12 = vadd.f32 %v533_v2, %v469_v10  ;;  %v472_v13 = vadd.f32 %v692_v11, %v622_v42 }
 0x111   : > { %553 = vst.msk [vmem:[%s897_s8 + $0x20] sm:$0xff] %vm548_vm1, %v534_v12  ;;  %v537_v14 = vadd.f32 %v536_v9, %v472_v13 }
 0x113   : > { %554 = vst.msk [vmem:[%s897_s8 + $0x28] sm:$0xff] %vm548_vm1, %v537_v14 }
 0x114 PF: > { %s13_s12 = sadd.s32 1, %s782_s12  }
 0x115   : > { %p10_p4 = scmp.ge.s32.totalorder %s13_s12, 4  }
 0x117   :  { %12 = sbr.rel (!%p10_p4) target bundleno = 1 (0x1), region = 62 }

// kernel: flowgen_forward.12
= control target key start
LH: loop header
LB: loop body
LE: loop exit
PB: predicated region body
PF: predicated region fallthrough
CT: control target
= control target key end

     0   :  { %vm26_vm0 = vcmask 64512   ;;  %vm124_vm1 = vcmask 261120   ;;  %s203_s1 = inlined_call_operand.vmem [shape: f32[8,32], index: 1, kind: input, shape index: {}]   ;;  %s204_s0 = inlined_call_operand.vmem [shape: f32[32,8], index: 0, kind: input, shape index: {}]   ;;  %s205_s2 = inlined_call_operand.vmem [shape: f32[1,32], index: 2, kind: input, shape index: {}]   ;;  %s206_s3 = inlined_call_operand.vmem [shape: f32[32,32], index: 3, kind: output, shape index: {}]  }
   0x1   :  { %v18_v0 = vld [vmem:[%s203_s1] sm:$0xff]  ;;  %v16_v2 = vld [vmem:[%s204_s0 + $0x10] sm:$0xff]  ;;  %v15_v3 = vld [vmem:[%s204_s0 + $0x8] sm:$0xff] }
   0x2   :  { %v14_v1 = vld [vmem:[%s204_s0] sm:$0xff]  ;;  %143 = vmatprep.subr.mxu0 %v18_v0  ;;  %151 = vmatprep.subr.mxu1 %v18_v0  ;;  %v17_v4 = vld [vmem:[%s204_s0 + $0x18] sm:$0xff] }
   0x3   :  { %144 = vmatpush3.msra.mxu0 %v18_v0  ;;  %152 = vmatpush3.msra.mxu1 %v18_v0  ;;  %v133_v5 = vld [vmem:[%s205_s2] ss:$0 sm:$0xff] }
   0x4   :  { %145 = vmatprep.mubr.msk.f32.mxu0 %vm26_vm0, %v14_v1  ;;  %148 = vmatprep.mubr.msk.f32.mxu1 %vm26_vm0, %v16_v2 }
   0x5   :  { %146 = vmatmul.mubr.msk.f32.vlgmr.msra.gmra.mrb[0].mxu0 %vm26_vm0, %v15_v3  ;;  %149 = vmatmul.mubr.msk.f32.vlgmr.msra.gmra.mrb[0].mxu1 %vm26_vm0, %v17_v4 }
  0xd8   :  { %v147_v6 = vpop.f32.mrb[0].mxu0  ;;  %v150_v7 = vpop.f32.mrb[0].mxu1 }
  0xd9   :  { %v111_v8 = vadd.f32 %v147_v6, %v133_v5  ;;  %v121_v9 = vadd.f32 %v150_v7, %v133_v5  ;;  %v105_v10 = vpop.f32.mrb[1].mxu0  ;;  %v115_v11 = vpop.f32.mrb[1].mxu1 }
  0xda   :  { %v106_v12 = vadd.f32 %v133_v5, %v105_v10  ;;  %v116_v13 = vadd.f32 %v133_v5, %v115_v11 }
  0xdb   :  { %126 = vst.msk [vmem:[%s206_s3 + $0x8] sm:$0xff] %vm124_vm1, %v111_v8  ;;  %128 = vst.msk [vmem:[%s206_s3 + $0x18] sm:$0xff] %vm124_vm1, %v121_v9 }
  0xdc   :  { %125 = vst.msk [vmem:[%s206_s3] sm:$0xff] %vm124_vm1, %v106_v12  ;;  %127 = vst.msk [vmem:[%s206_s3 + $0x10] sm:$0xff] %vm124_vm1, %v116_v13 }

// kernel: flowgen_forward.13
= control target key start
LH: loop header
LB: loop body
LE: loop exit
PB: predicated region body
PF: predicated region fallthrough
CT: control target
= control target key end

     0   :  { %vm26_vm0 = vcmask 64512   ;;  %s202_s1 = inlined_call_operand.vmem [shape: f32[8,128], index: 1, kind: input, shape index: {}]   ;;  %s203_s0 = inlined_call_operand.vmem [shape: f32[32,8], index: 0, kind: input, shape index: {}]   ;;  %s204_s2 = inlined_call_operand.vmem [shape: f32[1,128], index: 2, kind: input, shape index: {}]   ;;  %s205_s3 = inlined_call_operand.vmem [shape: f32[32,128], index: 3, kind: output, shape index: {}]  }
   0x1   :  { %v18_v0 = vld [vmem:[%s202_s1] sm:$0xff]  ;;  %v16_v2 = vld [vmem:[%s203_s0 + $0x10] sm:$0xff]  ;;  %v15_v3 = vld [vmem:[%s203_s0 + $0x8] sm:$0xff] }
   0x2   :  { %v14_v1 = vld [vmem:[%s203_s0] sm:$0xff]  ;;  %142 = vmatprep.subr.mxu0 %v18_v0  ;;  %150 = vmatprep.subr.mxu1 %v18_v0  ;;  %v17_v4 = vld [vmem:[%s203_s0 + $0x18] sm:$0xff] }
   0x3   :  { %143 = vmatpush3.msra.mxu0 %v18_v0  ;;  %151 = vmatpush3.msra.mxu1 %v18_v0  ;;  %v132_v5 = vld [vmem:[%s204_s2] ss:$0 sm:$0xff] }
   0x4   :  { %144 = vmatprep.mubr.msk.f32.mxu0 %vm26_vm0, %v14_v1  ;;  %147 = vmatprep.mubr.msk.f32.mxu1 %vm26_vm0, %v16_v2 }
   0x5   :  { %145 = vmatmul.mubr.msk.f32.vlgmr.msra.gmra.mrb[0].mxu0 %vm26_vm0, %v15_v3  ;;  %148 = vmatmul.mubr.msk.f32.vlgmr.msra.gmra.mrb[0].mxu1 %vm26_vm0, %v17_v4 }
  0xd8   :  { %v146_v6 = vpop.f32.mrb[0].mxu0  ;;  %v149_v7 = vpop.f32.mrb[0].mxu1 }
  0xd9   :  { %v111_v8 = vadd.f32 %v146_v6, %v132_v5  ;;  %v121_v9 = vadd.f32 %v149_v7, %v132_v5  ;;  %v105_v10 = vpop.f32.mrb[1].mxu0  ;;  %v115_v11 = vpop.f32.mrb[1].mxu1 }
  0xda   :  { %v106_v12 = vadd.f32 %v132_v5, %v105_v10  ;;  %v116_v13 = vadd.f32 %v132_v5, %v115_v11 }
  0xdb   :  { %125 = vst [vmem:[%s205_s3 + $0x8] sm:$0xff] %v111_v8  ;;  %127 = vst [vmem:[%s205_s3 + $0x18] sm:$0xff] %v121_v9 }
  0xdc   :  { %124 = vst [vmem:[%s205_s3] sm:$0xff] %v106_v12  ;;  %126 = vst [vmem:[%s205_s3 + $0x10] sm:$0xff] %v116_v13 }

// kernel: flowgen_forward.14
= control target key start
LH: loop header
LB: loop body
LE: loop exit
PB: predicated region body
PF: predicated region fallthrough
CT: control target
= control target key end

     0   :  { %s1988_s9 = smov 0   ;;  %s1990_s10 = smov 0   ;;  %s2704_s0 = inlined_call_operand.vmem [shape: bf16[2,256,32], index: 0, kind: input, shape index: {}]   ;;  %s2705_s1 = inlined_call_operand.vmem [shape: f32[2,2,1024], index: 1, kind: input, shape index: {}]   ;;  %s2706_s2 = inlined_call_operand.vmem [shape: f32[2,8,1024], index: 2, kind: output, shape index: {}]  }
   0x1   :  { %s1992_s11 = smov 0   ;;  %s1994_s12 = smov 0  }
   0x2   :  { %s1996_s13 = smov 0  }
   0x3 LB: > { %s21_s14 = sadd.s32 1, %s1962_s11  ;;  %s24_s15 = sadd.s32 1, %s1966_s12  ;;  %s1970_s13 = sphi %s1996_s13, %s12_s13   ;;  %s1966_s12 = sphi %s1994_s12, %s2710_s12   ;;  %s1962_s11 = sphi %s1992_s11, %s2709_s11   ;;  %s1958_s10 = sphi %s1990_s10, %s2708_s10   ;;  %s1954_s9 = sphi %s1988_s9, %s2707_s9  }
   0x4   : > { %p22_p0 = scmp.ge.s32.totalorder %s21_s14, 2  ;;  %p1810_p1 = scmp.ge.s32.totalorder %s1970_s13, 1 }
   0x5   : > { %p143_p2 = scmp.lt.s32.totalorder %s1970_s13, 5 }
   0x6   : > { %s2712_s14 = smov (%p22_p0, %s21_s14), 0  ;;  %s2714_s15 = smov (!%p22_p0, %s24_s15), %s1966_s12 }
   0x7   : > { %p144_p3 = pnand %p1810_p1, %p143_p2  ;;  %p26_p4 = scmp.ge.s32.totalorder %s2714_s15, 2 }
   0x8   : > { %p178_p5 = scmp.lt.s32.totalorder (!%p144_p3), %s1958_s10, 1  ;;  %s1813_s16 = sshll.u32 (!%p144_p3), %s1954_s9, 2  ;;  %v1972_v0 = vmov (!%p144_p3), 0   ;;  %v251_v3 = vlaneseq (!%p144_p3) }
   0x9   : > { %s2716_s15 = smov (%p26_p4, %s2714_s15), 0  ;;  %147 = sbr.rel (%p144_p3) target bundleno = 427 (0x1ab), region = 28 }
   0xa   : > { %p186_p6 = scmp.lt.s32.totalorder (!%p144_p3), %s1813_s16, 7  ;;  %643 = vmatprep.mubr.bf16.mxu0 (!%p144_p3), %v1972_v0  ;;  %836 = vmatprep.mubr.bf16.mxu1 (!%p144_p3), %v1972_v0  ;;  %v2031_v6 = vshrl.u32 (!%p144_p3), %v251_v3, 7 }
   0xc   : > { %v2034_v9 = vsub.s32 (!%p144_p3), 1, %v2031_v6  ;;  %v262_v10 = vsub.s32 (!%p144_p3), 3, %v2031_v6  ;;  %v270_v11 = vsub.s32 (!%p144_p3), 7, %v2031_v6  ;;  %v2039_v12 = vsub.s32 (!%p144_p3), 5, %v2031_v6 }
   0xd   : > { %v2048_v20 = vadd.s32 (!%p144_p3), 8, %v2031_v6  ;;  %v2055_v26 = vadd.s32 (!%p144_p3), 16, %v2031_v6  ;;  %v2063_v30 = vadd.s32 (!%p144_p3), 24, %v2031_v6 }
  0x10   : > { %s2718_s10 = smov (!%p178_p5, %s1958_s10), 1  ;;  %s2720_s16 = smov (!%p186_p6, %s1813_s16), 7 }
  0x11   : > { %s1870_s17 = sshll.u32 %s2718_s10, 7  ;;  %s1814_s18 = sshll.u32 %s2718_s10, 3 }
  0x12   : > { %s2023_s21 = scalar_lea.vmem %s2704_s0, %s1870_s17  ;;  %s2025_s22 = sadd.s32 %s1814_s18, %s2720_s16 }
  0x13   : > { %s1815_s23 = sshll.u32 %s2025_s22, 1  ;;  %s1818_s27 = sshll.u32 %s2025_s22, 3 }
  0x14   : > { %s191_s26 = scalar_lea.vmem %s2705_s1, %s1815_s23  ;;  %s201_s30 = scalar_lea.vmem %s2706_s2, %s1818_s27 }
  0x15   : > { %v236_v1 = vld [vmem:[%s191_s26] sm:$0xff] }
  0x16   : > { %v237_v2 = vadd.f32 1.0, %v236_v1 }
  0x18   : > { %v238_v4 = vmul.f32 32.0, %v237_v2 }
  0x1a   : > { %v1819_v5 = vadd.f32 -1.0, %v238_v4 }
  0x1c   : > { %v240_v7 = vmul.f32 0.5, %v1819_v5 }
  0x1e   : > { %v241_v8 = vfloor.f32 %v240_v7 }
  0x20   : > { %v2041_v13 = vsub.f32 %v240_v7, %v241_v8  ;;  %v244_v14 = vmax.f32 %v241_v8, -1.0  ;;  %v247_v15 = vadd.f32 1.0, %v241_v8 }
  0x22   : > { %v2044_v16 = vsub.f32 1.0, %v2041_v13  ;;  %v245_v17 = vmin.f32 %v244_v14, 32.0  ;;  %v248_v18 = vmax.f32 %v247_v15, -1.0  ;;  %v413_v19 = vrot.slane %v2041_v13, %v262_v10 }
  0x23   : > { %v421_v21 = vrot.slane %v2041_v13, %v270_v11  ;;  %v409_v22 = vrot.slane %v2041_v13, %v2034_v9  ;;  %v417_v29 = vrot.slane %v2041_v13, %v2039_v12 }
  0x24   : > { %v1871_v23 = vtrunc.f32 %v245_v17  ;;  %v249_v24 = vmin.f32 %v248_v18, 32.0  ;;  %v312_v25 = vrot.slane %v2044_v16, %v262_v10  ;;  %v320_v27 = vrot.slane %v2044_v16, %v270_v11 }
  0x25   : > { %v308_v28 = vrot.slane %v2044_v16, %v2034_v9  ;;  %v2068_v33 = vrot.slane %v413_v19, %v2034_v9  ;;  %v316_v34 = vrot.slane %v2044_v16, %v2039_v12  ;;  %v2079_v37 = vrot.slane %v421_v21, %v2034_v9 }
  0x26   : > { %v2065_v31 = vcvt.f32.s32 %v1871_v23  ;;  %v1873_v32 = vtrunc.f32 %v249_v24  ;;  %v2073_v35 = vrot.slane %v312_v25, %v2034_v9  ;;  %v2076_v36 = vrot.slane %v320_v27, %v2034_v9 }
  0x27   : > { %v2082_v38 = vrot.slane %v409_v22, %v2034_v9  ;;  %v2091_v43 = vrot.slane %v308_v28, %v2034_v9  ;;  %v2096_v45 = vrot.slane %v316_v34, %v2034_v9  ;;  %v2099_v46 = vrot.slane %v417_v29, %v2034_v9 }
  0x28   : > { %v2084_v39 = vcvt.f32.s32 %v1873_v32  ;;  %v263_v40 = vrot.slane %v2065_v31, %v262_v10  ;;  %v271_v41 = vrot.slane %v2065_v31, %v270_v11  ;;  %v259_v42 = vrot.slane %v2065_v31, %v2034_v9 }
  0x29   : > { %v267_v44 = vrot.slane %v2065_v31, %v2039_v12 }
  0x2a   : > { %v279_v47 = vrot.slane %v263_v40, %v2034_v9  ;;  %v364_v48 = vrot.slane %v2084_v39, %v262_v10  ;;  %v2104_v49 = vrot.slane %v271_v41, %v2034_v9  ;;  %v372_v50 = vrot.slane %v2084_v39, %v270_v11 }
  0x2b   : > { %v2108_v51 = vrot.slane %v259_v42, %v2034_v9  ;;  %v360_v52 = vrot.slane %v2084_v39, %v2034_v9  ;;  %v2113_v53 = vrot.slane %v267_v44, %v2034_v9  ;;  %v368_v54 = vrot.slane %v2084_v39, %v2039_v12 }
  0x2c   : > { %vm289_vm0 = vcmp.eq.s32.totalorder %v2031_v6, %v279_v47  ;;  %vm293_vm1 = vcmp.eq.s32.totalorder %v2048_v20, %v279_v47  ;;  %v380_v55 = vrot.slane %v364_v48, %v2034_v9  ;;  %vm291_vm2 = vcmp.eq.s32.totalorder %v2031_v6, %v2104_v49 }
  0x2d   : > { %v342_v56 = vsel %vm289_vm0, %v2073_v35, 0.0  ;;  %v346_v57 = vsel %vm293_vm1, %v2073_v35, 0.0  ;;  %vm295_vm3 = vcmp.eq.s32.totalorder %v2048_v20, %v2104_v49  ;;  %v344_v58 = vsel %vm291_vm2, %v2076_v36, 0.0 }
  0x2e   : > { %vm390_vm4 = vcmp.eq.s32.totalorder %v2031_v6, %v380_v55  ;;  %vm394_vm5 = vcmp.eq.s32.totalorder %v2048_v20, %v380_v55  ;;  %v348_v59 = vsel %vm295_vm3, %v2076_v36, 0.0  ;;  %v388_v60 = vrot.slane %v372_v50, %v2034_v9 }
  0x2f   : > { %v443_v61 = vsel %vm390_vm4, %v2068_v33, 0.0  ;;  %v447_v62 = vsel %vm394_vm5, %v2068_v33, 0.0  ;;  %vm288_vm6 = vcmp.eq.s32.totalorder %v2031_v6, %v2108_v51  ;;  %vm292_vm7 = vcmp.eq.s32.totalorder %v2048_v20, %v2108_v51 }
  0x30   : > { %v459_v63 = vadd.f32 %v443_v61, %v342_v56  ;;  %v463_v1 = vadd.f32 %v447_v62, %v346_v57  ;;  %vm392_vm8 = vcmp.eq.s32.totalorder %v2031_v6, %v388_v60  ;;  %vm396_vm9 = vcmp.eq.s32.totalorder %v2048_v20, %v388_v60  ;;  %v1916_v61 = vld [vmem:[%s2023_s21] sm:$0xff]   ;;  %v1917_v62 = vld [vmem:[%s2023_s21 + $0x8] sm:$0xff]  }
  0x31   : > { %v445_v2 = vsel %vm392_vm8, %v2079_v37, 0.0  ;;  %v449_v3 = vsel %vm396_vm9, %v2079_v37, 0.0  ;;  %v341_v4 = vsel %vm288_vm6, %v2091_v43, 0.0  ;;  %v345_v5 = vsel %vm292_vm7, %v2091_v43, 0.0 }
  0x32   : > { %v475_v7 = vpack.c.bf16 %v463_v1, %v459_v63  ;;  %v461_v8 = vadd.f32 %v445_v2, %v344_v58  ;;  %v465_v10 = vadd.f32 %v449_v3, %v348_v59  ;;  %v376_v11 = vrot.slane %v360_v52, %v2034_v9  ;;  %v1919_v63 = vld [vmem:[%s2023_s21 + $0x18] sm:$0xff]   ;;  %v1920_v1 = vld [vmem:[%s2023_s21 + $0x20] sm:$0xff]   ;;  %v1921_v2 = vld [vmem:[%s2023_s21 + $0x28] sm:$0xff]  }
  0x33   : > { %vm290_vm10 = vcmp.eq.s32.totalorder %v2031_v6, %v2113_v53  ;;  %vm294_vm11 = vcmp.eq.s32.totalorder %v2048_v20, %v2113_v53  ;;  %v2149_v12 = vrot.slane %v368_v54, %v2034_v9  ;;  %vm297_vm12 = vcmp.eq.s32.totalorder %v2055_v26, %v279_v47  ;;  %v1922_v3 = vld [vmem:[%s2023_s21 + $0x30] sm:$0xff]  }
  0x34   : > { %611 = vmatprep.subr.bf16.mxu0 %v475_v7  ;;  %v477_v14 = vpack.c.bf16 %v465_v10, %v461_v8  ;;  %vm389_vm13 = vcmp.eq.s32.totalorder %v2031_v6, %v376_v11  ;;  %vm393_vm14 = vcmp.eq.s32.totalorder %v2048_v20, %v376_v11  ;;  %v343_v15 = vsel %vm290_vm10, %v2096_v45, 0.0  ;;  %v1925_v7 = vld [vmem:[%s2023_s21 + $0x48] sm:$0xff]   ;;  %v1926_v8 = vld [vmem:[%s2023_s21 + $0x50] sm:$0xff]   ;;  %v1927_v10 = vld [vmem:[%s2023_s21 + $0x58] sm:$0xff]  }
  0x35   : > { %v442_v17 = vsel %vm389_vm13, %v2082_v38, 0.0  ;;  %v446_v18 = vsel %vm393_vm14, %v2082_v38, 0.0  ;;  %v347_v19 = vsel %vm294_vm11, %v2096_v45, 0.0  ;;  %vm391_vm15 = vcmp.eq.s32.totalorder %v2031_v6, %v2149_v12 }
  0x36   : > { %804 = vmatprep.subr.bf16.mxu1 %v477_v14  ;;  %v458_v9 = vadd.f32 %v442_v17, %v341_v4  ;;  %v462_v21 = vadd.f32 %v446_v18, %v345_v5  ;;  %vm395_vm0 = vcmp.eq.s32.totalorder %v2048_v20, %v2149_v12  ;;  %v444_v22 = vsel %vm391_vm15, %v2099_v46, 0.0  ;;  %v1923_v4 = vld [vmem:[%s2023_s21 + $0x38] sm:$0xff]   ;;  %v1924_v5 = vld [vmem:[%s2023_s21 + $0x40] sm:$0xff]   ;;  %v1930_v14 = vld [vmem:[%s2023_s21 + $0x70] sm:$0xff]  }
  0x37   : > { %v448_v23 = vsel %vm395_vm0, %v2099_v46, 0.0  ;;  %v460_v24 = vadd.f32 %v444_v22, %v343_v15  ;;  %vm301_vm1 = vcmp.eq.s32.totalorder %v2063_v30, %v279_v47  ;;  %v350_v25 = vsel %vm297_vm12, %v2073_v35, 0.0  ;;  %v1931_v15 = vld [vmem:[%s2023_s21 + $0x78] sm:$0xff]  }
  0x38   : > { %v474_v27 = vpack.c.bf16 %v462_v21, %v458_v9  ;;  %v464_v28 = vadd.f32 %v448_v23, %v347_v19  ;;  %v354_v29 = vsel %vm301_vm1, %v2073_v35, 0.0  ;;  %vm398_vm2 = vcmp.eq.s32.totalorder %v2055_v26, %v380_v55 }
  0x39   : > { %vm402_vm3 = vcmp.eq.s32.totalorder %v2063_v30, %v380_v55  ;;  %v451_v32 = vsel %vm398_vm2, %v2068_v33, 0.0  ;;  %vm299_vm4 = vcmp.eq.s32.totalorder %v2055_v26, %v2104_v49  ;;  %vm303_vm5 = vcmp.eq.s32.totalorder %v2063_v30, %v2104_v49 }
  0x3a   : > { %612 = vmatpush1.bf16.msra.mxu0 %v474_v27  ;;  %v476_v34 = vpack.c.bf16 %v464_v28, %v460_v24  ;;  %v455_v40 = vsel %vm402_vm3, %v2068_v33, 0.0  ;;  %v467_v41 = vadd.f32 %v451_v32, %v350_v25  ;;  %v352_v42 = vsel %vm299_vm4, %v2076_v36, 0.0 }
  0x3b   : > { %v471_v35 = vadd.f32 %v455_v40, %v354_v29  ;;  %v356_v44 = vsel %vm303_vm5, %v2076_v36, 0.0  ;;  %vm400_vm6 = vcmp.eq.s32.totalorder %v2055_v26, %v388_v60  ;;  %vm404_vm7 = vcmp.eq.s32.totalorder %v2063_v30, %v388_v60 }
  0x3c   : > { %805 = vmatpush1.bf16.msra.mxu1 %v476_v34  ;;  %v453_v47 = vsel %vm400_vm6, %v2079_v37, 0.0  ;;  %v457_v48 = vsel %vm404_vm7, %v2079_v37, 0.0  ;;  %vm296_vm8 = vcmp.eq.s32.totalorder %v2055_v26, %v2108_v51  ;;  %vm300_vm9 = vcmp.eq.s32.totalorder %v2063_v30, %v2108_v51 }
  0x3d   : > { %v479_v33 = vpack.c.bf16 %v471_v35, %v467_v41  ;;  %v469_v49 = vadd.f32 %v453_v47, %v352_v42  ;;  %v473_v50 = vadd.f32 %v457_v48, %v356_v44  ;;  %v349_v36 = vsel %vm296_vm8, %v2091_v43, 0.0 }
  0x3e   : > { %v353_v52 = vsel %vm300_vm9, %v2091_v43, 0.0  ;;  %vm397_vm10 = vcmp.eq.s32.totalorder %v2055_v26, %v376_v11  ;;  %vm401_vm11 = vcmp.eq.s32.totalorder %v2063_v30, %v376_v11  ;;  %vm298_vm12 = vcmp.eq.s32.totalorder %v2055_v26, %v2113_v53  ;;  %v1928_v11 = vld [vmem:[%s2023_s21 + $0x60] sm:$0xff]  }
  0x3f   : > { %613 = vmatprep.subr.bf16.mxu0 %v479_v33  ;;  %v481_v37 = vpack.c.bf16 %v473_v50, %v469_v49  ;;  %v450_v54 = vsel %vm397_vm10, %v2082_v38, 0.0  ;;  %v454_v51 = vsel %vm401_vm11, %v2082_v38, 0.0  ;;  %vm302_vm13 = vcmp.eq.s32.totalorder %v2063_v30, %v2113_v53 }
  0x40   : > { %v466_v55 = vadd.f32 %v450_v54, %v349_v36  ;;  %v470_v56 = vadd.f32 %v454_v51, %v353_v52  ;;  %v351_v43 = vsel %vm298_vm12, %v2096_v45, 0.0  ;;  %v355_v57 = vsel %vm302_vm13, %v2096_v45, 0.0 }
  0x41   : > { %806 = vmatprep.subr.bf16.mxu1 %v481_v37  ;;  %vm399_vm14 = vcmp.eq.s32.totalorder %v2055_v26, %v2149_v12  ;;  %vm403_vm15 = vcmp.eq.s32.totalorder %v2063_v30, %v2149_v12  ;;  %vm562_vm0 = vcmask 261120   ;;  %v1929_v12 = vld [vmem:[%s2023_s21 + $0x68] sm:$0xff]   ;;  %v999_v17 = vsub.s32 0, %v2031_v6 }
  0x42   : > { %v478_v58 = vpack.c.bf16 %v470_v56, %v466_v55  ;;  %v452_v38 = vsel %vm399_vm14, %v2099_v46, 0.0  ;;  %v456_v59 = vsel %vm403_vm15, %v2099_v46, 0.0  ;;  %v1918_v46 = vld [vmem:[%s2023_s21 + $0x10] sm:$0xff]   ;;  %v1007_v18 = vsub.s32 4, %v2031_v6 }
  0x43   : > { %v468_v53 = vadd.f32 %v452_v38, %v351_v43  ;;  %v472_v60 = vadd.f32 %v456_v59, %v355_v57  ;;  %v1003_v19 = vsub.s32 2, %v2031_v6  ;;  %v1000_v9 = vrot.slane %v2065_v31, %v999_v17 }
  0x44   : > { %614 = vmatpush1.bf16.msra.mxu0 %v478_v58  ;;  %v1100_v21 = vrot.slane %v2084_v39, %v999_v17  ;;  %v1008_v22 = vrot.slane %v2065_v31, %v1007_v18  ;;  %v1011_v23 = vsub.s32 6, %v2031_v6  ;;  %v1048_v24 = vrot.slane %v2044_v16, %v999_v17 }
  0x45   : > { %v480_v45 = vpack.c.bf16 %v472_v60, %v468_v53  ;;  %v1148_v25 = vrot.slane %v2041_v13, %v999_v17  ;;  %v1004_v27 = vrot.slane %v2065_v31, %v1003_v19  ;;  %v1104_v28 = vrot.slane %v2084_v39, %v1003_v19 }
  0x46   : > { %v2295_v29 = vrot.slane %v1000_v9, %v999_v17  ;;  %v1056_v32 = vrot.slane %v2044_v16, %v1007_v18  ;;  %v1156_v34 = vrot.slane %v2041_v13, %v1007_v18  ;;  %v2299_v40 = vrot.slane %v1100_v21, %v999_v17 }
  0x47   : > { %807 = vmatpush1.bf16.msra.mxu1 %v480_v45  ;;  %1836 = vmatmul.mubr.msk.bf16.vlgmr.msra.gmra.mrb[0].mxu0 %vm562_vm0, %v1916_v61  ;;  %v2301_v41 = vrot.slane %v1008_v22, %v999_v17  ;;  %v1012_v42 = vrot.slane %v2065_v31, %v1011_v23  ;;  %v1052_v44 = vrot.slane %v2044_v16, %v1003_v19 }
  0x48   : > { %653 = vmatprep.mubr.bf16.mxu0 %v1972_v0  ;;  %v1152_v47 = vrot.slane %v2041_v13, %v1003_v19  ;;  %v1112_v48 = vrot.slane %v2084_v39, %v1011_v23  ;;  %v2309_v33 = vrot.slane %v1048_v24, %v999_v17  ;;  %v2311_v49 = vrot.slane %v1148_v25, %v999_v17 }
  0x49   : > { %v2313_v50 = vrot.slane %v1004_v27, %v999_v17  ;;  %v2315_v36 = vrot.slane %v1104_v28, %v999_v17  ;;  %vm1029_vm1 = vcmp.eq.s32.totalorder %v2031_v6, %v2295_v29  ;;  %v2319_v31 = vrot.slane %v1056_v32, %v999_v17 }
  0x4a   : > { %1852 = vmatmul.mubr.msk.bf16.vlgmr.msra.gmra.mrb[0].mxu1 %vm562_vm0, %v1916_v61  ;;  %v2321_v52 = vrot.slane %v1156_v34, %v999_v17  ;;  %v1060_v37 = vrot.slane %v2044_v16, %v1011_v23  ;;  %vm1129_vm2 = vcmp.eq.s32.totalorder %v2031_v6, %v2299_v40  ;;  %vm1031_vm3 = vcmp.eq.s32.totalorder %v2031_v6, %v2301_v41 }
  0x4b   : > { %846 = vmatprep.mubr.bf16.mxu1 %v1972_v0  ;;  %v1160_v54 = vrot.slane %v2041_v13, %v1011_v23  ;;  %v2333_v51 = vrot.slane %v1052_v44, %v999_v17  ;;  %v2335_v55 = vrot.slane %v1152_v47, %v999_v17  ;;  %v2337_v56 = vrot.slane %v1112_v48, %v999_v17 }
  0x4c   : > { %vm1030_vm5 = vcmp.eq.s32.totalorder %v2031_v6, %v2313_v50  ;;  %vm1130_vm6 = vcmp.eq.s32.totalorder %v2031_v6, %v2315_v36  ;;  %v1081_v16 = vsel %vm1029_vm1, %v2309_v33, 0.0  ;;  %v1181_v43 = vsel %vm1129_vm2, %v2311_v49, 0.0 }
  0x4d   : > { %v1083_v13 = vsel %vm1031_vm3, %v2319_v31, 0.0  ;;  %v2346_v57 = vrot.slane %v1060_v37, %v999_v17  ;;  %v2351_v38 = vrot.slane %v1160_v54, %v999_v17  ;;  %vm1033_vm8 = vcmp.eq.s32.totalorder %v2048_v20, %v2295_v29 }
  0x4e   : > { %v1082_v59 = vsel %vm1030_vm5, %v2333_v51, 0.0  ;;  %v1182_v53 = vsel %vm1130_vm6, %v2335_v55, 0.0  ;;  %vm1132_vm9 = vcmp.eq.s32.totalorder %v2031_v6, %v2337_v56  ;;  %vm1133_vm10 = vcmp.eq.s32.totalorder %v2048_v20, %v2299_v40 }
  0x4f   : > { %1837 = vmatmul.mubr.msk.bf16.gmra.mrb[4].mxu0 %vm562_vm0, %v1917_v62  ;;  %v2361_v60 = vadd.f32 %v1181_v43, %v1081_v16  ;;  %vm1035_vm11 = vcmp.eq.s32.totalorder %v2048_v20, %v2301_v41  ;;  %vm1034_vm13 = vcmp.eq.s32.totalorder %v2048_v20, %v2313_v50  ;;  %vm1134_vm14 = vcmp.eq.s32.totalorder %v2048_v20, %v2315_v36 }
  0x50   : > { %663 = vmatprep.mubr.bf16.mxu0 %v1972_v0  ;;  %vm1037_vm1 = vcmp.eq.s32.totalorder %v2055_v26, %v2295_v29  ;;  %vm1137_vm2 = vcmp.eq.s32.totalorder %v2055_v26, %v2299_v40  ;;  %vm1039_vm3 = vcmp.eq.s32.totalorder %v2055_v26, %v2301_v41  ;;  %vm1038_vm5 = vcmp.eq.s32.totalorder %v2055_v26, %v2313_v50 }
  0x51   : > { %vm1138_vm6 = vcmp.eq.s32.totalorder %v2055_v26, %v2315_v36 }
  0x52   : > { %1853 = vmatmul.mubr.msk.bf16.gmra.mrb[4].mxu1 %vm562_vm0, %v1917_v62  ;;  %v1085_v62 = vsel %vm1033_vm8, %v2309_v33, 0.0  ;;  %vm1140_vm8 = vcmp.eq.s32.totalorder %v2055_v26, %v2337_v56 }
  0x53   : > { %856 = vmatprep.mubr.bf16.mxu1 %v1972_v0  ;;  %v1192_v27 = vsel %vm1140_vm8, %v2351_v38, 0.0 }
  0x57   : > { %1838 = vmatmul.mubr.msk.bf16.gmra.mrb[8].mxu0 %vm562_vm0, %v1918_v46 }
  0x58   : > { %673 = vmatprep.mubr.bf16.mxu0 %v1972_v0 }
  0x5a   : > { %1854 = vmatmul.mubr.msk.bf16.gmra.mrb[8].mxu1 %vm562_vm0, %v1918_v46  ;;  %v2367_v46 = vadd.f32 %v1182_v53, %v1082_v59 }
  0x5b   : > { %866 = vmatprep.mubr.bf16.mxu1 %v1972_v0 }
  0x5f   : > { %1839 = vmatmul.mubr.msk.bf16.gmra.mrb[12].mxu0 %vm562_vm0, %v1919_v63 }
  0x60   : > { %683 = vmatprep.mubr.bf16.mxu0 %v1972_v0 }
  0x62   : > { %1855 = vmatmul.mubr.msk.bf16.gmra.mrb[12].mxu1 %vm562_vm0, %v1919_v63  ;;  %v1184_v63 = vsel %vm1132_vm9, %v2351_v38, 0.0  ;;  %vm1041_vm9 = vcmp.eq.s32.totalorder %v2063_v30, %v2295_v29 }
  0x63   : > { %876 = vmatprep.mubr.bf16.mxu1 %v1972_v0  ;;  %v1093_v28 = vsel %vm1041_vm9, %v2309_v33, 0.0 }
  0x67   : > { %1840 = vmatmul.mubr.msk.bf16.gmra.mrb[16].mxu0 %vm562_vm0, %v1920_v1 }
  0x68   : > { %693 = vmatprep.mubr.bf16.mxu0 %v1972_v0 }
  0x6a   : > { %1856 = vmatmul.mubr.msk.bf16.gmra.mrb[16].mxu1 %vm562_vm0, %v1920_v1  ;;  %v1185_v1 = vsel %vm1133_vm10, %v2311_v49, 0.0  ;;  %vm1141_vm10 = vcmp.eq.s32.totalorder %v2063_v30, %v2299_v40 }
  0x6b   : > { %886 = vmatprep.mubr.bf16.mxu1 %v1972_v0 }
  0x6f   : > { %1841 = vmatmul.mubr.msk.bf16.gmra.mrb[20].mxu0 %vm562_vm0, %v1921_v2 }
  0x70   : > { %703 = vmatprep.mubr.bf16.mxu0 %v1972_v0 }
  0x72   : > { %1857 = vmatmul.mubr.msk.bf16.gmra.mrb[20].mxu1 %vm562_vm0, %v1921_v2  ;;  %v1086_v2 = vsel %vm1034_vm13, %v2333_v51, 0.0  ;;  %vm1043_vm13 = vcmp.eq.s32.totalorder %v2063_v30, %v2301_v41 }
  0x73   : > { %896 = vmatprep.mubr.bf16.mxu1 %v1972_v0 }
  0x77   : > { %1842 = vmatmul.mubr.msk.bf16.gmra.mrb[24].mxu0 %vm562_vm0, %v1922_v3 }
  0x78   : > { %713 = vmatprep.mubr.bf16.mxu0 %v1972_v0 }
  0x7a   : > { %1858 = vmatmul.mubr.msk.bf16.gmra.mrb[24].mxu1 %vm562_vm0, %v1922_v3  ;;  %v1186_v3 = vsel %vm1134_vm14, %v2335_v55, 0.0 }
  0x7b   : > { %906 = vmatprep.mubr.bf16.mxu1 %v1972_v0  ;;  %v2419_v9 = vadd.f32 %v1186_v3, %v1086_v2 }
  0x7f   : > { %1843 = vmatmul.mubr.msk.bf16.gmra.mrb[28].mxu0 %vm562_vm0, %v1923_v4 }
  0x80   : > { %723 = vmatprep.mubr.bf16.mxu0 %v1972_v0 }
  0x82   : > { %1859 = vmatmul.mubr.msk.bf16.gmra.mrb[28].mxu1 %vm562_vm0, %v1923_v4 }
  0x83   : > { %916 = vmatprep.mubr.bf16.mxu1 %v1972_v0 }
  0x87   : > { %1844 = vmatmul.mubr.msk.bf16.gmra.mrb[32].mxu0 %vm562_vm0, %v1924_v5 }
  0x88   : > { %733 = vmatprep.mubr.bf16.mxu0 %v1972_v0 }
  0x8a   : > { %1860 = vmatmul.mubr.msk.bf16.gmra.mrb[32].mxu1 %vm562_vm0, %v1924_v5 }
  0x8b   : > { %926 = vmatprep.mubr.bf16.mxu1 %v1972_v0 }
  0x8f   : > { %1845 = vmatmul.mubr.msk.bf16.gmra.mrb[36].mxu0 %vm562_vm0, %v1925_v7 }
  0x90   : > { %743 = vmatprep.mubr.bf16.mxu0 %v1972_v0 }
  0x92   : > { %1861 = vmatmul.mubr.msk.bf16.gmra.mrb[36].mxu1 %vm562_vm0, %v1925_v7  ;;  %v1089_v7 = vsel %vm1037_vm1, %v2309_v33, 0.0  ;;  %vm1661_vm1 = vcmask 1041409  }
  0x93   : > { %936 = vmatprep.mubr.bf16.mxu1 %v1972_v0 }
  0x97   : > { %1846 = vmatmul.mubr.msk.bf16.gmra.mrb[40].mxu0 %vm562_vm0, %v1926_v8 }
  0x98   : > { %753 = vmatprep.mubr.bf16.mxu0 %v1972_v0 }
  0x9a   : > { %1862 = vmatmul.mubr.msk.bf16.gmra.mrb[40].mxu1 %vm562_vm0, %v1926_v8  ;;  %v1189_v8 = vsel %vm1137_vm2, %v2311_v49, 0.0  ;;  %vm1663_vm2 = vcmask 1042434  }
  0x9b   : > { %946 = vmatprep.mubr.bf16.mxu1 %v1972_v0  ;;  %v2425_v23 = vadd.f32 %v1189_v8, %v1089_v7 }
  0x9f   : > { %1847 = vmatmul.mubr.msk.bf16.gmra.mrb[44].mxu0 %vm562_vm0, %v1927_v10 }
  0xa0   : > { %763 = vmatprep.mubr.bf16.mxu0 %v1972_v0 }
  0xa2   : > { %1863 = vmatmul.mubr.msk.bf16.gmra.mrb[44].mxu1 %vm562_vm0, %v1927_v10  ;;  %v1091_v10 = vsel %vm1039_vm3, %v2319_v31, 0.0  ;;  %vm1665_vm3 = vcmask 1043459  }
  0xa3   : > { %956 = vmatprep.mubr.bf16.mxu1 %v1972_v0 }
  0xa7   : > { %1848 = vmatmul.mubr.msk.bf16.gmra.mrb[48].mxu0 %vm562_vm0, %v1928_v11 }
  0xa8   : > { %773 = vmatprep.mubr.bf16.mxu0 %v1972_v0 }
  0xaa   : > { %1864 = vmatmul.mubr.msk.bf16.gmra.mrb[48].mxu1 %vm562_vm0, %v1928_v11 }
  0xab   : > { %966 = vmatprep.mubr.bf16.mxu1 %v1972_v0 }
  0xaf   : > { %1849 = vmatmul.mubr.msk.bf16.gmra.mrb[52].mxu0 %vm562_vm0, %v1929_v12 }
  0xb0   : > { %783 = vmatprep.mubr.bf16.mxu0 %v1972_v0 }
  0xb2   : > { %1865 = vmatmul.mubr.msk.bf16.gmra.mrb[52].mxu1 %vm562_vm0, %v1929_v12  ;;  %v1090_v12 = vsel %vm1038_vm5, %v2333_v51, 0.0  ;;  %vm1669_vm5 = vcmask 1045509  }
  0xb3   : > { %976 = vmatprep.mubr.bf16.mxu1 %v1972_v0 }
  0xb7   : > { %1850 = vmatmul.mubr.msk.bf16.gmra.mrb[56].mxu0 %vm562_vm0, %v1930_v14 }
  0xb8   : > { %793 = vmatprep.mubr.bf16.mxu0 %v1972_v0 }
  0xba   : > { %1866 = vmatmul.mubr.msk.bf16.gmra.mrb[56].mxu1 %vm562_vm0, %v1930_v14  ;;  %v1190_v14 = vsel %vm1138_vm6, %v2335_v55, 0.0  ;;  %vm1671_vm6 = vcmask 1046534  }
  0xbb   : > { %986 = vmatprep.mubr.bf16.mxu1 %v1972_v0  ;;  %v1108_v0 = vrot.slane %v2084_v39, %v1007_v18  ;;  %v2328_v39 = vrot.slane %v1012_v42, %v999_v17  ;;  %v2429_v24 = vadd.f32 %v1190_v14, %v1090_v12  ;;  %v1193_v42 = vsel %vm1141_vm10, %v2311_v49, 0.0 }
  0xbd   : > { %v2304_v35 = vrot.slane %v1108_v0, %v999_v17  ;;  %vm1032_vm7 = vcmp.eq.s32.totalorder %v2031_v6, %v2328_v39  ;;  %vm1036_vm15 = vcmp.eq.s32.totalorder %v2048_v20, %v2328_v39  ;;  %v2411_v17 = vadd.f32 %v1185_v1, %v1085_v62 }
  0xbe   : > { %v1084_v45 = vsel %vm1032_vm7, %v2346_v57, 0.0  ;;  %v1088_v4 = vsel %vm1036_vm15, %v2346_v57, 0.0  ;;  %vm1040_vm7 = vcmp.eq.s32.totalorder %v2055_v26, %v2328_v39  ;;  %vm1044_vm15 = vcmp.eq.s32.totalorder %v2063_v30, %v2328_v39 }
  0xbf   : > { %1851 = vmatmul.mubr.msk.bf16.gmra.mrb[60].mxu0 %vm562_vm0, %v1931_v15  ;;  %vm1131_vm4 = vcmp.eq.s32.totalorder %v2031_v6, %v2304_v35  ;;  %vm1135_vm12 = vcmp.eq.s32.totalorder %v2048_v20, %v2304_v35  ;;  %v1087_v6 = vsel %vm1035_vm11, %v2319_v31, 0.0  ;;  %vm1042_vm11 = vcmp.eq.s32.totalorder %v2063_v30, %v2313_v50 }
  0xc0   : > { %v1183_v58 = vsel %vm1131_vm4, %v2321_v52, 0.0  ;;  %vm1139_vm4 = vcmp.eq.s32.totalorder %v2055_v26, %v2304_v35  ;;  %v1092_v26 = vsel %vm1040_vm7, %v2346_v57, 0.0  ;;  %vm1143_vm14 = vcmp.eq.s32.totalorder %v2063_v30, %v2304_v35 }
  0xc1   : > { %v2363_v61 = vadd.f32 %v1183_v58, %v1083_v13  ;;  %v1191_v11 = vsel %vm1139_vm4, %v2321_v52, 0.0  ;;  %v2455_v13 = vadd.f32 %v1193_v42, %v1093_v28  ;;  %vm1667_vm4 = vcmask 1044484  }
  0xc2   : > { %1867 = vmatmul.mubr.msk.bf16.gmra.mrb[60].mxu1 %vm562_vm0, %v1931_v15  ;;  %vm1136_vm0 = vcmp.eq.s32.totalorder %v2048_v20, %v2337_v56  ;;  %v1187_v20 = vsel %vm1135_vm12, %v2321_v52, 0.0  ;;  %v2409_v15 = vadd.f32 %v1184_v63, %v1084_v45  ;;  %v2427_v0 = vadd.f32 %v1191_v11, %v1091_v10 }
  0xc3   : > { %v1188_v5 = vsel %vm1136_vm0, %v2351_v38, 0.0  ;;  %v2417_v19 = vadd.f32 %v1187_v20, %v1087_v6  ;;  %vm1142_vm12 = vcmp.eq.s32.totalorder %v2063_v30, %v2315_v36  ;;  %v1094_v36 = vsel %vm1042_vm11, %v2333_v51, 0.0 }
  0xc4   : > { %v2421_v21 = vadd.f32 %v1188_v5, %v1088_v4  ;;  %v1194_v49 = vsel %vm1142_vm12, %v2335_v55, 0.0  ;;  %vm1144_vm0 = vcmp.eq.s32.totalorder %v2063_v30, %v2337_v56  ;;  %v1095_v51 = vsel %vm1043_vm13, %v2319_v31, 0.0 }
  0xc5   : > { %v1195_v55 = vsel %vm1143_vm14, %v2321_v52, 0.0  ;;  %v2464_v53 = vadd.f32 %v1194_v49, %v1094_v36  ;;  %v1096_v45 = vsel %vm1044_vm15, %v2346_v57, 0.0  ;;  %v1196_v62 = vsel %vm1144_vm0, %v2351_v38, 0.0 }
  0xc6   : > { %v2472_v20 = vadd.f32 %v1192_v27, %v1092_v26  ;;  %v2475_v52 = vadd.f32 %v1195_v55, %v1095_v51  ;;  %v2478_v30 = vadd.f32 %v1196_v62, %v1096_v45  ;;  %vm1673_vm7 = vcmask 1047559  }
 0x11a   : > { %v645_v18 = vpop.f32.mrb[0].mxu0 }
 0x11b   : > { %v647_v22 = vpop.f32.mrb[1].mxu0  ;;  %v1213_v29 = vmul.f32 %v2361_v60, %v645_v18 }
 0x11c   : > { %v649_v25 = vpop.f32.mrb[2].mxu0  ;;  %v1214_v44 = vmul.f32 %v2367_v46, %v647_v22 }
 0x11d   : > { %v838_v32 = vpop.f32.mrb[0].mxu1  ;;  %v1217_v34 = vmul.f32 %v2411_v17, %v649_v25  ;;  %v651_v40 = vpop.f32.mrb[3].mxu0 }
 0x11e   : > { %v840_v47 = vpop.f32.mrb[1].mxu1  ;;  %v1218_v48 = vmul.f32 %v2419_v9, %v651_v40  ;;  %v1215_v37 = vmul.f32 %v2363_v61, %v838_v32 }
 0x11f   : > { %v1341_v33 = vadd.f32 %v1217_v34, %v1213_v29  ;;  %v842_v50 = vpop.f32.mrb[2].mxu1  ;;  %v1216_v35 = vmul.f32 %v2409_v15, %v840_v47 }
 0x120   : > { %v1219_v54 = vmul.f32 %v2417_v19, %v842_v50  ;;  %v1350_v16 = vadd.f32 %v1218_v48, %v1214_v44  ;;  %v844_v43 = vpop.f32.mrb[3].mxu1 }
 0x121   : > { %v1220_v58 = vmul.f32 %v2421_v21, %v844_v43 }
 0x122   : > { %v1359_v56 = vadd.f32 %v1219_v54, %v1215_v37  ;;  %v655_v59 = vpop.f32.mrb[4].mxu0 }
 0x123   : > { %v1368_v63 = vadd.f32 %v1220_v58, %v1216_v35  ;;  %v1221_v1 = vmul.f32 %v2425_v23, %v655_v59  ;;  %v657_v6 = vpop.f32.mrb[5].mxu0 }
 0x124   : > { %v1222_v41 = vmul.f32 %v2429_v24, %v657_v6  ;;  %v659_v31 = vpop.f32.mrb[6].mxu0 }
 0x125   : > { %v1342_v2 = vadd.f32 %v1341_v33, %v1221_v1  ;;  %v848_v3 = vpop.f32.mrb[4].mxu1  ;;  %v1225_v4 = vmul.f32 %v2455_v13, %v659_v31  ;;  %v661_v5 = vpop.f32.mrb[7].mxu0 }
 0x126   : > { %v1223_v39 = vmul.f32 %v2427_v0, %v848_v3  ;;  %v1351_v57 = vadd.f32 %v1350_v16, %v1222_v41  ;;  %v850_v38 = vpop.f32.mrb[5].mxu1  ;;  %v1226_v7 = vmul.f32 %v2464_v53, %v661_v5 }
 0x127   : > { %v1224_v8 = vmul.f32 %v2472_v20, %v850_v38  ;;  %v1343_v10 = vadd.f32 %v1342_v2, %v1225_v4  ;;  %v852_v11 = vpop.f32.mrb[6].mxu1 }
 0x128   : > { %v1360_v12 = vadd.f32 %v1359_v56, %v1223_v39  ;;  %v1227_v14 = vmul.f32 %v2475_v52, %v852_v11  ;;  %v1352_v18 = vadd.f32 %v1351_v57, %v1226_v7  ;;  %v854_v22 = vpop.f32.mrb[7].mxu1 }
 0x129   : > { %v1369_v26 = vadd.f32 %v1368_v63, %v1224_v8  ;;  %v1344_v25 = vrot.slane %v1343_v10, 4  ;;  %v1228_v27 = vmul.f32 %v2478_v30, %v854_v22 }
 0x12a   : > { %v1361_v28 = vadd.f32 %v1360_v12, %v1227_v14  ;;  %v1353_v29 = vrot.slane %v1352_v18, 4  ;;  %v665_v32 = vpop.f32.mrb[8].mxu0 }
 0x12b   : > { %v1345_v34 = vadd.f32 %v1344_v25, %v1343_v10  ;;  %v1370_v40 = vadd.f32 %v1369_v26, %v1228_v27  ;;  %v667_v42 = vpop.f32.mrb[9].mxu0  ;;  %v1229_v50 = vmul.f32 %v2361_v60, %v665_v32 }
 0x12c   : > { %v1362_v44 = vrot.slane %v1361_v28, 4  ;;  %v1354_v47 = vadd.f32 %v1353_v29, %v1352_v18  ;;  %v669_v48 = vpop.f32.mrb[10].mxu0  ;;  %v1230_v16 = vmul.f32 %v2367_v46, %v667_v42 }
 0x12d   : > { %v1371_v33 = vrot.slane %v1370_v40, 4  ;;  %v858_v36 = vpop.f32.mrb[8].mxu1  ;;  %v1233_v49 = vmul.f32 %v2411_v17, %v669_v48  ;;  %v671_v37 = vpop.f32.mrb[11].mxu0  ;;  %v1346_v54 = vrot.slane %v1345_v34, 2 }
 0x12e   : > { %v860_v43 = vpop.f32.mrb[9].mxu1  ;;  %v1234_v35 = vmul.f32 %v2419_v9, %v671_v37  ;;  %v1363_v58 = vadd.f32 %v1362_v44, %v1361_v28  ;;  %v1355_v51 = vrot.slane %v1354_v47, 2  ;;  %v1231_v45 = vmul.f32 %v2363_v61, %v858_v36 }
 0x12f   : > { %v1377_v55 = vadd.f32 %v1233_v49, %v1229_v50  ;;  %v862_v56 = vpop.f32.mrb[10].mxu1  ;;  %v1372_v59 = vadd.f32 %v1371_v33, %v1370_v40  ;;  %v1232_v6 = vmul.f32 %v2409_v15, %v860_v43  ;;  %v1347_v31 = vadd.f32 %v1346_v54, %v1345_v34 }
 0x130   : > { %v1235_v62 = vmul.f32 %v2417_v19, %v862_v56  ;;  %v1386_v63 = vadd.f32 %v1234_v35, %v1230_v16  ;;  %v864_v1 = vpop.f32.mrb[11].mxu1  ;;  %v1364_v4 = vrot.slane %v1363_v58, 2  ;;  %v1356_v5 = vadd.f32 %v1355_v51, %v1354_v47 }
 0x131   : > { %v1236_v41 = vmul.f32 %v2421_v21, %v864_v1  ;;  %v1373_v7 = vrot.slane %v1372_v59, 2  ;;  %v1348_v22 = vrot.slane %v1347_v31, 1 }
 0x132   : > { %v1395_v2 = vadd.f32 %v1235_v62, %v1231_v45  ;;  %v675_v3 = vpop.f32.mrb[12].mxu0  ;;  %v1365_v29 = vadd.f32 %v1364_v4, %v1363_v58  ;;  %v1357_v32 = vrot.slane %v1356_v5, 1 }
 0x133   : > { %v1404_v39 = vadd.f32 %v1236_v41, %v1232_v6  ;;  %v1237_v57 = vmul.f32 %v2425_v23, %v675_v3  ;;  %v677_v38 = vpop.f32.mrb[13].mxu0  ;;  %v1374_v44 = vadd.f32 %v1373_v7, %v1372_v59  ;;  %v1349_v35 = vadd.f32 %v1348_v22, %v1347_v31 }
 0x134   : > { %v1238_v8 = vmul.f32 %v2429_v24, %v677_v38  ;;  %v679_v10 = vpop.f32.mrb[14].mxu0  ;;  %v1366_v58 = vrot.slane %v1365_v29, 1  ;;  %v1358_v45 = vadd.f32 %v1357_v32, %v1356_v5 }
 0x135   : > { %v1378_v11 = vadd.f32 %v1377_v55, %v1237_v57  ;;  %v868_v12 = vpop.f32.mrb[12].mxu1  ;;  %v1241_v14 = vmul.f32 %v2455_v13, %v679_v10  ;;  %v681_v18 = vpop.f32.mrb[15].mxu0  ;;  %v1375_v59 = vrot.slane %v1374_v44, 1 }
 0x136   : > { %v1239_v26 = vmul.f32 %v2427_v0, %v868_v12  ;;  %v1387_v25 = vadd.f32 %v1386_v63, %v1238_v8  ;;  %v870_v27 = vpop.f32.mrb[13].mxu1  ;;  %v1242_v28 = vmul.f32 %v2464_v53, %v681_v18 }
 0x137   : > { %v1240_v34 = vmul.f32 %v2472_v20, %v870_v27  ;;  %v1379_v40 = vadd.f32 %v1378_v11, %v1241_v14  ;;  %v872_v42 = vpop.f32.mrb[14].mxu1 }
 0x138   : > { %v1396_v47 = vadd.f32 %v1395_v2, %v1239_v26  ;;  %v1243_v48 = vmul.f32 %v2475_v52, %v872_v42  ;;  %v1388_v33 = vadd.f32 %v1387_v25, %v1242_v28  ;;  %v874_v50 = vpop.f32.mrb[15].mxu1  ;;  %v1367_v42 = vadd.f32 %v1366_v58, %v1365_v29 }
 0x139   : > { %v1405_v36 = vadd.f32 %v1404_v39, %v1240_v34  ;;  %v1380_v49 = vrot.slane %v1379_v40, 4  ;;  %v1244_v37 = vmul.f32 %v2478_v30, %v874_v50 }
 0x13a   : > { %v1397_v54 = vadd.f32 %v1396_v47, %v1243_v48  ;;  %v1389_v16 = vrot.slane %v1388_v33, 4  ;;  %v685_v43 = vpop.f32.mrb[16].mxu0 }
 0x13b   : > { %v1381_v51 = vadd.f32 %v1380_v49, %v1379_v40  ;;  %v1406_v55 = vadd.f32 %v1405_v36, %v1244_v37  ;;  %v687_v56 = vpop.f32.mrb[17].mxu0  ;;  %v1245_v2 = vmul.f32 %v2361_v60, %v685_v43  ;;  %v1376_v43 = vadd.f32 %v1375_v59, %v1374_v44 }
 0x13c   : > { %v1398_v62 = vrot.slane %v1397_v54, 4  ;;  %v1390_v63 = vadd.f32 %v1389_v16, %v1388_v33  ;;  %v689_v1 = vpop.f32.mrb[18].mxu0  ;;  %v1246_v31 = vmul.f32 %v2367_v46, %v687_v56 }
 0x13d   : > { %v1382_v6 = vrot.slane %v1381_v51, 2  ;;  %v1407_v41 = vrot.slane %v1406_v55, 4  ;;  %v878_v3 = vpop.f32.mrb[16].mxu1  ;;  %v1249_v4 = vmul.f32 %v2411_v17, %v689_v1  ;;  %v691_v39 = vpop.f32.mrb[19].mxu0 }
 0x13e   : > { %v1399_v57 = vadd.f32 %v1398_v62, %v1397_v54  ;;  %v1391_v38 = vrot.slane %v1390_v63, 2  ;;  %v880_v7 = vpop.f32.mrb[17].mxu1  ;;  %v1250_v8 = vmul.f32 %v2419_v9, %v691_v39  ;;  %v1247_v11 = vmul.f32 %v2363_v61, %v878_v3 }
 0x13f   : > { %v1383_v5 = vadd.f32 %v1382_v6, %v1381_v51  ;;  %v1408_v10 = vadd.f32 %v1407_v41, %v1406_v55  ;;  %v1413_v12 = vadd.f32 %v1249_v4, %v1245_v2  ;;  %v882_v14 = vpop.f32.mrb[18].mxu1  ;;  %v1248_v34 = vmul.f32 %v2409_v15, %v880_v7 }
 0x140   : > { %v1400_v18 = vrot.slane %v1399_v57, 2  ;;  %v1392_v22 = vadd.f32 %v1391_v38, %v1390_v63  ;;  %v1251_v26 = vmul.f32 %v2417_v19, %v882_v14  ;;  %v1422_v25 = vadd.f32 %v1250_v8, %v1246_v31  ;;  %v884_v27 = vpop.f32.mrb[19].mxu1 }
 0x141   : > { %v1384_v28 = vrot.slane %v1383_v5, 1  ;;  %v1409_v32 = vrot.slane %v1408_v10, 2  ;;  %v1252_v40 = vmul.f32 %v2421_v21, %v884_v27 }
 0x142   : > { %v1401_v47 = vadd.f32 %v1400_v18, %v1399_v57  ;;  %v1393_v48 = vrot.slane %v1392_v22, 1  ;;  %v1431_v33 = vadd.f32 %v1251_v26, %v1247_v11  ;;  %v695_v50 = vpop.f32.mrb[20].mxu0 }
 0x143   : > { %v1385_v36 = vadd.f32 %v1384_v28, %v1383_v5  ;;  %v1410_v49 = vadd.f32 %v1409_v32, %v1408_v10  ;;  %v1440_v37 = vadd.f32 %v1252_v40, %v1248_v34  ;;  %v1253_v54 = vmul.f32 %v2425_v23, %v695_v50  ;;  %v697_v16 = vpop.f32.mrb[21].mxu0 }
 0x144   : > { %v1402_v51 = vrot.slane %v1401_v47, 1  ;;  %v1394_v55 = vadd.f32 %v1393_v48, %v1392_v22  ;;  %v1254_v56 = vmul.f32 %v2429_v24, %v697_v16  ;;  %v699_v62 = vpop.f32.mrb[22].mxu0 }
 0x145   : > { %v2512_v63 = vsel %vm1661_vm1, %v1385_v36, %v1349_v35  ;;  %v1411_v29 = vrot.slane %v1410_v49, 1  ;;  %v1414_v58 = vadd.f32 %v1413_v12, %v1253_v54  ;;  %v888_v1 = vpop.f32.mrb[20].mxu1  ;;  %v1257_v6 = vmul.f32 %v2455_v13, %v699_v62  ;;  %v701_v41 = vpop.f32.mrb[23].mxu0 }
 0x146   : > { %v1403_v2 = vadd.f32 %v1402_v51, %v1401_v47  ;;  %v2516_v3 = vsel %vm1661_vm1, %v1394_v55, %v1358_v45  ;;  %v1255_v44 = vmul.f32 %v2427_v0, %v888_v1  ;;  %v1423_v59 = vadd.f32 %v1422_v25, %v1254_v56  ;;  %v890_v4 = vpop.f32.mrb[21].mxu1 }
 0x147   : > { %v1412_v39 = vadd.f32 %v1411_v29, %v1410_v49  ;;  %v1256_v57 = vmul.f32 %v2472_v20, %v890_v4  ;;  %v1415_v38 = vadd.f32 %v1414_v58, %v1257_v6  ;;  %v892_v35 = vpop.f32.mrb[22].mxu1  ;;  %v1258_v31 = vmul.f32 %v2464_v53, %v701_v41 }
 0x148   : > { %v2522_v7 = vsel %vm1661_vm1, %v1403_v2, %v1367_v42  ;;  %v1432_v8 = vadd.f32 %v1431_v33, %v1255_v44  ;;  %v1259_v5 = vmul.f32 %v2475_v52, %v892_v35  ;;  %v894_v10 = vpop.f32.mrb[23].mxu1 }
 0x149   : > { %v2526_v45 = vsel %vm1661_vm1, %v1412_v39, %v1376_v43  ;;  %v1441_v11 = vadd.f32 %v1440_v37, %v1256_v57  ;;  %v1416_v12 = vrot.slane %v1415_v38, 4  ;;  %v1424_v14 = vadd.f32 %v1423_v59, %v1258_v31 }
 0x14a   : > { %v1433_v18 = vadd.f32 %v1432_v8, %v1259_v5  ;;  %v1260_v22 = vmul.f32 %v2478_v30, %v894_v10  ;;  %v705_v26 = vpop.f32.mrb[24].mxu0 }
 0x14b   : > { %v1417_v25 = vadd.f32 %v1416_v12, %v1415_v38  ;;  %v1425_v27 = vrot.slane %v1424_v14, 4  ;;  %v707_v28 = vpop.f32.mrb[25].mxu0  ;;  %v1261_v48 = vmul.f32 %v2361_v60, %v705_v26 }
 0x14c   : > { %v1434_v32 = vrot.slane %v1433_v18, 4  ;;  %v1442_v34 = vadd.f32 %v1441_v11, %v1260_v22  ;;  %v709_v40 = vpop.f32.mrb[26].mxu0  ;;  %v1262_v54 = vmul.f32 %v2367_v46, %v707_v28 }
 0x14d   : > { %v1418_v42 = vrot.slane %v1417_v25, 2  ;;  %v1426_v47 = vadd.f32 %v1425_v27, %v1424_v14  ;;  %v898_v33 = vpop.f32.mrb[24].mxu1  ;;  %v1265_v50 = vmul.f32 %v2411_v17, %v709_v40  ;;  %v711_v36 = vpop.f32.mrb[27].mxu0 }
 0x14e   : > { %v1435_v49 = vadd.f32 %v1434_v32, %v1433_v18  ;;  %v1443_v37 = vrot.slane %v1442_v34, 4  ;;  %v900_v16 = vpop.f32.mrb[25].mxu1  ;;  %v1266_v43 = vmul.f32 %v2419_v9, %v711_v36  ;;  %v1263_v56 = vmul.f32 %v2363_v61, %v898_v33 }
 0x14f   : > { %v1419_v51 = vadd.f32 %v1418_v42, %v1417_v25  ;;  %v1427_v55 = vrot.slane %v1426_v47, 2  ;;  %v1449_v62 = vadd.f32 %v1265_v50, %v1261_v48  ;;  %v902_v29 = vpop.f32.mrb[26].mxu1  ;;  %v1264_v4 = vmul.f32 %v2409_v15, %v900_v16 }
 0x150   : > { %v1436_v58 = vrot.slane %v1435_v49, 2  ;;  %v1444_v1 = vadd.f32 %v1443_v37, %v1442_v34  ;;  %v1267_v6 = vmul.f32 %v2417_v19, %v902_v29  ;;  %v1458_v41 = vadd.f32 %v1266_v43, %v1262_v54  ;;  %v904_v2 = vpop.f32.mrb[27].mxu1 }
 0x151   : > { %v1420_v44 = vrot.slane %v1419_v51, 1  ;;  %v1428_v59 = vadd.f32 %v1427_v55, %v1426_v47  ;;  %v1268_v39 = vmul.f32 %v2421_v21, %v904_v2 }
 0x152   : > { %v1437_v57 = vadd.f32 %v1436_v58, %v1435_v49  ;;  %v1445_v38 = vrot.slane %v1444_v1, 2  ;;  %v1467_v35 = vadd.f32 %v1267_v6, %v1263_v56  ;;  %v715_v31 = vpop.f32.mrb[28].mxu0 }
 0x153   : > { %v1421_v8 = vadd.f32 %v1420_v44, %v1419_v51  ;;  %v1429_v5 = vrot.slane %v1428_v59, 1  ;;  %v1476_v10 = vadd.f32 %v1268_v39, %v1264_v4  ;;  %v1269_v11 = vmul.f32 %v2425_v23, %v715_v31  ;;  %v717_v12 = vpop.f32.mrb[29].mxu0 }
 0x154   : > { %v1438_v14 = vrot.slane %v1437_v57, 1  ;;  %v1446_v18 = vadd.f32 %v1445_v38, %v1444_v1  ;;  %v1270_v22 = vmul.f32 %v2429_v24, %v717_v12  ;;  %v719_v26 = vpop.f32.mrb[30].mxu0 }
 0x155   : > { %v2541_v25 = vsel %vm1663_vm2, %v1421_v8, %v2512_v63  ;;  %v1430_v27 = vadd.f32 %v1429_v5, %v1428_v59  ;;  %v1450_v28 = vadd.f32 %v1449_v62, %v1269_v11  ;;  %v908_v32 = vpop.f32.mrb[28].mxu1  ;;  %v1273_v34 = vmul.f32 %v2455_v13, %v719_v26  ;;  %v721_v40 = vpop.f32.mrb[31].mxu0 }
 0x156   : > { %v1439_v42 = vadd.f32 %v1438_v14, %v1437_v57  ;;  %v1447_v47 = vrot.slane %v1446_v18, 1  ;;  %v1271_v48 = vmul.f32 %v2427_v0, %v908_v32  ;;  %v1459_v33 = vadd.f32 %v1458_v41, %v1270_v22  ;;  %v910_v50 = vpop.f32.mrb[29].mxu1 }
 0x157   : > { %v2547_v36 = vsel %vm1663_vm2, %v1430_v27, %v2516_v3  ;;  %v1272_v49 = vmul.f32 %v2472_v20, %v910_v50  ;;  %v1451_v63 = vadd.f32 %v1450_v28, %v1273_v34  ;;  %v912_v37 = vpop.f32.mrb[30].mxu1  ;;  %v1274_v54 = vmul.f32 %v2464_v53, %v721_v40 }
 0x158   : > { %v2553_v16 = vsel %vm1663_vm2, %v1439_v42, %v2522_v7  ;;  %v1448_v43 = vadd.f32 %v1447_v47, %v1446_v18  ;;  %v1468_v51 = vadd.f32 %v1467_v35, %v1271_v48  ;;  %v1275_v55 = vmul.f32 %v2475_v52, %v912_v37  ;;  %v914_v56 = vpop.f32.mrb[31].mxu1 }
 0x159   : > { %v1477_v62 = vadd.f32 %v1476_v10, %v1272_v49  ;;  %v1452_v29 = vrot.slane %v1451_v63, 4  ;;  %v1460_v58 = vadd.f32 %v1459_v33, %v1274_v54  ;;  %v1276_v3 = vmul.f32 %v2478_v30, %v914_v56 }
 0x15a   : > { %v2559_v1 = vsel %vm1663_vm2, %v1448_v43, %v2526_v45  ;;  %v1469_v6 = vadd.f32 %v1468_v51, %v1275_v55  ;;  %v725_v41 = vpop.f32.mrb[32].mxu0 }
 0x15b   : > { %v1453_v2 = vadd.f32 %v1452_v29, %v1451_v63  ;;  %v1461_v44 = vrot.slane %v1460_v58, 4  ;;  %v1478_v7 = vadd.f32 %v1477_v62, %v1276_v3  ;;  %v727_v59 = vpop.f32.mrb[33].mxu0  ;;  %v1277_v39 = vmul.f32 %v2361_v60, %v725_v41 }
 0x15c   : > { %v1470_v4 = vrot.slane %v1469_v6, 4  ;;  %v729_v57 = vpop.f32.mrb[34].mxu0  ;;  %v1278_v12 = vmul.f32 %v2367_v46, %v727_v59 }
 0x15d   : > { %v1454_v38 = vrot.slane %v1453_v2, 2  ;;  %v1462_v35 = vadd.f32 %v1461_v44, %v1460_v58  ;;  %v1479_v31 = vrot.slane %v1478_v7, 4  ;;  %v918_v8 = vpop.f32.mrb[32].mxu1  ;;  %v1281_v5 = vmul.f32 %v2411_v17, %v729_v57  ;;  %v731_v10 = vpop.f32.mrb[35].mxu0 }
 0x15e   : > { %v1471_v11 = vadd.f32 %v1470_v4, %v1469_v6  ;;  %v1279_v45 = vmul.f32 %v2363_v61, %v918_v8  ;;  %v920_v14 = vpop.f32.mrb[33].mxu1  ;;  %v1282_v18 = vmul.f32 %v2419_v9, %v731_v10 }
 0x15f   : > { %v1455_v22 = vadd.f32 %v1454_v38, %v1453_v2  ;;  %v1463_v26 = vrot.slane %v1462_v35, 2  ;;  %v1480_v27 = vadd.f32 %v1479_v31, %v1478_v7  ;;  %v1280_v28 = vmul.f32 %v2409_v15, %v920_v14  ;;  %v922_v32 = vpop.f32.mrb[34].mxu1 }
 0x160   : > { %v1472_v34 = vrot.slane %v1471_v11, 2  ;;  %v1485_v40 = vadd.f32 %v1281_v5, %v1277_v39  ;;  %v1283_v42 = vmul.f32 %v2417_v19, %v922_v32  ;;  %v1494_v47 = vadd.f32 %v1282_v18, %v1278_v12  ;;  %v924_v48 = vpop.f32.mrb[35].mxu1 }
 0x161   : > { %v1456_v33 = vrot.slane %v1455_v22, 1  ;;  %v1464_v50 = vadd.f32 %v1463_v26, %v1462_v35  ;;  %v1481_v49 = vrot.slane %v1480_v27, 2  ;;  %v1284_v63 = vmul.f32 %v2421_v21, %v924_v48 }
 0x162   : > { %v1473_v37 = vadd.f32 %v1472_v34, %v1471_v11  ;;  %v1503_v54 = vadd.f32 %v1283_v42, %v1279_v45  ;;  %v735_v43 = vpop.f32.mrb[36].mxu0 }
 0x163   : > { %v1457_v51 = vadd.f32 %v1456_v33, %v1455_v22  ;;  %v1465_v55 = vrot.slane %v1464_v50, 1  ;;  %v1482_v56 = vadd.f32 %v1481_v49, %v1480_v27  ;;  %v1512_v62 = vadd.f32 %v1284_v63, %v1280_v28  ;;  %v737_v29 = vpop.f32.mrb[37].mxu0 }
 0x164   : > { %v1474_v58 = vrot.slane %v1473_v37, 1  ;;  %v1285_v3 = vmul.f32 %v2425_v23, %v735_v43  ;;  %v1286_v6 = vmul.f32 %v2429_v24, %v737_v29  ;;  %v739_v41 = vpop.f32.mrb[38].mxu0 }
 0x165   : > { %v2573_v2 = vsel %vm1665_vm3, %v1457_v51, %v2541_v25  ;;  %v1466_v44 = vadd.f32 %v1465_v55, %v1464_v50  ;;  %v1483_v7 = vrot.slane %v1482_v56, 1  ;;  %v928_v59 = vpop.f32.mrb[36].mxu1  ;;  %v1289_v4 = vmul.f32 %v2455_v13, %v739_v41  ;;  %v741_v39 = vpop.f32.mrb[39].mxu0 }
 0x166   : > { %v1475_v57 = vadd.f32 %v1474_v58, %v1473_v37  ;;  %v1486_v38 = vadd.f32 %v1485_v40, %v1285_v3  ;;  %v1287_v35 = vmul.f32 %v2427_v0, %v928_v59  ;;  %v1495_v31 = vadd.f32 %v1494_v47, %v1286_v6  ;;  %v930_v8 = vpop.f32.mrb[37].mxu1 }
 0x167   : > { %v2579_v5 = vsel %vm1665_vm3, %v1466_v44, %v2547_v36  ;;  %v1484_v10 = vadd.f32 %v1483_v7, %v1482_v56  ;;  %v1288_v25 = vmul.f32 %v2472_v20, %v930_v8  ;;  %v932_v11 = vpop.f32.mrb[38].mxu1  ;;  %v1290_v45 = vmul.f32 %v2464_v53, %v741_v39 }
 0x168   : > { %v2585_v12 = vsel %vm1665_vm3, %v1475_v57, %v2553_v16  ;;  %v1504_v14 = vadd.f32 %v1503_v54, %v1287_v35  ;;  %v1487_v18 = vadd.f32 %v1486_v38, %v1289_v4  ;;  %v1291_v22 = vmul.f32 %v2475_v52, %v932_v11  ;;  %v934_v26 = vpop.f32.mrb[39].mxu1 }
 0x169   : > { %v2590_v27 = vsel %vm1665_vm3, %v1484_v10, %v2559_v1  ;;  %v1513_v36 = vadd.f32 %v1512_v62, %v1288_v25  ;;  %v1496_v28 = vadd.f32 %v1495_v31, %v1290_v45  ;;  %v1292_v32 = vmul.f32 %v2478_v30, %v934_v26 }
 0x16a   : > { %v1488_v34 = vrot.slane %v1487_v18, 4  ;;  %v1505_v40 = vadd.f32 %v1504_v14, %v1291_v22  ;;  %v745_v42 = vpop.f32.mrb[40].mxu0 }
 0x16b   : > { %v1497_v47 = vrot.slane %v1496_v28, 4  ;;  %v1514_v48 = vadd.f32 %v1513_v36, %v1292_v32  ;;  %v747_v16 = vpop.f32.mrb[41].mxu0  ;;  %v1293_v54 = vmul.f32 %v2361_v60, %v745_v42 }
 0x16c   : > { %v1489_v33 = vadd.f32 %v1488_v34, %v1487_v18  ;;  %v1506_v50 = vrot.slane %v1505_v40, 4  ;;  %v749_v49 = vpop.f32.mrb[42].mxu0  ;;  %v1294_v62 = vmul.f32 %v2367_v46, %v747_v16 }
 0x16d   : > { %v1498_v63 = vadd.f32 %v1497_v47, %v1496_v28  ;;  %v1515_v37 = vrot.slane %v1514_v48, 4  ;;  %v938_v43 = vpop.f32.mrb[40].mxu1  ;;  %v1297_v1 = vmul.f32 %v2411_v17, %v749_v49  ;;  %v751_v51 = vpop.f32.mrb[43].mxu0 }
 0x16e   : > { %v1490_v55 = vrot.slane %v1489_v33, 2  ;;  %v1507_v56 = vadd.f32 %v1506_v50, %v1505_v40  ;;  %v940_v29 = vpop.f32.mrb[41].mxu1  ;;  %v1298_v58 = vmul.f32 %v2419_v9, %v751_v51  ;;  %v1295_v41 = vmul.f32 %v2363_v61, %v938_v43 }
 0x16f   : > { %v1499_v3 = vrot.slane %v1498_v63, 2  ;;  %v1516_v6 = vadd.f32 %v1515_v37, %v1514_v48  ;;  %v1521_v44 = vadd.f32 %v1297_v1, %v1293_v54  ;;  %v942_v7 = vpop.f32.mrb[42].mxu1  ;;  %v1296_v8 = vmul.f32 %v2409_v15, %v940_v29 }
 0x170   : > { %v1491_v59 = vadd.f32 %v1490_v55, %v1489_v33  ;;  %v1508_v4 = vrot.slane %v1507_v56, 2  ;;  %v1299_v39 = vmul.f32 %v2417_v19, %v942_v7  ;;  %v1530_v57 = vadd.f32 %v1298_v58, %v1294_v62  ;;  %v944_v38 = vpop.f32.mrb[43].mxu1 }
 0x171   : > { %v1500_v35 = vadd.f32 %v1499_v3, %v1498_v63  ;;  %v1517_v31 = vrot.slane %v1516_v6, 2  ;;  %v1300_v10 = vmul.f32 %v2421_v21, %v944_v38 }
 0x172   : > { %v1492_v25 = vrot.slane %v1491_v59, 1  ;;  %v1509_v11 = vadd.f32 %v1508_v4, %v1507_v56  ;;  %v1539_v45 = vadd.f32 %v1299_v39, %v1295_v41  ;;  %v755_v14 = vpop.f32.mrb[44].mxu0 }
 0x173   : > { %v1501_v18 = vrot.slane %v1500_v35, 1  ;;  %v1518_v22 = vadd.f32 %v1517_v31, %v1516_v6  ;;  %v1548_v26 = vadd.f32 %v1300_v10, %v1296_v8  ;;  %v1301_v36 = vmul.f32 %v2425_v23, %v755_v14  ;;  %v757_v28 = vpop.f32.mrb[45].mxu0 }
 0x174   : > { %v1493_v32 = vadd.f32 %v1492_v25, %v1491_v59  ;;  %v1510_v34 = vrot.slane %v1509_v11, 1  ;;  %v1302_v40 = vmul.f32 %v2429_v24, %v757_v28  ;;  %v759_v42 = vpop.f32.mrb[46].mxu0 }
 0x175   : > { %v1502_v47 = vadd.f32 %v1501_v18, %v1500_v35  ;;  %v1519_v48 = vrot.slane %v1518_v22, 1  ;;  %v1522_v16 = vadd.f32 %v1521_v44, %v1301_v36  ;;  %v948_v33 = vpop.f32.mrb[44].mxu1  ;;  %v1305_v50 = vmul.f32 %v2455_v13, %v759_v42  ;;  %v761_v49 = vpop.f32.mrb[47].mxu0 }
 0x176   : > { %v2606_v63 = vsel %vm1667_vm4, %v1493_v32, %v2573_v2  ;;  %v1511_v37 = vadd.f32 %v1510_v34, %v1509_v11  ;;  %v1303_v54 = vmul.f32 %v2427_v0, %v948_v33  ;;  %v1531_v43 = vadd.f32 %v1530_v57, %v1302_v40  ;;  %v950_v1 = vpop.f32.mrb[45].mxu1 }
 0x177   : > { %v2611_v51 = vsel %vm1667_vm4, %v1502_v47, %v2579_v5  ;;  %v1520_v55 = vadd.f32 %v1519_v48, %v1518_v22  ;;  %v1304_v56 = vmul.f32 %v2472_v20, %v950_v1  ;;  %v1523_v62 = vadd.f32 %v1522_v16, %v1305_v50  ;;  %v952_v29 = vpop.f32.mrb[46].mxu1 }
 0x178   : > { %v2616_v58 = vsel %vm1667_vm4, %v1511_v37, %v2585_v12  ;;  %v1540_v2 = vadd.f32 %v1539_v45, %v1303_v54  ;;  %v1307_v3 = vmul.f32 %v2475_v52, %v952_v29  ;;  %v1306_v6 = vmul.f32 %v2464_v53, %v761_v49  ;;  %v954_v41 = vpop.f32.mrb[47].mxu1 }
 0x179   : > { %v2622_v44 = vsel %vm1667_vm4, %v1520_v55, %v2590_v27  ;;  %v1549_v5 = vadd.f32 %v1548_v26, %v1304_v56  ;;  %v1524_v7 = vrot.slane %v1523_v62, 4  ;;  %v1308_v59 = vmul.f32 %v2478_v30, %v954_v41 }
 0x17a   : > { %v1541_v4 = vadd.f32 %v1540_v2, %v1307_v3  ;;  %v1532_v39 = vadd.f32 %v1531_v43, %v1306_v6  ;;  %v765_v57 = vpop.f32.mrb[48].mxu0 }
 0x17b   : > { %v1525_v38 = vadd.f32 %v1524_v7, %v1523_v62  ;;  %v1550_v12 = vadd.f32 %v1549_v5, %v1308_v59  ;;  %v767_v35 = vpop.f32.mrb[49].mxu0  ;;  %v1309_v45 = vmul.f32 %v2361_v60, %v765_v57 }
 0x17c   : > { %v1542_v31 = vrot.slane %v1541_v4, 4  ;;  %v1533_v8 = vrot.slane %v1532_v39, 4  ;;  %v769_v10 = vpop.f32.mrb[50].mxu0  ;;  %v1310_v36 = vmul.f32 %v2367_v46, %v767_v35 }
 0x17d   : > { %v1526_v25 = vrot.slane %v1525_v38, 2  ;;  %v1551_v11 = vrot.slane %v1550_v12, 4  ;;  %v958_v14 = vpop.f32.mrb[48].mxu1  ;;  %v1313_v27 = vmul.f32 %v2411_v17, %v769_v10  ;;  %v771_v18 = vpop.f32.mrb[51].mxu0 }
 0x17e   : > { %v1543_v22 = vadd.f32 %v1542_v31, %v1541_v4  ;;  %v1534_v26 = vadd.f32 %v1533_v8, %v1532_v39  ;;  %v960_v28 = vpop.f32.mrb[49].mxu1  ;;  %v1314_v32 = vmul.f32 %v2419_v9, %v771_v18  ;;  %v1311_v42 = vmul.f32 %v2363_v61, %v958_v14 }
 0x17f   : > { %v1527_v34 = vadd.f32 %v1526_v25, %v1525_v38  ;;  %v1552_v40 = vadd.f32 %v1551_v11, %v1550_v12  ;;  %v1557_v47 = vadd.f32 %v1313_v27, %v1309_v45  ;;  %v962_v48 = vpop.f32.mrb[50].mxu1  ;;  %v1312_v1 = vmul.f32 %v2409_v15, %v960_v28 }
 0x180   : > { %v1544_v16 = vrot.slane %v1543_v22, 2  ;;  %v1535_v33 = vrot.slane %v1534_v26, 2  ;;  %v1315_v50 = vmul.f32 %v2417_v19, %v962_v48  ;;  %v1566_v49 = vadd.f32 %v1314_v32, %v1310_v36  ;;  %v964_v37 = vpop.f32.mrb[51].mxu1 }
 0x181   : > { %v1528_v54 = vrot.slane %v1527_v34, 1  ;;  %v1553_v43 = vrot.slane %v1552_v40, 2  ;;  %v1316_v55 = vmul.f32 %v2421_v21, %v964_v37 }
 0x182   : > { %v1545_v56 = vadd.f32 %v1544_v16, %v1543_v22  ;;  %v1536_v62 = vadd.f32 %v1535_v33, %v1534_v26  ;;  %v1575_v29 = vadd.f32 %v1315_v50, %v1311_v42  ;;  %v775_v2 = vpop.f32.mrb[52].mxu0 }
 0x183   : > { %v1529_v3 = vadd.f32 %v1528_v54, %v1527_v34  ;;  %v1554_v6 = vadd.f32 %v1553_v43, %v1552_v40  ;;  %v1584_v41 = vadd.f32 %v1316_v55, %v1312_v1  ;;  %v1317_v5 = vmul.f32 %v2425_v23, %v775_v2  ;;  %v777_v7 = vpop.f32.mrb[53].mxu0 }
 0x184   : > { %v1546_v59 = vrot.slane %v1545_v56, 1  ;;  %v1537_v4 = vrot.slane %v1536_v62, 1  ;;  %v1318_v39 = vmul.f32 %v2429_v24, %v777_v7  ;;  %v779_v57 = vpop.f32.mrb[54].mxu0 }
 0x185   : > { %v2637_v38 = vsel %vm1669_vm5, %v1529_v3, %v2606_v63  ;;  %v1555_v12 = vrot.slane %v1554_v6, 1  ;;  %v1558_v35 = vadd.f32 %v1557_v47, %v1317_v5  ;;  %v968_v31 = vpop.f32.mrb[52].mxu1  ;;  %v1321_v8 = vmul.f32 %v2455_v13, %v779_v57  ;;  %v781_v10 = vpop.f32.mrb[55].mxu0 }
 0x186   : > { %v1547_v25 = vadd.f32 %v1546_v59, %v1545_v56  ;;  %v1538_v11 = vadd.f32 %v1537_v4, %v1536_v62  ;;  %v1319_v45 = vmul.f32 %v2427_v0, %v968_v31  ;;  %v1567_v14 = vadd.f32 %v1566_v49, %v1318_v39  ;;  %v970_v27 = vpop.f32.mrb[53].mxu1 }
 0x187   : > { %v1556_v18 = vadd.f32 %v1555_v12, %v1554_v6  ;;  %v1320_v22 = vmul.f32 %v2472_v20, %v970_v27  ;;  %v1559_v26 = vadd.f32 %v1558_v35, %v1321_v8  ;;  %v972_v36 = vpop.f32.mrb[54].mxu1  ;;  %v1322_v63 = vmul.f32 %v2464_v53, %v781_v10 }
 0x188   : > { %v2645_v28 = vsel %vm1669_vm5, %v1547_v25, %v2616_v58  ;;  %v2649_v32 = vsel %vm1669_vm5, %v1538_v11, %v2611_v51  ;;  %v1576_v34 = vadd.f32 %v1575_v29, %v1319_v45  ;;  %v1323_v40 = vmul.f32 %v2475_v52, %v972_v36  ;;  %v974_v42 = vpop.f32.mrb[55].mxu1 }
 0x189   : > { %v2654_v47 = vsel %vm1669_vm5, %v1556_v18, %v2622_v44  ;;  %v1585_v48 = vadd.f32 %v1584_v41, %v1320_v22  ;;  %v1560_v16 = vrot.slane %v1559_v26, 4  ;;  %v1568_v33 = vadd.f32 %v1567_v14, %v1322_v63 }
 0x18a   : > { %v1577_v50 = vadd.f32 %v1576_v34, %v1323_v40  ;;  %v1324_v49 = vmul.f32 %v2478_v30, %v974_v42  ;;  %v785_v58 = vpop.f32.mrb[56].mxu0 }
 0x18b   : > { %v1561_v37 = vadd.f32 %v1560_v16, %v1559_v26  ;;  %v1569_v54 = vrot.slane %v1568_v33, 4  ;;  %v787_v43 = vpop.f32.mrb[57].mxu0  ;;  %v1325_v29 = vmul.f32 %v2361_v60, %v785_v58 }
 0x18c   : > { %v1578_v51 = vrot.slane %v1577_v50, 4  ;;  %v1586_v1 = vadd.f32 %v1585_v48, %v1324_v49  ;;  %v789_v55 = vpop.f32.mrb[58].mxu0  ;;  %v1326_v5 = vmul.f32 %v2367_v46, %v787_v43 }
 0x18d   : > { %v1562_v56 = vrot.slane %v1561_v37, 2  ;;  %v1570_v62 = vadd.f32 %v1569_v54, %v1568_v33  ;;  %v978_v2 = vpop.f32.mrb[56].mxu1  ;;  %v1329_v44 = vmul.f32 %v2411_v17, %v789_v55  ;;  %v791_v3 = vpop.f32.mrb[59].mxu0 }
 0x18e   : > { %v1579_v6 = vadd.f32 %v1578_v51, %v1577_v50  ;;  %v1587_v41 = vrot.slane %v1586_v1, 4  ;;  %v980_v7 = vpop.f32.mrb[57].mxu1  ;;  %v1330_v59 = vmul.f32 %v2419_v9, %v791_v3  ;;  %v1327_v57 = vmul.f32 %v2363_v61, %v978_v2 }
 0x18f   : > { %v1563_v4 = vadd.f32 %v1562_v56, %v1561_v37  ;;  %v1571_v39 = vrot.slane %v1570_v62, 2  ;;  %v1593_v12 = vadd.f32 %v1329_v44, %v1325_v29  ;;  %v982_v35 = vpop.f32.mrb[58].mxu1  ;;  %v1328_v45 = vmul.f32 %v2409_v15, %v980_v7 }
 0x190   : > { %v1580_v31 = vrot.slane %v1579_v6, 2  ;;  %v1588_v8 = vadd.f32 %v1587_v41, %v1586_v1  ;;  %v1331_v60 = vmul.f32 %v2417_v19, %v982_v35  ;;  %v1602_v10 = vadd.f32 %v1330_v59, %v1326_v5  ;;  %v984_v17 = vpop.f32.mrb[59].mxu1 }
 0x191   : > { %v1564_v25 = vrot.slane %v1563_v4, 1  ;;  %v1572_v11 = vadd.f32 %v1571_v39, %v1570_v62  ;;  %v1332_v46 = vmul.f32 %v2421_v21, %v984_v17 }
 0x192   : > { %v1581_v9 = vadd.f32 %v1580_v31, %v1579_v6  ;;  %v1589_v14 = vrot.slane %v1588_v8, 2  ;;  %v1611_v27 = vadd.f32 %v1331_v60, %v1327_v57  ;;  %v795_v18 = vpop.f32.mrb[60].mxu0 }
 0x193   : > { %v1565_v61 = vadd.f32 %v1564_v25, %v1563_v4  ;;  %v1573_v22 = vrot.slane %v1572_v11, 1  ;;  %v1620_v26 = vadd.f32 %v1332_v46, %v1328_v45  ;;  %v1333_v36 = vmul.f32 %v2425_v23, %v795_v18  ;;  %v797_v63 = vpop.f32.mrb[61].mxu0 }
 0x194   : > { %v1582_v19 = vrot.slane %v1581_v9, 1  ;;  %v1590_v34 = vadd.f32 %v1589_v14, %v1588_v8  ;;  %v1334_v40 = vmul.f32 %v2429_v24, %v797_v63  ;;  %v799_v42 = vpop.f32.mrb[62].mxu0 }
 0x195   : > { %v1672_v15 = vsel %vm1671_vm6, %v1565_v61, %v2637_v38  ;;  %v1574_v21 = vadd.f32 %v1573_v22, %v1572_v11  ;;  %v1594_v48 = vadd.f32 %v1593_v12, %v1333_v36  ;;  %v988_v16 = vpop.f32.mrb[60].mxu1  ;;  %v1337_v33 = vmul.f32 %v2455_v13, %v799_v42  ;;  %v801_v50 = vpop.f32.mrb[63].mxu0 }
 0x196   : > { %v1583_v49 = vadd.f32 %v1582_v19, %v1581_v9  ;;  %v1591_v58 = vrot.slane %v1590_v34, 1  ;;  %v1335_v37 = vmul.f32 %v2427_v0, %v988_v16  ;;  %v1603_v23 = vadd.f32 %v1602_v10, %v1334_v40  ;;  %v990_v54 = vpop.f32.mrb[61].mxu1 }
 0x197   : > { %v1680_v43 = vsel %vm1671_vm6, %v1574_v21, %v2649_v32  ;;  %v1336_v24 = vmul.f32 %v2472_v20, %v990_v54  ;;  %v1595_v51 = vadd.f32 %v1594_v48, %v1337_v33  ;;  %v992_v1 = vpop.f32.mrb[62].mxu1  ;;  %v1338_v38 = vmul.f32 %v2464_v53, %v801_v50 }
 0x198   : > { %v1687_v55 = vsel %vm1671_vm6, %v1583_v49, %v2645_v28  ;;  %v1592_v13 = vadd.f32 %v1591_v58, %v1590_v34  ;;  %v1612_v56 = vadd.f32 %v1611_v27, %v1335_v37  ;;  %v1339_v62 = vmul.f32 %v2475_v52, %v992_v1  ;;  %v994_v29 = vpop.f32.mrb[63].mxu1 }
 0x199   : > { %v1621_v0 = vadd.f32 %v1620_v26, %v1336_v24  ;;  %v1596_v2 = vrot.slane %v1595_v51, 4  ;;  %v1604_v44 = vadd.f32 %v1603_v23, %v1338_v38  ;;  %v1340_v32 = vmul.f32 %v2478_v30, %v994_v29 }
 0x19a   : > { %v1694_v20 = vsel %vm1671_vm6, %v1592_v13, %v2654_v47  ;;  %v1613_v3 = vadd.f32 %v1612_v56, %v1339_v62 }
 0x19b   : > { %v1597_v6 = vadd.f32 %v1596_v2, %v1595_v51  ;;  %v1605_v53 = vrot.slane %v1604_v44, 4  ;;  %v1622_v41 = vadd.f32 %v1621_v0, %v1340_v32 }
 0x19c   : > { %v1614_v5 = vrot.slane %v1613_v3, 4 }
 0x19d   : > { %v1598_v28 = vrot.slane %v1597_v6, 2  ;;  %v1606_v7 = vadd.f32 %v1605_v53, %v1604_v44  ;;  %v1623_v59 = vrot.slane %v1622_v41, 4 }
 0x19e   : > { %v1615_v4 = vadd.f32 %v1614_v5, %v1613_v3 }
 0x19f   : > { %v1599_v52 = vadd.f32 %v1598_v28, %v1597_v6  ;;  %v1607_v39 = vrot.slane %v1606_v7, 2  ;;  %v1624_v57 = vadd.f32 %v1623_v59, %v1622_v41 }
 0x1a0   : > { %v1616_v12 = vrot.slane %v1615_v4, 2 }
 0x1a1   : > { %v1600_v35 = vrot.slane %v1599_v52, 1  ;;  %v1608_v31 = vadd.f32 %v1607_v39, %v1606_v7  ;;  %v1625_v30 = vrot.slane %v1624_v57, 2 }
 0x1a2   : > { %v1617_v8 = vadd.f32 %v1616_v12, %v1615_v4 }
 0x1a3   : > { %v1601_v47 = vadd.f32 %v1600_v35, %v1599_v52  ;;  %v1609_v60 = vrot.slane %v1608_v31, 1  ;;  %v1626_v10 = vadd.f32 %v1625_v30, %v1624_v57 }
 0x1a4   : > { %v1618_v17 = vrot.slane %v1617_v8, 1 }
 0x1a5   : > { %v1674_v25 = vsel %vm1673_vm7, %v1601_v47, %v1672_v15  ;;  %v1610_v11 = vadd.f32 %v1609_v60, %v1608_v31  ;;  %v1627_v45 = vrot.slane %v1626_v10, 1 }
 0x1a6   : > { %1700 = vst [vmem:[%s201_s30] sm:$0xff] %v1674_v25  ;;  %v1619_v46 = vadd.f32 %v1618_v17, %v1617_v8 }
 0x1a7   : > { %v1681_v9 = vsel %vm1673_vm7, %v1610_v11, %v1680_v43  ;;  %v1628_v14 = vadd.f32 %v1627_v45, %v1626_v10 }
 0x1a8   : > { %v1688_v27 = vsel %vm1673_vm7, %v1619_v46, %v1687_v55  ;;  %1701 = vst [vmem:[%s201_s30 + $0x8] sm:$0xff] %v1681_v9 }
 0x1a9   : > { %1702 = vst [vmem:[%s201_s30 + $0x10] sm:$0xff] %v1688_v27  ;;  %v1695_v18 = vsel %vm1673_vm7, %v1628_v14, %v1694_v20 }
 0x1aa   : > { %1703 = vst [vmem:[%s201_s30 + $0x18] sm:$0xff] %v1695_v18 }
 0x1ab PF: > { %s12_s13 = sadd.s32 1, %s1970_s13   ;;  %s2707_s9 = smov %s1962_s11 }
 0x1ac   : > { %p9_p7 = scmp.ge.s32.totalorder %s12_s13, 6   ;;  %s2708_s10 = smov %s1966_s12 }
 0x1ad   : > { %s2709_s11 = smov %s2712_s14  ;;  %s2710_s12 = smov %s2716_s15 }
 0x1ae   :  { %11 = sbr.rel (!%p9_p7) target bundleno = 3 (0x3), region = 61 }

// kernel: flowgen_forward.15
= control target key start
LH: loop header
LB: loop body
LE: loop exit
PB: predicated region body
PF: predicated region fallthrough
CT: control target
= control target key end

     0   :  { %s2950_s12 = smov 0   ;;  %s3512_s0 = inlined_call_operand.vmem [shape: bf16[2048,63], index: 0, kind: input, shape index: {}]   ;;  %s3513_s1 = inlined_call_operand.vmem [shape: bf16[63,16], index: 1, kind: input, shape index: {}]   ;;  %s3514_s2 = inlined_call_operand.vmem [shape: f32[1,16], index: 2, kind: input, shape index: {}]   ;;  %s3515_s3 = inlined_call_operand.vmem [shape: bf16[2048,16], index: 3, kind: output, shape index: {}]  }
   0x1 LB: > { %s2231_s13 = sadd.s32 4294967295, %s2927_s12   ;;  %p2235_p0 = scmp.ge.s32.totalorder %s2927_s12, 1  ;;  %s2927_s12 = sphi %s2950_s12, %s13_s12  }
   0x2   : > { %p138_p1 = scmp.lt.s32.totalorder %s2927_s12, 3 }
   0x4   : > { %p139_p2 = pnand %p2235_p0, %p138_p1 }
   0x5   : > { %v2852_v0 = vld [vmem:[%s3513_s1] sm:$0xff] (!%p139_p2)   ;;  %vm854_vm0 = vcmask (!%p139_p2), 1046528   ;;  %v2853_v1 = vld [vmem:[%s3513_s1 + $0x8] sm:$0xff] (!%p139_p2)   ;;  %vm855_vm1 = vcmask (!%p139_p2), 1047552   ;;  %v2929_v2 = vmov (!%p139_p2), 65535   ;;  %v2854_v4 = vld [vmem:[%s3513_s1 + $0x10] sm:$0xff] (!%p139_p2)  }
   0x6   : > { %142 = sbr.rel (%p139_p2) target bundleno = 364 (0x16c), region = 32  ;;  %2699 = vmatprep.subr.bf16.mxu0 (!%p139_p2), %v2852_v0  ;;  %2835 = vmatprep.subr.bf16.mxu1 (!%p139_p2), %v2852_v0  ;;  %v856_v3 = vsel (!%p139_p2), %vm854_vm0, 4294967295, %v2929_v2  ;;  %v2855_v5 = vld [vmem:[%s3513_s1 + $0x18] sm:$0xff] (!%p139_p2)   ;;  %s2236_s22 = sshll.u32 (!%p139_p2), %s2231_s13, 7  ;;  %vm661_vm2 = vcmask (!%p139_p2), 515072   ;;  %vm2046_vm3 = vcmask (!%p139_p2), 125952  }
   0x7   : > { %2700 = vmatpush3.bf16.msra.mxu0 (!%p139_p2), %v2852_v0  ;;  %2839 = vmatpush3.bf16.msra.mxu1 (!%p139_p2), %v2852_v0  ;;  %v857_v6 = vsel (!%p139_p2), %vm855_vm1, %v856_v3, 0  ;;  %p163_p3 = scmp.lt.s32.totalorder (!%p139_p2), %s2236_s22, 255 }
   0x8   : > { %2701 = vmatprep.subr.bf16.mxu0 (!%p139_p2), %v2853_v1  ;;  %2836 = vmatprep.subr.bf16.mxu1 (!%p139_p2), %v2853_v1  ;;  %v859_v7 = vand.u32 (!%p139_p2), %v2855_v5, %v857_v6 }
   0xb   : > { %2702 = vmatpush3.bf16.msra.mxu0 (!%p139_p2), %v2853_v1  ;;  %2840 = vmatpush3.bf16.msra.mxu1 (!%p139_p2), %v2853_v1 }
   0xc   : > { %2703 = vmatprep.subr.bf16.mxu0 (!%p139_p2), %v2854_v4  ;;  %2837 = vmatprep.subr.bf16.mxu1 (!%p139_p2), %v2854_v4 }
   0xd   : > { %s3517_s22 = smov (!%p163_p3, %s2236_s22), 255 }
   0xe   : > { %s2237_s23 = sshll.u32 %s3517_s22, 2 }
   0xf   : > { %s2978_s26 = scalar_lea.vmem %s3512_s0, %s2237_s23  ;;  %2704 = vmatpush3.bf16.msra.mxu0 %v2854_v4  ;;  %2841 = vmatpush3.bf16.msra.mxu1 %v2854_v4  ;;  %s3124_s4 = scalar_lea.vmem %s3515_s3, %s2237_s23 }
  0x10   : > { %v2856_v8 = vld [vmem:[%s2978_s26] sm:$0xff]   ;;  %2705 = vmatprep.subr.bf16.mxu0 %v859_v7  ;;  %2838 = vmatprep.subr.bf16.mxu1 %v859_v7  ;;  %v2858_v10 = vld [vmem:[%s2978_s26 + $0x8] sm:$0xff]   ;;  %v2860_v12 = vld [vmem:[%s2978_s26 + $0x10] sm:$0xff]  }
  0x11   : > { %v2857_v9 = vld [vmem:[%s2978_s26 + $0x100] sm:$0xff]   ;;  %2707 = vmatprep.mubr.msk.bf16.mxu0 %vm661_vm2, %v2856_v8  ;;  %v2859_v11 = vld [vmem:[%s2978_s26 + $0x108] sm:$0xff]   ;;  %v2861_v13 = vld [vmem:[%s2978_s26 + $0x110] sm:$0xff]  }
  0x12   : > { %2771 = vmatprep.mubr.msk.bf16.mxu1 %vm661_vm2, %v2857_v9  ;;  %v2862_v14 = vld [vmem:[%s2978_s26 + $0x18] sm:$0xff]   ;;  %v2864_v16 = vld [vmem:[%s2978_s26 + $0x20] sm:$0xff]   ;;  %v2866_v18 = vld [vmem:[%s2978_s26 + $0x28] sm:$0xff]  }
  0x13   : > { %2706 = vmatpush3.bf16.msra.mxu0 %v859_v7  ;;  %2842 = vmatpush3.bf16.msra.mxu1 %v859_v7  ;;  %v2863_v15 = vld [vmem:[%s2978_s26 + $0x118] sm:$0xff]   ;;  %v2865_v17 = vld [vmem:[%s2978_s26 + $0x120] sm:$0xff]   ;;  %v2867_v19 = vld [vmem:[%s2978_s26 + $0x128] sm:$0xff]  }
  0x14   : > { %v2868_v20 = vld [vmem:[%s2978_s26 + $0x30] sm:$0xff]   ;;  %v2870_v22 = vld [vmem:[%s2978_s26 + $0x38] sm:$0xff]   ;;  %v2872_v24 = vld [vmem:[%s2978_s26 + $0x40] sm:$0xff]  }
  0x15   : > { %v2869_v21 = vld [vmem:[%s2978_s26 + $0x130] sm:$0xff]   ;;  %v2871_v23 = vld [vmem:[%s2978_s26 + $0x138] sm:$0xff]   ;;  %v2873_v25 = vld [vmem:[%s2978_s26 + $0x140] sm:$0xff]  }
  0x16   : > { %2708 = vmatmul.mubr.msk.bf16.vlgmr.msra.gmra.mrb[0].mxu0 %vm661_vm2, %v2858_v10  ;;  %2772 = vmatmul.mubr.msk.bf16.vlgmr.msra.gmra.mrb[0].mxu1 %vm661_vm2, %v2859_v11  ;;  %v2874_v26 = vld [vmem:[%s2978_s26 + $0x48] sm:$0xff]   ;;  %v2876_v28 = vld [vmem:[%s2978_s26 + $0x50] sm:$0xff]   ;;  %v2878_v30 = vld [vmem:[%s2978_s26 + $0x58] sm:$0xff]  }
  0x17   : > { %2711 = vmatprep.mubr.msk.bf16.mxu0 %vm661_vm2, %v2860_v12  ;;  %2775 = vmatprep.mubr.msk.bf16.mxu1 %vm661_vm2, %v2861_v13  ;;  %v2875_v27 = vld [vmem:[%s2978_s26 + $0x148] sm:$0xff]   ;;  %v2877_v29 = vld [vmem:[%s2978_s26 + $0x150] sm:$0xff]   ;;  %v2879_v31 = vld [vmem:[%s2978_s26 + $0x158] sm:$0xff]  }
  0x18   : > { %v2880_v32 = vld [vmem:[%s2978_s26 + $0x60] sm:$0xff]   ;;  %v2882_v34 = vld [vmem:[%s2978_s26 + $0x68] sm:$0xff]   ;;  %v2884_v36 = vld [vmem:[%s2978_s26 + $0x70] sm:$0xff]  }
  0x19   : > { %v2881_v33 = vld [vmem:[%s2978_s26 + $0x160] sm:$0xff]   ;;  %v2883_v35 = vld [vmem:[%s2978_s26 + $0x168] sm:$0xff]   ;;  %v2885_v37 = vld [vmem:[%s2978_s26 + $0x170] sm:$0xff]  }
  0x1a   : > { %v2886_v38 = vld [vmem:[%s2978_s26 + $0x78] sm:$0xff]   ;;  %v2888_v40 = vld [vmem:[%s2978_s26 + $0x80] sm:$0xff]   ;;  %v2890_v42 = vld [vmem:[%s2978_s26 + $0x88] sm:$0xff]  }
  0x1b   : > { %v2887_v39 = vld [vmem:[%s2978_s26 + $0x178] sm:$0xff]   ;;  %v2889_v41 = vld [vmem:[%s2978_s26 + $0x180] sm:$0xff]   ;;  %v2891_v43 = vld [vmem:[%s2978_s26 + $0x188] sm:$0xff]  }
  0x1c   : > { %v2892_v44 = vld [vmem:[%s2978_s26 + $0x90] sm:$0xff]   ;;  %v2894_v46 = vld [vmem:[%s2978_s26 + $0x98] sm:$0xff]   ;;  %v2896_v48 = vld [vmem:[%s2978_s26 + $0xa0] sm:$0xff]  }
  0x1d   : > { %v2893_v45 = vld [vmem:[%s2978_s26 + $0x190] sm:$0xff]   ;;  %v2895_v47 = vld [vmem:[%s2978_s26 + $0x198] sm:$0xff]   ;;  %v2897_v49 = vld [vmem:[%s2978_s26 + $0x1a0] sm:$0xff]  }
  0x1e   : > { %2712 = vmatmul.mubr.msk.bf16.gmra.mrb[4].mxu0 %vm661_vm2, %v2862_v14  ;;  %2776 = vmatmul.mubr.msk.bf16.gmra.mrb[4].mxu1 %vm661_vm2, %v2863_v15  ;;  %v2898_v50 = vld [vmem:[%s2978_s26 + $0xa8] sm:$0xff]   ;;  %v2900_v52 = vld [vmem:[%s2978_s26 + $0xb0] sm:$0xff]   ;;  %v2902_v54 = vld [vmem:[%s2978_s26 + $0xb8] sm:$0xff]  }
  0x1f   : > { %2715 = vmatprep.mubr.msk.bf16.mxu0 %vm661_vm2, %v2864_v16  ;;  %2779 = vmatprep.mubr.msk.bf16.mxu1 %vm661_vm2, %v2865_v17  ;;  %v2899_v51 = vld [vmem:[%s2978_s26 + $0x1a8] sm:$0xff]   ;;  %v2901_v53 = vld [vmem:[%s2978_s26 + $0x1b0] sm:$0xff]   ;;  %v2903_v55 = vld [vmem:[%s2978_s26 + $0x1b8] sm:$0xff]  }
  0x20   : > { %v2904_v56 = vld [vmem:[%s2978_s26 + $0xc0] sm:$0xff]   ;;  %v2906_v58 = vld [vmem:[%s2978_s26 + $0xc8] sm:$0xff]   ;;  %v2908_v60 = vld [vmem:[%s2978_s26 + $0xd0] sm:$0xff]  }
  0x21   : > { %v2905_v57 = vld [vmem:[%s2978_s26 + $0x1c0] sm:$0xff]   ;;  %v2907_v59 = vld [vmem:[%s2978_s26 + $0x1c8] sm:$0xff]   ;;  %v2909_v61 = vld [vmem:[%s2978_s26 + $0x1d0] sm:$0xff]  }
  0x22   : > { %v2910_v62 = vld [vmem:[%s2978_s26 + $0xd8] sm:$0xff]   ;;  %v2912_v0 = vld [vmem:[%s2978_s26 + $0xe0] sm:$0xff]   ;;  %v2914_v2 = vld [vmem:[%s2978_s26 + $0xe8] sm:$0xff]  }
  0x23   : > { %v2911_v63 = vld [vmem:[%s2978_s26 + $0x1d8] sm:$0xff]   ;;  %v2913_v1 = vld [vmem:[%s2978_s26 + $0x1e0] sm:$0xff]   ;;  %v2915_v3 = vld [vmem:[%s2978_s26 + $0x1e8] sm:$0xff]  }
  0x24   : > { %v2916_v4 = vld [vmem:[%s2978_s26 + $0xf0] sm:$0xff]   ;;  %v2918_v6 = vld [vmem:[%s2978_s26 + $0xf8] sm:$0xff]   ;;  %v3111_v8 = vld [vmem:[%s3514_s2] ss:$0 sm:$0xff] }
  0x25   : > { %v2917_v5 = vld [vmem:[%s2978_s26 + $0x1f0] sm:$0xff]   ;;  %v2919_v7 = vld [vmem:[%s2978_s26 + $0x1f8] sm:$0xff]  }
  0x26   : > { %2716 = vmatmul.mubr.msk.bf16.gmra.mrb[8].mxu0 %vm661_vm2, %v2866_v18  ;;  %2780 = vmatmul.mubr.msk.bf16.gmra.mrb[8].mxu1 %vm661_vm2, %v2867_v19 }
  0x27   : > { %2719 = vmatprep.mubr.msk.bf16.mxu0 %vm661_vm2, %v2868_v20  ;;  %2783 = vmatprep.mubr.msk.bf16.mxu1 %vm661_vm2, %v2869_v21 }
  0x2e   : > { %2720 = vmatmul.mubr.msk.bf16.gmra.mrb[12].mxu0 %vm661_vm2, %v2870_v22  ;;  %2784 = vmatmul.mubr.msk.bf16.gmra.mrb[12].mxu1 %vm661_vm2, %v2871_v23 }
  0x2f   : > { %2723 = vmatprep.mubr.msk.bf16.mxu0 %vm661_vm2, %v2872_v24  ;;  %2787 = vmatprep.mubr.msk.bf16.mxu1 %vm661_vm2, %v2873_v25 }
  0x36   : > { %2724 = vmatmul.mubr.msk.bf16.gmra.mrb[16].mxu0 %vm661_vm2, %v2874_v26  ;;  %2788 = vmatmul.mubr.msk.bf16.gmra.mrb[16].mxu1 %vm661_vm2, %v2875_v27 }
  0x37   : > { %2727 = vmatprep.mubr.msk.bf16.mxu0 %vm661_vm2, %v2876_v28  ;;  %2791 = vmatprep.mubr.msk.bf16.mxu1 %vm661_vm2, %v2877_v29 }
  0x3e   : > { %2728 = vmatmul.mubr.msk.bf16.gmra.mrb[20].mxu0 %vm661_vm2, %v2878_v30  ;;  %2792 = vmatmul.mubr.msk.bf16.gmra.mrb[20].mxu1 %vm661_vm2, %v2879_v31 }
  0x3f   : > { %2731 = vmatprep.mubr.msk.bf16.mxu0 %vm661_vm2, %v2880_v32  ;;  %2795 = vmatprep.mubr.msk.bf16.mxu1 %vm661_vm2, %v2881_v33 }
  0x46   : > { %2732 = vmatmul.mubr.msk.bf16.gmra.mrb[24].mxu0 %vm661_vm2, %v2882_v34  ;;  %2796 = vmatmul.mubr.msk.bf16.gmra.mrb[24].mxu1 %vm661_vm2, %v2883_v35 }
  0x47   : > { %2735 = vmatprep.mubr.msk.bf16.mxu0 %vm661_vm2, %v2884_v36  ;;  %2799 = vmatprep.mubr.msk.bf16.mxu1 %vm661_vm2, %v2885_v37 }
  0x4e   : > { %2736 = vmatmul.mubr.msk.bf16.gmra.mrb[28].mxu0 %vm661_vm2, %v2886_v38  ;;  %2800 = vmatmul.mubr.msk.bf16.gmra.mrb[28].mxu1 %vm661_vm2, %v2887_v39 }
  0x4f   : > { %2739 = vmatprep.mubr.msk.bf16.mxu0 %vm661_vm2, %v2888_v40  ;;  %2803 = vmatprep.mubr.msk.bf16.mxu1 %vm661_vm2, %v2889_v41 }
  0x56   : > { %2740 = vmatmul.mubr.msk.bf16.gmra.mrb[32].mxu0 %vm661_vm2, %v2890_v42  ;;  %2804 = vmatmul.mubr.msk.bf16.gmra.mrb[32].mxu1 %vm661_vm2, %v2891_v43 }
  0x57   : > { %2743 = vmatprep.mubr.msk.bf16.mxu0 %vm661_vm2, %v2892_v44  ;;  %2807 = vmatprep.mubr.msk.bf16.mxu1 %vm661_vm2, %v2893_v45 }
  0x5e   : > { %2744 = vmatmul.mubr.msk.bf16.gmra.mrb[36].mxu0 %vm661_vm2, %v2894_v46  ;;  %2808 = vmatmul.mubr.msk.bf16.gmra.mrb[36].mxu1 %vm661_vm2, %v2895_v47 }
  0x5f   : > { %2747 = vmatprep.mubr.msk.bf16.mxu0 %vm661_vm2, %v2896_v48  ;;  %2811 = vmatprep.mubr.msk.bf16.mxu1 %vm661_vm2, %v2897_v49 }
  0x66   : > { %2748 = vmatmul.mubr.msk.bf16.gmra.mrb[40].mxu0 %vm661_vm2, %v2898_v50  ;;  %2812 = vmatmul.mubr.msk.bf16.gmra.mrb[40].mxu1 %vm661_vm2, %v2899_v51 }
  0x67   : > { %2751 = vmatprep.mubr.msk.bf16.mxu0 %vm661_vm2, %v2900_v52  ;;  %2815 = vmatprep.mubr.msk.bf16.mxu1 %vm661_vm2, %v2901_v53 }
  0x6e   : > { %2752 = vmatmul.mubr.msk.bf16.gmra.mrb[44].mxu0 %vm661_vm2, %v2902_v54  ;;  %2816 = vmatmul.mubr.msk.bf16.gmra.mrb[44].mxu1 %vm661_vm2, %v2903_v55 }
  0x6f   : > { %2755 = vmatprep.mubr.msk.bf16.mxu0 %vm661_vm2, %v2904_v56  ;;  %2819 = vmatprep.mubr.msk.bf16.mxu1 %vm661_vm2, %v2905_v57 }
  0x76   : > { %2756 = vmatmul.mubr.msk.bf16.gmra.mrb[48].mxu0 %vm661_vm2, %v2906_v58  ;;  %2820 = vmatmul.mubr.msk.bf16.gmra.mrb[48].mxu1 %vm661_vm2, %v2907_v59 }
  0x77   : > { %2759 = vmatprep.mubr.msk.bf16.mxu0 %vm661_vm2, %v2908_v60  ;;  %2823 = vmatprep.mubr.msk.bf16.mxu1 %vm661_vm2, %v2909_v61 }
  0x7e   : > { %2760 = vmatmul.mubr.msk.bf16.gmra.mrb[52].mxu0 %vm661_vm2, %v2910_v62  ;;  %2824 = vmatmul.mubr.msk.bf16.gmra.mrb[52].mxu1 %vm661_vm2, %v2911_v63 }
  0x7f   : > { %2763 = vmatprep.mubr.msk.bf16.mxu0 %vm661_vm2, %v2912_v0  ;;  %2827 = vmatprep.mubr.msk.bf16.mxu1 %vm661_vm2, %v2913_v1 }
  0x86   : > { %2764 = vmatmul.mubr.msk.bf16.gmra.mrb[56].mxu0 %vm661_vm2, %v2914_v2  ;;  %2828 = vmatmul.mubr.msk.bf16.gmra.mrb[56].mxu1 %vm661_vm2, %v2915_v3 }
  0x87   : > { %2767 = vmatprep.mubr.msk.bf16.mxu0 %vm661_vm2, %v2916_v4  ;;  %2831 = vmatprep.mubr.msk.bf16.mxu1 %vm661_vm2, %v2917_v5 }
  0x8e   : > { %2768 = vmatmul.mubr.msk.bf16.gmra.mrb[60].mxu0 %vm661_vm2, %v2918_v6  ;;  %2832 = vmatmul.mubr.msk.bf16.gmra.mrb[60].mxu1 %vm661_vm2, %v2919_v7 }
  0xe9   : > { %v2709_v9 = vpop.f32.mrb[0].mxu0  ;;  %v2773_v10 = vpop.f32.mrb[0].mxu1 }
  0xea   : > { %v904_v11 = vadd.f32 %v2709_v9, %v3111_v8  ;;  %v1160_v12 = vadd.f32 %v2773_v10, %v3111_v8  ;;  %v895_v13 = vpop.f32.mrb[1].mxu0  ;;  %v1151_v14 = vpop.f32.mrb[1].mxu1 }
  0xeb   : > { %v896_v15 = vadd.f32 %v3111_v8, %v895_v13  ;;  %v1152_v16 = vadd.f32 %v3111_v8, %v1151_v14  ;;  %v2710_v17 = vpop.f32.mrb[2].mxu0  ;;  %v2774_v18 = vpop.f32.mrb[2].mxu1 }
  0xec   : > { %v1408_v19 = vmax.f32 %v904_v11, 0.0  ;;  %v1472_v20 = vmax.f32 %v1160_v12, 0.0  ;;  %v907_v21 = vadd.f32 %v2710_v17, %v3111_v8  ;;  %v1163_v22 = vadd.f32 %v2774_v18, %v3111_v8  ;;  %v898_v23 = vpop.f32.mrb[3].mxu0  ;;  %v1154_v24 = vpop.f32.mrb[3].mxu1 }
  0xed   : > { %v1406_v25 = vmax.f32 %v896_v15, 0.0  ;;  %v1470_v26 = vmax.f32 %v1152_v16, 0.0  ;;  %v899_v27 = vadd.f32 %v3111_v8, %v898_v23  ;;  %v1155_v28 = vadd.f32 %v3111_v8, %v1154_v24 }
  0xee   : > { %v2505_v29 = vpack.c.bf16 %v1408_v19, %v1408_v19  ;;  %v2569_v30 = vpack.c.bf16 %v1472_v20, %v1472_v20  ;;  %v1409_v31 = vmax.f32 %v907_v21, 0.0  ;;  %v1473_v32 = vmax.f32 %v1163_v22, 0.0 }
  0xef   : > { %v2503_v33 = vpack.c.bf16 %v1406_v25, %v1406_v25  ;;  %v2567_v34 = vpack.c.bf16 %v1470_v26, %v1470_v26  ;;  %v1407_v35 = vmax.f32 %v899_v27, 0.0  ;;  %v1471_v36 = vmax.f32 %v1155_v28, 0.0 }
  0xf0   : > { %2049 = vst.msk [vmem:[%s3124_s4 + $0x8] sm:$0xf] %vm2046_vm3, %v2505_v29  ;;  %2113 = vst.msk [vmem:[%s3124_s4 + $0x108] sm:$0xf] %vm2046_vm3, %v2569_v30  ;;  %v2506_v37 = vpack.c.bf16 %v1409_v31, %v1409_v31  ;;  %v2570_v38 = vpack.c.bf16 %v1473_v32, %v1473_v32 }
  0xf1   : > { %2047 = vst.msk [vmem:[%s3124_s4] sm:$0xf] %vm2046_vm3, %v2503_v33  ;;  %2111 = vst.msk [vmem:[%s3124_s4 + $0x100] sm:$0xf] %vm2046_vm3, %v2567_v34  ;;  %v2504_v39 = vpack.c.bf16 %v1407_v35, %v1407_v35  ;;  %v2568_v40 = vpack.c.bf16 %v1471_v36, %v1471_v36  ;;  %v2713_v41 = vpop.f32.mrb[4].mxu0  ;;  %v2777_v42 = vpop.f32.mrb[4].mxu1 }
  0xf2   : > { %2050 = vst.msk [vmem:[%s3124_s4 + $0xc] sm:$0xf] %vm2046_vm3, %v2506_v37  ;;  %2114 = vst.msk [vmem:[%s3124_s4 + $0x10c] sm:$0xf] %vm2046_vm3, %v2570_v38  ;;  %v920_v43 = vadd.f32 %v2713_v41, %v3111_v8  ;;  %v1176_v44 = vadd.f32 %v2777_v42, %v3111_v8  ;;  %v911_v45 = vpop.f32.mrb[5].mxu0  ;;  %v1167_v46 = vpop.f32.mrb[5].mxu1 }
  0xf3   : > { %2048 = vst.msk [vmem:[%s3124_s4 + $0x4] sm:$0xf] %vm2046_vm3, %v2504_v39  ;;  %2112 = vst.msk [vmem:[%s3124_s4 + $0x104] sm:$0xf] %vm2046_vm3, %v2568_v40  ;;  %v912_v47 = vadd.f32 %v3111_v8, %v911_v45  ;;  %v1168_v48 = vadd.f32 %v3111_v8, %v1167_v46  ;;  %v2714_v49 = vpop.f32.mrb[6].mxu0  ;;  %v2778_v50 = vpop.f32.mrb[6].mxu1 }
  0xf4   : > { %v1412_v51 = vmax.f32 %v920_v43, 0.0  ;;  %v1476_v52 = vmax.f32 %v1176_v44, 0.0  ;;  %v923_v53 = vadd.f32 %v2714_v49, %v3111_v8  ;;  %v1179_v54 = vadd.f32 %v2778_v50, %v3111_v8  ;;  %v914_v55 = vpop.f32.mrb[7].mxu0  ;;  %v1170_v56 = vpop.f32.mrb[7].mxu1 }
  0xf5   : > { %v1410_v57 = vmax.f32 %v912_v47, 0.0  ;;  %v1474_v58 = vmax.f32 %v1168_v48, 0.0  ;;  %v915_v59 = vadd.f32 %v3111_v8, %v914_v55  ;;  %v1171_v60 = vadd.f32 %v3111_v8, %v1170_v56 }
  0xf6   : > { %v2509_v61 = vpack.c.bf16 %v1412_v51, %v1412_v51  ;;  %v2573_v62 = vpack.c.bf16 %v1476_v52, %v1476_v52  ;;  %v1413_v63 = vmax.f32 %v923_v53, 0.0  ;;  %v1477_v0 = vmax.f32 %v1179_v54, 0.0 }
  0xf7   : > { %v2507_v1 = vpack.c.bf16 %v1410_v57, %v1410_v57  ;;  %v2571_v2 = vpack.c.bf16 %v1474_v58, %v1474_v58  ;;  %v1411_v3 = vmax.f32 %v915_v59, 0.0  ;;  %v1475_v4 = vmax.f32 %v1171_v60, 0.0 }
  0xf8   : > { %2053 = vst.msk [vmem:[%s3124_s4 + $0x18] sm:$0xf] %vm2046_vm3, %v2509_v61  ;;  %2117 = vst.msk [vmem:[%s3124_s4 + $0x118] sm:$0xf] %vm2046_vm3, %v2573_v62  ;;  %v2510_v5 = vpack.c.bf16 %v1413_v63, %v1413_v63  ;;  %v2574_v6 = vpack.c.bf16 %v1477_v0, %v1477_v0 }
  0xf9   : > { %2051 = vst.msk [vmem:[%s3124_s4 + $0x10] sm:$0xf] %vm2046_vm3, %v2507_v1  ;;  %2115 = vst.msk [vmem:[%s3124_s4 + $0x110] sm:$0xf] %vm2046_vm3, %v2571_v2  ;;  %v2508_v7 = vpack.c.bf16 %v1411_v3, %v1411_v3  ;;  %v2572_v9 = vpack.c.bf16 %v1475_v4, %v1475_v4  ;;  %v2717_v10 = vpop.f32.mrb[8].mxu0  ;;  %v2781_v11 = vpop.f32.mrb[8].mxu1 }
  0xfa   : > { %2054 = vst.msk [vmem:[%s3124_s4 + $0x1c] sm:$0xf] %vm2046_vm3, %v2510_v5  ;;  %2118 = vst.msk [vmem:[%s3124_s4 + $0x11c] sm:$0xf] %vm2046_vm3, %v2574_v6  ;;  %v936_v12 = vadd.f32 %v2717_v10, %v3111_v8  ;;  %v1192_v13 = vadd.f32 %v2781_v11, %v3111_v8  ;;  %v927_v14 = vpop.f32.mrb[9].mxu0  ;;  %v1183_v15 = vpop.f32.mrb[9].mxu1 }
  0xfb   : > { %2052 = vst.msk [vmem:[%s3124_s4 + $0x14] sm:$0xf] %vm2046_vm3, %v2508_v7  ;;  %2116 = vst.msk [vmem:[%s3124_s4 + $0x114] sm:$0xf] %vm2046_vm3, %v2572_v9  ;;  %v928_v16 = vadd.f32 %v3111_v8, %v927_v14  ;;  %v1184_v17 = vadd.f32 %v3111_v8, %v1183_v15  ;;  %v2718_v18 = vpop.f32.mrb[10].mxu0  ;;  %v2782_v19 = vpop.f32.mrb[10].mxu1 }
  0xfc   : > { %v1416_v20 = vmax.f32 %v936_v12, 0.0  ;;  %v1480_v21 = vmax.f32 %v1192_v13, 0.0  ;;  %v939_v22 = vadd.f32 %v2718_v18, %v3111_v8  ;;  %v1195_v23 = vadd.f32 %v2782_v19, %v3111_v8  ;;  %v930_v24 = vpop.f32.mrb[11].mxu0  ;;  %v1186_v25 = vpop.f32.mrb[11].mxu1 }
  0xfd   : > { %v1414_v26 = vmax.f32 %v928_v16, 0.0  ;;  %v1478_v27 = vmax.f32 %v1184_v17, 0.0  ;;  %v931_v28 = vadd.f32 %v3111_v8, %v930_v24  ;;  %v1187_v29 = vadd.f32 %v3111_v8, %v1186_v25 }
  0xfe   : > { %v2513_v30 = vpack.c.bf16 %v1416_v20, %v1416_v20  ;;  %v2577_v31 = vpack.c.bf16 %v1480_v21, %v1480_v21  ;;  %v1417_v32 = vmax.f32 %v939_v22, 0.0  ;;  %v1481_v33 = vmax.f32 %v1195_v23, 0.0 }
  0xff   : > { %v2511_v34 = vpack.c.bf16 %v1414_v26, %v1414_v26  ;;  %v2575_v35 = vpack.c.bf16 %v1478_v27, %v1478_v27  ;;  %v1415_v36 = vmax.f32 %v931_v28, 0.0  ;;  %v1479_v37 = vmax.f32 %v1187_v29, 0.0 }
 0x100   : > { %2057 = vst.msk [vmem:[%s3124_s4 + $0x28] sm:$0xf] %vm2046_vm3, %v2513_v30  ;;  %2121 = vst.msk [vmem:[%s3124_s4 + $0x128] sm:$0xf] %vm2046_vm3, %v2577_v31  ;;  %v2514_v38 = vpack.c.bf16 %v1417_v32, %v1417_v32  ;;  %v2578_v39 = vpack.c.bf16 %v1481_v33, %v1481_v33 }
 0x101   : > { %2055 = vst.msk [vmem:[%s3124_s4 + $0x20] sm:$0xf] %vm2046_vm3, %v2511_v34  ;;  %2119 = vst.msk [vmem:[%s3124_s4 + $0x120] sm:$0xf] %vm2046_vm3, %v2575_v35  ;;  %v2512_v40 = vpack.c.bf16 %v1415_v36, %v1415_v36  ;;  %v2576_v41 = vpack.c.bf16 %v1479_v37, %v1479_v37  ;;  %v2721_v42 = vpop.f32.mrb[12].mxu0  ;;  %v2785_v43 = vpop.f32.mrb[12].mxu1 }
 0x102   : > { %2058 = vst.msk [vmem:[%s3124_s4 + $0x2c] sm:$0xf] %vm2046_vm3, %v2514_v38  ;;  %2122 = vst.msk [vmem:[%s3124_s4 + $0x12c] sm:$0xf] %vm2046_vm3, %v2578_v39  ;;  %v952_v44 = vadd.f32 %v2721_v42, %v3111_v8  ;;  %v1208_v45 = vadd.f32 %v2785_v43, %v3111_v8  ;;  %v943_v46 = vpop.f32.mrb[13].mxu0  ;;  %v1199_v47 = vpop.f32.mrb[13].mxu1 }
 0x103   : > { %2056 = vst.msk [vmem:[%s3124_s4 + $0x24] sm:$0xf] %vm2046_vm3, %v2512_v40  ;;  %2120 = vst.msk [vmem:[%s3124_s4 + $0x124] sm:$0xf] %vm2046_vm3, %v2576_v41  ;;  %v944_v48 = vadd.f32 %v3111_v8, %v943_v46  ;;  %v1200_v49 = vadd.f32 %v3111_v8, %v1199_v47  ;;  %v2722_v50 = vpop.f32.mrb[14].mxu0  ;;  %v2786_v51 = vpop.f32.mrb[14].mxu1 }
 0x104   : > { %v1420_v52 = vmax.f32 %v952_v44, 0.0  ;;  %v1484_v53 = vmax.f32 %v1208_v45, 0.0  ;;  %v955_v54 = vadd.f32 %v2722_v50, %v3111_v8  ;;  %v1211_v55 = vadd.f32 %v2786_v51, %v3111_v8  ;;  %v946_v56 = vpop.f32.mrb[15].mxu0  ;;  %v1202_v57 = vpop.f32.mrb[15].mxu1 }
 0x105   : > { %v1418_v58 = vmax.f32 %v944_v48, 0.0  ;;  %v1482_v59 = vmax.f32 %v1200_v49, 0.0  ;;  %v947_v60 = vadd.f32 %v3111_v8, %v946_v56  ;;  %v1203_v61 = vadd.f32 %v3111_v8, %v1202_v57 }
 0x106   : > { %v2517_v62 = vpack.c.bf16 %v1420_v52, %v1420_v52  ;;  %v2581_v63 = vpack.c.bf16 %v1484_v53, %v1484_v53  ;;  %v1421_v0 = vmax.f32 %v955_v54, 0.0  ;;  %v1485_v1 = vmax.f32 %v1211_v55, 0.0 }
 0x107   : > { %v2515_v2 = vpack.c.bf16 %v1418_v58, %v1418_v58  ;;  %v2579_v3 = vpack.c.bf16 %v1482_v59, %v1482_v59  ;;  %v1419_v4 = vmax.f32 %v947_v60, 0.0  ;;  %v1483_v5 = vmax.f32 %v1203_v61, 0.0 }
 0x108   : > { %2061 = vst.msk [vmem:[%s3124_s4 + $0x38] sm:$0xf] %vm2046_vm3, %v2517_v62  ;;  %2125 = vst.msk [vmem:[%s3124_s4 + $0x138] sm:$0xf] %vm2046_vm3, %v2581_v63  ;;  %v2518_v6 = vpack.c.bf16 %v1421_v0, %v1421_v0  ;;  %v2582_v7 = vpack.c.bf16 %v1485_v1, %v1485_v1 }
 0x109   : > { %2059 = vst.msk [vmem:[%s3124_s4 + $0x30] sm:$0xf] %vm2046_vm3, %v2515_v2  ;;  %2123 = vst.msk [vmem:[%s3124_s4 + $0x130] sm:$0xf] %vm2046_vm3, %v2579_v3  ;;  %v2516_v9 = vpack.c.bf16 %v1419_v4, %v1419_v4  ;;  %v2580_v10 = vpack.c.bf16 %v1483_v5, %v1483_v5  ;;  %v2725_v11 = vpop.f32.mrb[16].mxu0  ;;  %v2789_v12 = vpop.f32.mrb[16].mxu1 }
 0x10a   : > { %2062 = vst.msk [vmem:[%s3124_s4 + $0x3c] sm:$0xf] %vm2046_vm3, %v2518_v6  ;;  %2126 = vst.msk [vmem:[%s3124_s4 + $0x13c] sm:$0xf] %vm2046_vm3, %v2582_v7  ;;  %v968_v13 = vadd.f32 %v2725_v11, %v3111_v8  ;;  %v1224_v14 = vadd.f32 %v2789_v12, %v3111_v8  ;;  %v959_v15 = vpop.f32.mrb[17].mxu0  ;;  %v1215_v16 = vpop.f32.mrb[17].mxu1 }
 0x10b   : > { %2060 = vst.msk [vmem:[%s3124_s4 + $0x34] sm:$0xf] %vm2046_vm3, %v2516_v9  ;;  %2124 = vst.msk [vmem:[%s3124_s4 + $0x134] sm:$0xf] %vm2046_vm3, %v2580_v10  ;;  %v960_v17 = vadd.f32 %v3111_v8, %v959_v15  ;;  %v1216_v18 = vadd.f32 %v3111_v8, %v1215_v16  ;;  %v2726_v19 = vpop.f32.mrb[18].mxu0  ;;  %v2790_v20 = vpop.f32.mrb[18].mxu1 }
 0x10c   : > { %v1424_v21 = vmax.f32 %v968_v13, 0.0  ;;  %v1488_v22 = vmax.f32 %v1224_v14, 0.0  ;;  %v971_v23 = vadd.f32 %v2726_v19, %v3111_v8  ;;  %v1227_v24 = vadd.f32 %v2790_v20, %v3111_v8  ;;  %v962_v25 = vpop.f32.mrb[19].mxu0  ;;  %v1218_v26 = vpop.f32.mrb[19].mxu1 }
 0x10d   : > { %v1422_v27 = vmax.f32 %v960_v17, 0.0  ;;  %v1486_v28 = vmax.f32 %v1216_v18, 0.0  ;;  %v963_v29 = vadd.f32 %v3111_v8, %v962_v25  ;;  %v1219_v30 = vadd.f32 %v3111_v8, %v1218_v26 }
 0x10e   : > { %v2521_v31 = vpack.c.bf16 %v1424_v21, %v1424_v21  ;;  %v2585_v32 = vpack.c.bf16 %v1488_v22, %v1488_v22  ;;  %v1425_v33 = vmax.f32 %v971_v23, 0.0  ;;  %v1489_v34 = vmax.f32 %v1227_v24, 0.0 }
 0x10f   : > { %v2519_v35 = vpack.c.bf16 %v1422_v27, %v1422_v27  ;;  %v2583_v36 = vpack.c.bf16 %v1486_v28, %v1486_v28  ;;  %v1423_v37 = vmax.f32 %v963_v29, 0.0  ;;  %v1487_v38 = vmax.f32 %v1219_v30, 0.0 }
 0x110   : > { %2065 = vst.msk [vmem:[%s3124_s4 + $0x48] sm:$0xf] %vm2046_vm3, %v2521_v31  ;;  %2129 = vst.msk [vmem:[%s3124_s4 + $0x148] sm:$0xf] %vm2046_vm3, %v2585_v32  ;;  %v2522_v39 = vpack.c.bf16 %v1425_v33, %v1425_v33  ;;  %v2586_v40 = vpack.c.bf16 %v1489_v34, %v1489_v34 }
 0x111   : > { %2063 = vst.msk [vmem:[%s3124_s4 + $0x40] sm:$0xf] %vm2046_vm3, %v2519_v35  ;;  %2127 = vst.msk [vmem:[%s3124_s4 + $0x140] sm:$0xf] %vm2046_vm3, %v2583_v36  ;;  %v2520_v41 = vpack.c.bf16 %v1423_v37, %v1423_v37  ;;  %v2584_v42 = vpack.c.bf16 %v1487_v38, %v1487_v38  ;;  %v2729_v43 = vpop.f32.mrb[20].mxu0  ;;  %v2793_v44 = vpop.f32.mrb[20].mxu1 }
 0x112   : > { %2066 = vst.msk [vmem:[%s3124_s4 + $0x4c] sm:$0xf] %vm2046_vm3, %v2522_v39  ;;  %2130 = vst.msk [vmem:[%s3124_s4 + $0x14c] sm:$0xf] %vm2046_vm3, %v2586_v40  ;;  %v984_v45 = vadd.f32 %v2729_v43, %v3111_v8  ;;  %v1240_v46 = vadd.f32 %v2793_v44, %v3111_v8  ;;  %v975_v47 = vpop.f32.mrb[21].mxu0  ;;  %v1231_v48 = vpop.f32.mrb[21].mxu1 }
 0x113   : > { %2064 = vst.msk [vmem:[%s3124_s4 + $0x44] sm:$0xf] %vm2046_vm3, %v2520_v41  ;;  %2128 = vst.msk [vmem:[%s3124_s4 + $0x144] sm:$0xf] %vm2046_vm3, %v2584_v42  ;;  %v976_v49 = vadd.f32 %v3111_v8, %v975_v47  ;;  %v1232_v50 = vadd.f32 %v3111_v8, %v1231_v48  ;;  %v2730_v51 = vpop.f32.mrb[22].mxu0  ;;  %v2794_v52 = vpop.f32.mrb[22].mxu1 }
 0x114   : > { %v1428_v53 = vmax.f32 %v984_v45, 0.0  ;;  %v1492_v54 = vmax.f32 %v1240_v46, 0.0  ;;  %v987_v55 = vadd.f32 %v2730_v51, %v3111_v8  ;;  %v1243_v56 = vadd.f32 %v2794_v52, %v3111_v8  ;;  %v978_v57 = vpop.f32.mrb[23].mxu0  ;;  %v1234_v58 = vpop.f32.mrb[23].mxu1 }
 0x115   : > { %v1426_v59 = vmax.f32 %v976_v49, 0.0  ;;  %v1490_v60 = vmax.f32 %v1232_v50, 0.0  ;;  %v979_v61 = vadd.f32 %v3111_v8, %v978_v57  ;;  %v1235_v62 = vadd.f32 %v3111_v8, %v1234_v58 }
 0x116   : > { %v2525_v63 = vpack.c.bf16 %v1428_v53, %v1428_v53  ;;  %v2589_v0 = vpack.c.bf16 %v1492_v54, %v1492_v54  ;;  %v1429_v1 = vmax.f32 %v987_v55, 0.0  ;;  %v1493_v2 = vmax.f32 %v1243_v56, 0.0 }
 0x117   : > { %v2523_v3 = vpack.c.bf16 %v1426_v59, %v1426_v59  ;;  %v2587_v4 = vpack.c.bf16 %v1490_v60, %v1490_v60  ;;  %v1427_v5 = vmax.f32 %v979_v61, 0.0  ;;  %v1491_v6 = vmax.f32 %v1235_v62, 0.0 }
 0x118   : > { %2069 = vst.msk [vmem:[%s3124_s4 + $0x58] sm:$0xf] %vm2046_vm3, %v2525_v63  ;;  %2133 = vst.msk [vmem:[%s3124_s4 + $0x158] sm:$0xf] %vm2046_vm3, %v2589_v0  ;;  %v2526_v7 = vpack.c.bf16 %v1429_v1, %v1429_v1  ;;  %v2590_v9 = vpack.c.bf16 %v1493_v2, %v1493_v2 }
 0x119   : > { %2067 = vst.msk [vmem:[%s3124_s4 + $0x50] sm:$0xf] %vm2046_vm3, %v2523_v3  ;;  %2131 = vst.msk [vmem:[%s3124_s4 + $0x150] sm:$0xf] %vm2046_vm3, %v2587_v4  ;;  %v2524_v10 = vpack.c.bf16 %v1427_v5, %v1427_v5  ;;  %v2588_v11 = vpack.c.bf16 %v1491_v6, %v1491_v6  ;;  %v2733_v12 = vpop.f32.mrb[24].mxu0  ;;  %v2797_v13 = vpop.f32.mrb[24].mxu1 }
 0x11a   : > { %2070 = vst.msk [vmem:[%s3124_s4 + $0x5c] sm:$0xf] %vm2046_vm3, %v2526_v7  ;;  %2134 = vst.msk [vmem:[%s3124_s4 + $0x15c] sm:$0xf] %vm2046_vm3, %v2590_v9  ;;  %v1000_v14 = vadd.f32 %v2733_v12, %v3111_v8  ;;  %v1256_v15 = vadd.f32 %v2797_v13, %v3111_v8  ;;  %v991_v16 = vpop.f32.mrb[25].mxu0  ;;  %v1247_v17 = vpop.f32.mrb[25].mxu1 }
 0x11b   : > { %2068 = vst.msk [vmem:[%s3124_s4 + $0x54] sm:$0xf] %vm2046_vm3, %v2524_v10  ;;  %2132 = vst.msk [vmem:[%s3124_s4 + $0x154] sm:$0xf] %vm2046_vm3, %v2588_v11  ;;  %v992_v18 = vadd.f32 %v3111_v8, %v991_v16  ;;  %v1248_v19 = vadd.f32 %v3111_v8, %v1247_v17  ;;  %v2734_v20 = vpop.f32.mrb[26].mxu0  ;;  %v2798_v21 = vpop.f32.mrb[26].mxu1 }
 0x11c   : > { %v1432_v22 = vmax.f32 %v1000_v14, 0.0  ;;  %v1496_v23 = vmax.f32 %v1256_v15, 0.0  ;;  %v1003_v24 = vadd.f32 %v2734_v20, %v3111_v8  ;;  %v1259_v25 = vadd.f32 %v2798_v21, %v3111_v8  ;;  %v994_v26 = vpop.f32.mrb[27].mxu0  ;;  %v1250_v27 = vpop.f32.mrb[27].mxu1 }
 0x11d   : > { %v1430_v28 = vmax.f32 %v992_v18, 0.0  ;;  %v1494_v29 = vmax.f32 %v1248_v19, 0.0  ;;  %v995_v30 = vadd.f32 %v3111_v8, %v994_v26  ;;  %v1251_v31 = vadd.f32 %v3111_v8, %v1250_v27 }
 0x11e   : > { %v2529_v32 = vpack.c.bf16 %v1432_v22, %v1432_v22  ;;  %v2593_v33 = vpack.c.bf16 %v1496_v23, %v1496_v23  ;;  %v1433_v34 = vmax.f32 %v1003_v24, 0.0  ;;  %v1497_v35 = vmax.f32 %v1259_v25, 0.0 }
 0x11f   : > { %v2527_v36 = vpack.c.bf16 %v1430_v28, %v1430_v28  ;;  %v2591_v37 = vpack.c.bf16 %v1494_v29, %v1494_v29  ;;  %v1431_v38 = vmax.f32 %v995_v30, 0.0  ;;  %v1495_v39 = vmax.f32 %v1251_v31, 0.0 }
 0x120   : > { %2073 = vst.msk [vmem:[%s3124_s4 + $0x68] sm:$0xf] %vm2046_vm3, %v2529_v32  ;;  %2137 = vst.msk [vmem:[%s3124_s4 + $0x168] sm:$0xf] %vm2046_vm3, %v2593_v33  ;;  %v2530_v40 = vpack.c.bf16 %v1433_v34, %v1433_v34  ;;  %v2594_v41 = vpack.c.bf16 %v1497_v35, %v1497_v35 }
 0x121   : > { %2071 = vst.msk [vmem:[%s3124_s4 + $0x60] sm:$0xf] %vm2046_vm3, %v2527_v36  ;;  %2135 = vst.msk [vmem:[%s3124_s4 + $0x160] sm:$0xf] %vm2046_vm3, %v2591_v37  ;;  %v2528_v42 = vpack.c.bf16 %v1431_v38, %v1431_v38  ;;  %v2592_v43 = vpack.c.bf16 %v1495_v39, %v1495_v39  ;;  %v2737_v44 = vpop.f32.mrb[28].mxu0  ;;  %v2801_v45 = vpop.f32.mrb[28].mxu1 }
 0x122   : > { %2074 = vst.msk [vmem:[%s3124_s4 + $0x6c] sm:$0xf] %vm2046_vm3, %v2530_v40  ;;  %2138 = vst.msk [vmem:[%s3124_s4 + $0x16c] sm:$0xf] %vm2046_vm3, %v2594_v41  ;;  %v1016_v46 = vadd.f32 %v2737_v44, %v3111_v8  ;;  %v1272_v47 = vadd.f32 %v2801_v45, %v3111_v8  ;;  %v1007_v48 = vpop.f32.mrb[29].mxu0  ;;  %v1263_v49 = vpop.f32.mrb[29].mxu1 }
 0x123   : > { %2072 = vst.msk [vmem:[%s3124_s4 + $0x64] sm:$0xf] %vm2046_vm3, %v2528_v42  ;;  %2136 = vst.msk [vmem:[%s3124_s4 + $0x164] sm:$0xf] %vm2046_vm3, %v2592_v43  ;;  %v1008_v50 = vadd.f32 %v3111_v8, %v1007_v48  ;;  %v1264_v51 = vadd.f32 %v3111_v8, %v1263_v49  ;;  %v2738_v52 = vpop.f32.mrb[30].mxu0  ;;  %v2802_v53 = vpop.f32.mrb[30].mxu1 }
 0x124   : > { %v1436_v54 = vmax.f32 %v1016_v46, 0.0  ;;  %v1500_v55 = vmax.f32 %v1272_v47, 0.0  ;;  %v1019_v56 = vadd.f32 %v2738_v52, %v3111_v8  ;;  %v1275_v57 = vadd.f32 %v2802_v53, %v3111_v8  ;;  %v1010_v58 = vpop.f32.mrb[31].mxu0  ;;  %v1266_v59 = vpop.f32.mrb[31].mxu1 }
 0x125   : > { %v1434_v60 = vmax.f32 %v1008_v50, 0.0  ;;  %v1498_v61 = vmax.f32 %v1264_v51, 0.0  ;;  %v1011_v62 = vadd.f32 %v3111_v8, %v1010_v58  ;;  %v1267_v63 = vadd.f32 %v3111_v8, %v1266_v59 }
 0x126   : > { %v2533_v0 = vpack.c.bf16 %v1436_v54, %v1436_v54  ;;  %v2597_v1 = vpack.c.bf16 %v1500_v55, %v1500_v55  ;;  %v1437_v2 = vmax.f32 %v1019_v56, 0.0  ;;  %v1501_v3 = vmax.f32 %v1275_v57, 0.0 }
 0x127   : > { %v2531_v4 = vpack.c.bf16 %v1434_v60, %v1434_v60  ;;  %v2595_v5 = vpack.c.bf16 %v1498_v61, %v1498_v61  ;;  %v1435_v6 = vmax.f32 %v1011_v62, 0.0  ;;  %v1499_v7 = vmax.f32 %v1267_v63, 0.0 }
 0x128   : > { %2077 = vst.msk [vmem:[%s3124_s4 + $0x78] sm:$0xf] %vm2046_vm3, %v2533_v0  ;;  %2141 = vst.msk [vmem:[%s3124_s4 + $0x178] sm:$0xf] %vm2046_vm3, %v2597_v1  ;;  %v2534_v9 = vpack.c.bf16 %v1437_v2, %v1437_v2  ;;  %v2598_v10 = vpack.c.bf16 %v1501_v3, %v1501_v3 }
 0x129   : > { %2075 = vst.msk [vmem:[%s3124_s4 + $0x70] sm:$0xf] %vm2046_vm3, %v2531_v4  ;;  %2139 = vst.msk [vmem:[%s3124_s4 + $0x170] sm:$0xf] %vm2046_vm3, %v2595_v5  ;;  %v2532_v11 = vpack.c.bf16 %v1435_v6, %v1435_v6  ;;  %v2596_v12 = vpack.c.bf16 %v1499_v7, %v1499_v7  ;;  %v2741_v13 = vpop.f32.mrb[32].mxu0  ;;  %v2805_v14 = vpop.f32.mrb[32].mxu1 }
 0x12a   : > { %2078 = vst.msk [vmem:[%s3124_s4 + $0x7c] sm:$0xf] %vm2046_vm3, %v2534_v9  ;;  %2142 = vst.msk [vmem:[%s3124_s4 + $0x17c] sm:$0xf] %vm2046_vm3, %v2598_v10  ;;  %v1032_v15 = vadd.f32 %v2741_v13, %v3111_v8  ;;  %v1288_v16 = vadd.f32 %v2805_v14, %v3111_v8  ;;  %v1023_v17 = vpop.f32.mrb[33].mxu0  ;;  %v1279_v18 = vpop.f32.mrb[33].mxu1 }
 0x12b   : > { %2076 = vst.msk [vmem:[%s3124_s4 + $0x74] sm:$0xf] %vm2046_vm3, %v2532_v11  ;;  %2140 = vst.msk [vmem:[%s3124_s4 + $0x174] sm:$0xf] %vm2046_vm3, %v2596_v12  ;;  %v1024_v19 = vadd.f32 %v3111_v8, %v1023_v17  ;;  %v1280_v20 = vadd.f32 %v3111_v8, %v1279_v18  ;;  %v2742_v21 = vpop.f32.mrb[34].mxu0  ;;  %v2806_v22 = vpop.f32.mrb[34].mxu1 }
 0x12c   : > { %v1440_v23 = vmax.f32 %v1032_v15, 0.0  ;;  %v1504_v24 = vmax.f32 %v1288_v16, 0.0  ;;  %v1035_v25 = vadd.f32 %v2742_v21, %v3111_v8  ;;  %v1291_v26 = vadd.f32 %v2806_v22, %v3111_v8  ;;  %v1026_v27 = vpop.f32.mrb[35].mxu0  ;;  %v1282_v28 = vpop.f32.mrb[35].mxu1 }
 0x12d   : > { %v1438_v29 = vmax.f32 %v1024_v19, 0.0  ;;  %v1502_v30 = vmax.f32 %v1280_v20, 0.0  ;;  %v1027_v31 = vadd.f32 %v3111_v8, %v1026_v27  ;;  %v1283_v32 = vadd.f32 %v3111_v8, %v1282_v28 }
 0x12e   : > { %v2537_v33 = vpack.c.bf16 %v1440_v23, %v1440_v23  ;;  %v2601_v34 = vpack.c.bf16 %v1504_v24, %v1504_v24  ;;  %v1441_v35 = vmax.f32 %v1035_v25, 0.0  ;;  %v1505_v36 = vmax.f32 %v1291_v26, 0.0 }
 0x12f   : > { %v2535_v37 = vpack.c.bf16 %v1438_v29, %v1438_v29  ;;  %v2599_v38 = vpack.c.bf16 %v1502_v30, %v1502_v30  ;;  %v1439_v39 = vmax.f32 %v1027_v31, 0.0  ;;  %v1503_v40 = vmax.f32 %v1283_v32, 0.0 }
 0x130   : > { %2081 = vst.msk [vmem:[%s3124_s4 + $0x88] sm:$0xf] %vm2046_vm3, %v2537_v33  ;;  %2145 = vst.msk [vmem:[%s3124_s4 + $0x188] sm:$0xf] %vm2046_vm3, %v2601_v34  ;;  %v2538_v41 = vpack.c.bf16 %v1441_v35, %v1441_v35  ;;  %v2602_v42 = vpack.c.bf16 %v1505_v36, %v1505_v36 }
 0x131   : > { %2079 = vst.msk [vmem:[%s3124_s4 + $0x80] sm:$0xf] %vm2046_vm3, %v2535_v37  ;;  %2143 = vst.msk [vmem:[%s3124_s4 + $0x180] sm:$0xf] %vm2046_vm3, %v2599_v38  ;;  %v2536_v43 = vpack.c.bf16 %v1439_v39, %v1439_v39  ;;  %v2600_v44 = vpack.c.bf16 %v1503_v40, %v1503_v40  ;;  %v2745_v45 = vpop.f32.mrb[36].mxu0  ;;  %v2809_v46 = vpop.f32.mrb[36].mxu1 }
 0x132   : > { %2082 = vst.msk [vmem:[%s3124_s4 + $0x8c] sm:$0xf] %vm2046_vm3, %v2538_v41  ;;  %2146 = vst.msk [vmem:[%s3124_s4 + $0x18c] sm:$0xf] %vm2046_vm3, %v2602_v42  ;;  %v1048_v47 = vadd.f32 %v2745_v45, %v3111_v8  ;;  %v1304_v48 = vadd.f32 %v2809_v46, %v3111_v8  ;;  %v1039_v49 = vpop.f32.mrb[37].mxu0  ;;  %v1295_v50 = vpop.f32.mrb[37].mxu1 }
 0x133   : > { %2080 = vst.msk [vmem:[%s3124_s4 + $0x84] sm:$0xf] %vm2046_vm3, %v2536_v43  ;;  %2144 = vst.msk [vmem:[%s3124_s4 + $0x184] sm:$0xf] %vm2046_vm3, %v2600_v44  ;;  %v1040_v51 = vadd.f32 %v3111_v8, %v1039_v49  ;;  %v1296_v52 = vadd.f32 %v3111_v8, %v1295_v50  ;;  %v2746_v53 = vpop.f32.mrb[38].mxu0  ;;  %v2810_v54 = vpop.f32.mrb[38].mxu1 }
 0x134   : > { %v1444_v55 = vmax.f32 %v1048_v47, 0.0  ;;  %v1508_v56 = vmax.f32 %v1304_v48, 0.0  ;;  %v1051_v57 = vadd.f32 %v2746_v53, %v3111_v8  ;;  %v1307_v58 = vadd.f32 %v2810_v54, %v3111_v8  ;;  %v1042_v59 = vpop.f32.mrb[39].mxu0  ;;  %v1298_v60 = vpop.f32.mrb[39].mxu1 }
 0x135   : > { %v1442_v61 = vmax.f32 %v1040_v51, 0.0  ;;  %v1506_v62 = vmax.f32 %v1296_v52, 0.0  ;;  %v1043_v63 = vadd.f32 %v3111_v8, %v1042_v59  ;;  %v1299_v0 = vadd.f32 %v3111_v8, %v1298_v60 }
 0x136   : > { %v2541_v1 = vpack.c.bf16 %v1444_v55, %v1444_v55  ;;  %v2605_v2 = vpack.c.bf16 %v1508_v56, %v1508_v56  ;;  %v1445_v3 = vmax.f32 %v1051_v57, 0.0  ;;  %v1509_v4 = vmax.f32 %v1307_v58, 0.0 }
 0x137   : > { %v2539_v5 = vpack.c.bf16 %v1442_v61, %v1442_v61  ;;  %v2603_v6 = vpack.c.bf16 %v1506_v62, %v1506_v62  ;;  %v1443_v7 = vmax.f32 %v1043_v63, 0.0  ;;  %v1507_v9 = vmax.f32 %v1299_v0, 0.0 }
 0x138   : > { %2085 = vst.msk [vmem:[%s3124_s4 + $0x98] sm:$0xf] %vm2046_vm3, %v2541_v1  ;;  %2149 = vst.msk [vmem:[%s3124_s4 + $0x198] sm:$0xf] %vm2046_vm3, %v2605_v2  ;;  %v2542_v10 = vpack.c.bf16 %v1445_v3, %v1445_v3  ;;  %v2606_v11 = vpack.c.bf16 %v1509_v4, %v1509_v4 }
 0x139   : > { %2083 = vst.msk [vmem:[%s3124_s4 + $0x90] sm:$0xf] %vm2046_vm3, %v2539_v5  ;;  %2147 = vst.msk [vmem:[%s3124_s4 + $0x190] sm:$0xf] %vm2046_vm3, %v2603_v6  ;;  %v2540_v12 = vpack.c.bf16 %v1443_v7, %v1443_v7  ;;  %v2604_v13 = vpack.c.bf16 %v1507_v9, %v1507_v9  ;;  %v2749_v14 = vpop.f32.mrb[40].mxu0  ;;  %v2813_v15 = vpop.f32.mrb[40].mxu1 }
 0x13a   : > { %2086 = vst.msk [vmem:[%s3124_s4 + $0x9c] sm:$0xf] %vm2046_vm3, %v2542_v10  ;;  %2150 = vst.msk [vmem:[%s3124_s4 + $0x19c] sm:$0xf] %vm2046_vm3, %v2606_v11  ;;  %v1064_v16 = vadd.f32 %v2749_v14, %v3111_v8  ;;  %v1320_v17 = vadd.f32 %v2813_v15, %v3111_v8  ;;  %v1055_v18 = vpop.f32.mrb[41].mxu0  ;;  %v1311_v19 = vpop.f32.mrb[41].mxu1 }
 0x13b   : > { %2084 = vst.msk [vmem:[%s3124_s4 + $0x94] sm:$0xf] %vm2046_vm3, %v2540_v12  ;;  %2148 = vst.msk [vmem:[%s3124_s4 + $0x194] sm:$0xf] %vm2046_vm3, %v2604_v13  ;;  %v1056_v20 = vadd.f32 %v3111_v8, %v1055_v18  ;;  %v1312_v21 = vadd.f32 %v3111_v8, %v1311_v19  ;;  %v2750_v22 = vpop.f32.mrb[42].mxu0  ;;  %v2814_v23 = vpop.f32.mrb[42].mxu1 }
 0x13c   : > { %v1448_v24 = vmax.f32 %v1064_v16, 0.0  ;;  %v1512_v25 = vmax.f32 %v1320_v17, 0.0  ;;  %v1067_v26 = vadd.f32 %v2750_v22, %v3111_v8  ;;  %v1323_v27 = vadd.f32 %v2814_v23, %v3111_v8  ;;  %v1058_v28 = vpop.f32.mrb[43].mxu0  ;;  %v1314_v29 = vpop.f32.mrb[43].mxu1 }
 0x13d   : > { %v1446_v30 = vmax.f32 %v1056_v20, 0.0  ;;  %v1510_v31 = vmax.f32 %v1312_v21, 0.0  ;;  %v1059_v32 = vadd.f32 %v3111_v8, %v1058_v28  ;;  %v1315_v33 = vadd.f32 %v3111_v8, %v1314_v29 }
 0x13e   : > { %v2545_v34 = vpack.c.bf16 %v1448_v24, %v1448_v24  ;;  %v2609_v35 = vpack.c.bf16 %v1512_v25, %v1512_v25  ;;  %v1449_v36 = vmax.f32 %v1067_v26, 0.0  ;;  %v1513_v37 = vmax.f32 %v1323_v27, 0.0 }
 0x13f   : > { %v2543_v38 = vpack.c.bf16 %v1446_v30, %v1446_v30  ;;  %v2607_v39 = vpack.c.bf16 %v1510_v31, %v1510_v31  ;;  %v1447_v40 = vmax.f32 %v1059_v32, 0.0  ;;  %v1511_v41 = vmax.f32 %v1315_v33, 0.0 }
 0x140   : > { %2089 = vst.msk [vmem:[%s3124_s4 + $0xa8] sm:$0xf] %vm2046_vm3, %v2545_v34  ;;  %2153 = vst.msk [vmem:[%s3124_s4 + $0x1a8] sm:$0xf] %vm2046_vm3, %v2609_v35  ;;  %v2546_v42 = vpack.c.bf16 %v1449_v36, %v1449_v36  ;;  %v2610_v43 = vpack.c.bf16 %v1513_v37, %v1513_v37 }
 0x141   : > { %2087 = vst.msk [vmem:[%s3124_s4 + $0xa0] sm:$0xf] %vm2046_vm3, %v2543_v38  ;;  %2151 = vst.msk [vmem:[%s3124_s4 + $0x1a0] sm:$0xf] %vm2046_vm3, %v2607_v39  ;;  %v2544_v44 = vpack.c.bf16 %v1447_v40, %v1447_v40  ;;  %v2608_v45 = vpack.c.bf16 %v1511_v41, %v1511_v41  ;;  %v2753_v46 = vpop.f32.mrb[44].mxu0  ;;  %v2817_v47 = vpop.f32.mrb[44].mxu1 }
 0x142   : > { %2090 = vst.msk [vmem:[%s3124_s4 + $0xac] sm:$0xf] %vm2046_vm3, %v2546_v42  ;;  %2154 = vst.msk [vmem:[%s3124_s4 + $0x1ac] sm:$0xf] %vm2046_vm3, %v2610_v43  ;;  %v1080_v48 = vadd.f32 %v2753_v46, %v3111_v8  ;;  %v1336_v49 = vadd.f32 %v2817_v47, %v3111_v8  ;;  %v1071_v50 = vpop.f32.mrb[45].mxu0  ;;  %v1327_v51 = vpop.f32.mrb[45].mxu1 }
 0x143   : > { %2088 = vst.msk [vmem:[%s3124_s4 + $0xa4] sm:$0xf] %vm2046_vm3, %v2544_v44  ;;  %2152 = vst.msk [vmem:[%s3124_s4 + $0x1a4] sm:$0xf] %vm2046_vm3, %v2608_v45  ;;  %v1072_v52 = vadd.f32 %v3111_v8, %v1071_v50  ;;  %v1328_v53 = vadd.f32 %v3111_v8, %v1327_v51  ;;  %v2754_v54 = vpop.f32.mrb[46].mxu0  ;;  %v2818_v55 = vpop.f32.mrb[46].mxu1 }
 0x144   : > { %v1452_v56 = vmax.f32 %v1080_v48, 0.0  ;;  %v1516_v57 = vmax.f32 %v1336_v49, 0.0  ;;  %v1083_v58 = vadd.f32 %v2754_v54, %v3111_v8  ;;  %v1339_v59 = vadd.f32 %v2818_v55, %v3111_v8  ;;  %v1074_v60 = vpop.f32.mrb[47].mxu0  ;;  %v1330_v61 = vpop.f32.mrb[47].mxu1  ;;  %v3431_v48 = vld [vmem:[%s3514_s2] ss:$0 sm:$0xff] }
 0x145   : > { %v1450_v62 = vmax.f32 %v1072_v52, 0.0  ;;  %v1514_v63 = vmax.f32 %v1328_v53, 0.0  ;;  %v1075_v0 = vadd.f32 %v3111_v8, %v1074_v60  ;;  %v1331_v1 = vadd.f32 %v3111_v8, %v1330_v61 }
 0x146   : > { %v2549_v2 = vpack.c.bf16 %v1452_v56, %v1452_v56  ;;  %v2613_v3 = vpack.c.bf16 %v1516_v57, %v1516_v57  ;;  %v1453_v4 = vmax.f32 %v1083_v58, 0.0  ;;  %v1517_v5 = vmax.f32 %v1339_v59, 0.0 }
 0x147   : > { %v2547_v6 = vpack.c.bf16 %v1450_v62, %v1450_v62  ;;  %v2611_v7 = vpack.c.bf16 %v1514_v63, %v1514_v63  ;;  %v1451_v9 = vmax.f32 %v1075_v0, 0.0  ;;  %v1515_v10 = vmax.f32 %v1331_v1, 0.0 }
 0x148   : > { %2093 = vst.msk [vmem:[%s3124_s4 + $0xb8] sm:$0xf] %vm2046_vm3, %v2549_v2  ;;  %2157 = vst.msk [vmem:[%s3124_s4 + $0x1b8] sm:$0xf] %vm2046_vm3, %v2613_v3  ;;  %v2550_v11 = vpack.c.bf16 %v1453_v4, %v1453_v4  ;;  %v2614_v12 = vpack.c.bf16 %v1517_v5, %v1517_v5 }
 0x149   : > { %2091 = vst.msk [vmem:[%s3124_s4 + $0xb0] sm:$0xf] %vm2046_vm3, %v2547_v6  ;;  %2155 = vst.msk [vmem:[%s3124_s4 + $0x1b0] sm:$0xf] %vm2046_vm3, %v2611_v7  ;;  %v2548_v13 = vpack.c.bf16 %v1451_v9, %v1451_v9  ;;  %v2612_v14 = vpack.c.bf16 %v1515_v10, %v1515_v10  ;;  %v2757_v15 = vpop.f32.mrb[48].mxu0  ;;  %v2821_v16 = vpop.f32.mrb[48].mxu1 }
 0x14a   : > { %2094 = vst.msk [vmem:[%s3124_s4 + $0xbc] sm:$0xf] %vm2046_vm3, %v2550_v11  ;;  %2158 = vst.msk [vmem:[%s3124_s4 + $0x1bc] sm:$0xf] %vm2046_vm3, %v2614_v12  ;;  %v1096_v17 = vadd.f32 %v2757_v15, %v3111_v8  ;;  %v1352_v18 = vadd.f32 %v2821_v16, %v3111_v8  ;;  %v1087_v19 = vpop.f32.mrb[49].mxu0  ;;  %v1343_v20 = vpop.f32.mrb[49].mxu1 }
 0x14b   : > { %2092 = vst.msk [vmem:[%s3124_s4 + $0xb4] sm:$0xf] %vm2046_vm3, %v2548_v13  ;;  %2156 = vst.msk [vmem:[%s3124_s4 + $0x1b4] sm:$0xf] %vm2046_vm3, %v2612_v14  ;;  %v1088_v21 = vadd.f32 %v3111_v8, %v1087_v19  ;;  %v1344_v22 = vadd.f32 %v3111_v8, %v1343_v20  ;;  %v2758_v23 = vpop.f32.mrb[50].mxu0  ;;  %v2822_v24 = vpop.f32.mrb[50].mxu1 }
 0x14c   : > { %v1456_v25 = vmax.f32 %v1096_v17, 0.0  ;;  %v1520_v26 = vmax.f32 %v1352_v18, 0.0  ;;  %v1099_v27 = vadd.f32 %v2758_v23, %v3111_v8  ;;  %v1355_v28 = vadd.f32 %v2822_v24, %v3111_v8  ;;  %v1090_v29 = vpop.f32.mrb[51].mxu0  ;;  %v1346_v30 = vpop.f32.mrb[51].mxu1 }
 0x14d   : > { %v1454_v31 = vmax.f32 %v1088_v21, 0.0  ;;  %v1518_v32 = vmax.f32 %v1344_v22, 0.0  ;;  %v1091_v33 = vadd.f32 %v3111_v8, %v1090_v29  ;;  %v1347_v34 = vadd.f32 %v3111_v8, %v1346_v30 }
 0x14e   : > { %v2553_v35 = vpack.c.bf16 %v1456_v25, %v1456_v25  ;;  %v2617_v36 = vpack.c.bf16 %v1520_v26, %v1520_v26  ;;  %v1457_v37 = vmax.f32 %v1099_v27, 0.0  ;;  %v1521_v38 = vmax.f32 %v1355_v28, 0.0 }
 0x14f   : > { %v2551_v39 = vpack.c.bf16 %v1454_v31, %v1454_v31  ;;  %v2615_v40 = vpack.c.bf16 %v1518_v32, %v1518_v32  ;;  %v1455_v41 = vmax.f32 %v1091_v33, 0.0  ;;  %v1519_v42 = vmax.f32 %v1347_v34, 0.0 }
 0x150   : > { %2097 = vst.msk [vmem:[%s3124_s4 + $0xc8] sm:$0xf] %vm2046_vm3, %v2553_v35  ;;  %2161 = vst.msk [vmem:[%s3124_s4 + $0x1c8] sm:$0xf] %vm2046_vm3, %v2617_v36  ;;  %v2554_v43 = vpack.c.bf16 %v1457_v37, %v1457_v37  ;;  %v2618_v44 = vpack.c.bf16 %v1521_v38, %v1521_v38 }
 0x151   : > { %2095 = vst.msk [vmem:[%s3124_s4 + $0xc0] sm:$0xf] %vm2046_vm3, %v2551_v39  ;;  %2159 = vst.msk [vmem:[%s3124_s4 + $0x1c0] sm:$0xf] %vm2046_vm3, %v2615_v40  ;;  %v2552_v8 = vpack.c.bf16 %v1455_v41, %v1455_v41  ;;  %v2616_v45 = vpack.c.bf16 %v1519_v42, %v1519_v42  ;;  %v2761_v46 = vpop.f32.mrb[52].mxu0  ;;  %v2825_v47 = vpop.f32.mrb[52].mxu1 }
 0x152   : > { %2098 = vst.msk [vmem:[%s3124_s4 + $0xcc] sm:$0xf] %vm2046_vm3, %v2554_v43  ;;  %2162 = vst.msk [vmem:[%s3124_s4 + $0x1cc] sm:$0xf] %vm2046_vm3, %v2618_v44  ;;  %v1112_v49 = vadd.f32 %v3431_v48, %v2761_v46  ;;  %v1368_v50 = vadd.f32 %v3431_v48, %v2825_v47  ;;  %v1103_v51 = vpop.f32.mrb[53].mxu0  ;;  %v1359_v52 = vpop.f32.mrb[53].mxu1 }
 0x153   : > { %2096 = vst.msk [vmem:[%s3124_s4 + $0xc4] sm:$0xf] %vm2046_vm3, %v2552_v8  ;;  %2160 = vst.msk [vmem:[%s3124_s4 + $0x1c4] sm:$0xf] %vm2046_vm3, %v2616_v45  ;;  %v1104_v53 = vadd.f32 %v3431_v48, %v1103_v51  ;;  %v1360_v54 = vadd.f32 %v3431_v48, %v1359_v52  ;;  %v2762_v55 = vpop.f32.mrb[54].mxu0  ;;  %v2826_v56 = vpop.f32.mrb[54].mxu1 }
 0x154   : > { %v1460_v57 = vmax.f32 %v1112_v49, 0.0  ;;  %v1524_v58 = vmax.f32 %v1368_v50, 0.0  ;;  %v1115_v59 = vadd.f32 %v3431_v48, %v2762_v55  ;;  %v1371_v60 = vadd.f32 %v3431_v48, %v2826_v56  ;;  %v1106_v61 = vpop.f32.mrb[55].mxu0  ;;  %v1362_v62 = vpop.f32.mrb[55].mxu1 }
 0x155   : > { %v1458_v63 = vmax.f32 %v1104_v53, 0.0  ;;  %v1522_v0 = vmax.f32 %v1360_v54, 0.0  ;;  %v1107_v1 = vadd.f32 %v3431_v48, %v1106_v61  ;;  %v1363_v2 = vadd.f32 %v3431_v48, %v1362_v62 }
 0x156   : > { %v2557_v3 = vpack.c.bf16 %v1460_v57, %v1460_v57  ;;  %v2621_v4 = vpack.c.bf16 %v1524_v58, %v1524_v58  ;;  %v1461_v5 = vmax.f32 %v1115_v59, 0.0  ;;  %v1525_v6 = vmax.f32 %v1371_v60, 0.0 }
 0x157   : > { %v2555_v7 = vpack.c.bf16 %v1458_v63, %v1458_v63  ;;  %v2619_v9 = vpack.c.bf16 %v1522_v0, %v1522_v0  ;;  %v1459_v10 = vmax.f32 %v1107_v1, 0.0  ;;  %v1523_v11 = vmax.f32 %v1363_v2, 0.0 }
 0x158   : > { %2101 = vst.msk [vmem:[%s3124_s4 + $0xd8] sm:$0xf] %vm2046_vm3, %v2557_v3  ;;  %2165 = vst.msk [vmem:[%s3124_s4 + $0x1d8] sm:$0xf] %vm2046_vm3, %v2621_v4  ;;  %v2558_v12 = vpack.c.bf16 %v1461_v5, %v1461_v5  ;;  %v2622_v13 = vpack.c.bf16 %v1525_v6, %v1525_v6 }
 0x159   : > { %2099 = vst.msk [vmem:[%s3124_s4 + $0xd0] sm:$0xf] %vm2046_vm3, %v2555_v7  ;;  %2163 = vst.msk [vmem:[%s3124_s4 + $0x1d0] sm:$0xf] %vm2046_vm3, %v2619_v9  ;;  %v2556_v14 = vpack.c.bf16 %v1459_v10, %v1459_v10  ;;  %v2620_v15 = vpack.c.bf16 %v1523_v11, %v1523_v11  ;;  %v2765_v16 = vpop.f32.mrb[56].mxu0  ;;  %v2829_v17 = vpop.f32.mrb[56].mxu1 }
 0x15a   : > { %2102 = vst.msk [vmem:[%s3124_s4 + $0xdc] sm:$0xf] %vm2046_vm3, %v2558_v12  ;;  %2166 = vst.msk [vmem:[%s3124_s4 + $0x1dc] sm:$0xf] %vm2046_vm3, %v2622_v13  ;;  %v1128_v18 = vadd.f32 %v3431_v48, %v2765_v16  ;;  %v1384_v19 = vadd.f32 %v3431_v48, %v2829_v17  ;;  %v1119_v20 = vpop.f32.mrb[57].mxu0  ;;  %v1375_v21 = vpop.f32.mrb[57].mxu1 }
 0x15b   : > { %2100 = vst.msk [vmem:[%s3124_s4 + $0xd4] sm:$0xf] %vm2046_vm3, %v2556_v14  ;;  %2164 = vst.msk [vmem:[%s3124_s4 + $0x1d4] sm:$0xf] %vm2046_vm3, %v2620_v15  ;;  %v1120_v22 = vadd.f32 %v3431_v48, %v1119_v20  ;;  %v1376_v23 = vadd.f32 %v3431_v48, %v1375_v21  ;;  %v2766_v24 = vpop.f32.mrb[58].mxu0  ;;  %v2830_v25 = vpop.f32.mrb[58].mxu1 }
 0x15c   : > { %v1464_v26 = vmax.f32 %v1128_v18, 0.0  ;;  %v1528_v27 = vmax.f32 %v1384_v19, 0.0  ;;  %v1131_v28 = vadd.f32 %v3431_v48, %v2766_v24  ;;  %v1387_v29 = vadd.f32 %v3431_v48, %v2830_v25  ;;  %v1122_v30 = vpop.f32.mrb[59].mxu0  ;;  %v1378_v31 = vpop.f32.mrb[59].mxu1 }
 0x15d   : > { %v1462_v32 = vmax.f32 %v1120_v22, 0.0  ;;  %v1526_v33 = vmax.f32 %v1376_v23, 0.0  ;;  %v1123_v34 = vadd.f32 %v3431_v48, %v1122_v30  ;;  %v1379_v35 = vadd.f32 %v3431_v48, %v1378_v31 }
 0x15e   : > { %v2561_v36 = vpack.c.bf16 %v1464_v26, %v1464_v26  ;;  %v2625_v37 = vpack.c.bf16 %v1528_v27, %v1528_v27  ;;  %v1465_v38 = vmax.f32 %v1131_v28, 0.0  ;;  %v1529_v39 = vmax.f32 %v1387_v29, 0.0 }
 0x15f   : > { %v2559_v40 = vpack.c.bf16 %v1462_v32, %v1462_v32  ;;  %v2623_v41 = vpack.c.bf16 %v1526_v33, %v1526_v33  ;;  %v1463_v42 = vmax.f32 %v1123_v34, 0.0  ;;  %v1527_v43 = vmax.f32 %v1379_v35, 0.0 }
 0x160   : > { %2105 = vst.msk [vmem:[%s3124_s4 + $0xe8] sm:$0xf] %vm2046_vm3, %v2561_v36  ;;  %2169 = vst.msk [vmem:[%s3124_s4 + $0x1e8] sm:$0xf] %vm2046_vm3, %v2625_v37  ;;  %v2562_v44 = vpack.c.bf16 %v1465_v38, %v1465_v38  ;;  %v2626_v8 = vpack.c.bf16 %v1529_v39, %v1529_v39 }
 0x161   : > { %2103 = vst.msk [vmem:[%s3124_s4 + $0xe0] sm:$0xf] %vm2046_vm3, %v2559_v40  ;;  %2167 = vst.msk [vmem:[%s3124_s4 + $0x1e0] sm:$0xf] %vm2046_vm3, %v2623_v41  ;;  %v2560_v45 = vpack.c.bf16 %v1463_v42, %v1463_v42  ;;  %v2624_v46 = vpack.c.bf16 %v1527_v43, %v1527_v43  ;;  %v2769_v47 = vpop.f32.mrb[60].mxu0  ;;  %v2833_v49 = vpop.f32.mrb[60].mxu1 }
 0x162   : > { %2106 = vst.msk [vmem:[%s3124_s4 + $0xec] sm:$0xf] %vm2046_vm3, %v2562_v44  ;;  %2170 = vst.msk [vmem:[%s3124_s4 + $0x1ec] sm:$0xf] %vm2046_vm3, %v2626_v8  ;;  %v1144_v50 = vadd.f32 %v3431_v48, %v2769_v47  ;;  %v1400_v51 = vadd.f32 %v3431_v48, %v2833_v49  ;;  %v1135_v52 = vpop.f32.mrb[61].mxu0  ;;  %v1391_v53 = vpop.f32.mrb[61].mxu1 }
 0x163   : > { %2104 = vst.msk [vmem:[%s3124_s4 + $0xe4] sm:$0xf] %vm2046_vm3, %v2560_v45  ;;  %2168 = vst.msk [vmem:[%s3124_s4 + $0x1e4] sm:$0xf] %vm2046_vm3, %v2624_v46  ;;  %v1136_v54 = vadd.f32 %v3431_v48, %v1135_v52  ;;  %v1392_v55 = vadd.f32 %v3431_v48, %v1391_v53  ;;  %v2770_v56 = vpop.f32.mrb[62].mxu0  ;;  %v2834_v57 = vpop.f32.mrb[62].mxu1 }
 0x164   : > { %v1468_v58 = vmax.f32 %v1144_v50, 0.0  ;;  %v1532_v59 = vmax.f32 %v1400_v51, 0.0  ;;  %v1147_v60 = vadd.f32 %v3431_v48, %v2770_v56  ;;  %v1403_v61 = vadd.f32 %v3431_v48, %v2834_v57  ;;  %v1138_v62 = vpop.f32.mrb[63].mxu0  ;;  %v1394_v63 = vpop.f32.mrb[63].mxu1 }
 0x165   : > { %v1466_v0 = vmax.f32 %v1136_v54, 0.0  ;;  %v1530_v1 = vmax.f32 %v1392_v55, 0.0  ;;  %v1139_v2 = vadd.f32 %v3431_v48, %v1138_v62  ;;  %v1395_v3 = vadd.f32 %v3431_v48, %v1394_v63 }
 0x166   : > { %v2565_v4 = vpack.c.bf16 %v1468_v58, %v1468_v58  ;;  %v2629_v5 = vpack.c.bf16 %v1532_v59, %v1532_v59  ;;  %v1469_v6 = vmax.f32 %v1147_v60, 0.0  ;;  %v1533_v7 = vmax.f32 %v1403_v61, 0.0 }
 0x167   : > { %v2563_v9 = vpack.c.bf16 %v1466_v0, %v1466_v0  ;;  %v2627_v10 = vpack.c.bf16 %v1530_v1, %v1530_v1  ;;  %v1467_v11 = vmax.f32 %v1139_v2, 0.0  ;;  %v1531_v12 = vmax.f32 %v1395_v3, 0.0 }
 0x168   : > { %2109 = vst.msk [vmem:[%s3124_s4 + $0xf8] sm:$0xf] %vm2046_vm3, %v2565_v4  ;;  %2173 = vst.msk [vmem:[%s3124_s4 + $0x1f8] sm:$0xf] %vm2046_vm3, %v2629_v5  ;;  %v2566_v13 = vpack.c.bf16 %v1469_v6, %v1469_v6  ;;  %v2630_v14 = vpack.c.bf16 %v1533_v7, %v1533_v7 }
 0x169   : > { %2107 = vst.msk [vmem:[%s3124_s4 + $0xf0] sm:$0xf] %vm2046_vm3, %v2563_v9  ;;  %2171 = vst.msk [vmem:[%s3124_s4 + $0x1f0] sm:$0xf] %vm2046_vm3, %v2627_v10  ;;  %v2564_v48 = vpack.c.bf16 %v1467_v11, %v1467_v11  ;;  %v2628_v15 = vpack.c.bf16 %v1531_v12, %v1531_v12 }
 0x16a   : > { %2110 = vst.msk [vmem:[%s3124_s4 + $0xfc] sm:$0xf] %vm2046_vm3, %v2566_v13  ;;  %2174 = vst.msk [vmem:[%s3124_s4 + $0x1fc] sm:$0xf] %vm2046_vm3, %v2630_v14 }
 0x16b   : > { %2108 = vst.msk [vmem:[%s3124_s4 + $0xf4] sm:$0xf] %vm2046_vm3, %v2564_v48  ;;  %2172 = vst.msk [vmem:[%s3124_s4 + $0x1f4] sm:$0xf] %vm2046_vm3, %v2628_v15 }
 0x16c PF: > { %s13_s12 = sadd.s32 1, %s2927_s12  }
 0x16d   : > { %p10_p4 = scmp.ge.s32.totalorder %s13_s12, 4  }
 0x16f   :  { %12 = sbr.rel (!%p10_p4) target bundleno = 1 (0x1), region = 62 }

// kernel: flowgen_forward.16
= control target key start
LH: loop header
LB: loop body
LE: loop exit
PB: predicated region body
PF: predicated region fallthrough
CT: control target
= control target key end

     0   :  { %s3253_s12 = smov 0   ;;  %s3891_s0 = inlined_call_operand.vmem [shape: bf16[2048,144], index: 0, kind: input, shape index: {}]   ;;  %s3892_s1 = inlined_call_operand.vmem [shape: bf16[144,16], index: 1, kind: input, shape index: {}]   ;;  %s3893_s2 = inlined_call_operand.vmem [shape: f32[1,16], index: 2, kind: input, shape index: {}]   ;;  %s3894_s3 = inlined_call_operand.vmem [shape: bf16[2048,16], index: 3, kind: output, shape index: {}]  }
   0x1 LB: > { %s2524_s13 = sadd.s32 4294967295, %s3230_s12   ;;  %p2528_p0 = scmp.ge.s32.totalorder %s3230_s12, 1  ;;  %s3230_s12 = sphi %s3253_s12, %s13_s12  }
   0x2   : > { %p139_p1 = scmp.lt.s32.totalorder %s3230_s12, 3 }
   0x4   : > { %p140_p2 = pnand %p2528_p0, %p139_p1 }
   0x5   : > { %v3022_v0 = vld [vmem:[%s3892_s1] sm:$0xff] (!%p140_p2)   ;;  %v3232_v1 = vmov (!%p140_p2), 0   ;;  %s2529_s16 = sshll.u32 (!%p140_p2), %s2524_s13, 7  ;;  %v3023_v2 = vld [vmem:[%s3892_s1 + $0x8] sm:$0xff] (!%p140_p2)   ;;  %v3024_v3 = vld [vmem:[%s3892_s1 + $0x10] sm:$0xff] (!%p140_p2)   ;;  %vm961_vm0 = vcmask (!%p140_p2), 130048  }
   0x6   : > { %143 = sbr.rel (%p140_p2) target bundleno = 511 (0x1ff), region = 32  ;;  %1154 = vmatprep.subr.bf16.mxu0 (!%p140_p2), %v3232_v1  ;;  %2995 = vmatprep.subr.bf16.mxu1 (!%p140_p2), %v3232_v1  ;;  %p165_p3 = scmp.lt.s32.totalorder (!%p140_p2), %s2529_s16, 255  ;;  %v3025_v4 = vld [vmem:[%s3892_s1 + $0x18] sm:$0xff] (!%p140_p2)   ;;  %v3026_v7 = vld [vmem:[%s3892_s1 + $0x20] sm:$0xff] (!%p140_p2)   ;;  %v3027_v8 = vld [vmem:[%s3892_s1 + $0x28] sm:$0xff] (!%p140_p2)   ;;  %vm2339_vm1 = vcmask (!%p140_p2), 125952  }
   0x7   : > { %1155 = vmatpush1.bf16.msra.mxu0 (!%p140_p2), %v3022_v0  ;;  %3004 = vmatpush1.bf16.msra.mxu1 (!%p140_p2), %v3022_v0  ;;  %v3028_v9 = vld [vmem:[%s3892_s1 + $0x30] sm:$0xff] (!%p140_p2)   ;;  %v3029_v10 = vld [vmem:[%s3892_s1 + $0x38] sm:$0xff] (!%p140_p2)   ;;  %v3030_v11 = vld [vmem:[%s3892_s1 + $0x40] sm:$0xff] (!%p140_p2)  }
   0x8   : > { %1156 = vmatprep.subr.bf16.mxu0 (!%p140_p2), %v3232_v1  ;;  %2996 = vmatprep.subr.bf16.mxu1 (!%p140_p2), %v3232_v1 }
   0xb   : > { %1157 = vmatpush1.bf16.msra.mxu0 (!%p140_p2), %v3023_v2  ;;  %3005 = vmatpush1.bf16.msra.mxu1 (!%p140_p2), %v3023_v2 }
   0xc   : > { %1158 = vmatprep.subr.bf16.mxu0 (!%p140_p2), %v3232_v1  ;;  %2997 = vmatprep.subr.bf16.mxu1 (!%p140_p2), %v3232_v1 }
   0xd   : > { %s3896_s16 = smov (!%p165_p3, %s2529_s16), 255 }
   0xe   : > { %s2866_s21 = sshll.u32 %s3896_s16, 3  ;;  %s2533_s13 = sshll.u32 %s3896_s16, 2 }
   0xf   : > { %s3276_s24 = scalar_lea.vmem %s3891_s0, %s2866_s21  ;;  %1159 = vmatpush1.bf16.msra.mxu0 %v3024_v3  ;;  %3006 = vmatpush1.bf16.msra.mxu1 %v3024_v3  ;;  %s3479_s16 = scalar_lea.vmem %s3894_s3, %s2533_s13 }
  0x10   : > { %v3033_v5 = vld [vmem:[%s3276_s24 + $0x4] ss:$8 sps:$4 sm:$0xff]   ;;  %1160 = vmatprep.subr.bf16.mxu0 %v3232_v1  ;;  %2998 = vmatprep.subr.bf16.mxu1 %v3232_v1  ;;  %v3031_v12 = vld [vmem:[%s3276_s24] ss:$8 sps:$4 sm:$0xff]   ;;  %v3037_v14 = vld [vmem:[%s3276_s24 + $0x14] ss:$8 sps:$4 sm:$0xff]  }
  0x11   : > { %v3036_v6 = vld [vmem:[%s3276_s24 + $0x204] ss:$8 sps:$4 sm:$0xff]   ;;  %2672 = vmatprep.mubr.msk.bf16.mxu0 %vm961_vm0, %v3033_v5  ;;  %v3034_v13 = vld [vmem:[%s3276_s24 + $0x200] ss:$8 sps:$4 sm:$0xff]   ;;  %v3039_v15 = vld [vmem:[%s3276_s24 + $0x214] ss:$8 sps:$4 sm:$0xff]  }
  0x12   : > { %2704 = vmatprep.mubr.msk.bf16.mxu1 %vm961_vm0, %v3036_v6  ;;  %v3041_v16 = vld [vmem:[%s3276_s24 + $0x10] ss:$8 sps:$4 sm:$0xff]   ;;  %v3043_v18 = vld [vmem:[%s3276_s24 + $0x24] ss:$8 sps:$4 sm:$0xff]   ;;  %v3047_v20 = vld [vmem:[%s3276_s24 + $0x20] ss:$8 sps:$4 sm:$0xff]  }
  0x13   : > { %1161 = vmatpush1.bf16.msra.mxu0 %v3025_v4  ;;  %3007 = vmatpush1.bf16.msra.mxu1 %v3025_v4  ;;  %v3042_v17 = vld [vmem:[%s3276_s24 + $0x210] ss:$8 sps:$4 sm:$0xff]   ;;  %v3045_v19 = vld [vmem:[%s3276_s24 + $0x224] ss:$8 sps:$4 sm:$0xff]   ;;  %v3048_v21 = vld [vmem:[%s3276_s24 + $0x220] ss:$8 sps:$4 sm:$0xff]  }
  0x14   : > { %1162 = vmatprep.subr.bf16.mxu0 %v3232_v1  ;;  %2999 = vmatprep.subr.bf16.mxu1 %v3232_v1  ;;  %v3049_v22 = vld [vmem:[%s3276_s24 + $0x34] ss:$8 sps:$4 sm:$0xff]   ;;  %v3053_v24 = vld [vmem:[%s3276_s24 + $0x30] ss:$8 sps:$4 sm:$0xff]   ;;  %v3055_v26 = vld [vmem:[%s3276_s24 + $0x44] ss:$8 sps:$4 sm:$0xff]  }
  0x15   : > { %v3051_v23 = vld [vmem:[%s3276_s24 + $0x234] ss:$8 sps:$4 sm:$0xff]   ;;  %v3054_v25 = vld [vmem:[%s3276_s24 + $0x230] ss:$8 sps:$4 sm:$0xff]   ;;  %v3057_v27 = vld [vmem:[%s3276_s24 + $0x244] ss:$8 sps:$4 sm:$0xff]  }
  0x16   : > { %v3059_v28 = vld [vmem:[%s3276_s24 + $0x40] ss:$8 sps:$4 sm:$0xff]   ;;  %v3061_v30 = vld [vmem:[%s3276_s24 + $0x54] ss:$8 sps:$4 sm:$0xff]   ;;  %v3065_v32 = vld [vmem:[%s3276_s24 + $0x50] ss:$8 sps:$4 sm:$0xff]  }
  0x17   : > { %1163 = vmatpush1.bf16.msra.mxu0 %v3026_v7  ;;  %3008 = vmatpush1.bf16.msra.mxu1 %v3026_v7  ;;  %v3060_v29 = vld [vmem:[%s3276_s24 + $0x240] ss:$8 sps:$4 sm:$0xff]   ;;  %v3063_v31 = vld [vmem:[%s3276_s24 + $0x254] ss:$8 sps:$4 sm:$0xff]   ;;  %v3066_v33 = vld [vmem:[%s3276_s24 + $0x250] ss:$8 sps:$4 sm:$0xff]  }
  0x18   : > { %1164 = vmatprep.subr.bf16.mxu0 %v3232_v1  ;;  %3000 = vmatprep.subr.bf16.mxu1 %v3232_v1  ;;  %v3067_v34 = vld [vmem:[%s3276_s24 + $0x64] ss:$8 sps:$4 sm:$0xff]   ;;  %v3071_v36 = vld [vmem:[%s3276_s24 + $0x60] ss:$8 sps:$4 sm:$0xff]   ;;  %v3073_v38 = vld [vmem:[%s3276_s24 + $0x74] ss:$8 sps:$4 sm:$0xff]  }
  0x19   : > { %v3069_v35 = vld [vmem:[%s3276_s24 + $0x264] ss:$8 sps:$4 sm:$0xff]   ;;  %v3072_v37 = vld [vmem:[%s3276_s24 + $0x260] ss:$8 sps:$4 sm:$0xff]   ;;  %v3075_v39 = vld [vmem:[%s3276_s24 + $0x274] ss:$8 sps:$4 sm:$0xff]  }
  0x1a   : > { %v3077_v40 = vld [vmem:[%s3276_s24 + $0x70] ss:$8 sps:$4 sm:$0xff]   ;;  %v3079_v42 = vld [vmem:[%s3276_s24 + $0x84] ss:$8 sps:$4 sm:$0xff]   ;;  %v3083_v44 = vld [vmem:[%s3276_s24 + $0x80] ss:$8 sps:$4 sm:$0xff]  }
  0x1b   : > { %1165 = vmatpush1.bf16.msra.mxu0 %v3027_v8  ;;  %3009 = vmatpush1.bf16.msra.mxu1 %v3027_v8  ;;  %v3078_v41 = vld [vmem:[%s3276_s24 + $0x270] ss:$8 sps:$4 sm:$0xff]   ;;  %v3081_v43 = vld [vmem:[%s3276_s24 + $0x284] ss:$8 sps:$4 sm:$0xff]   ;;  %v3084_v45 = vld [vmem:[%s3276_s24 + $0x280] ss:$8 sps:$4 sm:$0xff]  }
  0x1c   : > { %1166 = vmatprep.subr.bf16.mxu0 %v3232_v1  ;;  %3001 = vmatprep.subr.bf16.mxu1 %v3232_v1  ;;  %v3085_v46 = vld [vmem:[%s3276_s24 + $0x94] ss:$8 sps:$4 sm:$0xff]   ;;  %v3089_v48 = vld [vmem:[%s3276_s24 + $0x90] ss:$8 sps:$4 sm:$0xff]   ;;  %v3091_v50 = vld [vmem:[%s3276_s24 + $0xa4] ss:$8 sps:$4 sm:$0xff]  }
  0x1d   : > { %v3087_v47 = vld [vmem:[%s3276_s24 + $0x294] ss:$8 sps:$4 sm:$0xff]   ;;  %v3090_v49 = vld [vmem:[%s3276_s24 + $0x290] ss:$8 sps:$4 sm:$0xff]   ;;  %v3093_v51 = vld [vmem:[%s3276_s24 + $0x2a4] ss:$8 sps:$4 sm:$0xff]  }
  0x1e   : > { %v3095_v52 = vld [vmem:[%s3276_s24 + $0xa0] ss:$8 sps:$4 sm:$0xff]   ;;  %v3097_v54 = vld [vmem:[%s3276_s24 + $0xb4] ss:$8 sps:$4 sm:$0xff]   ;;  %v3101_v56 = vld [vmem:[%s3276_s24 + $0xb0] ss:$8 sps:$4 sm:$0xff]  }
  0x1f   : > { %1167 = vmatpush1.bf16.msra.mxu0 %v3028_v9  ;;  %3010 = vmatpush1.bf16.msra.mxu1 %v3028_v9  ;;  %v3096_v53 = vld [vmem:[%s3276_s24 + $0x2a0] ss:$8 sps:$4 sm:$0xff]   ;;  %v3099_v55 = vld [vmem:[%s3276_s24 + $0x2b4] ss:$8 sps:$4 sm:$0xff]   ;;  %v3102_v57 = vld [vmem:[%s3276_s24 + $0x2b0] ss:$8 sps:$4 sm:$0xff]  }
  0x20   : > { %1168 = vmatprep.subr.bf16.mxu0 %v3232_v1  ;;  %3002 = vmatprep.subr.bf16.mxu1 %v3232_v1  ;;  %v3103_v58 = vld [vmem:[%s3276_s24 + $0xc4] ss:$8 sps:$4 sm:$0xff]   ;;  %v3107_v60 = vld [vmem:[%s3276_s24 + $0xc0] ss:$8 sps:$4 sm:$0xff]   ;;  %v3109_v62 = vld [vmem:[%s3276_s24 + $0xd4] ss:$8 sps:$4 sm:$0xff]  }
  0x21   : > { %v3105_v59 = vld [vmem:[%s3276_s24 + $0x2c4] ss:$8 sps:$4 sm:$0xff]   ;;  %v3108_v61 = vld [vmem:[%s3276_s24 + $0x2c0] ss:$8 sps:$4 sm:$0xff]   ;;  %v3111_v63 = vld [vmem:[%s3276_s24 + $0x2d4] ss:$8 sps:$4 sm:$0xff]  }
  0x22   : > { %v3113_v0 = vld [vmem:[%s3276_s24 + $0xd0] ss:$8 sps:$4 sm:$0xff]   ;;  %v3115_v2 = vld [vmem:[%s3276_s24 + $0xe4] ss:$8 sps:$4 sm:$0xff]   ;;  %v3119_v4 = vld [vmem:[%s3276_s24 + $0xe0] ss:$8 sps:$4 sm:$0xff]  }
  0x23   : > { %1169 = vmatpush1.bf16.msra.mxu0 %v3029_v10  ;;  %3011 = vmatpush1.bf16.msra.mxu1 %v3029_v10  ;;  %v3117_v3 = vld [vmem:[%s3276_s24 + $0x2e4] ss:$8 sps:$4 sm:$0xff]   ;;  %v3120_v5 = vld [vmem:[%s3276_s24 + $0x2e0] ss:$8 sps:$4 sm:$0xff]   ;;  %v3121_v6 = vld [vmem:[%s3276_s24 + $0xf4] ss:$8 sps:$4 sm:$0xff]  }
  0x24   : > { %1170 = vmatprep.subr.bf16.mxu0 %v3232_v1  ;;  %3003 = vmatprep.subr.bf16.mxu1 %v3232_v1  ;;  %v3114_v1 = vld [vmem:[%s3276_s24 + $0x2d0] ss:$8 sps:$4 sm:$0xff]   ;;  %v3123_v7 = vld [vmem:[%s3276_s24 + $0x2f4] ss:$8 sps:$4 sm:$0xff]   ;;  %v3127_v10 = vld [vmem:[%s3276_s24 + $0x104] ss:$8 sps:$4 sm:$0xff]  }
  0x25   : > { %v3125_v8 = vld [vmem:[%s3276_s24 + $0xf0] ss:$8 sps:$4 sm:$0xff]  }
  0x26   : > { %v3126_v9 = vld [vmem:[%s3276_s24 + $0x2f0] ss:$8 sps:$4 sm:$0xff]  }
  0x27   : > { %1171 = vmatpush1.bf16.msra.mxu0 %v3030_v11  ;;  %3012 = vmatpush1.bf16.msra.mxu1 %v3030_v11  ;;  %v3129_v11 = vld [vmem:[%s3276_s24 + $0x304] ss:$8 sps:$4 sm:$0xff]  }
  0x2a   : > { %1187 = vmatmul.mubr.bf16.vlgmr.msra.gmra.mrb[0].mxu0 %v3031_v12  ;;  %1443 = vmatmul.mubr.bf16.vlgmr.msra.gmra.mrb[0].mxu1 %v3034_v13  ;;  %v3131_v12 = vld [vmem:[%s3276_s24 + $0x100] ss:$8 sps:$4 sm:$0xff]  }
  0x2b   : > { %2673 = vmatprep.mubr.msk.bf16.mxu0 %vm961_vm0, %v3037_v14  ;;  %2705 = vmatprep.mubr.msk.bf16.mxu1 %vm961_vm0, %v3039_v15  ;;  %v3132_v13 = vld [vmem:[%s3276_s24 + $0x300] ss:$8 sps:$4 sm:$0xff]   ;;  %v3133_v14 = vld [vmem:[%s3276_s24 + $0x114] ss:$8 sps:$4 sm:$0xff]  }
  0x2c   : > { %v3135_v15 = vld [vmem:[%s3276_s24 + $0x314] ss:$8 sps:$4 sm:$0xff]  }
  0x32   : > { %1195 = vmatmul.mubr.bf16.gmra.mrb[4].mxu0 %v3041_v16  ;;  %1451 = vmatmul.mubr.bf16.gmra.mrb[4].mxu1 %v3042_v17  ;;  %v3137_v16 = vld [vmem:[%s3276_s24 + $0x110] ss:$8 sps:$4 sm:$0xff]  }
  0x33   : > { %2674 = vmatprep.mubr.msk.bf16.mxu0 %vm961_vm0, %v3043_v18  ;;  %2706 = vmatprep.mubr.msk.bf16.mxu1 %vm961_vm0, %v3045_v19  ;;  %v3138_v17 = vld [vmem:[%s3276_s24 + $0x310] ss:$8 sps:$4 sm:$0xff]   ;;  %v3139_v18 = vld [vmem:[%s3276_s24 + $0x124] ss:$8 sps:$4 sm:$0xff]  }
  0x34   : > { %v3141_v19 = vld [vmem:[%s3276_s24 + $0x324] ss:$8 sps:$4 sm:$0xff]  }
  0x3a   : > { %1203 = vmatmul.mubr.bf16.gmra.mrb[8].mxu0 %v3047_v20  ;;  %1459 = vmatmul.mubr.bf16.gmra.mrb[8].mxu1 %v3048_v21  ;;  %v3143_v20 = vld [vmem:[%s3276_s24 + $0x120] ss:$8 sps:$4 sm:$0xff]  }
  0x3b   : > { %2675 = vmatprep.mubr.msk.bf16.mxu0 %vm961_vm0, %v3049_v22  ;;  %2707 = vmatprep.mubr.msk.bf16.mxu1 %vm961_vm0, %v3051_v23  ;;  %v3144_v21 = vld [vmem:[%s3276_s24 + $0x320] ss:$8 sps:$4 sm:$0xff]   ;;  %v3145_v22 = vld [vmem:[%s3276_s24 + $0x134] ss:$8 sps:$4 sm:$0xff]  }
  0x3c   : > { %v3147_v23 = vld [vmem:[%s3276_s24 + $0x334] ss:$8 sps:$4 sm:$0xff]  }
  0x42   : > { %1211 = vmatmul.mubr.bf16.gmra.mrb[12].mxu0 %v3053_v24  ;;  %1467 = vmatmul.mubr.bf16.gmra.mrb[12].mxu1 %v3054_v25  ;;  %v3149_v24 = vld [vmem:[%s3276_s24 + $0x130] ss:$8 sps:$4 sm:$0xff]  }
  0x43   : > { %2676 = vmatprep.mubr.msk.bf16.mxu0 %vm961_vm0, %v3055_v26  ;;  %2708 = vmatprep.mubr.msk.bf16.mxu1 %vm961_vm0, %v3057_v27  ;;  %v3150_v25 = vld [vmem:[%s3276_s24 + $0x330] ss:$8 sps:$4 sm:$0xff]   ;;  %v3151_v26 = vld [vmem:[%s3276_s24 + $0x144] ss:$8 sps:$4 sm:$0xff]  }
  0x44   : > { %v3153_v27 = vld [vmem:[%s3276_s24 + $0x344] ss:$8 sps:$4 sm:$0xff]  }
  0x4a   : > { %1219 = vmatmul.mubr.bf16.gmra.mrb[16].mxu0 %v3059_v28  ;;  %1475 = vmatmul.mubr.bf16.gmra.mrb[16].mxu1 %v3060_v29  ;;  %v3155_v28 = vld [vmem:[%s3276_s24 + $0x140] ss:$8 sps:$4 sm:$0xff]  }
  0x4b   : > { %2677 = vmatprep.mubr.msk.bf16.mxu0 %vm961_vm0, %v3061_v30  ;;  %2709 = vmatprep.mubr.msk.bf16.mxu1 %vm961_vm0, %v3063_v31  ;;  %v3156_v29 = vld [vmem:[%s3276_s24 + $0x340] ss:$8 sps:$4 sm:$0xff]   ;;  %v3157_v30 = vld [vmem:[%s3276_s24 + $0x154] ss:$8 sps:$4 sm:$0xff]  }
  0x4c   : > { %v3159_v31 = vld [vmem:[%s3276_s24 + $0x354] ss:$8 sps:$4 sm:$0xff]  }
  0x52   : > { %1227 = vmatmul.mubr.bf16.gmra.mrb[20].mxu0 %v3065_v32  ;;  %1483 = vmatmul.mubr.bf16.gmra.mrb[20].mxu1 %v3066_v33  ;;  %v3161_v32 = vld [vmem:[%s3276_s24 + $0x150] ss:$8 sps:$4 sm:$0xff]  }
  0x53   : > { %2678 = vmatprep.mubr.msk.bf16.mxu0 %vm961_vm0, %v3067_v34  ;;  %2710 = vmatprep.mubr.msk.bf16.mxu1 %vm961_vm0, %v3069_v35  ;;  %v3162_v33 = vld [vmem:[%s3276_s24 + $0x350] ss:$8 sps:$4 sm:$0xff]   ;;  %v3163_v34 = vld [vmem:[%s3276_s24 + $0x164] ss:$8 sps:$4 sm:$0xff]  }
  0x54   : > { %v3165_v35 = vld [vmem:[%s3276_s24 + $0x364] ss:$8 sps:$4 sm:$0xff]  }
  0x5a   : > { %1235 = vmatmul.mubr.bf16.gmra.mrb[24].mxu0 %v3071_v36  ;;  %1491 = vmatmul.mubr.bf16.gmra.mrb[24].mxu1 %v3072_v37  ;;  %v3167_v36 = vld [vmem:[%s3276_s24 + $0x160] ss:$8 sps:$4 sm:$0xff]  }
  0x5b   : > { %2679 = vmatprep.mubr.msk.bf16.mxu0 %vm961_vm0, %v3073_v38  ;;  %2711 = vmatprep.mubr.msk.bf16.mxu1 %vm961_vm0, %v3075_v39  ;;  %v3168_v37 = vld [vmem:[%s3276_s24 + $0x360] ss:$8 sps:$4 sm:$0xff]   ;;  %v3169_v38 = vld [vmem:[%s3276_s24 + $0x174] ss:$8 sps:$4 sm:$0xff]  }
  0x5c   : > { %v3171_v39 = vld [vmem:[%s3276_s24 + $0x374] ss:$8 sps:$4 sm:$0xff]  }
  0x62   : > { %1243 = vmatmul.mubr.bf16.gmra.mrb[28].mxu0 %v3077_v40  ;;  %1499 = vmatmul.mubr.bf16.gmra.mrb[28].mxu1 %v3078_v41  ;;  %v3173_v40 = vld [vmem:[%s3276_s24 + $0x170] ss:$8 sps:$4 sm:$0xff]  }
  0x63   : > { %2680 = vmatprep.mubr.msk.bf16.mxu0 %vm961_vm0, %v3079_v42  ;;  %2712 = vmatprep.mubr.msk.bf16.mxu1 %vm961_vm0, %v3081_v43  ;;  %v3174_v41 = vld [vmem:[%s3276_s24 + $0x370] ss:$8 sps:$4 sm:$0xff]   ;;  %v3175_v42 = vld [vmem:[%s3276_s24 + $0x184] ss:$8 sps:$4 sm:$0xff]  }
  0x64   : > { %v3177_v43 = vld [vmem:[%s3276_s24 + $0x384] ss:$8 sps:$4 sm:$0xff]  }
  0x6a   : > { %1251 = vmatmul.mubr.bf16.gmra.mrb[32].mxu0 %v3083_v44  ;;  %1507 = vmatmul.mubr.bf16.gmra.mrb[32].mxu1 %v3084_v45  ;;  %v3179_v44 = vld [vmem:[%s3276_s24 + $0x180] ss:$8 sps:$4 sm:$0xff]  }
  0x6b   : > { %2681 = vmatprep.mubr.msk.bf16.mxu0 %vm961_vm0, %v3085_v46  ;;  %2713 = vmatprep.mubr.msk.bf16.mxu1 %vm961_vm0, %v3087_v47  ;;  %v3180_v45 = vld [vmem:[%s3276_s24 + $0x380] ss:$8 sps:$4 sm:$0xff]   ;;  %v3181_v46 = vld [vmem:[%s3276_s24 + $0x194] ss:$8 sps:$4 sm:$0xff]  }
  0x6c   : > { %v3183_v47 = vld [vmem:[%s3276_s24 + $0x394] ss:$8 sps:$4 sm:$0xff]  }
  0x72   : > { %1259 = vmatmul.mubr.bf16.gmra.mrb[36].mxu0 %v3089_v48  ;;  %1515 = vmatmul.mubr.bf16.gmra.mrb[36].mxu1 %v3090_v49  ;;  %v3185_v48 = vld [vmem:[%s3276_s24 + $0x190] ss:$8 sps:$4 sm:$0xff]  }
  0x73   : > { %2682 = vmatprep.mubr.msk.bf16.mxu0 %vm961_vm0, %v3091_v50  ;;  %2714 = vmatprep.mubr.msk.bf16.mxu1 %vm961_vm0, %v3093_v51  ;;  %v3186_v49 = vld [vmem:[%s3276_s24 + $0x390] ss:$8 sps:$4 sm:$0xff]   ;;  %v3187_v50 = vld [vmem:[%s3276_s24 + $0x1a4] ss:$8 sps:$4 sm:$0xff]  }
  0x74   : > { %v3189_v51 = vld [vmem:[%s3276_s24 + $0x3a4] ss:$8 sps:$4 sm:$0xff]  }
  0x7a   : > { %1267 = vmatmul.mubr.bf16.gmra.mrb[40].mxu0 %v3095_v52  ;;  %1523 = vmatmul.mubr.bf16.gmra.mrb[40].mxu1 %v3096_v53  ;;  %v3191_v52 = vld [vmem:[%s3276_s24 + $0x1a0] ss:$8 sps:$4 sm:$0xff]  }
  0x7b   : > { %2683 = vmatprep.mubr.msk.bf16.mxu0 %vm961_vm0, %v3097_v54  ;;  %2715 = vmatprep.mubr.msk.bf16.mxu1 %vm961_vm0, %v3099_v55  ;;  %v3192_v53 = vld [vmem:[%s3276_s24 + $0x3a0] ss:$8 sps:$4 sm:$0xff]   ;;  %v3193_v54 = vld [vmem:[%s3276_s24 + $0x1b4] ss:$8 sps:$4 sm:$0xff]  }
  0x7c   : > { %v3195_v55 = vld [vmem:[%s3276_s24 + $0x3b4] ss:$8 sps:$4 sm:$0xff]  }
  0x82   : > { %1275 = vmatmul.mubr.bf16.gmra.mrb[44].mxu0 %v3101_v56  ;;  %1531 = vmatmul.mubr.bf16.gmra.mrb[44].mxu1 %v3102_v57  ;;  %v3463_v56 = vld [vmem:[%s3893_s2] ss:$0 sm:$0xff] }
  0x83   : > { %2684 = vmatprep.mubr.msk.bf16.mxu0 %vm961_vm0, %v3103_v58  ;;  %2716 = vmatprep.mubr.msk.bf16.mxu1 %vm961_vm0, %v3105_v59 }
  0x8a   : > { %1283 = vmatmul.mubr.bf16.gmra.mrb[48].mxu0 %v3107_v60  ;;  %1539 = vmatmul.mubr.bf16.gmra.mrb[48].mxu1 %v3108_v61 }
  0x8b   : > { %2685 = vmatprep.mubr.msk.bf16.mxu0 %vm961_vm0, %v3109_v62  ;;  %2717 = vmatprep.mubr.msk.bf16.mxu1 %vm961_vm0, %v3111_v63  ;;  %v3197_v63 = vld [vmem:[%s3276_s24 + $0x1b0] ss:$8 sps:$4 sm:$0xff]  }
  0x92   : > { %1291 = vmatmul.mubr.bf16.gmra.mrb[52].mxu0 %v3113_v0  ;;  %1547 = vmatmul.mubr.bf16.gmra.mrb[52].mxu1 %v3114_v1  ;;  %v3198_v0 = vld [vmem:[%s3276_s24 + $0x3b0] ss:$8 sps:$4 sm:$0xff]  }
  0x93   : > { %2686 = vmatprep.mubr.msk.bf16.mxu0 %vm961_vm0, %v3115_v2  ;;  %2718 = vmatprep.mubr.msk.bf16.mxu1 %vm961_vm0, %v3117_v3  ;;  %v3199_v3 = vld [vmem:[%s3276_s24 + $0x1c4] ss:$8 sps:$4 sm:$0xff]  }
  0x9a   : > { %1299 = vmatmul.mubr.bf16.gmra.mrb[56].mxu0 %v3119_v4  ;;  %1555 = vmatmul.mubr.bf16.gmra.mrb[56].mxu1 %v3120_v5  ;;  %v3201_v4 = vld [vmem:[%s3276_s24 + $0x3c4] ss:$8 sps:$4 sm:$0xff]  }
  0x9b   : > { %2687 = vmatprep.mubr.msk.bf16.mxu0 %vm961_vm0, %v3121_v6  ;;  %2719 = vmatprep.mubr.msk.bf16.mxu1 %vm961_vm0, %v3123_v7 }
  0xa2   : > { %1307 = vmatmul.mubr.bf16.gmra.mrb[60].mxu0 %v3125_v8  ;;  %1563 = vmatmul.mubr.bf16.gmra.mrb[60].mxu1 %v3126_v9 }
  0xa3   : > { %2688 = vmatprep.mubr.msk.bf16.mxu0 %vm961_vm0, %v3127_v10  ;;  %2720 = vmatprep.mubr.msk.bf16.mxu1 %vm961_vm0, %v3129_v11 }
  0xaa   : > { %1315 = vmatmul.mubr.bf16.gmra.mrb[64].mxu0 %v3131_v12  ;;  %1571 = vmatmul.mubr.bf16.gmra.mrb[64].mxu1 %v3132_v13 }
  0xab   : > { %2689 = vmatprep.mubr.msk.bf16.mxu0 %vm961_vm0, %v3133_v14  ;;  %2721 = vmatprep.mubr.msk.bf16.mxu1 %vm961_vm0, %v3135_v15 }
  0xb2   : > { %1323 = vmatmul.mubr.bf16.gmra.mrb[68].mxu0 %v3137_v16  ;;  %1579 = vmatmul.mubr.bf16.gmra.mrb[68].mxu1 %v3138_v17 }
  0xb3   : > { %2690 = vmatprep.mubr.msk.bf16.mxu0 %vm961_vm0, %v3139_v18  ;;  %2722 = vmatprep.mubr.msk.bf16.mxu1 %vm961_vm0, %v3141_v19 }
  0xba   : > { %1331 = vmatmul.mubr.bf16.gmra.mrb[72].mxu0 %v3143_v20  ;;  %1587 = vmatmul.mubr.bf16.gmra.mrb[72].mxu1 %v3144_v21 }
  0xbb   : > { %2691 = vmatprep.mubr.msk.bf16.mxu0 %vm961_vm0, %v3145_v22  ;;  %2723 = vmatprep.mubr.msk.bf16.mxu1 %vm961_vm0, %v3147_v23  ;;  %v3203_v23 = vld [vmem:[%s3276_s24 + $0x1c0] ss:$8 sps:$4 sm:$0xff]  }
  0xc2   : > { %1339 = vmatmul.mubr.bf16.gmra.mrb[76].mxu0 %v3149_v24  ;;  %1595 = vmatmul.mubr.bf16.gmra.mrb[76].mxu1 %v3150_v25  ;;  %v3204_v24 = vld [vmem:[%s3276_s24 + $0x3c0] ss:$8 sps:$4 sm:$0xff]  }
  0xc3   : > { %2692 = vmatprep.mubr.msk.bf16.mxu0 %vm961_vm0, %v3151_v26  ;;  %2724 = vmatprep.mubr.msk.bf16.mxu1 %vm961_vm0, %v3153_v27  ;;  %v3205_v27 = vld [vmem:[%s3276_s24 + $0x1d4] ss:$8 sps:$4 sm:$0xff]  }
  0xca   : > { %1347 = vmatmul.mubr.bf16.gmra.mrb[80].mxu0 %v3155_v28  ;;  %1603 = vmatmul.mubr.bf16.gmra.mrb[80].mxu1 %v3156_v29  ;;  %v3207_v28 = vld [vmem:[%s3276_s24 + $0x3d4] ss:$8 sps:$4 sm:$0xff]  }
  0xcb   : > { %2693 = vmatprep.mubr.msk.bf16.mxu0 %vm961_vm0, %v3157_v30  ;;  %2725 = vmatprep.mubr.msk.bf16.mxu1 %vm961_vm0, %v3159_v31 }
  0xd2   : > { %1355 = vmatmul.mubr.bf16.gmra.mrb[84].mxu0 %v3161_v32  ;;  %1611 = vmatmul.mubr.bf16.gmra.mrb[84].mxu1 %v3162_v33 }
  0xd3   : > { %2694 = vmatprep.mubr.msk.bf16.mxu0 %vm961_vm0, %v3163_v34  ;;  %2726 = vmatprep.mubr.msk.bf16.mxu1 %vm961_vm0, %v3165_v35 }
  0xda   : > { %1363 = vmatmul.mubr.bf16.gmra.mrb[88].mxu0 %v3167_v36  ;;  %1619 = vmatmul.mubr.bf16.gmra.mrb[88].mxu1 %v3168_v37 }
  0xdb   : > { %2695 = vmatprep.mubr.msk.bf16.mxu0 %vm961_vm0, %v3169_v38  ;;  %2727 = vmatprep.mubr.msk.bf16.mxu1 %vm961_vm0, %v3171_v39 }
  0xe2   : > { %1371 = vmatmul.mubr.bf16.gmra.mrb[92].mxu0 %v3173_v40  ;;  %1627 = vmatmul.mubr.bf16.gmra.mrb[92].mxu1 %v3174_v41 }
  0xe3   : > { %2696 = vmatprep.mubr.msk.bf16.mxu0 %vm961_vm0, %v3175_v42  ;;  %2728 = vmatprep.mubr.msk.bf16.mxu1 %vm961_vm0, %v3177_v43 }
  0xea   : > { %1379 = vmatmul.mubr.bf16.gmra.mrb[96].mxu0 %v3179_v44  ;;  %1635 = vmatmul.mubr.bf16.gmra.mrb[96].mxu1 %v3180_v45 }
  0xeb   : > { %2697 = vmatprep.mubr.msk.bf16.mxu0 %vm961_vm0, %v3181_v46  ;;  %2729 = vmatprep.mubr.msk.bf16.mxu1 %vm961_vm0, %v3183_v47  ;;  %v3209_v47 = vld [vmem:[%s3276_s24 + $0x1d0] ss:$8 sps:$4 sm:$0xff]  }
  0xf2   : > { %1387 = vmatmul.mubr.bf16.gmra.mrb[100].mxu0 %v3185_v48  ;;  %1643 = vmatmul.mubr.bf16.gmra.mrb[100].mxu1 %v3186_v49  ;;  %v3210_v48 = vld [vmem:[%s3276_s24 + $0x3d0] ss:$8 sps:$4 sm:$0xff]  }
  0xf3   : > { %2698 = vmatprep.mubr.msk.bf16.mxu0 %vm961_vm0, %v3187_v50  ;;  %2730 = vmatprep.mubr.msk.bf16.mxu1 %vm961_vm0, %v3189_v51  ;;  %v3211_v51 = vld [vmem:[%s3276_s24 + $0x1e4] ss:$8 sps:$4 sm:$0xff]  }
  0xfa   : > { %1395 = vmatmul.mubr.bf16.gmra.mrb[104].mxu0 %v3191_v52  ;;  %1651 = vmatmul.mubr.bf16.gmra.mrb[104].mxu1 %v3192_v53  ;;  %v3213_v52 = vld [vmem:[%s3276_s24 + $0x3e4] ss:$8 sps:$4 sm:$0xff]  }
  0xfb   : > { %2699 = vmatprep.mubr.msk.bf16.mxu0 %vm961_vm0, %v3193_v54  ;;  %2731 = vmatprep.mubr.msk.bf16.mxu1 %vm961_vm0, %v3195_v55 }
  0xfd   : > { %v1188_v57 = vpop.f32.mrb[0].mxu0  ;;  %v1444_v58 = vpop.f32.mrb[0].mxu1 }
  0xfe   : > { %v1189_v59 = vadd.f32 %v3463_v56, %v1188_v57  ;;  %v1445_v60 = vadd.f32 %v3463_v56, %v1444_v58  ;;  %v1190_v61 = vpop.f32.mrb[1].mxu0  ;;  %v1446_v62 = vpop.f32.mrb[1].mxu1 }
  0xff   : > { %v1191_v1 = vpop.f32.mrb[2].mxu0  ;;  %v1447_v2 = vpop.f32.mrb[2].mxu1 }
 0x100   : > { %v1699_v5 = vmax.f32 %v1189_v59, 0.0  ;;  %v1763_v6 = vmax.f32 %v1445_v60, 0.0  ;;  %v1192_v7 = vadd.f32 %v3463_v56, %v1191_v1  ;;  %v1448_v8 = vadd.f32 %v3463_v56, %v1447_v2  ;;  %v1193_v9 = vpop.f32.mrb[3].mxu0  ;;  %v1449_v10 = vpop.f32.mrb[3].mxu1 }
 0x101   : > { %v3216_v9 = vld [vmem:[%s3276_s24 + $0x3e0] ss:$8 sps:$4 sm:$0xff]  }
 0x102   : > { %v2867_v11 = vpack.c.bf16 %v1699_v5, %v1699_v5  ;;  %v2931_v12 = vpack.c.bf16 %v1763_v6, %v1763_v6  ;;  %v1700_v13 = vmax.f32 %v1192_v7, 0.0  ;;  %v1764_v14 = vmax.f32 %v1448_v8, 0.0  ;;  %1403 = vmatmul.mubr.bf16.gmra.mrb[108].mxu0 %v3197_v63  ;;  %1659 = vmatmul.mubr.bf16.gmra.mrb[108].mxu1 %v3198_v0  ;;  %v3215_v8 = vld [vmem:[%s3276_s24 + $0x1e0] ss:$8 sps:$4 sm:$0xff]  }
 0x103   : > { %2700 = vmatprep.mubr.msk.bf16.mxu0 %vm961_vm0, %v3199_v3  ;;  %2732 = vmatprep.mubr.msk.bf16.mxu1 %vm961_vm0, %v3201_v4 }
 0x104   : > { %2340 = vst.msk [vmem:[%s3479_s16] sm:$0xf] %vm2339_vm1, %v2867_v11  ;;  %2404 = vst.msk [vmem:[%s3479_s16 + $0x100] sm:$0xf] %vm2339_vm1, %v2931_v12  ;;  %v2868_v15 = vpack.c.bf16 %v1700_v13, %v1700_v13  ;;  %v2932_v16 = vpack.c.bf16 %v1764_v14, %v1764_v14  ;;  %v3217_v12 = vld [vmem:[%s3276_s24 + $0x1f4] ss:$8 sps:$4 sm:$0xff]  }
 0x105   : > { %v1196_v17 = vpop.f32.mrb[4].mxu0  ;;  %v1452_v18 = vpop.f32.mrb[4].mxu1  ;;  %v3219_v13 = vld [vmem:[%s3276_s24 + $0x3f4] ss:$8 sps:$4 sm:$0xff]  }
 0x106   : > { %2341 = vst.msk [vmem:[%s3479_s16 + $0x4] sm:$0xf] %vm2339_vm1, %v2868_v15  ;;  %2405 = vst.msk [vmem:[%s3479_s16 + $0x104] sm:$0xf] %vm2339_vm1, %v2932_v16  ;;  %v1197_v19 = vadd.f32 %v3463_v56, %v1196_v17  ;;  %v1453_v20 = vadd.f32 %v3463_v56, %v1452_v18  ;;  %v1198_v21 = vpop.f32.mrb[5].mxu0  ;;  %v1454_v22 = vpop.f32.mrb[5].mxu1 }
 0x107   : > { %v1199_v25 = vpop.f32.mrb[6].mxu0  ;;  %v1455_v26 = vpop.f32.mrb[6].mxu1 }
 0x108   : > { %v1701_v29 = vmax.f32 %v1197_v19, 0.0  ;;  %v1765_v30 = vmax.f32 %v1453_v20, 0.0  ;;  %v1200_v31 = vadd.f32 %v3463_v56, %v1199_v25  ;;  %v1456_v32 = vadd.f32 %v3463_v56, %v1455_v26  ;;  %v1201_v33 = vpop.f32.mrb[7].mxu0  ;;  %v1457_v34 = vpop.f32.mrb[7].mxu1 }
 0x109   : > { %v3222_v33 = vld [vmem:[%s3276_s24 + $0x3f0] ss:$8 sps:$4 sm:$0xff]  }
 0x10a   : > { %v2869_v35 = vpack.c.bf16 %v1701_v29, %v1701_v29  ;;  %v2933_v36 = vpack.c.bf16 %v1765_v30, %v1765_v30  ;;  %v1702_v37 = vmax.f32 %v1200_v31, 0.0  ;;  %v1766_v38 = vmax.f32 %v1456_v32, 0.0  ;;  %1411 = vmatmul.mubr.bf16.gmra.mrb[112].mxu0 %v3203_v23  ;;  %1667 = vmatmul.mubr.bf16.gmra.mrb[112].mxu1 %v3204_v24  ;;  %v3221_v32 = vld [vmem:[%s3276_s24 + $0x1f0] ss:$8 sps:$4 sm:$0xff]  }
 0x10b   : > { %2701 = vmatprep.mubr.msk.bf16.mxu0 %vm961_vm0, %v3205_v27  ;;  %2733 = vmatprep.mubr.msk.bf16.mxu1 %vm961_vm0, %v3207_v28 }
 0x10c   : > { %2342 = vst.msk [vmem:[%s3479_s16 + $0x8] sm:$0xf] %vm2339_vm1, %v2869_v35  ;;  %2406 = vst.msk [vmem:[%s3479_s16 + $0x108] sm:$0xf] %vm2339_vm1, %v2933_v36  ;;  %v2870_v39 = vpack.c.bf16 %v1702_v37, %v1702_v37  ;;  %v2934_v40 = vpack.c.bf16 %v1766_v38, %v1766_v38 }
 0x10d   : > { %v1204_v41 = vpop.f32.mrb[8].mxu0  ;;  %v1460_v42 = vpop.f32.mrb[8].mxu1 }
 0x10e   : > { %2343 = vst.msk [vmem:[%s3479_s16 + $0xc] sm:$0xf] %vm2339_vm1, %v2870_v39  ;;  %2407 = vst.msk [vmem:[%s3479_s16 + $0x10c] sm:$0xf] %vm2339_vm1, %v2934_v40  ;;  %v1205_v43 = vadd.f32 %v3463_v56, %v1204_v41  ;;  %v1461_v44 = vadd.f32 %v3463_v56, %v1460_v42  ;;  %v1206_v45 = vpop.f32.mrb[9].mxu0  ;;  %v1462_v46 = vpop.f32.mrb[9].mxu1 }
 0x10f   : > { %v1207_v49 = vpop.f32.mrb[10].mxu0  ;;  %v1463_v50 = vpop.f32.mrb[10].mxu1 }
 0x110   : > { %v1703_v53 = vmax.f32 %v1205_v43, 0.0  ;;  %v1767_v54 = vmax.f32 %v1461_v44, 0.0  ;;  %v1208_v55 = vadd.f32 %v3463_v56, %v1207_v49  ;;  %v1464_v57 = vadd.f32 %v3463_v56, %v1463_v50  ;;  %v1209_v58 = vpop.f32.mrb[11].mxu0  ;;  %v1465_v59 = vpop.f32.mrb[11].mxu1 }
 0x112   : > { %v2871_v60 = vpack.c.bf16 %v1703_v53, %v1703_v53  ;;  %v2935_v61 = vpack.c.bf16 %v1767_v54, %v1767_v54  ;;  %v1704_v62 = vmax.f32 %v1208_v55, 0.0  ;;  %v1768_v63 = vmax.f32 %v1464_v57, 0.0  ;;  %1419 = vmatmul.mubr.bf16.gmra.mrb[116].mxu0 %v3209_v47  ;;  %1675 = vmatmul.mubr.bf16.gmra.mrb[116].mxu1 %v3210_v48 }
 0x113   : > { %2702 = vmatprep.mubr.msk.bf16.mxu0 %vm961_vm0, %v3211_v51  ;;  %2734 = vmatprep.mubr.msk.bf16.mxu1 %vm961_vm0, %v3213_v52 }
 0x114   : > { %2344 = vst.msk [vmem:[%s3479_s16 + $0x10] sm:$0xf] %vm2339_vm1, %v2871_v60  ;;  %2408 = vst.msk [vmem:[%s3479_s16 + $0x110] sm:$0xf] %vm2339_vm1, %v2935_v61  ;;  %v2872_v0 = vpack.c.bf16 %v1704_v62, %v1704_v62  ;;  %v2936_v1 = vpack.c.bf16 %v1768_v63, %v1768_v63 }
 0x115   : > { %v1212_v2 = vpop.f32.mrb[12].mxu0  ;;  %v1468_v3 = vpop.f32.mrb[12].mxu1 }
 0x116   : > { %2345 = vst.msk [vmem:[%s3479_s16 + $0x14] sm:$0xf] %vm2339_vm1, %v2872_v0  ;;  %2409 = vst.msk [vmem:[%s3479_s16 + $0x114] sm:$0xf] %vm2339_vm1, %v2936_v1  ;;  %v1213_v4 = vadd.f32 %v3463_v56, %v1212_v2  ;;  %v1469_v5 = vadd.f32 %v3463_v56, %v1468_v3  ;;  %v1214_v6 = vpop.f32.mrb[13].mxu0  ;;  %v1470_v7 = vpop.f32.mrb[13].mxu1 }
 0x117   : > { %v1215_v10 = vpop.f32.mrb[14].mxu0  ;;  %v1471_v11 = vpop.f32.mrb[14].mxu1 }
 0x118   : > { %v1705_v14 = vmax.f32 %v1213_v4, 0.0  ;;  %v1769_v15 = vmax.f32 %v1469_v5, 0.0  ;;  %v1216_v16 = vadd.f32 %v3463_v56, %v1215_v10  ;;  %v1472_v17 = vadd.f32 %v3463_v56, %v1471_v11  ;;  %v1217_v18 = vpop.f32.mrb[15].mxu0  ;;  %v1473_v19 = vpop.f32.mrb[15].mxu1 }
 0x11a   : > { %v2873_v20 = vpack.c.bf16 %v1705_v14, %v1705_v14  ;;  %v2937_v21 = vpack.c.bf16 %v1769_v15, %v1769_v15  ;;  %v1706_v22 = vmax.f32 %v1216_v16, 0.0  ;;  %v1770_v23 = vmax.f32 %v1472_v17, 0.0  ;;  %1427 = vmatmul.mubr.bf16.gmra.mrb[120].mxu0 %v3215_v8  ;;  %1683 = vmatmul.mubr.bf16.gmra.mrb[120].mxu1 %v3216_v9 }
 0x11b   : > { %2703 = vmatprep.mubr.msk.bf16.mxu0 %vm961_vm0, %v3217_v12  ;;  %2735 = vmatprep.mubr.msk.bf16.mxu1 %vm961_vm0, %v3219_v13 }
 0x11c   : > { %2346 = vst.msk [vmem:[%s3479_s16 + $0x18] sm:$0xf] %vm2339_vm1, %v2873_v20  ;;  %2410 = vst.msk [vmem:[%s3479_s16 + $0x118] sm:$0xf] %vm2339_vm1, %v2937_v21  ;;  %v2874_v24 = vpack.c.bf16 %v1706_v22, %v1706_v22  ;;  %v2938_v25 = vpack.c.bf16 %v1770_v23, %v1770_v23 }
 0x11d   : > { %v1220_v26 = vpop.f32.mrb[16].mxu0  ;;  %v1476_v27 = vpop.f32.mrb[16].mxu1 }
 0x11e   : > { %2347 = vst.msk [vmem:[%s3479_s16 + $0x1c] sm:$0xf] %vm2339_vm1, %v2874_v24  ;;  %2411 = vst.msk [vmem:[%s3479_s16 + $0x11c] sm:$0xf] %vm2339_vm1, %v2938_v25  ;;  %v1221_v28 = vadd.f32 %v3463_v56, %v1220_v26  ;;  %v1477_v29 = vadd.f32 %v3463_v56, %v1476_v27  ;;  %v1222_v30 = vpop.f32.mrb[17].mxu0  ;;  %v1478_v31 = vpop.f32.mrb[17].mxu1 }
 0x11f   : > { %v1223_v34 = vpop.f32.mrb[18].mxu0  ;;  %v1479_v35 = vpop.f32.mrb[18].mxu1 }
 0x120   : > { %v1707_v36 = vmax.f32 %v1221_v28, 0.0  ;;  %v1771_v37 = vmax.f32 %v1477_v29, 0.0  ;;  %v1224_v38 = vadd.f32 %v3463_v56, %v1223_v34  ;;  %v1480_v39 = vadd.f32 %v3463_v56, %v1479_v35  ;;  %v1225_v40 = vpop.f32.mrb[19].mxu0  ;;  %v1481_v41 = vpop.f32.mrb[19].mxu1 }
 0x122   : > { %v2875_v42 = vpack.c.bf16 %v1707_v36, %v1707_v36  ;;  %v2939_v43 = vpack.c.bf16 %v1771_v37, %v1771_v37  ;;  %v1708_v44 = vmax.f32 %v1224_v38, 0.0  ;;  %v1772_v45 = vmax.f32 %v1480_v39, 0.0  ;;  %1435 = vmatmul.mubr.bf16.gmra.mrb[124].mxu0 %v3221_v32  ;;  %1691 = vmatmul.mubr.bf16.gmra.mrb[124].mxu1 %v3222_v33 }
 0x124   : > { %2348 = vst.msk [vmem:[%s3479_s16 + $0x20] sm:$0xf] %vm2339_vm1, %v2875_v42  ;;  %2412 = vst.msk [vmem:[%s3479_s16 + $0x120] sm:$0xf] %vm2339_vm1, %v2939_v43  ;;  %v2876_v46 = vpack.c.bf16 %v1708_v44, %v1708_v44  ;;  %v2940_v47 = vpack.c.bf16 %v1772_v45, %v1772_v45 }
 0x125   : > { %v1228_v48 = vpop.f32.mrb[20].mxu0  ;;  %v1484_v49 = vpop.f32.mrb[20].mxu1 }
 0x126   : > { %2349 = vst.msk [vmem:[%s3479_s16 + $0x24] sm:$0xf] %vm2339_vm1, %v2876_v46  ;;  %2413 = vst.msk [vmem:[%s3479_s16 + $0x124] sm:$0xf] %vm2339_vm1, %v2940_v47  ;;  %v1229_v50 = vadd.f32 %v3463_v56, %v1228_v48  ;;  %v1485_v51 = vadd.f32 %v3463_v56, %v1484_v49  ;;  %v1230_v52 = vpop.f32.mrb[21].mxu0  ;;  %v1486_v53 = vpop.f32.mrb[21].mxu1 }
 0x127   : > { %v1231_v54 = vpop.f32.mrb[22].mxu0  ;;  %v1487_v55 = vpop.f32.mrb[22].mxu1 }
 0x128   : > { %v1709_v57 = vmax.f32 %v1229_v50, 0.0  ;;  %v1773_v58 = vmax.f32 %v1485_v51, 0.0  ;;  %v1232_v59 = vadd.f32 %v3463_v56, %v1231_v54  ;;  %v1488_v60 = vadd.f32 %v3463_v56, %v1487_v55  ;;  %v1233_v61 = vpop.f32.mrb[23].mxu0  ;;  %v1489_v62 = vpop.f32.mrb[23].mxu1 }
 0x12a   : > { %v2877_v63 = vpack.c.bf16 %v1709_v57, %v1709_v57  ;;  %v2941_v0 = vpack.c.bf16 %v1773_v58, %v1773_v58  ;;  %v1710_v1 = vmax.f32 %v1232_v59, 0.0  ;;  %v1774_v2 = vmax.f32 %v1488_v60, 0.0 }
 0x12c   : > { %2350 = vst.msk [vmem:[%s3479_s16 + $0x28] sm:$0xf] %vm2339_vm1, %v2877_v63  ;;  %2414 = vst.msk [vmem:[%s3479_s16 + $0x128] sm:$0xf] %vm2339_vm1, %v2941_v0  ;;  %v2878_v3 = vpack.c.bf16 %v1710_v1, %v1710_v1  ;;  %v2942_v4 = vpack.c.bf16 %v1774_v2, %v1774_v2 }
 0x12d   : > { %v1236_v5 = vpop.f32.mrb[24].mxu0  ;;  %v1492_v6 = vpop.f32.mrb[24].mxu1 }
 0x12e   : > { %2351 = vst.msk [vmem:[%s3479_s16 + $0x2c] sm:$0xf] %vm2339_vm1, %v2878_v3  ;;  %2415 = vst.msk [vmem:[%s3479_s16 + $0x12c] sm:$0xf] %vm2339_vm1, %v2942_v4  ;;  %v1237_v7 = vadd.f32 %v3463_v56, %v1236_v5  ;;  %v1493_v8 = vadd.f32 %v3463_v56, %v1492_v6  ;;  %v1238_v9 = vpop.f32.mrb[25].mxu0  ;;  %v1494_v10 = vpop.f32.mrb[25].mxu1 }
 0x12f   : > { %v1239_v11 = vpop.f32.mrb[26].mxu0  ;;  %v1495_v12 = vpop.f32.mrb[26].mxu1 }
 0x130   : > { %v1711_v13 = vmax.f32 %v1237_v7, 0.0  ;;  %v1775_v14 = vmax.f32 %v1493_v8, 0.0  ;;  %v1240_v15 = vadd.f32 %v3463_v56, %v1239_v11  ;;  %v1496_v16 = vadd.f32 %v3463_v56, %v1495_v12  ;;  %v1241_v17 = vpop.f32.mrb[27].mxu0  ;;  %v1497_v18 = vpop.f32.mrb[27].mxu1 }
 0x132   : > { %v2879_v19 = vpack.c.bf16 %v1711_v13, %v1711_v13  ;;  %v2943_v20 = vpack.c.bf16 %v1775_v14, %v1775_v14  ;;  %v1712_v21 = vmax.f32 %v1240_v15, 0.0  ;;  %v1776_v22 = vmax.f32 %v1496_v16, 0.0 }
 0x134   : > { %2352 = vst.msk [vmem:[%s3479_s16 + $0x30] sm:$0xf] %vm2339_vm1, %v2879_v19  ;;  %2416 = vst.msk [vmem:[%s3479_s16 + $0x130] sm:$0xf] %vm2339_vm1, %v2943_v20  ;;  %v2880_v23 = vpack.c.bf16 %v1712_v21, %v1712_v21  ;;  %v2944_v24 = vpack.c.bf16 %v1776_v22, %v1776_v22 }
 0x135   : > { %v1244_v25 = vpop.f32.mrb[28].mxu0  ;;  %v1500_v26 = vpop.f32.mrb[28].mxu1 }
 0x136   : > { %2353 = vst.msk [vmem:[%s3479_s16 + $0x34] sm:$0xf] %vm2339_vm1, %v2880_v23  ;;  %2417 = vst.msk [vmem:[%s3479_s16 + $0x134] sm:$0xf] %vm2339_vm1, %v2944_v24  ;;  %v1245_v27 = vadd.f32 %v3463_v56, %v1244_v25  ;;  %v1501_v28 = vadd.f32 %v3463_v56, %v1500_v26  ;;  %v1246_v29 = vpop.f32.mrb[29].mxu0  ;;  %v1502_v30 = vpop.f32.mrb[29].mxu1 }
 0x137   : > { %v1247_v31 = vpop.f32.mrb[30].mxu0  ;;  %v1503_v32 = vpop.f32.mrb[30].mxu1 }
 0x138   : > { %v1713_v33 = vmax.f32 %v1245_v27, 0.0  ;;  %v1777_v34 = vmax.f32 %v1501_v28, 0.0  ;;  %v1248_v35 = vadd.f32 %v3463_v56, %v1247_v31  ;;  %v1504_v36 = vadd.f32 %v3463_v56, %v1503_v32  ;;  %v1249_v37 = vpop.f32.mrb[31].mxu0  ;;  %v1505_v38 = vpop.f32.mrb[31].mxu1 }
 0x13a   : > { %v2881_v39 = vpack.c.bf16 %v1713_v33, %v1713_v33  ;;  %v2945_v40 = vpack.c.bf16 %v1777_v34, %v1777_v34  ;;  %v1714_v41 = vmax.f32 %v1248_v35, 0.0  ;;  %v1778_v42 = vmax.f32 %v1504_v36, 0.0 }
 0x13c   : > { %2354 = vst.msk [vmem:[%s3479_s16 + $0x38] sm:$0xf] %vm2339_vm1, %v2881_v39  ;;  %2418 = vst.msk [vmem:[%s3479_s16 + $0x138] sm:$0xf] %vm2339_vm1, %v2945_v40  ;;  %v2882_v43 = vpack.c.bf16 %v1714_v41, %v1714_v41  ;;  %v2946_v44 = vpack.c.bf16 %v1778_v42, %v1778_v42 }
 0x13d   : > { %v1252_v45 = vpop.f32.mrb[32].mxu0  ;;  %v1508_v46 = vpop.f32.mrb[32].mxu1 }
 0x13e   : > { %2355 = vst.msk [vmem:[%s3479_s16 + $0x3c] sm:$0xf] %vm2339_vm1, %v2882_v43  ;;  %2419 = vst.msk [vmem:[%s3479_s16 + $0x13c] sm:$0xf] %vm2339_vm1, %v2946_v44  ;;  %v1253_v47 = vadd.f32 %v3463_v56, %v1252_v45  ;;  %v1509_v48 = vadd.f32 %v3463_v56, %v1508_v46  ;;  %v1254_v49 = vpop.f32.mrb[33].mxu0  ;;  %v1510_v50 = vpop.f32.mrb[33].mxu1 }
 0x13f   : > { %v1255_v51 = vpop.f32.mrb[34].mxu0  ;;  %v1511_v52 = vpop.f32.mrb[34].mxu1 }
 0x140   : > { %v1715_v53 = vmax.f32 %v1253_v47, 0.0  ;;  %v1779_v54 = vmax.f32 %v1509_v48, 0.0  ;;  %v1256_v55 = vadd.f32 %v3463_v56, %v1255_v51  ;;  %v1512_v57 = vadd.f32 %v3463_v56, %v1511_v52  ;;  %v1257_v58 = vpop.f32.mrb[35].mxu0  ;;  %v1513_v59 = vpop.f32.mrb[35].mxu1 }
 0x142   : > { %v2883_v60 = vpack.c.bf16 %v1715_v53, %v1715_v53  ;;  %v2947_v61 = vpack.c.bf16 %v1779_v54, %v1779_v54  ;;  %v1716_v62 = vmax.f32 %v1256_v55, 0.0  ;;  %v1780_v63 = vmax.f32 %v1512_v57, 0.0 }
 0x144   : > { %2356 = vst.msk [vmem:[%s3479_s16 + $0x40] sm:$0xf] %vm2339_vm1, %v2883_v60  ;;  %2420 = vst.msk [vmem:[%s3479_s16 + $0x140] sm:$0xf] %vm2339_vm1, %v2947_v61  ;;  %v2884_v0 = vpack.c.bf16 %v1716_v62, %v1716_v62  ;;  %v2948_v1 = vpack.c.bf16 %v1780_v63, %v1780_v63 }
 0x145   : > { %v1260_v2 = vpop.f32.mrb[36].mxu0  ;;  %v1516_v3 = vpop.f32.mrb[36].mxu1 }
 0x146   : > { %2357 = vst.msk [vmem:[%s3479_s16 + $0x44] sm:$0xf] %vm2339_vm1, %v2884_v0  ;;  %2421 = vst.msk [vmem:[%s3479_s16 + $0x144] sm:$0xf] %vm2339_vm1, %v2948_v1  ;;  %v1261_v4 = vadd.f32 %v3463_v56, %v1260_v2  ;;  %v1517_v5 = vadd.f32 %v3463_v56, %v1516_v3  ;;  %v1262_v6 = vpop.f32.mrb[37].mxu0  ;;  %v1518_v7 = vpop.f32.mrb[37].mxu1 }
 0x147   : > { %v1263_v8 = vpop.f32.mrb[38].mxu0  ;;  %v1519_v9 = vpop.f32.mrb[38].mxu1 }
 0x148   : > { %v1717_v10 = vmax.f32 %v1261_v4, 0.0  ;;  %v1781_v11 = vmax.f32 %v1517_v5, 0.0  ;;  %v1264_v12 = vadd.f32 %v3463_v56, %v1263_v8  ;;  %v1520_v13 = vadd.f32 %v3463_v56, %v1519_v9  ;;  %v1265_v14 = vpop.f32.mrb[39].mxu0  ;;  %v1521_v15 = vpop.f32.mrb[39].mxu1 }
 0x14a   : > { %v2885_v16 = vpack.c.bf16 %v1717_v10, %v1717_v10  ;;  %v2949_v17 = vpack.c.bf16 %v1781_v11, %v1781_v11  ;;  %v1718_v18 = vmax.f32 %v1264_v12, 0.0  ;;  %v1782_v19 = vmax.f32 %v1520_v13, 0.0 }
 0x14c   : > { %2358 = vst.msk [vmem:[%s3479_s16 + $0x48] sm:$0xf] %vm2339_vm1, %v2885_v16  ;;  %2422 = vst.msk [vmem:[%s3479_s16 + $0x148] sm:$0xf] %vm2339_vm1, %v2949_v17  ;;  %v2886_v20 = vpack.c.bf16 %v1718_v18, %v1718_v18  ;;  %v2950_v21 = vpack.c.bf16 %v1782_v19, %v1782_v19 }
 0x14d   : > { %v1268_v22 = vpop.f32.mrb[40].mxu0  ;;  %v1524_v23 = vpop.f32.mrb[40].mxu1 }
 0x14e   : > { %2359 = vst.msk [vmem:[%s3479_s16 + $0x4c] sm:$0xf] %vm2339_vm1, %v2886_v20  ;;  %2423 = vst.msk [vmem:[%s3479_s16 + $0x14c] sm:$0xf] %vm2339_vm1, %v2950_v21  ;;  %v1269_v24 = vadd.f32 %v3463_v56, %v1268_v22  ;;  %v1525_v25 = vadd.f32 %v3463_v56, %v1524_v23  ;;  %v1270_v26 = vpop.f32.mrb[41].mxu0  ;;  %v1526_v27 = vpop.f32.mrb[41].mxu1 }
 0x14f   : > { %v1271_v28 = vpop.f32.mrb[42].mxu0  ;;  %v1527_v29 = vpop.f32.mrb[42].mxu1 }
 0x150   : > { %v1719_v30 = vmax.f32 %v1269_v24, 0.0  ;;  %v1783_v31 = vmax.f32 %v1525_v25, 0.0  ;;  %v1272_v32 = vadd.f32 %v3463_v56, %v1271_v28  ;;  %v1528_v33 = vadd.f32 %v3463_v56, %v1527_v29  ;;  %v1273_v34 = vpop.f32.mrb[43].mxu0  ;;  %v1529_v35 = vpop.f32.mrb[43].mxu1 }
 0x152   : > { %v2887_v36 = vpack.c.bf16 %v1719_v30, %v1719_v30  ;;  %v2951_v37 = vpack.c.bf16 %v1783_v31, %v1783_v31  ;;  %v1720_v38 = vmax.f32 %v1272_v32, 0.0  ;;  %v1784_v39 = vmax.f32 %v1528_v33, 0.0 }
 0x154   : > { %2360 = vst.msk [vmem:[%s3479_s16 + $0x50] sm:$0xf] %vm2339_vm1, %v2887_v36  ;;  %2424 = vst.msk [vmem:[%s3479_s16 + $0x150] sm:$0xf] %vm2339_vm1, %v2951_v37  ;;  %v2888_v40 = vpack.c.bf16 %v1720_v38, %v1720_v38  ;;  %v2952_v41 = vpack.c.bf16 %v1784_v39, %v1784_v39 }
 0x155   : > { %v1276_v42 = vpop.f32.mrb[44].mxu0  ;;  %v1532_v43 = vpop.f32.mrb[44].mxu1 }
 0x156   : > { %2361 = vst.msk [vmem:[%s3479_s16 + $0x54] sm:$0xf] %vm2339_vm1, %v2888_v40  ;;  %2425 = vst.msk [vmem:[%s3479_s16 + $0x154] sm:$0xf] %vm2339_vm1, %v2952_v41  ;;  %v1277_v44 = vadd.f32 %v3463_v56, %v1276_v42  ;;  %v1533_v45 = vadd.f32 %v3463_v56, %v1532_v43  ;;  %v1278_v46 = vpop.f32.mrb[45].mxu0  ;;  %v1534_v47 = vpop.f32.mrb[45].mxu1 }
 0x157   : > { %v1279_v48 = vpop.f32.mrb[46].mxu0  ;;  %v1535_v49 = vpop.f32.mrb[46].mxu1 }
 0x158   : > { %v1721_v50 = vmax.f32 %v1277_v44, 0.0  ;;  %v1785_v51 = vmax.f32 %v1533_v45, 0.0  ;;  %v1280_v52 = vadd.f32 %v3463_v56, %v1279_v48  ;;  %v1536_v53 = vadd.f32 %v3463_v56, %v1535_v49  ;;  %v1281_v54 = vpop.f32.mrb[47].mxu0  ;;  %v1537_v55 = vpop.f32.mrb[47].mxu1 }
 0x15a   : > { %v2889_v57 = vpack.c.bf16 %v1721_v50, %v1721_v50  ;;  %v2953_v58 = vpack.c.bf16 %v1785_v51, %v1785_v51  ;;  %v1722_v59 = vmax.f32 %v1280_v52, 0.0  ;;  %v1786_v60 = vmax.f32 %v1536_v53, 0.0 }
 0x15c   : > { %2362 = vst.msk [vmem:[%s3479_s16 + $0x58] sm:$0xf] %vm2339_vm1, %v2889_v57  ;;  %2426 = vst.msk [vmem:[%s3479_s16 + $0x158] sm:$0xf] %vm2339_vm1, %v2953_v58  ;;  %v2890_v61 = vpack.c.bf16 %v1722_v59, %v1722_v59  ;;  %v2954_v62 = vpack.c.bf16 %v1786_v60, %v1786_v60 }
 0x15d   : > { %v1284_v63 = vpop.f32.mrb[48].mxu0  ;;  %v1540_v0 = vpop.f32.mrb[48].mxu1 }
 0x15e   : > { %2363 = vst.msk [vmem:[%s3479_s16 + $0x5c] sm:$0xf] %vm2339_vm1, %v2890_v61  ;;  %2427 = vst.msk [vmem:[%s3479_s16 + $0x15c] sm:$0xf] %vm2339_vm1, %v2954_v62  ;;  %v1285_v1 = vadd.f32 %v3463_v56, %v1284_v63  ;;  %v1541_v2 = vadd.f32 %v3463_v56, %v1540_v0  ;;  %v1286_v3 = vpop.f32.mrb[49].mxu0  ;;  %v1542_v4 = vpop.f32.mrb[49].mxu1 }
 0x15f   : > { %v1287_v5 = vpop.f32.mrb[50].mxu0  ;;  %v1543_v6 = vpop.f32.mrb[50].mxu1 }
 0x160   : > { %v1723_v7 = vmax.f32 %v1285_v1, 0.0  ;;  %v1787_v8 = vmax.f32 %v1541_v2, 0.0  ;;  %v1288_v9 = vadd.f32 %v3463_v56, %v1287_v5  ;;  %v1544_v10 = vadd.f32 %v3463_v56, %v1543_v6  ;;  %v1289_v11 = vpop.f32.mrb[51].mxu0  ;;  %v1545_v12 = vpop.f32.mrb[51].mxu1 }
 0x162   : > { %v2891_v13 = vpack.c.bf16 %v1723_v7, %v1723_v7  ;;  %v2955_v14 = vpack.c.bf16 %v1787_v8, %v1787_v8  ;;  %v1724_v15 = vmax.f32 %v1288_v9, 0.0  ;;  %v1788_v16 = vmax.f32 %v1544_v10, 0.0 }
 0x164   : > { %2364 = vst.msk [vmem:[%s3479_s16 + $0x60] sm:$0xf] %vm2339_vm1, %v2891_v13  ;;  %2428 = vst.msk [vmem:[%s3479_s16 + $0x160] sm:$0xf] %vm2339_vm1, %v2955_v14  ;;  %v2892_v17 = vpack.c.bf16 %v1724_v15, %v1724_v15  ;;  %v2956_v18 = vpack.c.bf16 %v1788_v16, %v1788_v16 }
 0x165   : > { %v1292_v19 = vpop.f32.mrb[52].mxu0  ;;  %v1548_v20 = vpop.f32.mrb[52].mxu1 }
 0x166   : > { %2365 = vst.msk [vmem:[%s3479_s16 + $0x64] sm:$0xf] %vm2339_vm1, %v2892_v17  ;;  %2429 = vst.msk [vmem:[%s3479_s16 + $0x164] sm:$0xf] %vm2339_vm1, %v2956_v18  ;;  %v1293_v21 = vadd.f32 %v3463_v56, %v1292_v19  ;;  %v1549_v22 = vadd.f32 %v3463_v56, %v1548_v20  ;;  %v1294_v23 = vpop.f32.mrb[53].mxu0  ;;  %v1550_v24 = vpop.f32.mrb[53].mxu1 }
 0x167   : > { %v1295_v25 = vpop.f32.mrb[54].mxu0  ;;  %v1551_v26 = vpop.f32.mrb[54].mxu1 }
 0x168   : > { %v1725_v27 = vmax.f32 %v1293_v21, 0.0  ;;  %v1789_v28 = vmax.f32 %v1549_v22, 0.0  ;;  %v1296_v29 = vadd.f32 %v3463_v56, %v1295_v25  ;;  %v1552_v30 = vadd.f32 %v3463_v56, %v1551_v26  ;;  %v1297_v31 = vpop.f32.mrb[55].mxu0  ;;  %v1553_v32 = vpop.f32.mrb[55].mxu1 }
 0x16a   : > { %v2893_v33 = vpack.c.bf16 %v1725_v27, %v1725_v27  ;;  %v2957_v34 = vpack.c.bf16 %v1789_v28, %v1789_v28  ;;  %v1726_v35 = vmax.f32 %v1296_v29, 0.0  ;;  %v1790_v36 = vmax.f32 %v1552_v30, 0.0 }
 0x16c   : > { %2366 = vst.msk [vmem:[%s3479_s16 + $0x68] sm:$0xf] %vm2339_vm1, %v2893_v33  ;;  %2430 = vst.msk [vmem:[%s3479_s16 + $0x168] sm:$0xf] %vm2339_vm1, %v2957_v34  ;;  %v2894_v37 = vpack.c.bf16 %v1726_v35, %v1726_v35  ;;  %v2958_v38 = vpack.c.bf16 %v1790_v36, %v1790_v36 }
 0x16d   : > { %v1300_v39 = vpop.f32.mrb[56].mxu0  ;;  %v1556_v40 = vpop.f32.mrb[56].mxu1 }
 0x16e   : > { %2367 = vst.msk [vmem:[%s3479_s16 + $0x6c] sm:$0xf] %vm2339_vm1, %v2894_v37  ;;  %2431 = vst.msk [vmem:[%s3479_s16 + $0x16c] sm:$0xf] %vm2339_vm1, %v2958_v38  ;;  %v1301_v41 = vadd.f32 %v3463_v56, %v1300_v39  ;;  %v1557_v42 = vadd.f32 %v3463_v56, %v1556_v40  ;;  %v1302_v43 = vpop.f32.mrb[57].mxu0  ;;  %v1558_v44 = vpop.f32.mrb[57].mxu1 }
 0x16f   : > { %v1303_v45 = vpop.f32.mrb[58].mxu0  ;;  %v1559_v46 = vpop.f32.mrb[58].mxu1 }
 0x170   : > { %v1727_v47 = vmax.f32 %v1301_v41, 0.0  ;;  %v1791_v48 = vmax.f32 %v1557_v42, 0.0  ;;  %v1304_v49 = vadd.f32 %v3463_v56, %v1303_v45  ;;  %v1560_v50 = vadd.f32 %v3463_v56, %v1559_v46  ;;  %v1305_v51 = vpop.f32.mrb[59].mxu0  ;;  %v1561_v52 = vpop.f32.mrb[59].mxu1 }
 0x172   : > { %v2895_v53 = vpack.c.bf16 %v1727_v47, %v1727_v47  ;;  %v2959_v54 = vpack.c.bf16 %v1791_v48, %v1791_v48  ;;  %v1728_v55 = vmax.f32 %v1304_v49, 0.0  ;;  %v1792_v57 = vmax.f32 %v1560_v50, 0.0 }
 0x174   : > { %2368 = vst.msk [vmem:[%s3479_s16 + $0x70] sm:$0xf] %vm2339_vm1, %v2895_v53  ;;  %2432 = vst.msk [vmem:[%s3479_s16 + $0x170] sm:$0xf] %vm2339_vm1, %v2959_v54  ;;  %v2896_v58 = vpack.c.bf16 %v1728_v55, %v1728_v55  ;;  %v2960_v59 = vpack.c.bf16 %v1792_v57, %v1792_v57 }
 0x175   : > { %v1308_v60 = vpop.f32.mrb[60].mxu0  ;;  %v1564_v61 = vpop.f32.mrb[60].mxu1 }
 0x176   : > { %2369 = vst.msk [vmem:[%s3479_s16 + $0x74] sm:$0xf] %vm2339_vm1, %v2896_v58  ;;  %2433 = vst.msk [vmem:[%s3479_s16 + $0x174] sm:$0xf] %vm2339_vm1, %v2960_v59  ;;  %v1309_v62 = vadd.f32 %v3463_v56, %v1308_v60  ;;  %v1565_v63 = vadd.f32 %v3463_v56, %v1564_v61  ;;  %v1310_v0 = vpop.f32.mrb[61].mxu0  ;;  %v1566_v1 = vpop.f32.mrb[61].mxu1 }
 0x177   : > { %v1311_v2 = vpop.f32.mrb[62].mxu0  ;;  %v1567_v3 = vpop.f32.mrb[62].mxu1 }
 0x178   : > { %v1729_v4 = vmax.f32 %v1309_v62, 0.0  ;;  %v1793_v5 = vmax.f32 %v1565_v63, 0.0  ;;  %v1312_v6 = vadd.f32 %v3463_v56, %v1311_v2  ;;  %v1568_v7 = vadd.f32 %v3463_v56, %v1567_v3  ;;  %v1313_v8 = vpop.f32.mrb[63].mxu0  ;;  %v1569_v9 = vpop.f32.mrb[63].mxu1 }
 0x17a   : > { %v2897_v10 = vpack.c.bf16 %v1729_v4, %v1729_v4  ;;  %v2961_v11 = vpack.c.bf16 %v1793_v5, %v1793_v5  ;;  %v1730_v12 = vmax.f32 %v1312_v6, 0.0  ;;  %v1794_v13 = vmax.f32 %v1568_v7, 0.0 }
 0x17c   : > { %2370 = vst.msk [vmem:[%s3479_s16 + $0x78] sm:$0xf] %vm2339_vm1, %v2897_v10  ;;  %2434 = vst.msk [vmem:[%s3479_s16 + $0x178] sm:$0xf] %vm2339_vm1, %v2961_v11  ;;  %v2898_v14 = vpack.c.bf16 %v1730_v12, %v1730_v12  ;;  %v2962_v15 = vpack.c.bf16 %v1794_v13, %v1794_v13 }
 0x17d   : > { %v1316_v16 = vpop.f32.mrb[64].mxu0  ;;  %v1572_v17 = vpop.f32.mrb[64].mxu1 }
 0x17e   : > { %2371 = vst.msk [vmem:[%s3479_s16 + $0x7c] sm:$0xf] %vm2339_vm1, %v2898_v14  ;;  %2435 = vst.msk [vmem:[%s3479_s16 + $0x17c] sm:$0xf] %vm2339_vm1, %v2962_v15  ;;  %v1317_v18 = vadd.f32 %v3463_v56, %v1316_v16  ;;  %v1573_v19 = vadd.f32 %v3463_v56, %v1572_v17  ;;  %v1318_v20 = vpop.f32.mrb[65].mxu0  ;;  %v1574_v21 = vpop.f32.mrb[65].mxu1 }
 0x17f   : > { %v1319_v22 = vpop.f32.mrb[66].mxu0  ;;  %v1575_v23 = vpop.f32.mrb[66].mxu1 }
 0x180   : > { %v1731_v24 = vmax.f32 %v1317_v18, 0.0  ;;  %v1795_v25 = vmax.f32 %v1573_v19, 0.0  ;;  %v1320_v26 = vadd.f32 %v3463_v56, %v1319_v22  ;;  %v1576_v27 = vadd.f32 %v3463_v56, %v1575_v23  ;;  %v1321_v28 = vpop.f32.mrb[67].mxu0  ;;  %v1577_v29 = vpop.f32.mrb[67].mxu1 }
 0x182   : > { %v2899_v30 = vpack.c.bf16 %v1731_v24, %v1731_v24  ;;  %v2963_v31 = vpack.c.bf16 %v1795_v25, %v1795_v25  ;;  %v1732_v32 = vmax.f32 %v1320_v26, 0.0  ;;  %v1796_v33 = vmax.f32 %v1576_v27, 0.0 }
 0x184   : > { %2372 = vst.msk [vmem:[%s3479_s16 + $0x80] sm:$0xf] %vm2339_vm1, %v2899_v30  ;;  %2436 = vst.msk [vmem:[%s3479_s16 + $0x180] sm:$0xf] %vm2339_vm1, %v2963_v31  ;;  %v2900_v34 = vpack.c.bf16 %v1732_v32, %v1732_v32  ;;  %v2964_v35 = vpack.c.bf16 %v1796_v33, %v1796_v33 }
 0x185   : > { %v1324_v36 = vpop.f32.mrb[68].mxu0  ;;  %v1580_v37 = vpop.f32.mrb[68].mxu1 }
 0x186   : > { %2373 = vst.msk [vmem:[%s3479_s16 + $0x84] sm:$0xf] %vm2339_vm1, %v2900_v34  ;;  %2437 = vst.msk [vmem:[%s3479_s16 + $0x184] sm:$0xf] %vm2339_vm1, %v2964_v35  ;;  %v1325_v38 = vadd.f32 %v3463_v56, %v1324_v36  ;;  %v1581_v39 = vadd.f32 %v3463_v56, %v1580_v37  ;;  %v1326_v40 = vpop.f32.mrb[69].mxu0  ;;  %v1582_v41 = vpop.f32.mrb[69].mxu1 }
 0x187   : > { %v1327_v42 = vpop.f32.mrb[70].mxu0  ;;  %v1583_v43 = vpop.f32.mrb[70].mxu1 }
 0x188   : > { %v1733_v44 = vmax.f32 %v1325_v38, 0.0  ;;  %v1797_v45 = vmax.f32 %v1581_v39, 0.0  ;;  %v1328_v46 = vadd.f32 %v3463_v56, %v1327_v42  ;;  %v1584_v47 = vadd.f32 %v3463_v56, %v1583_v43  ;;  %v1329_v48 = vpop.f32.mrb[71].mxu0  ;;  %v1585_v49 = vpop.f32.mrb[71].mxu1 }
 0x18a   : > { %v2901_v50 = vpack.c.bf16 %v1733_v44, %v1733_v44  ;;  %v2965_v51 = vpack.c.bf16 %v1797_v45, %v1797_v45  ;;  %v1734_v52 = vmax.f32 %v1328_v46, 0.0  ;;  %v1798_v53 = vmax.f32 %v1584_v47, 0.0 }
 0x18c   : > { %2374 = vst.msk [vmem:[%s3479_s16 + $0x88] sm:$0xf] %vm2339_vm1, %v2901_v50  ;;  %2438 = vst.msk [vmem:[%s3479_s16 + $0x188] sm:$0xf] %vm2339_vm1, %v2965_v51  ;;  %v2902_v54 = vpack.c.bf16 %v1734_v52, %v1734_v52  ;;  %v2966_v55 = vpack.c.bf16 %v1798_v53, %v1798_v53 }
 0x18d   : > { %v1332_v57 = vpop.f32.mrb[72].mxu0  ;;  %v1588_v58 = vpop.f32.mrb[72].mxu1 }
 0x18e   : > { %2375 = vst.msk [vmem:[%s3479_s16 + $0x8c] sm:$0xf] %vm2339_vm1, %v2902_v54  ;;  %2439 = vst.msk [vmem:[%s3479_s16 + $0x18c] sm:$0xf] %vm2339_vm1, %v2966_v55  ;;  %v1333_v59 = vadd.f32 %v3463_v56, %v1332_v57  ;;  %v1589_v60 = vadd.f32 %v3463_v56, %v1588_v58  ;;  %v1334_v61 = vpop.f32.mrb[73].mxu0  ;;  %v1590_v62 = vpop.f32.mrb[73].mxu1 }
 0x18f   : > { %v1335_v63 = vpop.f32.mrb[74].mxu0  ;;  %v1591_v0 = vpop.f32.mrb[74].mxu1 }
 0x190   : > { %v1735_v1 = vmax.f32 %v1333_v59, 0.0  ;;  %v1799_v2 = vmax.f32 %v1589_v60, 0.0  ;;  %v1336_v3 = vadd.f32 %v3463_v56, %v1335_v63  ;;  %v1592_v4 = vadd.f32 %v3463_v56, %v1591_v0  ;;  %v1337_v5 = vpop.f32.mrb[75].mxu0  ;;  %v1593_v6 = vpop.f32.mrb[75].mxu1 }
 0x192   : > { %v2903_v7 = vpack.c.bf16 %v1735_v1, %v1735_v1  ;;  %v2967_v8 = vpack.c.bf16 %v1799_v2, %v1799_v2  ;;  %v1736_v9 = vmax.f32 %v1336_v3, 0.0  ;;  %v1800_v10 = vmax.f32 %v1592_v4, 0.0 }
 0x194   : > { %2376 = vst.msk [vmem:[%s3479_s16 + $0x90] sm:$0xf] %vm2339_vm1, %v2903_v7  ;;  %2440 = vst.msk [vmem:[%s3479_s16 + $0x190] sm:$0xf] %vm2339_vm1, %v2967_v8  ;;  %v2904_v11 = vpack.c.bf16 %v1736_v9, %v1736_v9  ;;  %v2968_v12 = vpack.c.bf16 %v1800_v10, %v1800_v10 }
 0x195   : > { %v1340_v13 = vpop.f32.mrb[76].mxu0  ;;  %v1596_v14 = vpop.f32.mrb[76].mxu1 }
 0x196   : > { %2377 = vst.msk [vmem:[%s3479_s16 + $0x94] sm:$0xf] %vm2339_vm1, %v2904_v11  ;;  %2441 = vst.msk [vmem:[%s3479_s16 + $0x194] sm:$0xf] %vm2339_vm1, %v2968_v12  ;;  %v1341_v15 = vadd.f32 %v3463_v56, %v1340_v13  ;;  %v1597_v16 = vadd.f32 %v3463_v56, %v1596_v14  ;;  %v1342_v17 = vpop.f32.mrb[77].mxu0  ;;  %v1598_v18 = vpop.f32.mrb[77].mxu1 }
 0x197   : > { %v1343_v19 = vpop.f32.mrb[78].mxu0  ;;  %v1599_v20 = vpop.f32.mrb[78].mxu1 }
 0x198   : > { %v1737_v21 = vmax.f32 %v1341_v15, 0.0  ;;  %v1801_v22 = vmax.f32 %v1597_v16, 0.0  ;;  %v1344_v23 = vadd.f32 %v3463_v56, %v1343_v19  ;;  %v1600_v24 = vadd.f32 %v3463_v56, %v1599_v20  ;;  %v1345_v25 = vpop.f32.mrb[79].mxu0  ;;  %v1601_v26 = vpop.f32.mrb[79].mxu1  ;;  %v3742_v56 = vld [vmem:[%s3893_s2] ss:$0 sm:$0xff] }
 0x19a   : > { %v2905_v27 = vpack.c.bf16 %v1737_v21, %v1737_v21  ;;  %v2969_v28 = vpack.c.bf16 %v1801_v22, %v1801_v22  ;;  %v1738_v29 = vmax.f32 %v1344_v23, 0.0  ;;  %v1802_v30 = vmax.f32 %v1600_v24, 0.0 }
 0x19c   : > { %2378 = vst.msk [vmem:[%s3479_s16 + $0x98] sm:$0xf] %vm2339_vm1, %v2905_v27  ;;  %2442 = vst.msk [vmem:[%s3479_s16 + $0x198] sm:$0xf] %vm2339_vm1, %v2969_v28  ;;  %v2906_v31 = vpack.c.bf16 %v1738_v29, %v1738_v29  ;;  %v2970_v32 = vpack.c.bf16 %v1802_v30, %v1802_v30 }
 0x19d   : > { %v1348_v33 = vpop.f32.mrb[80].mxu0  ;;  %v1604_v34 = vpop.f32.mrb[80].mxu1 }
 0x19e   : > { %2379 = vst.msk [vmem:[%s3479_s16 + $0x9c] sm:$0xf] %vm2339_vm1, %v2906_v31  ;;  %2443 = vst.msk [vmem:[%s3479_s16 + $0x19c] sm:$0xf] %vm2339_vm1, %v2970_v32  ;;  %v1349_v35 = vadd.f32 %v3742_v56, %v1348_v33  ;;  %v1605_v36 = vadd.f32 %v3742_v56, %v1604_v34  ;;  %v1350_v37 = vpop.f32.mrb[81].mxu0  ;;  %v1606_v38 = vpop.f32.mrb[81].mxu1 }
 0x19f   : > { %v1351_v39 = vpop.f32.mrb[82].mxu0  ;;  %v1607_v40 = vpop.f32.mrb[82].mxu1 }
 0x1a0   : > { %v1739_v41 = vmax.f32 %v1349_v35, 0.0  ;;  %v1803_v42 = vmax.f32 %v1605_v36, 0.0  ;;  %v1352_v43 = vadd.f32 %v3742_v56, %v1351_v39  ;;  %v1608_v44 = vadd.f32 %v3742_v56, %v1607_v40  ;;  %v1353_v45 = vpop.f32.mrb[83].mxu0  ;;  %v1609_v46 = vpop.f32.mrb[83].mxu1 }
 0x1a2   : > { %v2907_v47 = vpack.c.bf16 %v1739_v41, %v1739_v41  ;;  %v2971_v48 = vpack.c.bf16 %v1803_v42, %v1803_v42  ;;  %v1740_v49 = vmax.f32 %v1352_v43, 0.0  ;;  %v1804_v50 = vmax.f32 %v1608_v44, 0.0 }
 0x1a4   : > { %2380 = vst.msk [vmem:[%s3479_s16 + $0xa0] sm:$0xf] %vm2339_vm1, %v2907_v47  ;;  %2444 = vst.msk [vmem:[%s3479_s16 + $0x1a0] sm:$0xf] %vm2339_vm1, %v2971_v48  ;;  %v2908_v51 = vpack.c.bf16 %v1740_v49, %v1740_v49  ;;  %v2972_v52 = vpack.c.bf16 %v1804_v50, %v1804_v50 }
 0x1a5   : > { %v1356_v53 = vpop.f32.mrb[84].mxu0  ;;  %v1612_v54 = vpop.f32.mrb[84].mxu1 }
 0x1a6   : > { %2381 = vst.msk [vmem:[%s3479_s16 + $0xa4] sm:$0xf] %vm2339_vm1, %v2908_v51  ;;  %2445 = vst.msk [vmem:[%s3479_s16 + $0x1a4] sm:$0xf] %vm2339_vm1, %v2972_v52  ;;  %v1357_v55 = vadd.f32 %v3742_v56, %v1356_v53  ;;  %v1613_v57 = vadd.f32 %v3742_v56, %v1612_v54  ;;  %v1358_v58 = vpop.f32.mrb[85].mxu0  ;;  %v1614_v59 = vpop.f32.mrb[85].mxu1 }
 0x1a7   : > { %v1359_v60 = vpop.f32.mrb[86].mxu0  ;;  %v1615_v61 = vpop.f32.mrb[86].mxu1 }
 0x1a8   : > { %v1741_v62 = vmax.f32 %v1357_v55, 0.0  ;;  %v1805_v63 = vmax.f32 %v1613_v57, 0.0  ;;  %v1360_v0 = vadd.f32 %v3742_v56, %v1359_v60  ;;  %v1616_v1 = vadd.f32 %v3742_v56, %v1615_v61  ;;  %v1361_v2 = vpop.f32.mrb[87].mxu0  ;;  %v1617_v3 = vpop.f32.mrb[87].mxu1 }
 0x1aa   : > { %v2909_v4 = vpack.c.bf16 %v1741_v62, %v1741_v62  ;;  %v2973_v5 = vpack.c.bf16 %v1805_v63, %v1805_v63  ;;  %v1742_v6 = vmax.f32 %v1360_v0, 0.0  ;;  %v1806_v7 = vmax.f32 %v1616_v1, 0.0 }
 0x1ac   : > { %2382 = vst.msk [vmem:[%s3479_s16 + $0xa8] sm:$0xf] %vm2339_vm1, %v2909_v4  ;;  %2446 = vst.msk [vmem:[%s3479_s16 + $0x1a8] sm:$0xf] %vm2339_vm1, %v2973_v5  ;;  %v2910_v8 = vpack.c.bf16 %v1742_v6, %v1742_v6  ;;  %v2974_v9 = vpack.c.bf16 %v1806_v7, %v1806_v7 }
 0x1ad   : > { %v1364_v10 = vpop.f32.mrb[88].mxu0  ;;  %v1620_v11 = vpop.f32.mrb[88].mxu1 }
 0x1ae   : > { %2383 = vst.msk [vmem:[%s3479_s16 + $0xac] sm:$0xf] %vm2339_vm1, %v2910_v8  ;;  %2447 = vst.msk [vmem:[%s3479_s16 + $0x1ac] sm:$0xf] %vm2339_vm1, %v2974_v9  ;;  %v1365_v12 = vadd.f32 %v3742_v56, %v1364_v10  ;;  %v1621_v13 = vadd.f32 %v3742_v56, %v1620_v11  ;;  %v1366_v14 = vpop.f32.mrb[89].mxu0  ;;  %v1622_v15 = vpop.f32.mrb[89].mxu1 }
 0x1af   : > { %v1367_v16 = vpop.f32.mrb[90].mxu0  ;;  %v1623_v17 = vpop.f32.mrb[90].mxu1 }
 0x1b0   : > { %v1743_v18 = vmax.f32 %v1365_v12, 0.0  ;;  %v1807_v19 = vmax.f32 %v1621_v13, 0.0  ;;  %v1368_v20 = vadd.f32 %v3742_v56, %v1367_v16  ;;  %v1624_v21 = vadd.f32 %v3742_v56, %v1623_v17  ;;  %v1369_v22 = vpop.f32.mrb[91].mxu0  ;;  %v1625_v23 = vpop.f32.mrb[91].mxu1 }
 0x1b2   : > { %v2911_v24 = vpack.c.bf16 %v1743_v18, %v1743_v18  ;;  %v2975_v25 = vpack.c.bf16 %v1807_v19, %v1807_v19  ;;  %v1744_v26 = vmax.f32 %v1368_v20, 0.0  ;;  %v1808_v27 = vmax.f32 %v1624_v21, 0.0 }
 0x1b4   : > { %2384 = vst.msk [vmem:[%s3479_s16 + $0xb0] sm:$0xf] %vm2339_vm1, %v2911_v24  ;;  %2448 = vst.msk [vmem:[%s3479_s16 + $0x1b0] sm:$0xf] %vm2339_vm1, %v2975_v25  ;;  %v2912_v28 = vpack.c.bf16 %v1744_v26, %v1744_v26  ;;  %v2976_v29 = vpack.c.bf16 %v1808_v27, %v1808_v27 }
 0x1b5   : > { %v1372_v30 = vpop.f32.mrb[92].mxu0  ;;  %v1628_v31 = vpop.f32.mrb[92].mxu1 }
 0x1b6   : > { %2385 = vst.msk [vmem:[%s3479_s16 + $0xb4] sm:$0xf] %vm2339_vm1, %v2912_v28  ;;  %2449 = vst.msk [vmem:[%s3479_s16 + $0x1b4] sm:$0xf] %vm2339_vm1, %v2976_v29  ;;  %v1373_v32 = vadd.f32 %v3742_v56, %v1372_v30  ;;  %v1629_v33 = vadd.f32 %v3742_v56, %v1628_v31  ;;  %v1374_v34 = vpop.f32.mrb[93].mxu0  ;;  %v1630_v35 = vpop.f32.mrb[93].mxu1 }
 0x1b7   : > { %v1375_v36 = vpop.f32.mrb[94].mxu0  ;;  %v1631_v37 = vpop.f32.mrb[94].mxu1 }
 0x1b8   : > { %v1745_v38 = vmax.f32 %v1373_v32, 0.0  ;;  %v1809_v39 = vmax.f32 %v1629_v33, 0.0  ;;  %v1376_v40 = vadd.f32 %v3742_v56, %v1375_v36  ;;  %v1632_v41 = vadd.f32 %v3742_v56, %v1631_v37  ;;  %v1377_v42 = vpop.f32.mrb[95].mxu0  ;;  %v1633_v43 = vpop.f32.mrb[95].mxu1 }
 0x1ba   : > { %v2913_v44 = vpack.c.bf16 %v1745_v38, %v1745_v38  ;;  %v2977_v45 = vpack.c.bf16 %v1809_v39, %v1809_v39  ;;  %v1746_v46 = vmax.f32 %v1376_v40, 0.0  ;;  %v1810_v47 = vmax.f32 %v1632_v41, 0.0 }
 0x1bc   : > { %2386 = vst.msk [vmem:[%s3479_s16 + $0xb8] sm:$0xf] %vm2339_vm1, %v2913_v44  ;;  %2450 = vst.msk [vmem:[%s3479_s16 + $0x1b8] sm:$0xf] %vm2339_vm1, %v2977_v45  ;;  %v2914_v48 = vpack.c.bf16 %v1746_v46, %v1746_v46  ;;  %v2978_v49 = vpack.c.bf16 %v1810_v47, %v1810_v47 }
 0x1bd   : > { %v1380_v50 = vpop.f32.mrb[96].mxu0  ;;  %v1636_v51 = vpop.f32.mrb[96].mxu1 }
 0x1be   : > { %2387 = vst.msk [vmem:[%s3479_s16 + $0xbc] sm:$0xf] %vm2339_vm1, %v2914_v48  ;;  %2451 = vst.msk [vmem:[%s3479_s16 + $0x1bc] sm:$0xf] %vm2339_vm1, %v2978_v49  ;;  %v1381_v52 = vadd.f32 %v3742_v56, %v1380_v50  ;;  %v1637_v53 = vadd.f32 %v3742_v56, %v1636_v51  ;;  %v1382_v54 = vpop.f32.mrb[97].mxu0  ;;  %v1638_v55 = vpop.f32.mrb[97].mxu1 }
 0x1bf   : > { %v1383_v57 = vpop.f32.mrb[98].mxu0  ;;  %v1639_v58 = vpop.f32.mrb[98].mxu1 }
 0x1c0   : > { %v1747_v59 = vmax.f32 %v1381_v52, 0.0  ;;  %v1811_v60 = vmax.f32 %v1637_v53, 0.0  ;;  %v1384_v61 = vadd.f32 %v3742_v56, %v1383_v57  ;;  %v1640_v62 = vadd.f32 %v3742_v56, %v1639_v58  ;;  %v1385_v63 = vpop.f32.mrb[99].mxu0  ;;  %v1641_v0 = vpop.f32.mrb[99].mxu1 }
 0x1c2   : > { %v2915_v1 = vpack.c.bf16 %v1747_v59, %v1747_v59  ;;  %v2979_v2 = vpack.c.bf16 %v1811_v60, %v1811_v60  ;;  %v1748_v3 = vmax.f32 %v1384_v61, 0.0  ;;  %v1812_v4 = vmax.f32 %v1640_v62, 0.0 }
 0x1c4   : > { %2388 = vst.msk [vmem:[%s3479_s16 + $0xc0] sm:$0xf] %vm2339_vm1, %v2915_v1  ;;  %2452 = vst.msk [vmem:[%s3479_s16 + $0x1c0] sm:$0xf] %vm2339_vm1, %v2979_v2  ;;  %v2916_v5 = vpack.c.bf16 %v1748_v3, %v1748_v3  ;;  %v2980_v6 = vpack.c.bf16 %v1812_v4, %v1812_v4 }
 0x1c5   : > { %v1388_v7 = vpop.f32.mrb[100].mxu0  ;;  %v1644_v8 = vpop.f32.mrb[100].mxu1 }
 0x1c6   : > { %2389 = vst.msk [vmem:[%s3479_s16 + $0xc4] sm:$0xf] %vm2339_vm1, %v2916_v5  ;;  %2453 = vst.msk [vmem:[%s3479_s16 + $0x1c4] sm:$0xf] %vm2339_vm1, %v2980_v6  ;;  %v1389_v9 = vadd.f32 %v3742_v56, %v1388_v7  ;;  %v1645_v10 = vadd.f32 %v3742_v56, %v1644_v8  ;;  %v1390_v11 = vpop.f32.mrb[101].mxu0  ;;  %v1646_v12 = vpop.f32.mrb[101].mxu1 }
 0x1c7   : > { %v1391_v13 = vpop.f32.mrb[102].mxu0  ;;  %v1647_v14 = vpop.f32.mrb[102].mxu1 }
 0x1c8   : > { %v1749_v15 = vmax.f32 %v1389_v9, 0.0  ;;  %v1813_v16 = vmax.f32 %v1645_v10, 0.0  ;;  %v1392_v17 = vadd.f32 %v3742_v56, %v1391_v13  ;;  %v1648_v18 = vadd.f32 %v3742_v56, %v1647_v14  ;;  %v1393_v19 = vpop.f32.mrb[103].mxu0  ;;  %v1649_v20 = vpop.f32.mrb[103].mxu1 }
 0x1ca   : > { %v2917_v21 = vpack.c.bf16 %v1749_v15, %v1749_v15  ;;  %v2981_v22 = vpack.c.bf16 %v1813_v16, %v1813_v16  ;;  %v1750_v23 = vmax.f32 %v1392_v17, 0.0  ;;  %v1814_v24 = vmax.f32 %v1648_v18, 0.0 }
 0x1cc   : > { %2390 = vst.msk [vmem:[%s3479_s16 + $0xc8] sm:$0xf] %vm2339_vm1, %v2917_v21  ;;  %2454 = vst.msk [vmem:[%s3479_s16 + $0x1c8] sm:$0xf] %vm2339_vm1, %v2981_v22  ;;  %v2918_v25 = vpack.c.bf16 %v1750_v23, %v1750_v23  ;;  %v2982_v26 = vpack.c.bf16 %v1814_v24, %v1814_v24 }
 0x1cd   : > { %v1396_v27 = vpop.f32.mrb[104].mxu0  ;;  %v1652_v28 = vpop.f32.mrb[104].mxu1 }
 0x1ce   : > { %2391 = vst.msk [vmem:[%s3479_s16 + $0xcc] sm:$0xf] %vm2339_vm1, %v2918_v25  ;;  %2455 = vst.msk [vmem:[%s3479_s16 + $0x1cc] sm:$0xf] %vm2339_vm1, %v2982_v26  ;;  %v1397_v29 = vadd.f32 %v3742_v56, %v1396_v27  ;;  %v1653_v30 = vadd.f32 %v3742_v56, %v1652_v28  ;;  %v1398_v31 = vpop.f32.mrb[105].mxu0  ;;  %v1654_v32 = vpop.f32.mrb[105].mxu1 }
 0x1cf   : > { %v1399_v33 = vpop.f32.mrb[106].mxu0  ;;  %v1655_v34 = vpop.f32.mrb[106].mxu1 }
 0x1d0   : > { %v1751_v35 = vmax.f32 %v1397_v29, 0.0  ;;  %v1815_v36 = vmax.f32 %v1653_v30, 0.0  ;;  %v1400_v37 = vadd.f32 %v3742_v56, %v1399_v33  ;;  %v1656_v38 = vadd.f32 %v3742_v56, %v1655_v34  ;;  %v1401_v39 = vpop.f32.mrb[107].mxu0  ;;  %v1657_v40 = vpop.f32.mrb[107].mxu1 }
 0x1d2   : > { %v2919_v41 = vpack.c.bf16 %v1751_v35, %v1751_v35  ;;  %v2983_v42 = vpack.c.bf16 %v1815_v36, %v1815_v36  ;;  %v1752_v43 = vmax.f32 %v1400_v37, 0.0  ;;  %v1816_v44 = vmax.f32 %v1656_v38, 0.0 }
 0x1d4   : > { %2392 = vst.msk [vmem:[%s3479_s16 + $0xd0] sm:$0xf] %vm2339_vm1, %v2919_v41  ;;  %2456 = vst.msk [vmem:[%s3479_s16 + $0x1d0] sm:$0xf] %vm2339_vm1, %v2983_v42  ;;  %v2920_v45 = vpack.c.bf16 %v1752_v43, %v1752_v43  ;;  %v2984_v46 = vpack.c.bf16 %v1816_v44, %v1816_v44 }
 0x1d5   : > { %v1404_v47 = vpop.f32.mrb[108].mxu0  ;;  %v1660_v48 = vpop.f32.mrb[108].mxu1 }
 0x1d6   : > { %2393 = vst.msk [vmem:[%s3479_s16 + $0xd4] sm:$0xf] %vm2339_vm1, %v2920_v45  ;;  %2457 = vst.msk [vmem:[%s3479_s16 + $0x1d4] sm:$0xf] %vm2339_vm1, %v2984_v46  ;;  %v1405_v49 = vadd.f32 %v3742_v56, %v1404_v47  ;;  %v1661_v50 = vadd.f32 %v3742_v56, %v1660_v48  ;;  %v1406_v51 = vpop.f32.mrb[109].mxu0  ;;  %v1662_v52 = vpop.f32.mrb[109].mxu1 }
 0x1d7   : > { %v1407_v53 = vpop.f32.mrb[110].mxu0  ;;  %v1663_v54 = vpop.f32.mrb[110].mxu1 }
 0x1d8   : > { %v1753_v55 = vmax.f32 %v1405_v49, 0.0  ;;  %v1817_v57 = vmax.f32 %v1661_v50, 0.0  ;;  %v1408_v58 = vadd.f32 %v3742_v56, %v1407_v53  ;;  %v1664_v59 = vadd.f32 %v3742_v56, %v1663_v54  ;;  %v1409_v60 = vpop.f32.mrb[111].mxu0  ;;  %v1665_v61 = vpop.f32.mrb[111].mxu1 }
 0x1da   : > { %v2921_v62 = vpack.c.bf16 %v1753_v55, %v1753_v55  ;;  %v2985_v63 = vpack.c.bf16 %v1817_v57, %v1817_v57  ;;  %v1754_v0 = vmax.f32 %v1408_v58, 0.0  ;;  %v1818_v1 = vmax.f32 %v1664_v59, 0.0 }
 0x1dc   : > { %2394 = vst.msk [vmem:[%s3479_s16 + $0xd8] sm:$0xf] %vm2339_vm1, %v2921_v62  ;;  %2458 = vst.msk [vmem:[%s3479_s16 + $0x1d8] sm:$0xf] %vm2339_vm1, %v2985_v63  ;;  %v2922_v2 = vpack.c.bf16 %v1754_v0, %v1754_v0  ;;  %v2986_v3 = vpack.c.bf16 %v1818_v1, %v1818_v1 }
 0x1dd   : > { %v1412_v4 = vpop.f32.mrb[112].mxu0  ;;  %v1668_v5 = vpop.f32.mrb[112].mxu1 }
 0x1de   : > { %2395 = vst.msk [vmem:[%s3479_s16 + $0xdc] sm:$0xf] %vm2339_vm1, %v2922_v2  ;;  %2459 = vst.msk [vmem:[%s3479_s16 + $0x1dc] sm:$0xf] %vm2339_vm1, %v2986_v3  ;;  %v1413_v6 = vadd.f32 %v3742_v56, %v1412_v4  ;;  %v1669_v7 = vadd.f32 %v3742_v56, %v1668_v5  ;;  %v1414_v8 = vpop.f32.mrb[113].mxu0  ;;  %v1670_v9 = vpop.f32.mrb[113].mxu1 }
 0x1df   : > { %v1415_v10 = vpop.f32.mrb[114].mxu0  ;;  %v1671_v11 = vpop.f32.mrb[114].mxu1 }
 0x1e0   : > { %v1755_v12 = vmax.f32 %v1413_v6, 0.0  ;;  %v1819_v13 = vmax.f32 %v1669_v7, 0.0  ;;  %v1416_v14 = vadd.f32 %v3742_v56, %v1415_v10  ;;  %v1672_v15 = vadd.f32 %v3742_v56, %v1671_v11  ;;  %v1417_v16 = vpop.f32.mrb[115].mxu0  ;;  %v1673_v17 = vpop.f32.mrb[115].mxu1 }
 0x1e2   : > { %v2923_v18 = vpack.c.bf16 %v1755_v12, %v1755_v12  ;;  %v2987_v19 = vpack.c.bf16 %v1819_v13, %v1819_v13  ;;  %v1756_v20 = vmax.f32 %v1416_v14, 0.0  ;;  %v1820_v21 = vmax.f32 %v1672_v15, 0.0 }
 0x1e4   : > { %2396 = vst.msk [vmem:[%s3479_s16 + $0xe0] sm:$0xf] %vm2339_vm1, %v2923_v18  ;;  %2460 = vst.msk [vmem:[%s3479_s16 + $0x1e0] sm:$0xf] %vm2339_vm1, %v2987_v19  ;;  %v2924_v22 = vpack.c.bf16 %v1756_v20, %v1756_v20  ;;  %v2988_v23 = vpack.c.bf16 %v1820_v21, %v1820_v21 }
 0x1e5   : > { %v1420_v24 = vpop.f32.mrb[116].mxu0  ;;  %v1676_v25 = vpop.f32.mrb[116].mxu1 }
 0x1e6   : > { %2397 = vst.msk [vmem:[%s3479_s16 + $0xe4] sm:$0xf] %vm2339_vm1, %v2924_v22  ;;  %2461 = vst.msk [vmem:[%s3479_s16 + $0x1e4] sm:$0xf] %vm2339_vm1, %v2988_v23  ;;  %v1421_v26 = vadd.f32 %v3742_v56, %v1420_v24  ;;  %v1677_v27 = vadd.f32 %v3742_v56, %v1676_v25  ;;  %v1422_v28 = vpop.f32.mrb[117].mxu0  ;;  %v1678_v29 = vpop.f32.mrb[117].mxu1 }
 0x1e7   : > { %v1423_v30 = vpop.f32.mrb[118].mxu0  ;;  %v1679_v31 = vpop.f32.mrb[118].mxu1 }
 0x1e8   : > { %v1757_v32 = vmax.f32 %v1421_v26, 0.0  ;;  %v1821_v33 = vmax.f32 %v1677_v27, 0.0  ;;  %v1424_v34 = vadd.f32 %v3742_v56, %v1423_v30  ;;  %v1680_v35 = vadd.f32 %v3742_v56, %v1679_v31  ;;  %v1425_v36 = vpop.f32.mrb[119].mxu0  ;;  %v1681_v37 = vpop.f32.mrb[119].mxu1 }
 0x1ea   : > { %v2925_v38 = vpack.c.bf16 %v1757_v32, %v1757_v32  ;;  %v2989_v39 = vpack.c.bf16 %v1821_v33, %v1821_v33  ;;  %v1758_v40 = vmax.f32 %v1424_v34, 0.0  ;;  %v1822_v41 = vmax.f32 %v1680_v35, 0.0 }
 0x1ec   : > { %2398 = vst.msk [vmem:[%s3479_s16 + $0xe8] sm:$0xf] %vm2339_vm1, %v2925_v38  ;;  %2462 = vst.msk [vmem:[%s3479_s16 + $0x1e8] sm:$0xf] %vm2339_vm1, %v2989_v39  ;;  %v2926_v42 = vpack.c.bf16 %v1758_v40, %v1758_v40  ;;  %v2990_v43 = vpack.c.bf16 %v1822_v41, %v1822_v41 }
 0x1ed   : > { %v1428_v44 = vpop.f32.mrb[120].mxu0  ;;  %v1684_v45 = vpop.f32.mrb[120].mxu1 }
 0x1ee   : > { %2399 = vst.msk [vmem:[%s3479_s16 + $0xec] sm:$0xf] %vm2339_vm1, %v2926_v42  ;;  %2463 = vst.msk [vmem:[%s3479_s16 + $0x1ec] sm:$0xf] %vm2339_vm1, %v2990_v43  ;;  %v1429_v46 = vadd.f32 %v3742_v56, %v1428_v44  ;;  %v1685_v47 = vadd.f32 %v3742_v56, %v1684_v45  ;;  %v1430_v48 = vpop.f32.mrb[121].mxu0  ;;  %v1686_v49 = vpop.f32.mrb[121].mxu1 }
 0x1ef   : > { %v1431_v50 = vpop.f32.mrb[122].mxu0  ;;  %v1687_v51 = vpop.f32.mrb[122].mxu1 }
 0x1f0   : > { %v1759_v52 = vmax.f32 %v1429_v46, 0.0  ;;  %v1823_v53 = vmax.f32 %v1685_v47, 0.0  ;;  %v1432_v54 = vadd.f32 %v3742_v56, %v1431_v50  ;;  %v1688_v55 = vadd.f32 %v3742_v56, %v1687_v51  ;;  %v1433_v57 = vpop.f32.mrb[123].mxu0  ;;  %v1689_v58 = vpop.f32.mrb[123].mxu1 }
 0x1f2   : > { %v2927_v59 = vpack.c.bf16 %v1759_v52, %v1759_v52  ;;  %v2991_v60 = vpack.c.bf16 %v1823_v53, %v1823_v53  ;;  %v1760_v61 = vmax.f32 %v1432_v54, 0.0  ;;  %v1824_v62 = vmax.f32 %v1688_v55, 0.0 }
 0x1f4   : > { %2400 = vst.msk [vmem:[%s3479_s16 + $0xf0] sm:$0xf] %vm2339_vm1, %v2927_v59  ;;  %2464 = vst.msk [vmem:[%s3479_s16 + $0x1f0] sm:$0xf] %vm2339_vm1, %v2991_v60  ;;  %v2928_v63 = vpack.c.bf16 %v1760_v61, %v1760_v61  ;;  %v2992_v0 = vpack.c.bf16 %v1824_v62, %v1824_v62 }
 0x1f5   : > { %v1436_v1 = vpop.f32.mrb[124].mxu0  ;;  %v1692_v2 = vpop.f32.mrb[124].mxu1 }
 0x1f6   : > { %2401 = vst.msk [vmem:[%s3479_s16 + $0xf4] sm:$0xf] %vm2339_vm1, %v2928_v63  ;;  %2465 = vst.msk [vmem:[%s3479_s16 + $0x1f4] sm:$0xf] %vm2339_vm1, %v2992_v0  ;;  %v1437_v3 = vadd.f32 %v3742_v56, %v1436_v1  ;;  %v1693_v4 = vadd.f32 %v3742_v56, %v1692_v2  ;;  %v1438_v5 = vpop.f32.mrb[125].mxu0  ;;  %v1694_v6 = vpop.f32.mrb[125].mxu1 }
 0x1f7   : > { %v1439_v7 = vpop.f32.mrb[126].mxu0  ;;  %v1695_v8 = vpop.f32.mrb[126].mxu1 }
 0x1f8   : > { %v1761_v9 = vmax.f32 %v1437_v3, 0.0  ;;  %v1825_v10 = vmax.f32 %v1693_v4, 0.0  ;;  %v1440_v11 = vadd.f32 %v3742_v56, %v1439_v7  ;;  %v1696_v12 = vadd.f32 %v3742_v56, %v1695_v8  ;;  %v1441_v13 = vpop.f32.mrb[127].mxu0  ;;  %v1697_v14 = vpop.f32.mrb[127].mxu1 }
 0x1fa   : > { %v2929_v15 = vpack.c.bf16 %v1761_v9, %v1761_v9  ;;  %v2993_v16 = vpack.c.bf16 %v1825_v10, %v1825_v10  ;;  %v1762_v17 = vmax.f32 %v1440_v11, 0.0  ;;  %v1826_v18 = vmax.f32 %v1696_v12, 0.0 }
 0x1fc   : > { %2402 = vst.msk [vmem:[%s3479_s16 + $0xf8] sm:$0xf] %vm2339_vm1, %v2929_v15  ;;  %2466 = vst.msk [vmem:[%s3479_s16 + $0x1f8] sm:$0xf] %vm2339_vm1, %v2993_v16  ;;  %v2930_v19 = vpack.c.bf16 %v1762_v17, %v1762_v17  ;;  %v2994_v20 = vpack.c.bf16 %v1826_v18, %v1826_v18 }
 0x1fe   : > { %2403 = vst.msk [vmem:[%s3479_s16 + $0xfc] sm:$0xf] %vm2339_vm1, %v2930_v19  ;;  %2467 = vst.msk [vmem:[%s3479_s16 + $0x1fc] sm:$0xf] %vm2339_vm1, %v2994_v20 }
 0x1ff PF: > { %s13_s12 = sadd.s32 1, %s3230_s12  }
 0x200   : > { %p10_p4 = scmp.ge.s32.totalorder %s13_s12, 4  }
 0x202   :  { %12 = sbr.rel (!%p10_p4) target bundleno = 1 (0x1), region = 62 }

// kernel: flowgen_forward.17
= control target key start
LH: loop header
LB: loop body
LE: loop exit
PB: predicated region body
PF: predicated region fallthrough
CT: control target
= control target key end

     0   :  { %s2000_s12 = smov 0   ;;  %s2545_s0 = inlined_call_operand.vmem [shape: bf16[2048,16], index: 0, kind: input, shape index: {}]   ;;  %s2546_s1 = inlined_call_operand.vmem [shape: bf16[16,3], index: 1, kind: input, shape index: {}]   ;;  %s2547_s2 = inlined_call_operand.vmem [shape: f32[1,3], index: 2, kind: input, shape index: {}]   ;;  %s2548_s3 = inlined_call_operand.vmem [shape: f32[2048,3], index: 3, kind: output, shape index: {}]  }
   0x1 LB: > { %s1561_s13 = sadd.s32 4294967295, %s1978_s12   ;;  %p1565_p0 = scmp.ge.s32.totalorder %s1978_s12, 1  ;;  %s1978_s12 = sphi %s2000_s12, %s13_s12  }
   0x2   : > { %p138_p1 = scmp.lt.s32.totalorder %s1978_s12, 3 }
   0x4   : > { %p139_p2 = pnand %p1565_p0, %p138_p1 }
   0x5   : > { %v1907_v0 = vld [vmem:[%s2546_s1] sm:$0xff] (!%p139_p2)   ;;  %s1566_s16 = sshll.u32 (!%p139_p2), %s1561_s13, 7  ;;  %vm638_vm0 = vcmask (!%p139_p2), 130048   ;;  %vm1376_vm1 = vcmask (!%p139_p2), 23552  }
   0x6   : > { %142 = sbr.rel (%p139_p2) target bundleno = 357 (0x165), region = 32  ;;  %p163_p3 = scmp.lt.s32.totalorder (!%p139_p2), %s1566_s16, 255  ;;  %1767 = vmatprep.subr.bf16.mxu0 (!%p139_p2), %v1907_v0  ;;  %1897 = vmatprep.subr.bf16.mxu1 (!%p139_p2), %v1907_v0 }
   0x7   : > { %1768 = vmatpush3.bf16.msra.mxu0 (!%p139_p2), %v1907_v0  ;;  %1898 = vmatpush3.bf16.msra.mxu1 (!%p139_p2), %v1907_v0 }
   0xd   : > { %s2550_s16 = smov (!%p163_p3, %s1566_s16), 255 }
   0xe   : > { %s1567_s17 = sshll.u32 %s2550_s16, 2  ;;  %s1569_s21 = sshll.u32 %s2550_s16, 3 }
   0xf   : > { %s2017_s20 = scalar_lea.vmem %s2545_s0, %s1567_s17  ;;  %s2156_s26 = scalar_lea.vmem %s2548_s3, %s1569_s21 }
  0x10   : > { %v1908_v1 = vld [vmem:[%s2017_s20] sm:$0xff]   ;;  %v1910_v3 = vld [vmem:[%s2017_s20 + $0x8] sm:$0xff]   ;;  %v1912_v5 = vld [vmem:[%s2017_s20 + $0x10] sm:$0xff]  }
  0x11   : > { %v1909_v2 = vld [vmem:[%s2017_s20 + $0x100] sm:$0xff]   ;;  %1769 = vmatprep.mubr.msk.bf16.mxu0 %vm638_vm0, %v1908_v1  ;;  %v1911_v4 = vld [vmem:[%s2017_s20 + $0x108] sm:$0xff]   ;;  %v1913_v6 = vld [vmem:[%s2017_s20 + $0x110] sm:$0xff]  }
  0x12   : > { %1833 = vmatprep.mubr.msk.bf16.mxu1 %vm638_vm0, %v1909_v2  ;;  %1770 = vmatmul.mubr.msk.bf16.vlgmr.msra.gmra.mrb[0].mxu0 %vm638_vm0, %v1910_v3  ;;  %v1914_v7 = vld [vmem:[%s2017_s20 + $0x18] sm:$0xff]   ;;  %v1916_v9 = vld [vmem:[%s2017_s20 + $0x20] sm:$0xff]   ;;  %v1918_v11 = vld [vmem:[%s2017_s20 + $0x28] sm:$0xff]  }
  0x13   : > { %1834 = vmatmul.mubr.msk.bf16.vlgmr.msra.gmra.mrb[0].mxu1 %vm638_vm0, %v1911_v4  ;;  %1773 = vmatprep.mubr.msk.bf16.mxu0 %vm638_vm0, %v1912_v5  ;;  %v1915_v8 = vld [vmem:[%s2017_s20 + $0x118] sm:$0xff]   ;;  %v1917_v10 = vld [vmem:[%s2017_s20 + $0x120] sm:$0xff]   ;;  %v1919_v12 = vld [vmem:[%s2017_s20 + $0x128] sm:$0xff]  }
  0x14   : > { %1837 = vmatprep.mubr.msk.bf16.mxu1 %vm638_vm0, %v1913_v6  ;;  %v1920_v13 = vld [vmem:[%s2017_s20 + $0x30] sm:$0xff]   ;;  %v1922_v15 = vld [vmem:[%s2017_s20 + $0x38] sm:$0xff]   ;;  %v1924_v17 = vld [vmem:[%s2017_s20 + $0x40] sm:$0xff]  }
  0x15   : > { %v1921_v14 = vld [vmem:[%s2017_s20 + $0x130] sm:$0xff]   ;;  %v1923_v16 = vld [vmem:[%s2017_s20 + $0x138] sm:$0xff]   ;;  %v1925_v18 = vld [vmem:[%s2017_s20 + $0x140] sm:$0xff]  }
  0x16   : > { %v1926_v19 = vld [vmem:[%s2017_s20 + $0x48] sm:$0xff]   ;;  %v1928_v21 = vld [vmem:[%s2017_s20 + $0x50] sm:$0xff]   ;;  %v1930_v23 = vld [vmem:[%s2017_s20 + $0x58] sm:$0xff]  }
  0x17   : > { %v1927_v20 = vld [vmem:[%s2017_s20 + $0x148] sm:$0xff]   ;;  %v1929_v22 = vld [vmem:[%s2017_s20 + $0x150] sm:$0xff]   ;;  %v1931_v24 = vld [vmem:[%s2017_s20 + $0x158] sm:$0xff]  }
  0x18   : > { %v1932_v25 = vld [vmem:[%s2017_s20 + $0x60] sm:$0xff]   ;;  %v1934_v27 = vld [vmem:[%s2017_s20 + $0x68] sm:$0xff]   ;;  %v1936_v29 = vld [vmem:[%s2017_s20 + $0x70] sm:$0xff]  }
  0x19   : > { %v1933_v26 = vld [vmem:[%s2017_s20 + $0x160] sm:$0xff]   ;;  %v1935_v28 = vld [vmem:[%s2017_s20 + $0x168] sm:$0xff]   ;;  %v1937_v30 = vld [vmem:[%s2017_s20 + $0x170] sm:$0xff]  }
  0x1a   : > { %1774 = vmatmul.mubr.msk.bf16.gmra.mrb[4].mxu0 %vm638_vm0, %v1914_v7  ;;  %v1938_v31 = vld [vmem:[%s2017_s20 + $0x78] sm:$0xff]   ;;  %v1940_v33 = vld [vmem:[%s2017_s20 + $0x80] sm:$0xff]   ;;  %v1942_v35 = vld [vmem:[%s2017_s20 + $0x88] sm:$0xff]  }
  0x1b   : > { %1838 = vmatmul.mubr.msk.bf16.gmra.mrb[4].mxu1 %vm638_vm0, %v1915_v8  ;;  %1777 = vmatprep.mubr.msk.bf16.mxu0 %vm638_vm0, %v1916_v9  ;;  %v1939_v32 = vld [vmem:[%s2017_s20 + $0x178] sm:$0xff]   ;;  %v1941_v34 = vld [vmem:[%s2017_s20 + $0x180] sm:$0xff]   ;;  %v1943_v36 = vld [vmem:[%s2017_s20 + $0x188] sm:$0xff]  }
  0x1c   : > { %1841 = vmatprep.mubr.msk.bf16.mxu1 %vm638_vm0, %v1917_v10  ;;  %v1944_v37 = vld [vmem:[%s2017_s20 + $0x90] sm:$0xff]   ;;  %v1946_v39 = vld [vmem:[%s2017_s20 + $0x98] sm:$0xff]   ;;  %v1948_v41 = vld [vmem:[%s2017_s20 + $0xa0] sm:$0xff]  }
  0x1d   : > { %v1945_v38 = vld [vmem:[%s2017_s20 + $0x190] sm:$0xff]   ;;  %v1947_v40 = vld [vmem:[%s2017_s20 + $0x198] sm:$0xff]   ;;  %v1949_v42 = vld [vmem:[%s2017_s20 + $0x1a0] sm:$0xff]  }
  0x1e   : > { %v1950_v43 = vld [vmem:[%s2017_s20 + $0xa8] sm:$0xff]   ;;  %v1952_v45 = vld [vmem:[%s2017_s20 + $0xb0] sm:$0xff]   ;;  %v1954_v47 = vld [vmem:[%s2017_s20 + $0xb8] sm:$0xff]  }
  0x1f   : > { %v1951_v44 = vld [vmem:[%s2017_s20 + $0x1a8] sm:$0xff]   ;;  %v1953_v46 = vld [vmem:[%s2017_s20 + $0x1b0] sm:$0xff]   ;;  %v1955_v48 = vld [vmem:[%s2017_s20 + $0x1b8] sm:$0xff]  }
  0x20   : > { %v1956_v49 = vld [vmem:[%s2017_s20 + $0xc0] sm:$0xff]   ;;  %v1958_v51 = vld [vmem:[%s2017_s20 + $0xc8] sm:$0xff]   ;;  %v1960_v53 = vld [vmem:[%s2017_s20 + $0xd0] sm:$0xff]  }
  0x21   : > { %v1957_v50 = vld [vmem:[%s2017_s20 + $0x1c0] sm:$0xff]   ;;  %v1959_v52 = vld [vmem:[%s2017_s20 + $0x1c8] sm:$0xff]   ;;  %v1961_v54 = vld [vmem:[%s2017_s20 + $0x1d0] sm:$0xff]  }
  0x22   : > { %1778 = vmatmul.mubr.msk.bf16.gmra.mrb[8].mxu0 %vm638_vm0, %v1918_v11  ;;  %v1962_v55 = vld [vmem:[%s2017_s20 + $0xd8] sm:$0xff]   ;;  %v1964_v57 = vld [vmem:[%s2017_s20 + $0xe0] sm:$0xff]   ;;  %v1966_v59 = vld [vmem:[%s2017_s20 + $0xe8] sm:$0xff]  }
  0x23   : > { %1842 = vmatmul.mubr.msk.bf16.gmra.mrb[8].mxu1 %vm638_vm0, %v1919_v12  ;;  %1781 = vmatprep.mubr.msk.bf16.mxu0 %vm638_vm0, %v1920_v13  ;;  %v1963_v56 = vld [vmem:[%s2017_s20 + $0x1d8] sm:$0xff]   ;;  %v1965_v58 = vld [vmem:[%s2017_s20 + $0x1e0] sm:$0xff]   ;;  %v1967_v60 = vld [vmem:[%s2017_s20 + $0x1e8] sm:$0xff]  }
  0x24   : > { %1845 = vmatprep.mubr.msk.bf16.mxu1 %vm638_vm0, %v1921_v14  ;;  %v1968_v61 = vld [vmem:[%s2017_s20 + $0xf0] sm:$0xff]   ;;  %v1970_v63 = vld [vmem:[%s2017_s20 + $0xf8] sm:$0xff]   ;;  %v2151_v1 = vld [vmem:[%s2547_s2] ss:$0 sm:$0xff] }
  0x25   : > { %v1969_v62 = vld [vmem:[%s2017_s20 + $0x1f0] sm:$0xff]   ;;  %v1971_v0 = vld [vmem:[%s2017_s20 + $0x1f8] sm:$0xff]  }
  0x2a   : > { %1782 = vmatmul.mubr.msk.bf16.gmra.mrb[12].mxu0 %vm638_vm0, %v1922_v15 }
  0x2b   : > { %1846 = vmatmul.mubr.msk.bf16.gmra.mrb[12].mxu1 %vm638_vm0, %v1923_v16  ;;  %1785 = vmatprep.mubr.msk.bf16.mxu0 %vm638_vm0, %v1924_v17 }
  0x2c   : > { %1849 = vmatprep.mubr.msk.bf16.mxu1 %vm638_vm0, %v1925_v18 }
  0x32   : > { %1786 = vmatmul.mubr.msk.bf16.gmra.mrb[16].mxu0 %vm638_vm0, %v1926_v19 }
  0x33   : > { %1850 = vmatmul.mubr.msk.bf16.gmra.mrb[16].mxu1 %vm638_vm0, %v1927_v20  ;;  %1789 = vmatprep.mubr.msk.bf16.mxu0 %vm638_vm0, %v1928_v21 }
  0x34   : > { %1853 = vmatprep.mubr.msk.bf16.mxu1 %vm638_vm0, %v1929_v22 }
  0x3a   : > { %1790 = vmatmul.mubr.msk.bf16.gmra.mrb[20].mxu0 %vm638_vm0, %v1930_v23 }
  0x3b   : > { %1854 = vmatmul.mubr.msk.bf16.gmra.mrb[20].mxu1 %vm638_vm0, %v1931_v24  ;;  %1793 = vmatprep.mubr.msk.bf16.mxu0 %vm638_vm0, %v1932_v25 }
  0x3c   : > { %1857 = vmatprep.mubr.msk.bf16.mxu1 %vm638_vm0, %v1933_v26 }
  0x42   : > { %1794 = vmatmul.mubr.msk.bf16.gmra.mrb[24].mxu0 %vm638_vm0, %v1934_v27 }
  0x43   : > { %1858 = vmatmul.mubr.msk.bf16.gmra.mrb[24].mxu1 %vm638_vm0, %v1935_v28  ;;  %1797 = vmatprep.mubr.msk.bf16.mxu0 %vm638_vm0, %v1936_v29 }
  0x44   : > { %1861 = vmatprep.mubr.msk.bf16.mxu1 %vm638_vm0, %v1937_v30 }
  0x4a   : > { %1798 = vmatmul.mubr.msk.bf16.gmra.mrb[28].mxu0 %vm638_vm0, %v1938_v31 }
  0x4b   : > { %1862 = vmatmul.mubr.msk.bf16.gmra.mrb[28].mxu1 %vm638_vm0, %v1939_v32  ;;  %1801 = vmatprep.mubr.msk.bf16.mxu0 %vm638_vm0, %v1940_v33 }
  0x4c   : > { %1865 = vmatprep.mubr.msk.bf16.mxu1 %vm638_vm0, %v1941_v34 }
  0x52   : > { %1802 = vmatmul.mubr.msk.bf16.gmra.mrb[32].mxu0 %vm638_vm0, %v1942_v35 }
  0x53   : > { %1866 = vmatmul.mubr.msk.bf16.gmra.mrb[32].mxu1 %vm638_vm0, %v1943_v36  ;;  %1805 = vmatprep.mubr.msk.bf16.mxu0 %vm638_vm0, %v1944_v37 }
  0x54   : > { %1869 = vmatprep.mubr.msk.bf16.mxu1 %vm638_vm0, %v1945_v38 }
  0x5a   : > { %1806 = vmatmul.mubr.msk.bf16.gmra.mrb[36].mxu0 %vm638_vm0, %v1946_v39 }
  0x5b   : > { %1870 = vmatmul.mubr.msk.bf16.gmra.mrb[36].mxu1 %vm638_vm0, %v1947_v40  ;;  %1809 = vmatprep.mubr.msk.bf16.mxu0 %vm638_vm0, %v1948_v41 }
  0x5c   : > { %1873 = vmatprep.mubr.msk.bf16.mxu1 %vm638_vm0, %v1949_v42 }
  0x62   : > { %1810 = vmatmul.mubr.msk.bf16.gmra.mrb[40].mxu0 %vm638_vm0, %v1950_v43 }
  0x63   : > { %1874 = vmatmul.mubr.msk.bf16.gmra.mrb[40].mxu1 %vm638_vm0, %v1951_v44  ;;  %1813 = vmatprep.mubr.msk.bf16.mxu0 %vm638_vm0, %v1952_v45 }
  0x64   : > { %1877 = vmatprep.mubr.msk.bf16.mxu1 %vm638_vm0, %v1953_v46 }
  0x6a   : > { %1814 = vmatmul.mubr.msk.bf16.gmra.mrb[44].mxu0 %vm638_vm0, %v1954_v47 }
  0x6b   : > { %1878 = vmatmul.mubr.msk.bf16.gmra.mrb[44].mxu1 %vm638_vm0, %v1955_v48  ;;  %1817 = vmatprep.mubr.msk.bf16.mxu0 %vm638_vm0, %v1956_v49 }
  0x6c   : > { %1881 = vmatprep.mubr.msk.bf16.mxu1 %vm638_vm0, %v1957_v50 }
  0x72   : > { %1818 = vmatmul.mubr.msk.bf16.gmra.mrb[48].mxu0 %vm638_vm0, %v1958_v51 }
  0x73   : > { %1882 = vmatmul.mubr.msk.bf16.gmra.mrb[48].mxu1 %vm638_vm0, %v1959_v52  ;;  %1821 = vmatprep.mubr.msk.bf16.mxu0 %vm638_vm0, %v1960_v53 }
  0x74   : > { %1885 = vmatprep.mubr.msk.bf16.mxu1 %vm638_vm0, %v1961_v54 }
  0x7a   : > { %1822 = vmatmul.mubr.msk.bf16.gmra.mrb[52].mxu0 %vm638_vm0, %v1962_v55 }
  0x7b   : > { %1886 = vmatmul.mubr.msk.bf16.gmra.mrb[52].mxu1 %vm638_vm0, %v1963_v56  ;;  %1825 = vmatprep.mubr.msk.bf16.mxu0 %vm638_vm0, %v1964_v57 }
  0x7c   : > { %1889 = vmatprep.mubr.msk.bf16.mxu1 %vm638_vm0, %v1965_v58 }
  0x82   : > { %1826 = vmatmul.mubr.msk.bf16.gmra.mrb[56].mxu0 %vm638_vm0, %v1966_v59 }
  0x83   : > { %1890 = vmatmul.mubr.msk.bf16.gmra.mrb[56].mxu1 %vm638_vm0, %v1967_v60  ;;  %1829 = vmatprep.mubr.msk.bf16.mxu0 %vm638_vm0, %v1968_v61 }
  0x84   : > { %1893 = vmatprep.mubr.msk.bf16.mxu1 %vm638_vm0, %v1969_v62 }
  0x8a   : > { %1830 = vmatmul.mubr.msk.bf16.gmra.mrb[60].mxu0 %vm638_vm0, %v1970_v63 }
  0x8b   : > { %1894 = vmatmul.mubr.msk.bf16.gmra.mrb[60].mxu1 %vm638_vm0, %v1971_v0 }
  0xe5   : > { %v1771_v2 = vpop.f32.mrb[0].mxu0 }
  0xe6   : > { %v874_v3 = vadd.f32 %v1771_v2, %v2151_v1  ;;  %v1835_v4 = vpop.f32.mrb[0].mxu1  ;;  %v865_v5 = vpop.f32.mrb[1].mxu0 }
  0xe7   : > { %v1130_v6 = vadd.f32 %v1835_v4, %v2151_v1  ;;  %v866_v7 = vadd.f32 %v2151_v1, %v865_v5  ;;  %v1121_v8 = vpop.f32.mrb[1].mxu1  ;;  %v1772_v9 = vpop.f32.mrb[2].mxu0 }
  0xe8   : > { %1379 = vst.msk [vmem:[%s2156_s26 + $0x10] sm:$0xff] %vm1376_vm1, %v874_v3  ;;  %v1122_v10 = vadd.f32 %v2151_v1, %v1121_v8  ;;  %v877_v11 = vadd.f32 %v1772_v9, %v2151_v1  ;;  %v1836_v12 = vpop.f32.mrb[2].mxu1  ;;  %v868_v13 = vpop.f32.mrb[3].mxu0 }
  0xe9   : > { %1443 = vst.msk [vmem:[%s2156_s26 + $0x210] sm:$0xff] %vm1376_vm1, %v1130_v6  ;;  %1377 = vst.msk [vmem:[%s2156_s26] sm:$0xff] %vm1376_vm1, %v866_v7  ;;  %v1133_v14 = vadd.f32 %v1836_v12, %v2151_v1  ;;  %v869_v15 = vadd.f32 %v2151_v1, %v868_v13  ;;  %v1124_v16 = vpop.f32.mrb[3].mxu1 }
  0xea   : > { %1441 = vst.msk [vmem:[%s2156_s26 + $0x200] sm:$0xff] %vm1376_vm1, %v1122_v10  ;;  %1380 = vst.msk [vmem:[%s2156_s26 + $0x18] sm:$0xff] %vm1376_vm1, %v877_v11  ;;  %v1125_v17 = vadd.f32 %v2151_v1, %v1124_v16 }
  0xeb   : > { %1444 = vst.msk [vmem:[%s2156_s26 + $0x218] sm:$0xff] %vm1376_vm1, %v1133_v14  ;;  %1378 = vst.msk [vmem:[%s2156_s26 + $0x8] sm:$0xff] %vm1376_vm1, %v869_v15 }
  0xec   : > { %1442 = vst.msk [vmem:[%s2156_s26 + $0x208] sm:$0xff] %vm1376_vm1, %v1125_v17 }
  0xed   : > { %v1775_v18 = vpop.f32.mrb[4].mxu0 }
  0xee   : > { %v890_v19 = vadd.f32 %v1775_v18, %v2151_v1  ;;  %v1839_v20 = vpop.f32.mrb[4].mxu1  ;;  %v881_v21 = vpop.f32.mrb[5].mxu0 }
  0xef   : > { %v1146_v22 = vadd.f32 %v1839_v20, %v2151_v1  ;;  %v882_v23 = vadd.f32 %v2151_v1, %v881_v21  ;;  %v1137_v24 = vpop.f32.mrb[5].mxu1  ;;  %v1776_v25 = vpop.f32.mrb[6].mxu0 }
  0xf0   : > { %1383 = vst.msk [vmem:[%s2156_s26 + $0x30] sm:$0xff] %vm1376_vm1, %v890_v19  ;;  %v1138_v26 = vadd.f32 %v2151_v1, %v1137_v24  ;;  %v893_v27 = vadd.f32 %v1776_v25, %v2151_v1  ;;  %v1840_v28 = vpop.f32.mrb[6].mxu1  ;;  %v884_v29 = vpop.f32.mrb[7].mxu0 }
  0xf1   : > { %1447 = vst.msk [vmem:[%s2156_s26 + $0x230] sm:$0xff] %vm1376_vm1, %v1146_v22  ;;  %1381 = vst.msk [vmem:[%s2156_s26 + $0x20] sm:$0xff] %vm1376_vm1, %v882_v23  ;;  %v1149_v30 = vadd.f32 %v1840_v28, %v2151_v1  ;;  %v885_v31 = vadd.f32 %v2151_v1, %v884_v29  ;;  %v1140_v32 = vpop.f32.mrb[7].mxu1 }
  0xf2   : > { %1445 = vst.msk [vmem:[%s2156_s26 + $0x220] sm:$0xff] %vm1376_vm1, %v1138_v26  ;;  %1384 = vst.msk [vmem:[%s2156_s26 + $0x38] sm:$0xff] %vm1376_vm1, %v893_v27  ;;  %v1141_v33 = vadd.f32 %v2151_v1, %v1140_v32 }
  0xf3   : > { %1448 = vst.msk [vmem:[%s2156_s26 + $0x238] sm:$0xff] %vm1376_vm1, %v1149_v30  ;;  %1382 = vst.msk [vmem:[%s2156_s26 + $0x28] sm:$0xff] %vm1376_vm1, %v885_v31 }
  0xf4   : > { %1446 = vst.msk [vmem:[%s2156_s26 + $0x228] sm:$0xff] %vm1376_vm1, %v1141_v33 }
  0xf5   : > { %v1779_v34 = vpop.f32.mrb[8].mxu0 }
  0xf6   : > { %v906_v35 = vadd.f32 %v1779_v34, %v2151_v1  ;;  %v1843_v36 = vpop.f32.mrb[8].mxu1  ;;  %v897_v37 = vpop.f32.mrb[9].mxu0 }
  0xf7   : > { %v1162_v38 = vadd.f32 %v1843_v36, %v2151_v1  ;;  %v898_v39 = vadd.f32 %v2151_v1, %v897_v37  ;;  %v1153_v40 = vpop.f32.mrb[9].mxu1  ;;  %v1780_v41 = vpop.f32.mrb[10].mxu0 }
  0xf8   : > { %1387 = vst.msk [vmem:[%s2156_s26 + $0x50] sm:$0xff] %vm1376_vm1, %v906_v35  ;;  %v1154_v42 = vadd.f32 %v2151_v1, %v1153_v40  ;;  %v909_v43 = vadd.f32 %v1780_v41, %v2151_v1  ;;  %v1844_v44 = vpop.f32.mrb[10].mxu1  ;;  %v900_v45 = vpop.f32.mrb[11].mxu0 }
  0xf9   : > { %1451 = vst.msk [vmem:[%s2156_s26 + $0x250] sm:$0xff] %vm1376_vm1, %v1162_v38  ;;  %1385 = vst.msk [vmem:[%s2156_s26 + $0x40] sm:$0xff] %vm1376_vm1, %v898_v39  ;;  %v1165_v46 = vadd.f32 %v1844_v44, %v2151_v1  ;;  %v901_v47 = vadd.f32 %v2151_v1, %v900_v45  ;;  %v1156_v48 = vpop.f32.mrb[11].mxu1 }
  0xfa   : > { %1449 = vst.msk [vmem:[%s2156_s26 + $0x240] sm:$0xff] %vm1376_vm1, %v1154_v42  ;;  %1388 = vst.msk [vmem:[%s2156_s26 + $0x58] sm:$0xff] %vm1376_vm1, %v909_v43  ;;  %v1157_v49 = vadd.f32 %v2151_v1, %v1156_v48 }
  0xfb   : > { %1452 = vst.msk [vmem:[%s2156_s26 + $0x258] sm:$0xff] %vm1376_vm1, %v1165_v46  ;;  %1386 = vst.msk [vmem:[%s2156_s26 + $0x48] sm:$0xff] %vm1376_vm1, %v901_v47 }
  0xfc   : > { %1450 = vst.msk [vmem:[%s2156_s26 + $0x248] sm:$0xff] %vm1376_vm1, %v1157_v49 }
  0xfd   : > { %v1783_v50 = vpop.f32.mrb[12].mxu0 }
  0xfe   : > { %v922_v51 = vadd.f32 %v1783_v50, %v2151_v1  ;;  %v1847_v52 = vpop.f32.mrb[12].mxu1  ;;  %v913_v53 = vpop.f32.mrb[13].mxu0 }
  0xff   : > { %v1178_v54 = vadd.f32 %v1847_v52, %v2151_v1  ;;  %v914_v55 = vadd.f32 %v2151_v1, %v913_v53  ;;  %v1169_v56 = vpop.f32.mrb[13].mxu1  ;;  %v1784_v57 = vpop.f32.mrb[14].mxu0 }
 0x100   : > { %1391 = vst.msk [vmem:[%s2156_s26 + $0x70] sm:$0xff] %vm1376_vm1, %v922_v51  ;;  %v1170_v58 = vadd.f32 %v2151_v1, %v1169_v56  ;;  %v925_v59 = vadd.f32 %v1784_v57, %v2151_v1  ;;  %v1848_v60 = vpop.f32.mrb[14].mxu1  ;;  %v916_v61 = vpop.f32.mrb[15].mxu0 }
 0x101   : > { %1455 = vst.msk [vmem:[%s2156_s26 + $0x270] sm:$0xff] %vm1376_vm1, %v1178_v54  ;;  %1389 = vst.msk [vmem:[%s2156_s26 + $0x60] sm:$0xff] %vm1376_vm1, %v914_v55  ;;  %v1181_v62 = vadd.f32 %v1848_v60, %v2151_v1  ;;  %v917_v63 = vadd.f32 %v2151_v1, %v916_v61  ;;  %v1172_v0 = vpop.f32.mrb[15].mxu1 }
 0x102   : > { %1453 = vst.msk [vmem:[%s2156_s26 + $0x260] sm:$0xff] %vm1376_vm1, %v1170_v58  ;;  %1392 = vst.msk [vmem:[%s2156_s26 + $0x78] sm:$0xff] %vm1376_vm1, %v925_v59  ;;  %v1173_v2 = vadd.f32 %v2151_v1, %v1172_v0 }
 0x103   : > { %1456 = vst.msk [vmem:[%s2156_s26 + $0x278] sm:$0xff] %vm1376_vm1, %v1181_v62  ;;  %1390 = vst.msk [vmem:[%s2156_s26 + $0x68] sm:$0xff] %vm1376_vm1, %v917_v63 }
 0x104   : > { %1454 = vst.msk [vmem:[%s2156_s26 + $0x268] sm:$0xff] %vm1376_vm1, %v1173_v2 }
 0x105   : > { %v1787_v3 = vpop.f32.mrb[16].mxu0 }
 0x106   : > { %v938_v4 = vadd.f32 %v1787_v3, %v2151_v1  ;;  %v1851_v5 = vpop.f32.mrb[16].mxu1  ;;  %v929_v6 = vpop.f32.mrb[17].mxu0 }
 0x107   : > { %v1194_v7 = vadd.f32 %v1851_v5, %v2151_v1  ;;  %v930_v8 = vadd.f32 %v2151_v1, %v929_v6  ;;  %v1185_v9 = vpop.f32.mrb[17].mxu1  ;;  %v1788_v10 = vpop.f32.mrb[18].mxu0 }
 0x108   : > { %1395 = vst.msk [vmem:[%s2156_s26 + $0x90] sm:$0xff] %vm1376_vm1, %v938_v4  ;;  %v1186_v11 = vadd.f32 %v2151_v1, %v1185_v9  ;;  %v941_v12 = vadd.f32 %v1788_v10, %v2151_v1  ;;  %v1852_v13 = vpop.f32.mrb[18].mxu1  ;;  %v932_v14 = vpop.f32.mrb[19].mxu0 }
 0x109   : > { %1459 = vst.msk [vmem:[%s2156_s26 + $0x290] sm:$0xff] %vm1376_vm1, %v1194_v7  ;;  %1393 = vst.msk [vmem:[%s2156_s26 + $0x80] sm:$0xff] %vm1376_vm1, %v930_v8  ;;  %v1197_v15 = vadd.f32 %v1852_v13, %v2151_v1  ;;  %v933_v16 = vadd.f32 %v2151_v1, %v932_v14  ;;  %v1188_v17 = vpop.f32.mrb[19].mxu1 }
 0x10a   : > { %1457 = vst.msk [vmem:[%s2156_s26 + $0x280] sm:$0xff] %vm1376_vm1, %v1186_v11  ;;  %1396 = vst.msk [vmem:[%s2156_s26 + $0x98] sm:$0xff] %vm1376_vm1, %v941_v12  ;;  %v1189_v18 = vadd.f32 %v2151_v1, %v1188_v17 }
 0x10b   : > { %1460 = vst.msk [vmem:[%s2156_s26 + $0x298] sm:$0xff] %vm1376_vm1, %v1197_v15  ;;  %1394 = vst.msk [vmem:[%s2156_s26 + $0x88] sm:$0xff] %vm1376_vm1, %v933_v16 }
 0x10c   : > { %1458 = vst.msk [vmem:[%s2156_s26 + $0x288] sm:$0xff] %vm1376_vm1, %v1189_v18 }
 0x10d   : > { %v1791_v19 = vpop.f32.mrb[20].mxu0 }
 0x10e   : > { %v954_v20 = vadd.f32 %v1791_v19, %v2151_v1  ;;  %v1855_v21 = vpop.f32.mrb[20].mxu1  ;;  %v945_v22 = vpop.f32.mrb[21].mxu0 }
 0x10f   : > { %v1210_v23 = vadd.f32 %v1855_v21, %v2151_v1  ;;  %v946_v24 = vadd.f32 %v2151_v1, %v945_v22  ;;  %v1201_v25 = vpop.f32.mrb[21].mxu1  ;;  %v1792_v26 = vpop.f32.mrb[22].mxu0 }
 0x110   : > { %1399 = vst.msk [vmem:[%s2156_s26 + $0xb0] sm:$0xff] %vm1376_vm1, %v954_v20  ;;  %v1202_v27 = vadd.f32 %v2151_v1, %v1201_v25  ;;  %v957_v28 = vadd.f32 %v1792_v26, %v2151_v1  ;;  %v1856_v29 = vpop.f32.mrb[22].mxu1  ;;  %v948_v30 = vpop.f32.mrb[23].mxu0 }
 0x111   : > { %1463 = vst.msk [vmem:[%s2156_s26 + $0x2b0] sm:$0xff] %vm1376_vm1, %v1210_v23  ;;  %1397 = vst.msk [vmem:[%s2156_s26 + $0xa0] sm:$0xff] %vm1376_vm1, %v946_v24  ;;  %v1213_v31 = vadd.f32 %v1856_v29, %v2151_v1  ;;  %v949_v32 = vadd.f32 %v2151_v1, %v948_v30  ;;  %v1204_v33 = vpop.f32.mrb[23].mxu1 }
 0x112   : > { %1461 = vst.msk [vmem:[%s2156_s26 + $0x2a0] sm:$0xff] %vm1376_vm1, %v1202_v27  ;;  %1400 = vst.msk [vmem:[%s2156_s26 + $0xb8] sm:$0xff] %vm1376_vm1, %v957_v28  ;;  %v1205_v34 = vadd.f32 %v2151_v1, %v1204_v33 }
 0x113   : > { %1464 = vst.msk [vmem:[%s2156_s26 + $0x2b8] sm:$0xff] %vm1376_vm1, %v1213_v31  ;;  %1398 = vst.msk [vmem:[%s2156_s26 + $0xa8] sm:$0xff] %vm1376_vm1, %v949_v32 }
 0x114   : > { %1462 = vst.msk [vmem:[%s2156_s26 + $0x2a8] sm:$0xff] %vm1376_vm1, %v1205_v34 }
 0x115   : > { %v1795_v35 = vpop.f32.mrb[24].mxu0 }
 0x116   : > { %v970_v36 = vadd.f32 %v1795_v35, %v2151_v1  ;;  %v1859_v37 = vpop.f32.mrb[24].mxu1  ;;  %v961_v38 = vpop.f32.mrb[25].mxu0 }
 0x117   : > { %v1226_v39 = vadd.f32 %v1859_v37, %v2151_v1  ;;  %v962_v40 = vadd.f32 %v2151_v1, %v961_v38  ;;  %v1217_v41 = vpop.f32.mrb[25].mxu1  ;;  %v1796_v42 = vpop.f32.mrb[26].mxu0 }
 0x118   : > { %1403 = vst.msk [vmem:[%s2156_s26 + $0xd0] sm:$0xff] %vm1376_vm1, %v970_v36  ;;  %v1218_v43 = vadd.f32 %v2151_v1, %v1217_v41  ;;  %v973_v44 = vadd.f32 %v1796_v42, %v2151_v1  ;;  %v1860_v45 = vpop.f32.mrb[26].mxu1  ;;  %v964_v46 = vpop.f32.mrb[27].mxu0 }
 0x119   : > { %1467 = vst.msk [vmem:[%s2156_s26 + $0x2d0] sm:$0xff] %vm1376_vm1, %v1226_v39  ;;  %1401 = vst.msk [vmem:[%s2156_s26 + $0xc0] sm:$0xff] %vm1376_vm1, %v962_v40  ;;  %v1229_v47 = vadd.f32 %v1860_v45, %v2151_v1  ;;  %v965_v48 = vadd.f32 %v2151_v1, %v964_v46  ;;  %v1220_v49 = vpop.f32.mrb[27].mxu1 }
 0x11a   : > { %1465 = vst.msk [vmem:[%s2156_s26 + $0x2c0] sm:$0xff] %vm1376_vm1, %v1218_v43  ;;  %1404 = vst.msk [vmem:[%s2156_s26 + $0xd8] sm:$0xff] %vm1376_vm1, %v973_v44  ;;  %v1221_v50 = vadd.f32 %v2151_v1, %v1220_v49 }
 0x11b   : > { %1468 = vst.msk [vmem:[%s2156_s26 + $0x2d8] sm:$0xff] %vm1376_vm1, %v1229_v47  ;;  %1402 = vst.msk [vmem:[%s2156_s26 + $0xc8] sm:$0xff] %vm1376_vm1, %v965_v48 }
 0x11c   : > { %1466 = vst.msk [vmem:[%s2156_s26 + $0x2c8] sm:$0xff] %vm1376_vm1, %v1221_v50 }
 0x11d   : > { %v1799_v51 = vpop.f32.mrb[28].mxu0 }
 0x11e   : > { %v986_v52 = vadd.f32 %v1799_v51, %v2151_v1  ;;  %v1863_v53 = vpop.f32.mrb[28].mxu1  ;;  %v977_v54 = vpop.f32.mrb[29].mxu0 }
 0x11f   : > { %v1242_v55 = vadd.f32 %v1863_v53, %v2151_v1  ;;  %v978_v56 = vadd.f32 %v2151_v1, %v977_v54  ;;  %v1233_v57 = vpop.f32.mrb[29].mxu1  ;;  %v1800_v58 = vpop.f32.mrb[30].mxu0 }
 0x120   : > { %1407 = vst.msk [vmem:[%s2156_s26 + $0xf0] sm:$0xff] %vm1376_vm1, %v986_v52  ;;  %v1234_v59 = vadd.f32 %v2151_v1, %v1233_v57  ;;  %v989_v60 = vadd.f32 %v1800_v58, %v2151_v1  ;;  %v1864_v61 = vpop.f32.mrb[30].mxu1  ;;  %v980_v62 = vpop.f32.mrb[31].mxu0 }
 0x121   : > { %1471 = vst.msk [vmem:[%s2156_s26 + $0x2f0] sm:$0xff] %vm1376_vm1, %v1242_v55  ;;  %1405 = vst.msk [vmem:[%s2156_s26 + $0xe0] sm:$0xff] %vm1376_vm1, %v978_v56  ;;  %v1245_v63 = vadd.f32 %v1864_v61, %v2151_v1  ;;  %v981_v0 = vadd.f32 %v2151_v1, %v980_v62  ;;  %v1236_v2 = vpop.f32.mrb[31].mxu1 }
 0x122   : > { %1469 = vst.msk [vmem:[%s2156_s26 + $0x2e0] sm:$0xff] %vm1376_vm1, %v1234_v59  ;;  %1408 = vst.msk [vmem:[%s2156_s26 + $0xf8] sm:$0xff] %vm1376_vm1, %v989_v60  ;;  %v1237_v3 = vadd.f32 %v2151_v1, %v1236_v2 }
 0x123   : > { %1472 = vst.msk [vmem:[%s2156_s26 + $0x2f8] sm:$0xff] %vm1376_vm1, %v1245_v63  ;;  %1406 = vst.msk [vmem:[%s2156_s26 + $0xe8] sm:$0xff] %vm1376_vm1, %v981_v0 }
 0x124   : > { %1470 = vst.msk [vmem:[%s2156_s26 + $0x2e8] sm:$0xff] %vm1376_vm1, %v1237_v3 }
 0x125   : > { %v1803_v4 = vpop.f32.mrb[32].mxu0 }
 0x126   : > { %v1002_v5 = vadd.f32 %v1803_v4, %v2151_v1  ;;  %v1867_v6 = vpop.f32.mrb[32].mxu1  ;;  %v993_v7 = vpop.f32.mrb[33].mxu0 }
 0x127   : > { %v1258_v8 = vadd.f32 %v1867_v6, %v2151_v1  ;;  %v994_v9 = vadd.f32 %v2151_v1, %v993_v7  ;;  %v1249_v10 = vpop.f32.mrb[33].mxu1  ;;  %v1804_v11 = vpop.f32.mrb[34].mxu0 }
 0x128   : > { %1411 = vst.msk [vmem:[%s2156_s26 + $0x110] sm:$0xff] %vm1376_vm1, %v1002_v5  ;;  %v1250_v12 = vadd.f32 %v2151_v1, %v1249_v10  ;;  %v1005_v13 = vadd.f32 %v1804_v11, %v2151_v1  ;;  %v1868_v14 = vpop.f32.mrb[34].mxu1  ;;  %v996_v15 = vpop.f32.mrb[35].mxu0 }
 0x129   : > { %1475 = vst.msk [vmem:[%s2156_s26 + $0x310] sm:$0xff] %vm1376_vm1, %v1258_v8  ;;  %1409 = vst.msk [vmem:[%s2156_s26 + $0x100] sm:$0xff] %vm1376_vm1, %v994_v9  ;;  %v1261_v16 = vadd.f32 %v1868_v14, %v2151_v1  ;;  %v997_v17 = vadd.f32 %v2151_v1, %v996_v15  ;;  %v1252_v18 = vpop.f32.mrb[35].mxu1 }
 0x12a   : > { %1473 = vst.msk [vmem:[%s2156_s26 + $0x300] sm:$0xff] %vm1376_vm1, %v1250_v12  ;;  %1412 = vst.msk [vmem:[%s2156_s26 + $0x118] sm:$0xff] %vm1376_vm1, %v1005_v13  ;;  %v1253_v19 = vadd.f32 %v2151_v1, %v1252_v18 }
 0x12b   : > { %1476 = vst.msk [vmem:[%s2156_s26 + $0x318] sm:$0xff] %vm1376_vm1, %v1261_v16  ;;  %1410 = vst.msk [vmem:[%s2156_s26 + $0x108] sm:$0xff] %vm1376_vm1, %v997_v17 }
 0x12c   : > { %1474 = vst.msk [vmem:[%s2156_s26 + $0x308] sm:$0xff] %vm1376_vm1, %v1253_v19 }
 0x12d   : > { %v1807_v20 = vpop.f32.mrb[36].mxu0 }
 0x12e   : > { %v1018_v21 = vadd.f32 %v1807_v20, %v2151_v1  ;;  %v1871_v22 = vpop.f32.mrb[36].mxu1  ;;  %v1009_v23 = vpop.f32.mrb[37].mxu0 }
 0x12f   : > { %v1274_v24 = vadd.f32 %v1871_v22, %v2151_v1  ;;  %v1010_v25 = vadd.f32 %v2151_v1, %v1009_v23  ;;  %v1265_v26 = vpop.f32.mrb[37].mxu1  ;;  %v1808_v27 = vpop.f32.mrb[38].mxu0 }
 0x130   : > { %1415 = vst.msk [vmem:[%s2156_s26 + $0x130] sm:$0xff] %vm1376_vm1, %v1018_v21  ;;  %v1266_v28 = vadd.f32 %v2151_v1, %v1265_v26  ;;  %v1021_v29 = vadd.f32 %v1808_v27, %v2151_v1  ;;  %v1872_v30 = vpop.f32.mrb[38].mxu1  ;;  %v1012_v31 = vpop.f32.mrb[39].mxu0 }
 0x131   : > { %1479 = vst.msk [vmem:[%s2156_s26 + $0x330] sm:$0xff] %vm1376_vm1, %v1274_v24  ;;  %1413 = vst.msk [vmem:[%s2156_s26 + $0x120] sm:$0xff] %vm1376_vm1, %v1010_v25  ;;  %v1277_v32 = vadd.f32 %v1872_v30, %v2151_v1  ;;  %v1013_v33 = vadd.f32 %v2151_v1, %v1012_v31  ;;  %v1268_v34 = vpop.f32.mrb[39].mxu1 }
 0x132   : > { %1477 = vst.msk [vmem:[%s2156_s26 + $0x320] sm:$0xff] %vm1376_vm1, %v1266_v28  ;;  %1416 = vst.msk [vmem:[%s2156_s26 + $0x138] sm:$0xff] %vm1376_vm1, %v1021_v29  ;;  %v1269_v35 = vadd.f32 %v2151_v1, %v1268_v34 }
 0x133   : > { %1480 = vst.msk [vmem:[%s2156_s26 + $0x338] sm:$0xff] %vm1376_vm1, %v1277_v32  ;;  %1414 = vst.msk [vmem:[%s2156_s26 + $0x128] sm:$0xff] %vm1376_vm1, %v1013_v33 }
 0x134   : > { %1478 = vst.msk [vmem:[%s2156_s26 + $0x328] sm:$0xff] %vm1376_vm1, %v1269_v35 }
 0x135   : > { %v1811_v36 = vpop.f32.mrb[40].mxu0 }
 0x136   : > { %v1034_v37 = vadd.f32 %v1811_v36, %v2151_v1  ;;  %v1875_v38 = vpop.f32.mrb[40].mxu1  ;;  %v1025_v39 = vpop.f32.mrb[41].mxu0 }
 0x137   : > { %v1290_v40 = vadd.f32 %v1875_v38, %v2151_v1  ;;  %v1026_v41 = vadd.f32 %v2151_v1, %v1025_v39  ;;  %v1281_v42 = vpop.f32.mrb[41].mxu1  ;;  %v1812_v43 = vpop.f32.mrb[42].mxu0 }
 0x138   : > { %1419 = vst.msk [vmem:[%s2156_s26 + $0x150] sm:$0xff] %vm1376_vm1, %v1034_v37  ;;  %v1282_v44 = vadd.f32 %v2151_v1, %v1281_v42  ;;  %v1037_v45 = vadd.f32 %v1812_v43, %v2151_v1  ;;  %v1876_v46 = vpop.f32.mrb[42].mxu1  ;;  %v1028_v47 = vpop.f32.mrb[43].mxu0 }
 0x139   : > { %1483 = vst.msk [vmem:[%s2156_s26 + $0x350] sm:$0xff] %vm1376_vm1, %v1290_v40  ;;  %1417 = vst.msk [vmem:[%s2156_s26 + $0x140] sm:$0xff] %vm1376_vm1, %v1026_v41  ;;  %v1293_v48 = vadd.f32 %v1876_v46, %v2151_v1  ;;  %v1029_v49 = vadd.f32 %v2151_v1, %v1028_v47  ;;  %v1284_v50 = vpop.f32.mrb[43].mxu1 }
 0x13a   : > { %1481 = vst.msk [vmem:[%s2156_s26 + $0x340] sm:$0xff] %vm1376_vm1, %v1282_v44  ;;  %1420 = vst.msk [vmem:[%s2156_s26 + $0x158] sm:$0xff] %vm1376_vm1, %v1037_v45  ;;  %v1285_v51 = vadd.f32 %v2151_v1, %v1284_v50 }
 0x13b   : > { %1484 = vst.msk [vmem:[%s2156_s26 + $0x358] sm:$0xff] %vm1376_vm1, %v1293_v48  ;;  %1418 = vst.msk [vmem:[%s2156_s26 + $0x148] sm:$0xff] %vm1376_vm1, %v1029_v49 }
 0x13c   : > { %1482 = vst.msk [vmem:[%s2156_s26 + $0x348] sm:$0xff] %vm1376_vm1, %v1285_v51 }
 0x13d   : > { %v1815_v52 = vpop.f32.mrb[44].mxu0 }
 0x13e   : > { %v1050_v53 = vadd.f32 %v1815_v52, %v2151_v1  ;;  %v1879_v54 = vpop.f32.mrb[44].mxu1  ;;  %v1041_v55 = vpop.f32.mrb[45].mxu0 }
 0x13f   : > { %v1306_v56 = vadd.f32 %v1879_v54, %v2151_v1  ;;  %v1042_v57 = vadd.f32 %v2151_v1, %v1041_v55  ;;  %v1297_v58 = vpop.f32.mrb[45].mxu1  ;;  %v1816_v59 = vpop.f32.mrb[46].mxu0 }
 0x140   : > { %1423 = vst.msk [vmem:[%s2156_s26 + $0x170] sm:$0xff] %vm1376_vm1, %v1050_v53  ;;  %v1298_v60 = vadd.f32 %v2151_v1, %v1297_v58  ;;  %v1053_v61 = vadd.f32 %v1816_v59, %v2151_v1  ;;  %v1880_v62 = vpop.f32.mrb[46].mxu1  ;;  %v1044_v63 = vpop.f32.mrb[47].mxu0 }
 0x141   : > { %1487 = vst.msk [vmem:[%s2156_s26 + $0x370] sm:$0xff] %vm1376_vm1, %v1306_v56  ;;  %1421 = vst.msk [vmem:[%s2156_s26 + $0x160] sm:$0xff] %vm1376_vm1, %v1042_v57  ;;  %v1309_v0 = vadd.f32 %v1880_v62, %v2151_v1  ;;  %v1045_v2 = vadd.f32 %v2151_v1, %v1044_v63  ;;  %v1300_v3 = vpop.f32.mrb[47].mxu1 }
 0x142   : > { %1485 = vst.msk [vmem:[%s2156_s26 + $0x360] sm:$0xff] %vm1376_vm1, %v1298_v60  ;;  %1424 = vst.msk [vmem:[%s2156_s26 + $0x178] sm:$0xff] %vm1376_vm1, %v1053_v61  ;;  %v1301_v4 = vadd.f32 %v2151_v1, %v1300_v3 }
 0x143   : > { %1488 = vst.msk [vmem:[%s2156_s26 + $0x378] sm:$0xff] %vm1376_vm1, %v1309_v0  ;;  %1422 = vst.msk [vmem:[%s2156_s26 + $0x168] sm:$0xff] %vm1376_vm1, %v1045_v2 }
 0x144   : > { %1486 = vst.msk [vmem:[%s2156_s26 + $0x368] sm:$0xff] %vm1376_vm1, %v1301_v4 }
 0x145   : > { %v1819_v5 = vpop.f32.mrb[48].mxu0 }
 0x146   : > { %v1066_v6 = vadd.f32 %v1819_v5, %v2151_v1  ;;  %v1883_v7 = vpop.f32.mrb[48].mxu1  ;;  %v1057_v8 = vpop.f32.mrb[49].mxu0 }
 0x147   : > { %v1322_v9 = vadd.f32 %v1883_v7, %v2151_v1  ;;  %v1058_v10 = vadd.f32 %v2151_v1, %v1057_v8  ;;  %v1313_v11 = vpop.f32.mrb[49].mxu1  ;;  %v1820_v12 = vpop.f32.mrb[50].mxu0 }
 0x148   : > { %1427 = vst.msk [vmem:[%s2156_s26 + $0x190] sm:$0xff] %vm1376_vm1, %v1066_v6  ;;  %v1314_v13 = vadd.f32 %v2151_v1, %v1313_v11  ;;  %v1069_v14 = vadd.f32 %v1820_v12, %v2151_v1  ;;  %v1884_v15 = vpop.f32.mrb[50].mxu1  ;;  %v1060_v16 = vpop.f32.mrb[51].mxu0 }
 0x149   : > { %1491 = vst.msk [vmem:[%s2156_s26 + $0x390] sm:$0xff] %vm1376_vm1, %v1322_v9  ;;  %1425 = vst.msk [vmem:[%s2156_s26 + $0x180] sm:$0xff] %vm1376_vm1, %v1058_v10  ;;  %v1325_v17 = vadd.f32 %v1884_v15, %v2151_v1  ;;  %v1061_v18 = vadd.f32 %v2151_v1, %v1060_v16  ;;  %v1316_v19 = vpop.f32.mrb[51].mxu1 }
 0x14a   : > { %1489 = vst.msk [vmem:[%s2156_s26 + $0x380] sm:$0xff] %vm1376_vm1, %v1314_v13  ;;  %1428 = vst.msk [vmem:[%s2156_s26 + $0x198] sm:$0xff] %vm1376_vm1, %v1069_v14  ;;  %v1317_v20 = vadd.f32 %v2151_v1, %v1316_v19 }
 0x14b   : > { %1492 = vst.msk [vmem:[%s2156_s26 + $0x398] sm:$0xff] %vm1376_vm1, %v1325_v17  ;;  %1426 = vst.msk [vmem:[%s2156_s26 + $0x188] sm:$0xff] %vm1376_vm1, %v1061_v18 }
 0x14c   : > { %1490 = vst.msk [vmem:[%s2156_s26 + $0x388] sm:$0xff] %vm1376_vm1, %v1317_v20 }
 0x14d   : > { %v1823_v21 = vpop.f32.mrb[52].mxu0 }
 0x14e   : > { %v1082_v22 = vadd.f32 %v1823_v21, %v2151_v1  ;;  %v1887_v23 = vpop.f32.mrb[52].mxu1  ;;  %v1073_v24 = vpop.f32.mrb[53].mxu0 }
 0x14f   : > { %v1338_v25 = vadd.f32 %v1887_v23, %v2151_v1  ;;  %v1074_v26 = vadd.f32 %v2151_v1, %v1073_v24  ;;  %v1329_v27 = vpop.f32.mrb[53].mxu1  ;;  %v1824_v28 = vpop.f32.mrb[54].mxu0 }
 0x150   : > { %1431 = vst.msk [vmem:[%s2156_s26 + $0x1b0] sm:$0xff] %vm1376_vm1, %v1082_v22  ;;  %v1330_v29 = vadd.f32 %v2151_v1, %v1329_v27  ;;  %v1085_v30 = vadd.f32 %v1824_v28, %v2151_v1  ;;  %v1888_v31 = vpop.f32.mrb[54].mxu1  ;;  %v1076_v32 = vpop.f32.mrb[55].mxu0 }
 0x151   : > { %1495 = vst.msk [vmem:[%s2156_s26 + $0x3b0] sm:$0xff] %vm1376_vm1, %v1338_v25  ;;  %1429 = vst.msk [vmem:[%s2156_s26 + $0x1a0] sm:$0xff] %vm1376_vm1, %v1074_v26  ;;  %v1341_v33 = vadd.f32 %v1888_v31, %v2151_v1  ;;  %v1077_v34 = vadd.f32 %v2151_v1, %v1076_v32  ;;  %v1332_v35 = vpop.f32.mrb[55].mxu1 }
 0x152   : > { %1493 = vst.msk [vmem:[%s2156_s26 + $0x3a0] sm:$0xff] %vm1376_vm1, %v1330_v29  ;;  %1432 = vst.msk [vmem:[%s2156_s26 + $0x1b8] sm:$0xff] %vm1376_vm1, %v1085_v30  ;;  %v1333_v36 = vadd.f32 %v2151_v1, %v1332_v35 }
 0x153   : > { %1496 = vst.msk [vmem:[%s2156_s26 + $0x3b8] sm:$0xff] %vm1376_vm1, %v1341_v33  ;;  %1430 = vst.msk [vmem:[%s2156_s26 + $0x1a8] sm:$0xff] %vm1376_vm1, %v1077_v34 }
 0x154   : > { %1494 = vst.msk [vmem:[%s2156_s26 + $0x3a8] sm:$0xff] %vm1376_vm1, %v1333_v36 }
 0x155   : > { %v1827_v37 = vpop.f32.mrb[56].mxu0 }
 0x156   : > { %v1098_v38 = vadd.f32 %v1827_v37, %v2151_v1  ;;  %v1891_v39 = vpop.f32.mrb[56].mxu1  ;;  %v1089_v40 = vpop.f32.mrb[57].mxu0 }
 0x157   : > { %v1354_v41 = vadd.f32 %v1891_v39, %v2151_v1  ;;  %v1090_v42 = vadd.f32 %v2151_v1, %v1089_v40  ;;  %v1345_v43 = vpop.f32.mrb[57].mxu1  ;;  %v1828_v44 = vpop.f32.mrb[58].mxu0 }
 0x158   : > { %1435 = vst.msk [vmem:[%s2156_s26 + $0x1d0] sm:$0xff] %vm1376_vm1, %v1098_v38  ;;  %v1346_v45 = vadd.f32 %v2151_v1, %v1345_v43  ;;  %v1101_v46 = vadd.f32 %v1828_v44, %v2151_v1  ;;  %v1892_v47 = vpop.f32.mrb[58].mxu1  ;;  %v1092_v48 = vpop.f32.mrb[59].mxu0 }
 0x159   : > { %1499 = vst.msk [vmem:[%s2156_s26 + $0x3d0] sm:$0xff] %vm1376_vm1, %v1354_v41  ;;  %1433 = vst.msk [vmem:[%s2156_s26 + $0x1c0] sm:$0xff] %vm1376_vm1, %v1090_v42  ;;  %v1357_v49 = vadd.f32 %v1892_v47, %v2151_v1  ;;  %v1093_v50 = vadd.f32 %v2151_v1, %v1092_v48  ;;  %v1348_v51 = vpop.f32.mrb[59].mxu1 }
 0x15a   : > { %1497 = vst.msk [vmem:[%s2156_s26 + $0x3c0] sm:$0xff] %vm1376_vm1, %v1346_v45  ;;  %1436 = vst.msk [vmem:[%s2156_s26 + $0x1d8] sm:$0xff] %vm1376_vm1, %v1101_v46  ;;  %v1349_v52 = vadd.f32 %v2151_v1, %v1348_v51 }
 0x15b   : > { %1500 = vst.msk [vmem:[%s2156_s26 + $0x3d8] sm:$0xff] %vm1376_vm1, %v1357_v49  ;;  %1434 = vst.msk [vmem:[%s2156_s26 + $0x1c8] sm:$0xff] %vm1376_vm1, %v1093_v50 }
 0x15c   : > { %1498 = vst.msk [vmem:[%s2156_s26 + $0x3c8] sm:$0xff] %vm1376_vm1, %v1349_v52 }
 0x15d   : > { %v1831_v53 = vpop.f32.mrb[60].mxu0 }
 0x15e   : > { %v1114_v54 = vadd.f32 %v1831_v53, %v2151_v1  ;;  %v1895_v55 = vpop.f32.mrb[60].mxu1  ;;  %v1105_v56 = vpop.f32.mrb[61].mxu0 }
 0x15f   : > { %v1370_v57 = vadd.f32 %v1895_v55, %v2151_v1  ;;  %v1106_v58 = vadd.f32 %v2151_v1, %v1105_v56  ;;  %v1361_v59 = vpop.f32.mrb[61].mxu1  ;;  %v1832_v60 = vpop.f32.mrb[62].mxu0 }
 0x160   : > { %1439 = vst.msk [vmem:[%s2156_s26 + $0x1f0] sm:$0xff] %vm1376_vm1, %v1114_v54  ;;  %v1362_v61 = vadd.f32 %v2151_v1, %v1361_v59  ;;  %v1117_v62 = vadd.f32 %v1832_v60, %v2151_v1  ;;  %v1896_v63 = vpop.f32.mrb[62].mxu1  ;;  %v1108_v0 = vpop.f32.mrb[63].mxu0 }
 0x161   : > { %1503 = vst.msk [vmem:[%s2156_s26 + $0x3f0] sm:$0xff] %vm1376_vm1, %v1370_v57  ;;  %1437 = vst.msk [vmem:[%s2156_s26 + $0x1e0] sm:$0xff] %vm1376_vm1, %v1106_v58  ;;  %v1373_v2 = vadd.f32 %v1896_v63, %v2151_v1  ;;  %v1109_v3 = vadd.f32 %v2151_v1, %v1108_v0  ;;  %v1364_v4 = vpop.f32.mrb[63].mxu1 }
 0x162   : > { %1501 = vst.msk [vmem:[%s2156_s26 + $0x3e0] sm:$0xff] %vm1376_vm1, %v1362_v61  ;;  %1440 = vst.msk [vmem:[%s2156_s26 + $0x1f8] sm:$0xff] %vm1376_vm1, %v1117_v62  ;;  %v1365_v5 = vadd.f32 %v2151_v1, %v1364_v4 }
 0x163   : > { %1504 = vst.msk [vmem:[%s2156_s26 + $0x3f8] sm:$0xff] %vm1376_vm1, %v1373_v2  ;;  %1438 = vst.msk [vmem:[%s2156_s26 + $0x1e8] sm:$0xff] %vm1376_vm1, %v1109_v3 }
 0x164   : > { %1502 = vst.msk [vmem:[%s2156_s26 + $0x3e8] sm:$0xff] %vm1376_vm1, %v1365_v5 }
 0x165 PF: > { %s13_s12 = sadd.s32 1, %s1978_s12  }
 0x166   : > { %p10_p4 = scmp.ge.s32.totalorder %s13_s12, 4  }
 0x168   :  { %12 = sbr.rel (!%p10_p4) target bundleno = 1 (0x1), region = 62 }

</bundles_post_ra>
